<compile_context>
chip_gen: v7x
topology: tpu7x:2x2x1
jax: 0.10.0
libtpu: 0.0.40
codegen_flags: <defaults>
</compile_context>

<pallas_src>
import jax
import jax.numpy as jnp
from jax import lax
from jax.experimental import pallas as pl
from jax.experimental.pallas import tpu as pltpu


# ----------------------------------------------------------------------------
# Fused SSPN kernel (whole network; one grid step = one SSB for one batch item)
# ----------------------------------------------------------------------------
def _make_sspn_kernel(H, W, Wp, Hpp, C, res_scale):
    HWp = H * Wp
    inv_hw = 1.0 / float(H * W)

    def kernel(x_ref,
               w1_ref, b1_ref, w2_ref, b2_ref,        # spa conv3x3 x2
               wc1_ref, bc1_ref, wc2_ref, bc2_ref,    # spc conv1x1 x2
               wdt_ref, bd_ref, wu_ref, bu_ref,       # CALayer squeeze/excite
               out_ref,
               act_ref, pad_ref):
        blk = pl.program_id(1)
        nb = pl.num_programs(1)

        # First SSB of this batch element: zero the padded conv buffer (its
        # border rows/columns must be zero; only the interior is rewritten by
        # each conv) and load the input into the resident VMEM activation.
        @pl.when(blk == 0)
        def _():
            pad_ref[...] = jnp.zeros_like(pad_ref)
            act_ref[...] = x_ref[0]

        # 0/1 mask of the valid columns (1..W) of the row-padded layout.
        col = lax.broadcasted_iota(jnp.int32, (HWp, 1), 0) % Wp
        colmask = ((col >= 1) & (col <= W)).astype(jnp.float32)

        x = act_ref[...]                                     # (HWp, C) f32

        def conv3x3(inp, w_ref_, b_ref_):
            # Single bf16 cast + ONE aligned contiguous store of the interior
            # (pad columns of `inp` are zero, so the zero border is kept).
            pad_ref[2 * Wp: 2 * Wp + HWp, :] = inp.astype(jnp.bfloat16)
            acc = None
            for dy in range(3):
                for dx in range(3):
                    off = (dy + 1) * Wp + (dx - 1)
                    tap = pad_ref[off: off + HWp, :]         # contiguous slice
                    prod = jnp.dot(tap, w_ref_[0, dy * 3 + dx],
                                   preferred_element_type=jnp.float32)
                    acc = prod if acc is None else acc + prod
            # Valid in columns 1..W; pad columns hold bounded garbage and are
            # masked by the caller.
            return acc + b_ref_[0]

        # ---- spa: ResBlock  conv3x3 -> ReLU -> conv3x3, *rs, +skip ---------
        y = jnp.maximum(conv3x3(x, w1_ref, b1_ref), 0.0) * colmask
        y = conv3x3(y, w2_ref, b2_ref) * colmask
        y = y * res_scale + x                                # canonical layout

        # ---- spc: 1x1 -> ReLU -> 1x1 -> CALayer, *rs, +skip ----------------
        z = jnp.dot(y.astype(jnp.bfloat16), wc1_ref[0],
                    preferred_element_type=jnp.float32) + bc1_ref[0]
        z = jnp.maximum(z, 0.0)
        z = (jnp.dot(z.astype(jnp.bfloat16), wc2_ref[0],
                     preferred_element_type=jnp.float32)
             + bc2_ref[0]) * colmask

        # CALayer: masked global average pool + squeeze/excite on the VPU
        # (M=1 matmuls are not worth an MXU push/drain).
        pooled = jnp.sum(z, axis=0, keepdims=True) * inv_hw            # (1, C)
        d = jnp.maximum(
            jnp.sum(pooled * wdt_ref[0], axis=1, keepdims=True) + bd_ref[0],
            0.0)                                                        # (Cr,1)
        s = jax.nn.sigmoid(
            jnp.sum(d * wu_ref[0], axis=0, keepdims=True) + bu_ref[0])  # (1, C)

        new_act = (z * s) * res_scale + y
        act_ref[...] = new_act

        # Last SSB: add the SSPN-level skip and emit the output block.
        @pl.when(blk == nb - 1)
        def _():
            out_ref[0] = (new_act + x_ref[0]).astype(out_ref.dtype)

    return kernel


# ----------------------------------------------------------------------------
# Host wrapper: layout plumbing + weight stacking + one pallas_call
# ----------------------------------------------------------------------------
def sspn_forward(x_nchw, params, res_scale):
    B, C, H, W = x_nchw.shape
    n_blocks = len(params)
    Cr = params[0]["ca_wd"].shape[1]
    Wp = ((W + 2 + 7) // 8) * 8        # 8-aligned padded row width (>= W + 2)
    Hpp = H + 4                        # padded-buffer rows (2 top + 2 bottom)
    HWp = H * Wp

    # Row-padded activation layout: (H, Wp, C) with valid pixels at columns
    # 1..W and zeros elsewhere, flattened to (HWp, C).  Built once with XLA.
    x = jnp.transpose(x_nchw, (0, 2, 3, 1))                        # NHWC
    x = jnp.pad(x, ((0, 0), (0, 0), (1, Wp - W - 1), (0, 0)))
    x = x.reshape(B, HWp, C)

    stack = lambda name: jnp.stack([p[name] for p in params])
    spa_w1 = stack("spa_w1").reshape(n_blocks, 9, C, C).astype(jnp.bfloat16)
    spa_w2 = stack("spa_w2").reshape(n_blocks, 9, C, C).astype(jnp.bfloat16)
    spa_b1 = stack("spa_b1").reshape(n_blocks, 1, C)
    spa_b2 = stack("spa_b2").reshape(n_blocks, 1, C)
    spc_w1 = stack("spc_w1").astype(jnp.bfloat16)                  # (nb, C, C)
    spc_w2 = stack("spc_w2").astype(jnp.bfloat16)
    spc_b1 = stack("spc_b1").reshape(n_blocks, 1, C)
    spc_b2 = stack("spc_b2").reshape(n_blocks, 1, C)
    ca_wdt = jnp.stack([p["ca_wd"].T for p in params])             # (nb, Cr, C)
    ca_bd = stack("ca_bd").reshape(n_blocks, Cr, 1)
    ca_wu = stack("ca_wu")                                         # (nb, Cr, C)
    ca_bu = stack("ca_bu").reshape(n_blocks, 1, C)

    kern = _make_sspn_kernel(H, W, Wp, Hpp, C, res_scale)

    in_specs = [
        pl.BlockSpec((1, HWp, C), lambda b, j: (b, 0, 0)),         # x (revisit)
        pl.BlockSpec((1, 9, C, C), lambda b, j: (j, 0, 0, 0)),     # spa_w1
        pl.BlockSpec((1, 1, C), lambda b, j: (j, 0, 0)),           # spa_b1
        pl.BlockSpec((1, 9, C, C), lambda b, j: (j, 0, 0, 0)),     # spa_w2
        pl.BlockSpec((1, 1, C), lambda b, j: (j, 0, 0)),           # spa_b2
        pl.BlockSpec((1, C, C), lambda b, j: (j, 0, 0)),           # spc_w1
        pl.BlockSpec((1, 1, C), lambda b, j: (j, 0, 0)),           # spc_b1
        pl.BlockSpec((1, C, C), lambda b, j: (j, 0, 0)),           # spc_w2
        pl.BlockSpec((1, 1, C), lambda b, j: (j, 0, 0)),           # spc_b2
        pl.BlockSpec((1, Cr, C), lambda b, j: (j, 0, 0)),          # ca_wd^T
        pl.BlockSpec((1, Cr, 1), lambda b, j: (j, 0, 0)),          # ca_bd
        pl.BlockSpec((1, Cr, C), lambda b, j: (j, 0, 0)),          # ca_wu
        pl.BlockSpec((1, 1, C), lambda b, j: (j, 0, 0)),           # ca_bu
    ]

    # Explicit VMEM budget (v7x has only 64 MiB of physical VMEM).
    blk_w_bytes = (2 * 9 * C * C * 2 + 2 * C * C * 2 + 2 * Cr * C * 4
                   + (5 * C + Cr) * 4)
    io_bytes = 2 * HWp * C * 4                       # x block + out block
    scratch_bytes = HWp * C * 4 + Hpp * Wp * C * 2
    vmem_needed = 2 * (blk_w_bytes + io_bytes) + scratch_bytes
    vmem_limit = int(min(max(4 * vmem_needed, 16 * 1024 * 1024),
                         64 * 1024 * 1024))

    out = pl.pallas_call(
        kern,
        grid=(B, n_blocks),
        in_specs=in_specs,
        out_specs=pl.BlockSpec((1, HWp, C), lambda b, j: (b, 0, 0)),
        out_shape=jax.ShapeDtypeStruct((B, HWp, C), x.dtype),
        scratch_shapes=[
            pltpu.VMEM((HWp, C), jnp.float32),        # resident activation
            pltpu.VMEM((Hpp * Wp, C), jnp.bfloat16),  # zero-padded conv buffer
        ],
        compiler_params=pltpu.CompilerParams(
            dimension_semantics=("parallel", "arbitrary"),
            vmem_limit_bytes=vmem_limit),
    )(x, spa_w1, spa_b1, spa_w2, spa_b2,
      spc_w1, spc_b1, spc_w2, spc_b2, ca_wdt, ca_bd, ca_wu, ca_bu)

    out = out.reshape(B, H, Wp, C)[:, :, 1:W + 1, :]
    return jnp.transpose(out, (0, 3, 1, 2))                         # back NCHW


# ----------------------------------------------------------------------------
# Pure-JAX reference (f32, for verification)
# ----------------------------------------------------------------------------
def sspn_reference(x_nchw, params, res_scale):
    x = jnp.transpose(x_nchw, (0, 2, 3, 1))  # NHWC

    def conv3(t, w, b):
        return lax.conv_general_dilated(
            t, w, (1, 1), "SAME",
            dimension_numbers=("NHWC", "HWIO", "NHWC")) + b.reshape(1, 1, 1, -1)

    def conv1(t, w, b):
        return jnp.einsum("bhwi,io->bhwo", t, w) + b.reshape(1, 1, 1, -1)

    inp = x
    for p in params:
        y = jnp.maximum(conv3(x, p["spa_w1"], p["spa_b1"]), 0.0)
        x = conv3(y, p["spa_w2"], p["spa_b2"]) * res_scale + x
        y = jnp.maximum(conv1(x, p["spc_w1"], p["spc_b1"]), 0.0)
        y = conv1(y, p["spc_w2"], p["spc_b2"])
        pooled = jnp.mean(y, axis=(1, 2), keepdims=True)
        z = jnp.maximum(jnp.einsum("bhwi,io->bhwo", pooled, p["ca_wd"])
                        + p["ca_bd"], 0.0)
        s = jax.nn.sigmoid(jnp.einsum("bhwi,io->bhwo", z, p["ca_wu"])
                           + p["ca_bu"])
        x = y * s * res_scale + x
    out = x + inp
    return jnp.transpose(out, (0, 3, 1, 2))


# ----------------------------------------------------------------------------
# Deterministic parameter init (shapes follow the PyTorch module's __init__)
# ----------------------------------------------------------------------------
def init_params(key, n_feats, n_blocks, reduction=16):
    C = n_feats
    Cr = max(C // reduction, 1)
    params = []
    for i in range(n_blocks):
        ks = jax.random.split(jax.random.fold_in(key, i), 12)

        def w(k, shape, fan_in):
            return (jax.random.normal(k, shape, jnp.float32)
                    / jnp.sqrt(jnp.float32(fan_in)))

        params.append(dict(
            spa_w1=w(ks[0], (3, 3, C, C), 9 * C),
            spa_b1=0.01 * jax.random.normal(ks[1], (C,), jnp.float32),
            spa_w2=w(ks[2], (3, 3, C, C), 9 * C),
            spa_b2=0.01 * jax.random.normal(ks[3], (C,), jnp.float32),
            spc_w1=w(ks[4], (C, C), C),
            spc_b1=0.01 * jax.random.normal(ks[5], (C,), jnp.float32),
            spc_w2=w(ks[6], (C, C), C),
            spc_b2=0.01 * jax.random.normal(ks[7], (C,), jnp.float32),
            ca_wd=w(ks[8], (C, Cr), C),
            ca_bd=0.01 * jax.random.normal(ks[9], (Cr,), jnp.float32),
            ca_wu=w(ks[10], (Cr, C), Cr),
            ca_bu=0.01 * jax.random.normal(ks[11], (C,), jnp.float32),
        ))
    return params


if __name__ == "__main__":
    key = jax.random.PRNGKey(0)
    B, C, H, W = 2, 32, 16, 16     # n_feats=32 -> CALayer reduction 16 -> 2 ch
    n_blocks = 2
    res_scale = 0.1

    kx, kp = jax.random.split(key)
    x = jax.random.normal(kx, (B, C, H, W), jnp.float32)
    params = init_params(kp, C, n_blocks)

    out = jax.block_until_ready(sspn_forward(x, params, res_scale))
    ref = jax.block_until_ready(sspn_reference(x, params, res_scale))

    max_err = float(jnp.max(jnp.abs(out - ref)))
    assert out.shape == (B, C, H, W)
    assert max_err < 2e-2, f"mismatch vs reference: {max_err}"
    print("KERNEL_OK")
</pallas_src>

<mosaic_0001>
module attributes {stable_mosaic.version = 11 : i64} {
  func.func @kernel(%arg0: i32, %arg1: i32, %arg2: memref<1x384x32xf32, #tpu.memory_space<vmem>>, %arg3: memref<1x9x32x32xbf16, #tpu.memory_space<vmem>>, %arg4: memref<1x1x32xf32, #tpu.memory_space<vmem>>, %arg5: memref<1x9x32x32xbf16, #tpu.memory_space<vmem>>, %arg6: memref<1x1x32xf32, #tpu.memory_space<vmem>>, %arg7: memref<1x32x32xbf16, #tpu.memory_space<vmem>>, %arg8: memref<1x1x32xf32, #tpu.memory_space<vmem>>, %arg9: memref<1x32x32xbf16, #tpu.memory_space<vmem>>, %arg10: memref<1x1x32xf32, #tpu.memory_space<vmem>>, %arg11: memref<1x2x32xf32, #tpu.memory_space<vmem>>, %arg12: memref<1x2x1xf32, #tpu.memory_space<vmem>>, %arg13: memref<1x2x32xf32, #tpu.memory_space<vmem>>, %arg14: memref<1x1x32xf32, #tpu.memory_space<vmem>>, %arg15: memref<1x384x32xf32, #tpu.memory_space<vmem>>, %arg16: memref<384x32xf32, #tpu.memory_space<vmem>>, %arg17: memref<480x32xbf16, #tpu.memory_space<vmem>>) attributes {dimension_semantics = [#tpu.dimension_semantics<parallel>, #tpu.dimension_semantics<arbitrary>], iteration_bounds = array<i64: 2, 2>, scalar_prefetch = 0 : i64, scratch_operands = 2 : i64, tpu.core_type = #tpu.core_type<tc>, window_params = [{transform_indices = @transform_0, window_bounds = array<i64: 1, 384, 32>}, {transform_indices = @transform_1, window_bounds = array<i64: 1, 9, 32, 32>}, {transform_indices = @transform_2, window_bounds = array<i64: 1, 1, 32>}, {transform_indices = @transform_3, window_bounds = array<i64: 1, 9, 32, 32>}, {transform_indices = @transform_4, window_bounds = array<i64: 1, 1, 32>}, {transform_indices = @transform_5, window_bounds = array<i64: 1, 32, 32>}, {transform_indices = @transform_6, window_bounds = array<i64: 1, 1, 32>}, {transform_indices = @transform_7, window_bounds = array<i64: 1, 32, 32>}, {transform_indices = @transform_8, window_bounds = array<i64: 1, 1, 32>}, {transform_indices = @transform_9, window_bounds = array<i64: 1, 2, 32>}, {transform_indices = @transform_10, window_bounds = array<i64: 1, 2, 1>}, {transform_indices = @transform_11, window_bounds = array<i64: 1, 2, 32>}, {transform_indices = @transform_12, window_bounds = array<i64: 1, 1, 32>}, {transform_indices = @transform_13, window_bounds = array<i64: 1, 384, 32>}]} {
    %c0_i32 = arith.constant 0 : i32
    %0 = arith.cmpi eq, %arg1, %c0_i32 : i32
    %1 = arith.extui %0 : i1 to i32
    %c0_i32_0 = arith.constant 0 : i32
    %2 = arith.cmpi ne, %1, %c0_i32_0 : i32
    scf.if %2 {
      %cst_165 = arith.constant 0.000000e+00 : bf16
      %195 = vector.broadcast %cst_165 : bf16 to vector<480x32xbf16>
      %c0_166 = arith.constant 0 : index
      %c0_167 = arith.constant 0 : index
      %196 = vector.load %arg17[%c0_166, %c0_167] : memref<480x32xbf16, #tpu.memory_space<vmem>>, vector<480x32xbf16>
      tpu.vector_store %arg17[%c0_166, %c0_167], %195 {strides = array<i32>} : memref<480x32xbf16, #tpu.memory_space<vmem>>, vector<480x32xbf16>,
      %c0_168 = arith.constant 0 : index
      %c0_169 = arith.constant 0 : index
      %c0_170 = arith.constant 0 : index
      %197 = vector.load %arg2[%c0_168, %c0_169, %c0_170] : memref<1x384x32xf32, #tpu.memory_space<vmem>>, vector<1x384x32xf32>
      %198 = vector.shape_cast %197 : vector<1x384x32xf32> to vector<384x32xf32>
      %c0_171 = arith.constant 0 : index
      %c0_172 = arith.constant 0 : index
      %199 = vector.load %arg16[%c0_171, %c0_172] : memref<384x32xf32, #tpu.memory_space<vmem>>, vector<384x32xf32>
      tpu.vector_store %arg16[%c0_171, %c0_172], %198 {strides = array<i32>} : memref<384x32xf32, #tpu.memory_space<vmem>>, vector<384x32xf32>,
    } else {
    }
    %3 = tpu.iota {dimensions = array<i32: 0>} : vector<384x1xi32>
    %c24_i32 = arith.constant 24 : i32
    %c0_i32_1 = arith.constant 0 : i32
    %4 = arith.cmpi eq, %c24_i32, %c0_i32_1 : i32
    %c1_i32 = arith.constant 1 : i32
    %5 = arith.select %4, %c1_i32, %c24_i32 : i32
    %6 = vector.broadcast %5 : i32 to vector<384x1xi32>
    %7 = arith.remsi %3, %6 : vector<384x1xi32>
    %c0_i32_2 = arith.constant 0 : i32
    %8 = vector.broadcast %c0_i32_2 : i32 to vector<384x1xi32>
    %9 = arith.cmpi ne, %7, %8 : vector<384x1xi32>
    %c0_i32_3 = arith.constant 0 : i32
    %10 = vector.broadcast %c0_i32_3 : i32 to vector<384x1xi32>
    %11 = arith.cmpi slt, %7, %10 : vector<384x1xi32>
    %c0_i32_4 = arith.constant 0 : i32
    %12 = arith.cmpi slt, %5, %c0_i32_4 : i32
    %13 = vector.broadcast %12 : i1 to vector<384x1xi1>
    %14 = vector.broadcast %13 : vector<384x1xi1> to vector<384x1xi1>
    %15 = arith.xori %11, %14 : vector<384x1xi1>
    %16 = arith.andi %15, %9 : vector<384x1xi1>
    %17 = vector.broadcast %5 : i32 to vector<384x1xi32>
    %18 = arith.addi %7, %17 : vector<384x1xi32>
    %19 = arith.select %16, %18, %7 : vector<384x1xi1>, vector<384x1xi32>
    %c1_i32_5 = arith.constant 1 : i32
    %20 = vector.broadcast %c1_i32_5 : i32 to vector<384x1xi32>
    %21 = arith.cmpi sge, %19, %20 : vector<384x1xi32>
    %c16_i32 = arith.constant 16 : i32
    %22 = vector.broadcast %c16_i32 : i32 to vector<384x1xi32>
    %23 = arith.cmpi sle, %19, %22 : vector<384x1xi32>
    %24 = arith.andi %21, %23 : vector<384x1xi1>
    %25 = arith.extui %24 : vector<384x1xi1> to vector<384x1xi32>
    %26 = arith.sitofp %25 : vector<384x1xi32> to vector<384x1xf32>
    %c0 = arith.constant 0 : index
    %c0_6 = arith.constant 0 : index
    %27 = vector.load %arg16[%c0, %c0_6] : memref<384x32xf32, #tpu.memory_space<vmem>>, vector<384x32xf32>
    %28 = arith.truncf %27 : vector<384x32xf32> to vector<384x32xbf16>
    %c48 = arith.constant 48 : index
    %c0_7 = arith.constant 0 : index
    %29 = vector.load %arg17[%c48, %c0_7] : memref<480x32xbf16, #tpu.memory_space<vmem>>, vector<384x32xbf16>
    tpu.vector_store %arg17[%c48, %c0_7], %28 {strides = array<i32>} : memref<480x32xbf16, #tpu.memory_space<vmem>>, vector<384x32xbf16>,
    %c23 = arith.constant 23 : index
    %c0_8 = arith.constant 0 : index
    %30 = vector.load %arg17[%c23, %c0_8] : memref<480x32xbf16, #tpu.memory_space<vmem>>, vector<384x32xbf16>
    %c0_9 = arith.constant 0 : index
    %c0_10 = arith.constant 0 : index
    %c0_11 = arith.constant 0 : index
    %c0_12 = arith.constant 0 : index
    %31 = vector.load %arg3[%c0_9, %c0_10, %c0_11, %c0_12] : memref<1x9x32x32xbf16, #tpu.memory_space<vmem>>, vector<1x1x32x32xbf16>
    %32 = vector.shape_cast %31 : vector<1x1x32x32xbf16> to vector<32x32xbf16>
    %cst = arith.constant dense<0.000000e+00> : vector<384x32xf32>
    %33 = tpu.matmul %30, %32, %cst {dimension_numbers = #tpu.dot_dimension_numbers<[1], [0], [0], [1], [0, 0, 1, 1], [], []>} : vector<384x32xbf16>, vector<32x32xbf16>, vector<384x32xf32> -> vector<384x32xf32>
    %c24 = arith.constant 24 : index
    %c0_13 = arith.constant 0 : index
    %34 = vector.load %arg17[%c24, %c0_13] : memref<480x32xbf16, #tpu.memory_space<vmem>>, vector<384x32xbf16>
    %c0_14 = arith.constant 0 : index
    %c1 = arith.constant 1 : index
    %c0_15 = arith.constant 0 : index
    %c0_16 = arith.constant 0 : index
    %35 = vector.load %arg3[%c0_14, %c1, %c0_15, %c0_16] : memref<1x9x32x32xbf16, #tpu.memory_space<vmem>>, vector<1x1x32x32xbf16>
    %36 = vector.shape_cast %35 : vector<1x1x32x32xbf16> to vector<32x32xbf16>
    %cst_17 = arith.constant dense<0.000000e+00> : vector<384x32xf32>
    %37 = tpu.matmul %34, %36, %cst_17 {dimension_numbers = #tpu.dot_dimension_numbers<[1], [0], [0], [1], [0, 0, 1, 1], [], []>} : vector<384x32xbf16>, vector<32x32xbf16>, vector<384x32xf32> -> vector<384x32xf32>
    %38 = arith.addf %33, %37 : vector<384x32xf32>
    %c25 = arith.constant 25 : index
    %c0_18 = arith.constant 0 : index
    %39 = vector.load %arg17[%c25, %c0_18] : memref<480x32xbf16, #tpu.memory_space<vmem>>, vector<384x32xbf16>
    %c0_19 = arith.constant 0 : index
    %c2 = arith.constant 2 : index
    %c0_20 = arith.constant 0 : index
    %c0_21 = arith.constant 0 : index
    %40 = vector.load %arg3[%c0_19, %c2, %c0_20, %c0_21] : memref<1x9x32x32xbf16, #tpu.memory_space<vmem>>, vector<1x1x32x32xbf16>
    %41 = vector.shape_cast %40 : vector<1x1x32x32xbf16> to vector<32x32xbf16>
    %cst_22 = arith.constant dense<0.000000e+00> : vector<384x32xf32>
    %42 = tpu.matmul %39, %41, %cst_22 {dimension_numbers = #tpu.dot_dimension_numbers<[1], [0], [0], [1], [0, 0, 1, 1], [], []>} : vector<384x32xbf16>, vector<32x32xbf16>, vector<384x32xf32> -> vector<384x32xf32>
    %43 = arith.addf %38, %42 : vector<384x32xf32>
    %c47 = arith.constant 47 : index
    %c0_23 = arith.constant 0 : index
    %44 = vector.load %arg17[%c47, %c0_23] : memref<480x32xbf16, #tpu.memory_space<vmem>>, vector<384x32xbf16>
    %c0_24 = arith.constant 0 : index
    %c3 = arith.constant 3 : index
    %c0_25 = arith.constant 0 : index
    %c0_26 = arith.constant 0 : index
    %45 = vector.load %arg3[%c0_24, %c3, %c0_25, %c0_26] : memref<1x9x32x32xbf16, #tpu.memory_space<vmem>>, vector<1x1x32x32xbf16>
    %46 = vector.shape_cast %45 : vector<1x1x32x32xbf16> to vector<32x32xbf16>
    %cst_27 = arith.constant dense<0.000000e+00> : vector<384x32xf32>
    %47 = tpu.matmul %44, %46, %cst_27 {dimension_numbers = #tpu.dot_dimension_numbers<[1], [0], [0], [1], [0, 0, 1, 1], [], []>} : vector<384x32xbf16>, vector<32x32xbf16>, vector<384x32xf32> -> vector<384x32xf32>
    %48 = arith.addf %43, %47 : vector<384x32xf32>
    %c48_28 = arith.constant 48 : index
    %c0_29 = arith.constant 0 : index
    %49 = vector.load %arg17[%c48_28, %c0_29] : memref<480x32xbf16, #tpu.memory_space<vmem>>, vector<384x32xbf16>
    %c0_30 = arith.constant 0 : index
    %c4 = arith.constant 4 : index
    %c0_31 = arith.constant 0 : index
    %c0_32 = arith.constant 0 : index
    %50 = vector.load %arg3[%c0_30, %c4, %c0_31, %c0_32] : memref<1x9x32x32xbf16, #tpu.memory_space<vmem>>, vector<1x1x32x32xbf16>
    %51 = vector.shape_cast %50 : vector<1x1x32x32xbf16> to vector<32x32xbf16>
    %cst_33 = arith.constant dense<0.000000e+00> : vector<384x32xf32>
    %52 = tpu.matmul %49, %51, %cst_33 {dimension_numbers = #tpu.dot_dimension_numbers<[1], [0], [0], [1], [0, 0, 1, 1], [], []>} : vector<384x32xbf16>, vector<32x32xbf16>, vector<384x32xf32> -> vector<384x32xf32>
    %53 = arith.addf %48, %52 : vector<384x32xf32>
    %c49 = arith.constant 49 : index
    %c0_34 = arith.constant 0 : index
    %54 = vector.load %arg17[%c49, %c0_34] : memref<480x32xbf16, #tpu.memory_space<vmem>>, vector<384x32xbf16>
    %c0_35 = arith.constant 0 : index
    %c5 = arith.constant 5 : index
    %c0_36 = arith.constant 0 : index
    %c0_37 = arith.constant 0 : index
    %55 = vector.load %arg3[%c0_35, %c5, %c0_36, %c0_37] : memref<1x9x32x32xbf16, #tpu.memory_space<vmem>>, vector<1x1x32x32xbf16>
    %56 = vector.shape_cast %55 : vector<1x1x32x32xbf16> to vector<32x32xbf16>
    %cst_38 = arith.constant dense<0.000000e+00> : vector<384x32xf32>
    %57 = tpu.matmul %54, %56, %cst_38 {dimension_numbers = #tpu.dot_dimension_numbers<[1], [0], [0], [1], [0, 0, 1, 1], [], []>} : vector<384x32xbf16>, vector<32x32xbf16>, vector<384x32xf32> -> vector<384x32xf32>
    %58 = arith.addf %53, %57 : vector<384x32xf32>
    %c71 = arith.constant 71 : index
    %c0_39 = arith.constant 0 : index
    %59 = vector.load %arg17[%c71, %c0_39] : memref<480x32xbf16, #tpu.memory_space<vmem>>, vector<384x32xbf16>
    %c0_40 = arith.constant 0 : index
    %c6 = arith.constant 6 : index
    %c0_41 = arith.constant 0 : index
    %c0_42 = arith.constant 0 : index
    %60 = vector.load %arg3[%c0_40, %c6, %c0_41, %c0_42] : memref<1x9x32x32xbf16, #tpu.memory_space<vmem>>, vector<1x1x32x32xbf16>
    %61 = vector.shape_cast %60 : vector<1x1x32x32xbf16> to vector<32x32xbf16>
    %cst_43 = arith.constant dense<0.000000e+00> : vector<384x32xf32>
    %62 = tpu.matmul %59, %61, %cst_43 {dimension_numbers = #tpu.dot_dimension_numbers<[1], [0], [0], [1], [0, 0, 1, 1], [], []>} : vector<384x32xbf16>, vector<32x32xbf16>, vector<384x32xf32> -> vector<384x32xf32>
    %63 = arith.addf %58, %62 : vector<384x32xf32>
    %c72 = arith.constant 72 : index
    %c0_44 = arith.constant 0 : index
    %64 = vector.load %arg17[%c72, %c0_44] : memref<480x32xbf16, #tpu.memory_space<vmem>>, vector<384x32xbf16>
    %c0_45 = arith.constant 0 : index
    %c7 = arith.constant 7 : index
    %c0_46 = arith.constant 0 : index
    %c0_47 = arith.constant 0 : index
    %65 = vector.load %arg3[%c0_45, %c7, %c0_46, %c0_47] : memref<1x9x32x32xbf16, #tpu.memory_space<vmem>>, vector<1x1x32x32xbf16>
    %66 = vector.shape_cast %65 : vector<1x1x32x32xbf16> to vector<32x32xbf16>
    %cst_48 = arith.constant dense<0.000000e+00> : vector<384x32xf32>
    %67 = tpu.matmul %64, %66, %cst_48 {dimension_numbers = #tpu.dot_dimension_numbers<[1], [0], [0], [1], [0, 0, 1, 1], [], []>} : vector<384x32xbf16>, vector<32x32xbf16>, vector<384x32xf32> -> vector<384x32xf32>
    %68 = arith.addf %63, %67 : vector<384x32xf32>
    %c73 = arith.constant 73 : index
    %c0_49 = arith.constant 0 : index
    %69 = vector.load %arg17[%c73, %c0_49] : memref<480x32xbf16, #tpu.memory_space<vmem>>, vector<384x32xbf16>
    %c0_50 = arith.constant 0 : index
    %c8 = arith.constant 8 : index
    %c0_51 = arith.constant 0 : index
    %c0_52 = arith.constant 0 : index
    %70 = vector.load %arg3[%c0_50, %c8, %c0_51, %c0_52] : memref<1x9x32x32xbf16, #tpu.memory_space<vmem>>, vector<1x1x32x32xbf16>
    %71 = vector.shape_cast %70 : vector<1x1x32x32xbf16> to vector<32x32xbf16>
    %cst_53 = arith.constant dense<0.000000e+00> : vector<384x32xf32>
    %72 = tpu.matmul %69, %71, %cst_53 {dimension_numbers = #tpu.dot_dimension_numbers<[1], [0], [0], [1], [0, 0, 1, 1], [], []>} : vector<384x32xbf16>, vector<32x32xbf16>, vector<384x32xf32> -> vector<384x32xf32>
    %73 = arith.addf %68, %72 : vector<384x32xf32>
    %c0_54 = arith.constant 0 : index
    %c0_55 = arith.constant 0 : index
    %c0_56 = arith.constant 0 : index
    %74 = vector.load %arg4[%c0_54, %c0_55, %c0_56] : memref<1x1x32xf32, #tpu.memory_space<vmem>>, vector<1x1x32xf32>
    %75 = vector.shape_cast %74 : vector<1x1x32xf32> to vector<1x32xf32>
    %76 = vector.broadcast %75 : vector<1x32xf32> to vector<384x32xf32>
    %77 = arith.addf %73, %76 : vector<384x32xf32>
    %cst_57 = arith.constant 0.000000e+00 : f32
    %78 = vector.broadcast %cst_57 : f32 to vector<384x32xf32>
    %79 = arith.maximumf %77, %78 : vector<384x32xf32>
    %80 = vector.broadcast %26 : vector<384x1xf32> to vector<384x32xf32>
    %81 = arith.mulf %79, %80 : vector<384x32xf32>
    %82 = arith.truncf %81 : vector<384x32xf32> to vector<384x32xbf16>
    %c48_58 = arith.constant 48 : index
    %c0_59 = arith.constant 0 : index
    %83 = vector.load %arg17[%c48_58, %c0_59] : memref<480x32xbf16, #tpu.memory_space<vmem>>, vector<384x32xbf16>
    tpu.vector_store %arg17[%c48_58, %c0_59], %82 {strides = array<i32>} : memref<480x32xbf16, #tpu.memory_space<vmem>>, vector<384x32xbf16>,
    %c23_60 = arith.constant 23 : index
    %c0_61 = arith.constant 0 : index
    %84 = vector.load %arg17[%c23_60, %c0_61] : memref<480x32xbf16, #tpu.memory_space<vmem>>, vector<384x32xbf16>
    %c0_62 = arith.constant 0 : index
    %c0_63 = arith.constant 0 : index
    %c0_64 = arith.constant 0 : index
    %c0_65 = arith.constant 0 : index
    %85 = vector.load %arg5[%c0_62, %c0_63, %c0_64, %c0_65] : memref<1x9x32x32xbf16, #tpu.memory_space<vmem>>, vector<1x1x32x32xbf16>
    %86 = vector.shape_cast %85 : vector<1x1x32x32xbf16> to vector<32x32xbf16>
    %cst_66 = arith.constant dense<0.000000e+00> : vector<384x32xf32>
    %87 = tpu.matmul %84, %86, %cst_66 {dimension_numbers = #tpu.dot_dimension_numbers<[1], [0], [0], [1], [0, 0, 1, 1], [], []>} : vector<384x32xbf16>, vector<32x32xbf16>, vector<384x32xf32> -> vector<384x32xf32>
    %c24_67 = arith.constant 24 : index
    %c0_68 = arith.constant 0 : index
    %88 = vector.load %arg17[%c24_67, %c0_68] : memref<480x32xbf16, #tpu.memory_space<vmem>>, vector<384x32xbf16>
    %c0_69 = arith.constant 0 : index
    %c1_70 = arith.constant 1 : index
    %c0_71 = arith.constant 0 : index
    %c0_72 = arith.constant 0 : index
    %89 = vector.load %arg5[%c0_69, %c1_70, %c0_71, %c0_72] : memref<1x9x32x32xbf16, #tpu.memory_space<vmem>>, vector<1x1x32x32xbf16>
    %90 = vector.shape_cast %89 : vector<1x1x32x32xbf16> to vector<32x32xbf16>
    %cst_73 = arith.constant dense<0.000000e+00> : vector<384x32xf32>
    %91 = tpu.matmul %88, %90, %cst_73 {dimension_numbers = #tpu.dot_dimension_numbers<[1], [0], [0], [1], [0, 0, 1, 1], [], []>} : vector<384x32xbf16>, vector<32x32xbf16>, vector<384x32xf32> -> vector<384x32xf32>
    %92 = arith.addf %87, %91 : vector<384x32xf32>
    %c25_74 = arith.constant 25 : index
    %c0_75 = arith.constant 0 : index
    %93 = vector.load %arg17[%c25_74, %c0_75] : memref<480x32xbf16, #tpu.memory_space<vmem>>, vector<384x32xbf16>
    %c0_76 = arith.constant 0 : index
    %c2_77 = arith.constant 2 : index
    %c0_78 = arith.constant 0 : index
    %c0_79 = arith.constant 0 : index
    %94 = vector.load %arg5[%c0_76, %c2_77, %c0_78, %c0_79] : memref<1x9x32x32xbf16, #tpu.memory_space<vmem>>, vector<1x1x32x32xbf16>
    %95 = vector.shape_cast %94 : vector<1x1x32x32xbf16> to vector<32x32xbf16>
    %cst_80 = arith.constant dense<0.000000e+00> : vector<384x32xf32>
    %96 = tpu.matmul %93, %95, %cst_80 {dimension_numbers = #tpu.dot_dimension_numbers<[1], [0], [0], [1], [0, 0, 1, 1], [], []>} : vector<384x32xbf16>, vector<32x32xbf16>, vector<384x32xf32> -> vector<384x32xf32>
    %97 = arith.addf %92, %96 : vector<384x32xf32>
    %c47_81 = arith.constant 47 : index
    %c0_82 = arith.constant 0 : index
    %98 = vector.load %arg17[%c47_81, %c0_82] : memref<480x32xbf16, #tpu.memory_space<vmem>>, vector<384x32xbf16>
    %c0_83 = arith.constant 0 : index
    %c3_84 = arith.constant 3 : index
    %c0_85 = arith.constant 0 : index
    %c0_86 = arith.constant 0 : index
    %99 = vector.load %arg5[%c0_83, %c3_84, %c0_85, %c0_86] : memref<1x9x32x32xbf16, #tpu.memory_space<vmem>>, vector<1x1x32x32xbf16>
    %100 = vector.shape_cast %99 : vector<1x1x32x32xbf16> to vector<32x32xbf16>
    %cst_87 = arith.constant dense<0.000000e+00> : vector<384x32xf32>
    %101 = tpu.matmul %98, %100, %cst_87 {dimension_numbers = #tpu.dot_dimension_numbers<[1], [0], [0], [1], [0, 0, 1, 1], [], []>} : vector<384x32xbf16>, vector<32x32xbf16>, vector<384x32xf32> -> vector<384x32xf32>
    %102 = arith.addf %97, %101 : vector<384x32xf32>
    %c48_88 = arith.constant 48 : index
    %c0_89 = arith.constant 0 : index
    %103 = vector.load %arg17[%c48_88, %c0_89] : memref<480x32xbf16, #tpu.memory_space<vmem>>, vector<384x32xbf16>
    %c0_90 = arith.constant 0 : index
    %c4_91 = arith.constant 4 : index
    %c0_92 = arith.constant 0 : index
    %c0_93 = arith.constant 0 : index
    %104 = vector.load %arg5[%c0_90, %c4_91, %c0_92, %c0_93] : memref<1x9x32x32xbf16, #tpu.memory_space<vmem>>, vector<1x1x32x32xbf16>
    %105 = vector.shape_cast %104 : vector<1x1x32x32xbf16> to vector<32x32xbf16>
    %cst_94 = arith.constant dense<0.000000e+00> : vector<384x32xf32>
    %106 = tpu.matmul %103, %105, %cst_94 {dimension_numbers = #tpu.dot_dimension_numbers<[1], [0], [0], [1], [0, 0, 1, 1], [], []>} : vector<384x32xbf16>, vector<32x32xbf16>, vector<384x32xf32> -> vector<384x32xf32>
    %107 = arith.addf %102, %106 : vector<384x32xf32>
    %c49_95 = arith.constant 49 : index
    %c0_96 = arith.constant 0 : index
    %108 = vector.load %arg17[%c49_95, %c0_96] : memref<480x32xbf16, #tpu.memory_space<vmem>>, vector<384x32xbf16>
    %c0_97 = arith.constant 0 : index
    %c5_98 = arith.constant 5 : index
    %c0_99 = arith.constant 0 : index
    %c0_100 = arith.constant 0 : index
    %109 = vector.load %arg5[%c0_97, %c5_98, %c0_99, %c0_100] : memref<1x9x32x32xbf16, #tpu.memory_space<vmem>>, vector<1x1x32x32xbf16>
    %110 = vector.shape_cast %109 : vector<1x1x32x32xbf16> to vector<32x32xbf16>
    %cst_101 = arith.constant dense<0.000000e+00> : vector<384x32xf32>
    %111 = tpu.matmul %108, %110, %cst_101 {dimension_numbers = #tpu.dot_dimension_numbers<[1], [0], [0], [1], [0, 0, 1, 1], [], []>} : vector<384x32xbf16>, vector<32x32xbf16>, vector<384x32xf32> -> vector<384x32xf32>
    %112 = arith.addf %107, %111 : vector<384x32xf32>
    %c71_102 = arith.constant 71 : index
    %c0_103 = arith.constant 0 : index
    %113 = vector.load %arg17[%c71_102, %c0_103] : memref<480x32xbf16, #tpu.memory_space<vmem>>, vector<384x32xbf16>
    %c0_104 = arith.constant 0 : index
    %c6_105 = arith.constant 6 : index
    %c0_106 = arith.constant 0 : index
    %c0_107 = arith.constant 0 : index
    %114 = vector.load %arg5[%c0_104, %c6_105, %c0_106, %c0_107] : memref<1x9x32x32xbf16, #tpu.memory_space<vmem>>, vector<1x1x32x32xbf16>
    %115 = vector.shape_cast %114 : vector<1x1x32x32xbf16> to vector<32x32xbf16>
    %cst_108 = arith.constant dense<0.000000e+00> : vector<384x32xf32>
    %116 = tpu.matmul %113, %115, %cst_108 {dimension_numbers = #tpu.dot_dimension_numbers<[1], [0], [0], [1], [0, 0, 1, 1], [], []>} : vector<384x32xbf16>, vector<32x32xbf16>, vector<384x32xf32> -> vector<384x32xf32>
    %117 = arith.addf %112, %116 : vector<384x32xf32>
    %c72_109 = arith.constant 72 : index
    %c0_110 = arith.constant 0 : index
    %118 = vector.load %arg17[%c72_109, %c0_110] : memref<480x32xbf16, #tpu.memory_space<vmem>>, vector<384x32xbf16>
    %c0_111 = arith.constant 0 : index
    %c7_112 = arith.constant 7 : index
    %c0_113 = arith.constant 0 : index
    %c0_114 = arith.constant 0 : index
    %119 = vector.load %arg5[%c0_111, %c7_112, %c0_113, %c0_114] : memref<1x9x32x32xbf16, #tpu.memory_space<vmem>>, vector<1x1x32x32xbf16>
    %120 = vector.shape_cast %119 : vector<1x1x32x32xbf16> to vector<32x32xbf16>
    %cst_115 = arith.constant dense<0.000000e+00> : vector<384x32xf32>
    %121 = tpu.matmul %118, %120, %cst_115 {dimension_numbers = #tpu.dot_dimension_numbers<[1], [0], [0], [1], [0, 0, 1, 1], [], []>} : vector<384x32xbf16>, vector<32x32xbf16>, vector<384x32xf32> -> vector<384x32xf32>
    %122 = arith.addf %117, %121 : vector<384x32xf32>
    %c73_116 = arith.constant 73 : index
    %c0_117 = arith.constant 0 : index
    %123 = vector.load %arg17[%c73_116, %c0_117] : memref<480x32xbf16, #tpu.memory_space<vmem>>, vector<384x32xbf16>
    %c0_118 = arith.constant 0 : index
    %c8_119 = arith.constant 8 : index
    %c0_120 = arith.constant 0 : index
    %c0_121 = arith.constant 0 : index
    %124 = vector.load %arg5[%c0_118, %c8_119, %c0_120, %c0_121] : memref<1x9x32x32xbf16, #tpu.memory_space<vmem>>, vector<1x1x32x32xbf16>
    %125 = vector.shape_cast %124 : vector<1x1x32x32xbf16> to vector<32x32xbf16>
    %cst_122 = arith.constant dense<0.000000e+00> : vector<384x32xf32>
    %126 = tpu.matmul %123, %125, %cst_122 {dimension_numbers = #tpu.dot_dimension_numbers<[1], [0], [0], [1], [0, 0, 1, 1], [], []>} : vector<384x32xbf16>, vector<32x32xbf16>, vector<384x32xf32> -> vector<384x32xf32>
    %127 = arith.addf %122, %126 : vector<384x32xf32>
    %c0_123 = arith.constant 0 : index
    %c0_124 = arith.constant 0 : index
    %c0_125 = arith.constant 0 : index
    %128 = vector.load %arg6[%c0_123, %c0_124, %c0_125] : memref<1x1x32xf32, #tpu.memory_space<vmem>>, vector<1x1x32xf32>
    %129 = vector.shape_cast %128 : vector<1x1x32xf32> to vector<1x32xf32>
    %130 = vector.broadcast %129 : vector<1x32xf32> to vector<384x32xf32>
    %131 = arith.addf %127, %130 : vector<384x32xf32>
    %132 = vector.broadcast %26 : vector<384x1xf32> to vector<384x32xf32>
    %133 = arith.mulf %131, %132 : vector<384x32xf32>
    %cst_126 = arith.constant 1.000000e-01 : f32
    %134 = vector.broadcast %cst_126 : f32 to vector<384x32xf32>
    %135 = arith.mulf %133, %134 : vector<384x32xf32>
    %136 = arith.addf %135, %27 : vector<384x32xf32>
    %137 = arith.truncf %136 : vector<384x32xf32> to vector<384x32xbf16>
    %c0_127 = arith.constant 0 : index
    %c0_128 = arith.constant 0 : index
    %c0_129 = arith.constant 0 : index
    %138 = vector.load %arg7[%c0_127, %c0_128, %c0_129] : memref<1x32x32xbf16, #tpu.memory_space<vmem>>, vector<1x32x32xbf16>
    %139 = vector.shape_cast %138 : vector<1x32x32xbf16> to vector<32x32xbf16>
    %cst_130 = arith.constant dense<0.000000e+00> : vector<384x32xf32>
    %140 = tpu.matmul %137, %139, %cst_130 {dimension_numbers = #tpu.dot_dimension_numbers<[1], [0], [0], [1], [0, 0, 1, 1], [], []>} : vector<384x32xbf16>, vector<32x32xbf16>, vector<384x32xf32> -> vector<384x32xf32>
    %c0_131 = arith.constant 0 : index
    %c0_132 = arith.constant 0 : index
    %c0_133 = arith.constant 0 : index
    %141 = vector.load %arg8[%c0_131, %c0_132, %c0_133] : memref<1x1x32xf32, #tpu.memory_space<vmem>>, vector<1x1x32xf32>
    %142 = vector.shape_cast %141 : vector<1x1x32xf32> to vector<1x32xf32>
    %143 = vector.broadcast %142 : vector<1x32xf32> to vector<384x32xf32>
    %144 = arith.addf %140, %143 : vector<384x32xf32>
    %cst_134 = arith.constant 0.000000e+00 : f32
    %145 = vector.broadcast %cst_134 : f32 to vector<384x32xf32>
    %146 = arith.maximumf %144, %145 : vector<384x32xf32>
    %147 = arith.truncf %146 : vector<384x32xf32> to vector<384x32xbf16>
    %c0_135 = arith.constant 0 : index
    %c0_136 = arith.constant 0 : index
    %c0_137 = arith.constant 0 : index
    %148 = vector.load %arg9[%c0_135, %c0_136, %c0_137] : memref<1x32x32xbf16, #tpu.memory_space<vmem>>, vector<1x32x32xbf16>
    %149 = vector.shape_cast %148 : vector<1x32x32xbf16> to vector<32x32xbf16>
    %cst_138 = arith.constant dense<0.000000e+00> : vector<384x32xf32>
    %150 = tpu.matmul %147, %149, %cst_138 {dimension_numbers = #tpu.dot_dimension_numbers<[1], [0], [0], [1], [0, 0, 1, 1], [], []>} : vector<384x32xbf16>, vector<32x32xbf16>, vector<384x32xf32> -> vector<384x32xf32>
    %c0_139 = arith.constant 0 : index
    %c0_140 = arith.constant 0 : index
    %c0_141 = arith.constant 0 : index
    %151 = vector.load %arg10[%c0_139, %c0_140, %c0_141] : memref<1x1x32xf32, #tpu.memory_space<vmem>>, vector<1x1x32xf32>
    %152 = vector.shape_cast %151 : vector<1x1x32xf32> to vector<1x32xf32>
    %153 = vector.broadcast %152 : vector<1x32xf32> to vector<384x32xf32>
    %154 = arith.addf %150, %153 : vector<384x32xf32>
    %155 = vector.broadcast %26 : vector<384x1xf32> to vector<384x32xf32>
    %156 = arith.mulf %154, %155 : vector<384x32xf32>
    %cst_142 = arith.constant dense<0.000000e+00> : vector<32xf32>
    %157 = vector.multi_reduction <add>, %156, %cst_142 [0] : vector<384x32xf32> to vector<32xf32>
    %158 = vector.shape_cast %157 : vector<32xf32> to vector<1x32xf32>
    %cst_143 = arith.constant 3.906250e-03 : f32
    %159 = vector.broadcast %cst_143 : f32 to vector<1x32xf32>
    %160 = arith.mulf %158, %159 : vector<1x32xf32>
    %c0_144 = arith.constant 0 : index
    %c0_145 = arith.constant 0 : index
    %c0_146 = arith.constant 0 : index
    %161 = vector.load %arg11[%c0_144, %c0_145, %c0_146] : memref<1x2x32xf32, #tpu.memory_space<vmem>>, vector<1x2x32xf32>
    %162 = vector.shape_cast %161 : vector<1x2x32xf32> to vector<2x32xf32>
    %163 = vector.broadcast %160 : vector<1x32xf32> to vector<2x32xf32>
    %164 = arith.mulf %163, %162 : vector<2x32xf32>
    %cst_147 = arith.constant dense<0.000000e+00> : vector<2xf32>
    %165 = vector.multi_reduction <add>, %164, %cst_147 [1] : vector<2x32xf32> to vector<2xf32>
    %166 = vector.shape_cast %165 : vector<2xf32> to vector<2x1xf32>
    %c0_148 = arith.constant 0 : index
    %c0_149 = arith.constant 0 : index
    %c0_150 = arith.constant 0 : index
    %167 = vector.load %arg12[%c0_148, %c0_149, %c0_150] : memref<1x2x1xf32, #tpu.memory_space<vmem>>, vector<1x2x1xf32>
    %168 = vector.shape_cast %167 : vector<1x2x1xf32> to vector<2x1xf32>
    %169 = arith.addf %166, %168 : vector<2x1xf32>
    %cst_151 = arith.constant 0.000000e+00 : f32
    %170 = vector.broadcast %cst_151 : f32 to vector<2x1xf32>
    %171 = arith.maximumf %169, %170 : vector<2x1xf32>
    %c0_152 = arith.constant 0 : index
    %c0_153 = arith.constant 0 : index
    %c0_154 = arith.constant 0 : index
    %172 = vector.load %arg13[%c0_152, %c0_153, %c0_154] : memref<1x2x32xf32, #tpu.memory_space<vmem>>, vector<1x2x32xf32>
    %173 = vector.shape_cast %172 : vector<1x2x32xf32> to vector<2x32xf32>
    %174 = vector.broadcast %171 : vector<2x1xf32> to vector<2x32xf32>
    %175 = arith.mulf %174, %173 : vector<2x32xf32>
    %cst_155 = arith.constant dense<0.000000e+00> : vector<32xf32>
    %176 = vector.multi_reduction <add>, %175, %cst_155 [0] : vector<2x32xf32> to vector<32xf32>
    %177 = vector.shape_cast %176 : vector<32xf32> to vector<1x32xf32>
    %c0_156 = arith.constant 0 : index
    %c0_157 = arith.constant 0 : index
    %c0_158 = arith.constant 0 : index
    %178 = vector.load %arg14[%c0_156, %c0_157, %c0_158] : memref<1x1x32xf32, #tpu.memory_space<vmem>>, vector<1x1x32xf32>
    %179 = vector.shape_cast %178 : vector<1x1x32xf32> to vector<1x32xf32>
    %180 = arith.addf %177, %179 : vector<1x32xf32>
    %181 = arith.negf %180 : vector<1x32xf32>
    %182 = math.exp %181 : vector<1x32xf32>
    %cst_159 = arith.constant 1.000000e+00 : f32
    %183 = vector.broadcast %cst_159 : f32 to vector<1x32xf32>
    %184 = arith.addf %183, %182 : vector<1x32xf32>
    %185 = arith.divf %183, %184 : vector<1x32xf32>
    %186 = vector.broadcast %185 : vector<1x32xf32> to vector<384x32xf32>
    %187 = arith.mulf %156, %186 : vector<384x32xf32>
    %cst_160 = arith.constant 1.000000e-01 : f32
    %188 = vector.broadcast %cst_160 : f32 to vector<384x32xf32>
    %189 = arith.mulf %187, %188 : vector<384x32xf32>
    %190 = arith.addf %189, %136 : vector<384x32xf32>
    %c0_161 = arith.constant 0 : index
    %c0_162 = arith.constant 0 : index
    %191 = vector.load %arg16[%c0_161, %c0_162] : memref<384x32xf32, #tpu.memory_space<vmem>>, vector<384x32xf32>
    tpu.vector_store %arg16[%c0_161, %c0_162], %190 {strides = array<i32>} : memref<384x32xf32, #tpu.memory_space<vmem>>, vector<384x32xf32>,
    %c1_i32_163 = arith.constant 1 : i32
    %192 = arith.cmpi eq, %arg1, %c1_i32_163 : i32
    %193 = arith.extui %192 : i1 to i32
    %c0_i32_164 = arith.constant 0 : i32
    %194 = arith.cmpi ne, %193, %c0_i32_164 : i32
    scf.if %194 {
      %c0_165 = arith.constant 0 : index
      %c0_166 = arith.constant 0 : index
      %c0_167 = arith.constant 0 : index
      %195 = vector.load %arg2[%c0_165, %c0_166, %c0_167] : memref<1x384x32xf32, #tpu.memory_space<vmem>>, vector<1x384x32xf32>
      %196 = vector.shape_cast %195 : vector<1x384x32xf32> to vector<384x32xf32>
      %197 = arith.addf %190, %196 : vector<384x32xf32>
      %c0_168 = arith.constant 0 : index
      %c0_169 = arith.constant 0 : index
      %c0_170 = arith.constant 0 : index
      %198 = vector.load %arg15[%c0_168, %c0_169, %c0_170] : memref<1x384x32xf32, #tpu.memory_space<vmem>>, vector<1x384x32xf32>
      %199 = vector.shape_cast %198 : vector<1x384x32xf32> to vector<384x32xf32>
      %200 = vector.shape_cast %197 : vector<384x32xf32> to vector<1x384x32xf32>
      tpu.vector_store %arg15[%c0_168, %c0_169, %c0_170], %200 {strides = array<i32>} : memref<1x384x32xf32, #tpu.memory_space<vmem>>, vector<1x384x32xf32>,
    } else {
    }
    return
  }
  func.func @transform_0(%arg0: i32, %arg1: i32) -> (i32, i32, i32) {
    %c0_i32 = arith.constant 0 : i32
    %c0_i32_0 = arith.constant 0 : i32
    %c0_i32_1 = arith.constant 0 : i32
    return %arg0, %c0_i32, %c0_i32_0 : i32, i32, i32
  }
  func.func @transform_1(%arg0: i32, %arg1: i32) -> (i32, i32, i32, i32) {
    %c0_i32 = arith.constant 0 : i32
    %c0_i32_0 = arith.constant 0 : i32
    %c0_i32_1 = arith.constant 0 : i32
    %c0_i32_2 = arith.constant 0 : i32
    return %arg1, %c0_i32, %c0_i32_0, %c0_i32_1 : i32, i32, i32, i32
  }
  func.func @transform_2(%arg0: i32, %arg1: i32) -> (i32, i32, i32) {
    %c0_i32 = arith.constant 0 : i32
    %c0_i32_0 = arith.constant 0 : i32
    %c0_i32_1 = arith.constant 0 : i32
    return %arg1, %c0_i32, %c0_i32_0 : i32, i32, i32
  }
  func.func @transform_3(%arg0: i32, %arg1: i32) -> (i32, i32, i32, i32) {
    %c0_i32 = arith.constant 0 : i32
    %c0_i32_0 = arith.constant 0 : i32
    %c0_i32_1 = arith.constant 0 : i32
    %c0_i32_2 = arith.constant 0 : i32
    return %arg1, %c0_i32, %c0_i32_0, %c0_i32_1 : i32, i32, i32, i32
  }
  func.func @transform_4(%arg0: i32, %arg1: i32) -> (i32, i32, i32) {
    %c0_i32 = arith.constant 0 : i32
    %c0_i32_0 = arith.constant 0 : i32
    %c0_i32_1 = arith.constant 0 : i32
    return %arg1, %c0_i32, %c0_i32_0 : i32, i32, i32
  }
  func.func @transform_5(%arg0: i32, %arg1: i32) -> (i32, i32, i32) {
    %c0_i32 = arith.constant 0 : i32
    %c0_i32_0 = arith.constant 0 : i32
    %c0_i32_1 = arith.constant 0 : i32
    return %arg1, %c0_i32, %c0_i32_0 : i32, i32, i32
  }
  func.func @transform_6(%arg0: i32, %arg1: i32) -> (i32, i32, i32) {
    %c0_i32 = arith.constant 0 : i32
    %c0_i32_0 = arith.constant 0 : i32
    %c0_i32_1 = arith.constant 0 : i32
    return %arg1, %c0_i32, %c0_i32_0 : i32, i32, i32
  }
  func.func @transform_7(%arg0: i32, %arg1: i32) -> (i32, i32, i32) {
    %c0_i32 = arith.constant 0 : i32
    %c0_i32_0 = arith.constant 0 : i32
    %c0_i32_1 = arith.constant 0 : i32
    return %arg1, %c0_i32, %c0_i32_0 : i32, i32, i32
  }
  func.func @transform_8(%arg0: i32, %arg1: i32) -> (i32, i32, i32) {
    %c0_i32 = arith.constant 0 : i32
    %c0_i32_0 = arith.constant 0 : i32
    %c0_i32_1 = arith.constant 0 : i32
    return %arg1, %c0_i32, %c0_i32_0 : i32, i32, i32
  }
  func.func @transform_9(%arg0: i32, %arg1: i32) -> (i32, i32, i32) {
    %c0_i32 = arith.constant 0 : i32
    %c0_i32_0 = arith.constant 0 : i32
    %c0_i32_1 = arith.constant 0 : i32
    return %arg1, %c0_i32, %c0_i32_0 : i32, i32, i32
  }
  func.func @transform_10(%arg0: i32, %arg1: i32) -> (i32, i32, i32) {
    %c0_i32 = arith.constant 0 : i32
    %c0_i32_0 = arith.constant 0 : i32
    %c0_i32_1 = arith.constant 0 : i32
    return %arg1, %c0_i32, %c0_i32_0 : i32, i32, i32
  }
  func.func @transform_11(%arg0: i32, %arg1: i32) -> (i32, i32, i32) {
    %c0_i32 = arith.constant 0 : i32
    %c0_i32_0 = arith.constant 0 : i32
    %c0_i32_1 = arith.constant 0 : i32
    return %arg1, %c0_i32, %c0_i32_0 : i32, i32, i32
  }
  func.func @transform_12(%arg0: i32, %arg1: i32) -> (i32, i32, i32) {
    %c0_i32 = arith.constant 0 : i32
    %c0_i32_0 = arith.constant 0 : i32
    %c0_i32_1 = arith.constant 0 : i32
    return %arg1, %c0_i32, %c0_i32_0 : i32, i32, i32
  }
  func.func @transform_13(%arg0: i32, %arg1: i32) -> (i32, i32, i32) {
    %c0_i32 = arith.constant 0 : i32
    %c0_i32_0 = arith.constant 0 : i32
    %c0_i32_1 = arith.constant 0 : i32
    return %arg0, %c0_i32, %c0_i32_0 : i32, i32, i32
  }
}

</mosaic_0001>

<bundles_post_ra>
// kernel: tpu_custom_call.1
= control target key start
LH: loop header
LB: loop body
LE: loop exit
PB: predicated region body
PF: predicated region fallthrough
CT: control target
= control target key end

     0   :  { %s16047_s25 = smov 0   ;;  %s16049_s26 = smov 0   ;;  %s21256_s0 = inlined_call_operand.vmem [shape: f32[2,384,32], index: 0, kind: input, shape index: {}]   ;;  %s21257_s1 = inlined_call_operand.vmem [shape: bf16[2,9,32,32], index: 1, kind: input, shape index: {}]   ;;  %s21258_s2 = inlined_call_operand.vmem [shape: f32[2,1,32], index: 2, kind: input, shape index: {}]   ;;  %s21259_s3 = inlined_call_operand.vmem [shape: bf16[2,9,32,32], index: 3, kind: input, shape index: {}]   ;;  %s21260_s4 = inlined_call_operand.vmem [shape: f32[2,1,32], index: 4, kind: input, shape index: {}]   ;;  %s21261_s5 = inlined_call_operand.vmem [shape: bf16[2,32,32], index: 5, kind: input, shape index: {}]   ;;  %s21262_s6 = inlined_call_operand.vmem [shape: f32[2,1,32], index: 6, kind: input, shape index: {}]   ;;  %s21263_s7 = inlined_call_operand.vmem [shape: bf16[2,32,32], index: 7, kind: input, shape index: {}]   ;;  %s21264_s8 = inlined_call_operand.vmem [shape: f32[2,1,32], index: 8, kind: input, shape index: {}]   ;;  %s21265_s9 = inlined_call_operand.vmem [shape: f32[2,2,32], index: 9, kind: input, shape index: {}]   ;;  %s21266_s10 = inlined_call_operand.vmem [shape: f32[2,2,1], index: 10, kind: input, shape index: {}]   ;;  %s21267_s11 = inlined_call_operand.vmem [shape: f32[2,2,32], index: 11, kind: input, shape index: {}]   ;;  %s21268_s12 = inlined_call_operand.vmem [shape: f32[2,1,32], index: 12, kind: input, shape index: {}]   ;;  %s21269_s13 = inlined_call_operand.vmem [shape: f32[2,384,32], index: 13, kind: output, shape index: {}]  }
   0x1   :  { %21534 = sst [smem:[#allocation102_spill]] %s21256_s0  ;;  %s16051_s27 = smov 0  }
   0x2   :  { %21535 = sst [smem:[#allocation103_spill]] %s21257_s1  ;;  %s16053_s28 = smov 0  }
   0x3   :  { %21536 = sst [smem:[#allocation104_spill]] %s21258_s2  ;;  %s16055_s29 = smov 0  }
   0x4   :  { %21537 = sst [smem:[#allocation105_spill]] %s21259_s3 }
   0x5   :  { %21538 = sst [smem:[#allocation106_spill]] %s21261_s5 }
   0x6   :  { %21539 = sst [smem:[#allocation107_spill]] %s21263_s7 }
   0x7 LB: > { %21540 = sst [smem:[#allocation4_spill]] %s15956_s25  ;;  %s32_s30 = sadd.s32 1, %s15964_s27  ;;  %s15972_s29 = sphi %s16055_s29, %s23_s29   ;;  %s15968_s28 = sphi %s16053_s28, %s22691_s28   ;;  %s15964_s27 = sphi %s16051_s27, %s22690_s27   ;;  %s15960_s26 = sphi %s16049_s26, %s22689_s26   ;;  %s15956_s25 = sphi %s16047_s25, %s22688_s25  }
   0x8   : > { %21541 = sst [smem:[#allocation5_spill]] %s15964_s27  ;;  %s35_s14 = sadd.s32 1, %s15968_s28 }
   0x9   : > { %21542 = sst [smem:[#allocation6_spill]] %s15968_s28  ;;  %p33_p0 = scmp.ge.s32.totalorder %s32_s30, 2 }
   0xa   : > { %21543 = sst [smem:[#allocation7_spill]] %s15972_s29  ;;  %p12697_p1 = scmp.ge.s32.totalorder %s15972_s29, 1 }
   0xb   : > { %p506_p2 = scmp.lt.s32.totalorder %s15972_s29, 5  ;;  %s22693_s30 = smov (%p33_p0, %s32_s30), 0 }
   0xc   : > { %21544 = sst [smem:[#allocation8_spill]] %s22693_s30  ;;  %s22695_s14 = smov (!%p33_p0, %s35_s14), %s15968_s28 }
   0xd   : > { %p507_p3 = pnand %p12697_p1, %p506_p2  ;;  %p37_p4 = scmp.ge.s32.totalorder %s22695_s14, 2 }
   0xf   : > { %s22697_s14 = smov (%p37_p4, %s22695_s14), 0  ;;  %510 = sbr.rel (%p507_p3) target bundleno = 3084 (0xc0c), region = 72 }
  0x10   : > { %21545 = sst [smem:[#allocation9_spill]] %s22697_s14 }
  0x16   : > { %p597_p5 = scmp.lt.s32.totalorder %s15960_s26, 1  ;;  %p602_p6 = scmp.lt.s32.totalorder %s15956_s25, 1 }
  0x17   : > { %s21546_s2 = sld [smem:[#allocation104_spill]]  ;;  %s21548_s0 = sld [smem:[#allocation102_spill]] }
  0x18   : > { %s22699_s26 = smov (!%p597_p5, %s15960_s26), 1  ;;  %s21549_s1 = sld [smem:[#allocation103_spill]] }
  0x19   : > { %s16081_s15 = scalar_select %p602_p6, %s15956_s25, 1 }
  0x1a   : > { %s15680_s16 = smul.u32 384, %s22699_s26  ;;  %s21550_s3 = sld [smem:[#allocation105_spill]] }
  0x1b   : > { %s15681_s17 = smul.u32 144, %s16081_s15  ;;  %s13350_s19 = sshll.u32 %s16081_s15, 4 }
  0x1c   : > { %s21551_s5 = sld [smem:[#allocation106_spill]]  ;;  %s21552_s7 = sld [smem:[#allocation107_spill]] }
  0x1d   : > { %s16088_s20 = scalar_lea.vmem %s21546_s2, %s16081_s15  ;;  %s16093_s23 = scalar_lea.vmem %s21548_s0, %s15680_s16 }
  0x1e   : > { %21547 = sst [smem:[#allocation10_spill]] %s16088_s20  ;;  %s16102_s26 = scalar_lea.vmem %s21549_s1, %s15681_s17 }
  0x1f   : > { %s16129_s29 = sshll.u32 %s16081_s15, 1  ;;  %s648_s28 = scalar_lea.vmem %s21268_s12, %s16081_s15 }
  0x20   : > { %s16107_s18 = scalar_lea.vmem %s21550_s3, %s15681_s17  ;;  %s637_s0 = scalar_lea.vmem %s21265_s9, %s16129_s29 }
  0x21   : > { %s641_s21 = scalar_lea.vmem %s21266_s10, %s16129_s29  ;;  %s645_s24 = scalar_lea.vmem %s21267_s11, %s16129_s29 }
  0x22   : > { %s16117_s14 = scalar_lea.vmem %s21551_s5, %s13350_s19  ;;  %s16122_s27 = scalar_lea.vmem %s21552_s7, %s13350_s19 }
  0x23   : > { %s16150_s7 = scalar_lea.vmem %s21269_s13, %s15680_s16  ;;  %s21553_s17 = sld [smem:[#allocation4_spill]] }
  0x29   : > { %p12709_p7 = scmp.ne.s32.totalorder %s21553_s17, 0 }
  0x2a   : > { %vm659_vm0 = vcmask (!%p12709_p7), 261120   ;;  %v690_v0 = vld [vmem:[%s16093_s23] sm:$0xff] (!%p12709_p7)  ;;  %v691_v1 = vld [vmem:[%s16093_s23 + $0x8] sm:$0xff] (!%p12709_p7)  ;;  %v692_v2 = vld [vmem:[%s16093_s23 + $0x10] sm:$0xff] (!%p12709_p7)  ;;  %v15974_v3 = vmov (!%p12709_p7), 0  }
  0x2b   : > { %658 = sbr.rel (%p12709_p7) target bundleno = 81 (0x51), region = 76  ;;  %661 = vst.msk [vmem:[#allocation3 + $0x8] sm:$0xff] (!%p12709_p7), %vm659_vm0, %v15974_v3  ;;  %662 = vst.msk [vmem:[#allocation3 + $0x10] sm:$0xff] (!%p12709_p7), %vm659_vm0, %v15974_v3  ;;  %v693_v4 = vld [vmem:[%s16093_s23 + $0x18] sm:$0xff] (!%p12709_p7)  ;;  %v694_v5 = vld [vmem:[%s16093_s23 + $0x20] sm:$0xff] (!%p12709_p7) }
  0x2c   : > { %663 = vst.msk [vmem:[#allocation3 + $0x18] sm:$0xff] (!%p12709_p7), %vm659_vm0, %v15974_v3  ;;  %664 = vst.msk [vmem:[#allocation3 + $0x20] sm:$0xff] (!%p12709_p7), %vm659_vm0, %v15974_v3  ;;  %v695_v6 = vld [vmem:[%s16093_s23 + $0x28] sm:$0xff] (!%p12709_p7)  ;;  %v696_v7 = vld [vmem:[%s16093_s23 + $0x30] sm:$0xff] (!%p12709_p7) }
  0x2d   : > { %665 = vst.msk [vmem:[#allocation3 + $0x28] sm:$0xff] (!%p12709_p7), %vm659_vm0, %v15974_v3  ;;  %666 = vst.msk [vmem:[#allocation3 + $0x30] sm:$0xff] (!%p12709_p7), %vm659_vm0, %v15974_v3  ;;  %v697_v8 = vld [vmem:[%s16093_s23 + $0x38] sm:$0xff] (!%p12709_p7)  ;;  %v698_v9 = vld [vmem:[%s16093_s23 + $0x40] sm:$0xff] (!%p12709_p7) }
  0x2e   : > { %667 = vst.msk [vmem:[#allocation3 + $0x38] sm:$0xff] (!%p12709_p7), %vm659_vm0, %v15974_v3  ;;  %668 = vst.msk [vmem:[#allocation3 + $0x40] sm:$0xff] (!%p12709_p7), %vm659_vm0, %v15974_v3  ;;  %v699_v10 = vld [vmem:[%s16093_s23 + $0x48] sm:$0xff] (!%p12709_p7)  ;;  %v700_v11 = vld [vmem:[%s16093_s23 + $0x50] sm:$0xff] (!%p12709_p7) }
  0x2f   : > { %669 = vst.msk [vmem:[#allocation3 + $0x48] sm:$0xff] (!%p12709_p7), %vm659_vm0, %v15974_v3  ;;  %670 = vst.msk [vmem:[#allocation3 + $0x50] sm:$0xff] (!%p12709_p7), %vm659_vm0, %v15974_v3  ;;  %v701_v12 = vld [vmem:[%s16093_s23 + $0x58] sm:$0xff] (!%p12709_p7)  ;;  %v702_v13 = vld [vmem:[%s16093_s23 + $0x60] sm:$0xff] (!%p12709_p7) }
  0x30   : > { %671 = vst.msk [vmem:[#allocation3 + $0x58] sm:$0xff] (!%p12709_p7), %vm659_vm0, %v15974_v3  ;;  %672 = vst.msk [vmem:[#allocation3 + $0x60] sm:$0xff] (!%p12709_p7), %vm659_vm0, %v15974_v3  ;;  %v703_v14 = vld [vmem:[%s16093_s23 + $0x68] sm:$0xff] (!%p12709_p7)  ;;  %v704_v15 = vld [vmem:[%s16093_s23 + $0x70] sm:$0xff] (!%p12709_p7) }
  0x31   : > { %673 = vst.msk [vmem:[#allocation3 + $0x68] sm:$0xff] (!%p12709_p7), %vm659_vm0, %v15974_v3  ;;  %674 = vst.msk [vmem:[#allocation3 + $0x70] sm:$0xff] (!%p12709_p7), %vm659_vm0, %v15974_v3  ;;  %v705_v16 = vld [vmem:[%s16093_s23 + $0x78] sm:$0xff] (!%p12709_p7)  ;;  %v706_v17 = vld [vmem:[%s16093_s23 + $0x80] sm:$0xff] (!%p12709_p7) }
  0x32   : > { %675 = vst.msk [vmem:[#allocation3 + $0x78] sm:$0xff] %vm659_vm0, %v15974_v3  ;;  %676 = vst.msk [vmem:[#allocation3 + $0x80] sm:$0xff] %vm659_vm0, %v15974_v3  ;;  %v707_v18 = vld [vmem:[%s16093_s23 + $0x88] sm:$0xff]  ;;  %v708_v19 = vld [vmem:[%s16093_s23 + $0x90] sm:$0xff] }
  0x33   : > { %677 = vst.msk [vmem:[#allocation3 + $0x88] sm:$0xff] %vm659_vm0, %v15974_v3  ;;  %678 = vst.msk [vmem:[#allocation3 + $0x90] sm:$0xff] %vm659_vm0, %v15974_v3  ;;  %v709_v20 = vld [vmem:[%s16093_s23 + $0x98] sm:$0xff]  ;;  %v710_v21 = vld [vmem:[%s16093_s23 + $0xa0] sm:$0xff] }
  0x34   : > { %679 = vst.msk [vmem:[#allocation3 + $0x98] sm:$0xff] %vm659_vm0, %v15974_v3  ;;  %680 = vst.msk [vmem:[#allocation3 + $0xa0] sm:$0xff] %vm659_vm0, %v15974_v3  ;;  %v711_v22 = vld [vmem:[%s16093_s23 + $0xa8] sm:$0xff]  ;;  %v712_v23 = vld [vmem:[%s16093_s23 + $0xb0] sm:$0xff] }
  0x35   : > { %681 = vst.msk [vmem:[#allocation3 + $0xa8] sm:$0xff] %vm659_vm0, %v15974_v3  ;;  %682 = vst.msk [vmem:[#allocation3 + $0xb0] sm:$0xff] %vm659_vm0, %v15974_v3  ;;  %v713_v24 = vld [vmem:[%s16093_s23 + $0xb8] sm:$0xff]  ;;  %v714_v25 = vld [vmem:[%s16093_s23 + $0xc0] sm:$0xff] }
  0x36   : > { %683 = vst.msk [vmem:[#allocation3 + $0xb8] sm:$0xff] %vm659_vm0, %v15974_v3  ;;  %684 = vst.msk [vmem:[#allocation3 + $0xc0] sm:$0xff] %vm659_vm0, %v15974_v3  ;;  %v715_v26 = vld [vmem:[%s16093_s23 + $0xc8] sm:$0xff]  ;;  %v716_v27 = vld [vmem:[%s16093_s23 + $0xd0] sm:$0xff] }
  0x37   : > { %685 = vst.msk [vmem:[#allocation3 + $0xc8] sm:$0xff] %vm659_vm0, %v15974_v3  ;;  %686 = vst.msk [vmem:[#allocation3 + $0xd0] sm:$0xff] %vm659_vm0, %v15974_v3  ;;  %v717_v28 = vld [vmem:[%s16093_s23 + $0xd8] sm:$0xff]  ;;  %v718_v29 = vld [vmem:[%s16093_s23 + $0xe0] sm:$0xff] }
  0x38   : > { %687 = vst.msk [vmem:[#allocation3 + $0xd8] sm:$0xff] %vm659_vm0, %v15974_v3  ;;  %688 = vst.msk [vmem:[#allocation3 + $0xe0] sm:$0xff] %vm659_vm0, %v15974_v3  ;;  %v719_v30 = vld [vmem:[%s16093_s23 + $0xe8] sm:$0xff]  ;;  %v720_v31 = vld [vmem:[%s16093_s23 + $0xf0] sm:$0xff] }
  0x39   : > { %738 = vst.msk [vmem:[#allocation2] sm:$0xff] %vm659_vm0, %v690_v0  ;;  %739 = vst.msk [vmem:[#allocation2 + $0x8] sm:$0xff] %vm659_vm0, %v691_v1  ;;  %v721_v32 = vld [vmem:[%s16093_s23 + $0xf8] sm:$0xff]  ;;  %v722_v33 = vld [vmem:[%s16093_s23 + $0x100] sm:$0xff] }
  0x3a   : > { %740 = vst.msk [vmem:[#allocation2 + $0x10] sm:$0xff] %vm659_vm0, %v692_v2  ;;  %741 = vst.msk [vmem:[#allocation2 + $0x18] sm:$0xff] %vm659_vm0, %v693_v4  ;;  %v723_v34 = vld [vmem:[%s16093_s23 + $0x108] sm:$0xff]  ;;  %v724_v35 = vld [vmem:[%s16093_s23 + $0x110] sm:$0xff] }
  0x3b   : > { %742 = vst.msk [vmem:[#allocation2 + $0x20] sm:$0xff] %vm659_vm0, %v694_v5  ;;  %743 = vst.msk [vmem:[#allocation2 + $0x28] sm:$0xff] %vm659_vm0, %v695_v6  ;;  %v725_v36 = vld [vmem:[%s16093_s23 + $0x118] sm:$0xff]  ;;  %v726_v37 = vld [vmem:[%s16093_s23 + $0x120] sm:$0xff] }
  0x3c   : > { %744 = vst.msk [vmem:[#allocation2 + $0x30] sm:$0xff] %vm659_vm0, %v696_v7  ;;  %745 = vst.msk [vmem:[#allocation2 + $0x38] sm:$0xff] %vm659_vm0, %v697_v8  ;;  %v727_v38 = vld [vmem:[%s16093_s23 + $0x128] sm:$0xff]  ;;  %v728_v39 = vld [vmem:[%s16093_s23 + $0x130] sm:$0xff] }
  0x3d   : > { %746 = vst.msk [vmem:[#allocation2 + $0x40] sm:$0xff] %vm659_vm0, %v698_v9  ;;  %747 = vst.msk [vmem:[#allocation2 + $0x48] sm:$0xff] %vm659_vm0, %v699_v10  ;;  %v729_v40 = vld [vmem:[%s16093_s23 + $0x138] sm:$0xff]  ;;  %v730_v41 = vld [vmem:[%s16093_s23 + $0x140] sm:$0xff] }
  0x3e   : > { %748 = vst.msk [vmem:[#allocation2 + $0x50] sm:$0xff] %vm659_vm0, %v700_v11  ;;  %749 = vst.msk [vmem:[#allocation2 + $0x58] sm:$0xff] %vm659_vm0, %v701_v12  ;;  %v731_v42 = vld [vmem:[%s16093_s23 + $0x148] sm:$0xff]  ;;  %v732_v43 = vld [vmem:[%s16093_s23 + $0x150] sm:$0xff] }
  0x3f   : > { %750 = vst.msk [vmem:[#allocation2 + $0x60] sm:$0xff] %vm659_vm0, %v702_v13  ;;  %751 = vst.msk [vmem:[#allocation2 + $0x68] sm:$0xff] %vm659_vm0, %v703_v14  ;;  %v733_v44 = vld [vmem:[%s16093_s23 + $0x158] sm:$0xff]  ;;  %v734_v45 = vld [vmem:[%s16093_s23 + $0x160] sm:$0xff] }
  0x40   : > { %752 = vst.msk [vmem:[#allocation2 + $0x70] sm:$0xff] %vm659_vm0, %v704_v15  ;;  %753 = vst.msk [vmem:[#allocation2 + $0x78] sm:$0xff] %vm659_vm0, %v705_v16  ;;  %v735_v46 = vld [vmem:[%s16093_s23 + $0x168] sm:$0xff]  ;;  %v736_v47 = vld [vmem:[%s16093_s23 + $0x170] sm:$0xff] }
  0x41   : > { %754 = vst.msk [vmem:[#allocation2 + $0x80] sm:$0xff] %vm659_vm0, %v706_v17  ;;  %755 = vst.msk [vmem:[#allocation2 + $0x88] sm:$0xff] %vm659_vm0, %v707_v18  ;;  %v737_v48 = vld [vmem:[%s16093_s23 + $0x178] sm:$0xff] }
  0x42   : > { %756 = vst.msk [vmem:[#allocation2 + $0x90] sm:$0xff] %vm659_vm0, %v708_v19  ;;  %757 = vst.msk [vmem:[#allocation2 + $0x98] sm:$0xff] %vm659_vm0, %v709_v20 }
  0x43   : > { %758 = vst.msk [vmem:[#allocation2 + $0xa0] sm:$0xff] %vm659_vm0, %v710_v21  ;;  %759 = vst.msk [vmem:[#allocation2 + $0xa8] sm:$0xff] %vm659_vm0, %v711_v22 }
  0x44   : > { %760 = vst.msk [vmem:[#allocation2 + $0xb0] sm:$0xff] %vm659_vm0, %v712_v23  ;;  %761 = vst.msk [vmem:[#allocation2 + $0xb8] sm:$0xff] %vm659_vm0, %v713_v24 }
  0x45   : > { %762 = vst.msk [vmem:[#allocation2 + $0xc0] sm:$0xff] %vm659_vm0, %v714_v25  ;;  %763 = vst.msk [vmem:[#allocation2 + $0xc8] sm:$0xff] %vm659_vm0, %v715_v26 }
  0x46   : > { %764 = vst.msk [vmem:[#allocation2 + $0xd0] sm:$0xff] %vm659_vm0, %v716_v27  ;;  %765 = vst.msk [vmem:[#allocation2 + $0xd8] sm:$0xff] %vm659_vm0, %v717_v28 }
  0x47   : > { %766 = vst.msk [vmem:[#allocation2 + $0xe0] sm:$0xff] %vm659_vm0, %v718_v29  ;;  %767 = vst.msk [vmem:[#allocation2 + $0xe8] sm:$0xff] %vm659_vm0, %v719_v30 }
  0x48   : > { %768 = vst.msk [vmem:[#allocation2 + $0xf0] sm:$0xff] %vm659_vm0, %v720_v31  ;;  %769 = vst.msk [vmem:[#allocation2 + $0xf8] sm:$0xff] %vm659_vm0, %v721_v32 }
  0x49   : > { %770 = vst.msk [vmem:[#allocation2 + $0x100] sm:$0xff] %vm659_vm0, %v722_v33  ;;  %771 = vst.msk [vmem:[#allocation2 + $0x108] sm:$0xff] %vm659_vm0, %v723_v34 }
  0x4a   : > { %772 = vst.msk [vmem:[#allocation2 + $0x110] sm:$0xff] %vm659_vm0, %v724_v35  ;;  %773 = vst.msk [vmem:[#allocation2 + $0x118] sm:$0xff] %vm659_vm0, %v725_v36 }
  0x4b   : > { %774 = vst.msk [vmem:[#allocation2 + $0x120] sm:$0xff] %vm659_vm0, %v726_v37  ;;  %775 = vst.msk [vmem:[#allocation2 + $0x128] sm:$0xff] %vm659_vm0, %v727_v38 }
  0x4c   : > { %776 = vst.msk [vmem:[#allocation2 + $0x130] sm:$0xff] %vm659_vm0, %v728_v39  ;;  %777 = vst.msk [vmem:[#allocation2 + $0x138] sm:$0xff] %vm659_vm0, %v729_v40 }
  0x4d   : > { %778 = vst.msk [vmem:[#allocation2 + $0x140] sm:$0xff] %vm659_vm0, %v730_v41  ;;  %779 = vst.msk [vmem:[#allocation2 + $0x148] sm:$0xff] %vm659_vm0, %v731_v42 }
  0x4e   : > { %780 = vst.msk [vmem:[#allocation2 + $0x150] sm:$0xff] %vm659_vm0, %v732_v43  ;;  %781 = vst.msk [vmem:[#allocation2 + $0x158] sm:$0xff] %vm659_vm0, %v733_v44 }
  0x4f   : > { %782 = vst.msk [vmem:[#allocation2 + $0x160] sm:$0xff] %vm659_vm0, %v734_v45  ;;  %783 = vst.msk [vmem:[#allocation2 + $0x168] sm:$0xff] %vm659_vm0, %v735_v46 }
  0x50   : > { %784 = vst.msk [vmem:[#allocation2 + $0x170] sm:$0xff] %vm659_vm0, %v736_v47  ;;  %785 = vst.msk [vmem:[#allocation2 + $0x178] sm:$0xff] %vm659_vm0, %v737_v48 }
  0x51 PF: > { %v15822_v49 = vld [vmem:[%s16102_s26 + $0x10] sm:$0xff]   ;;  %v15823_v50 = vld [vmem:[%s16102_s26 + $0x18] sm:$0xff]   ;;  %v16281_v52 = vld [vmem:[#allocation3 + $0x8] sm:$0xf0]  ;;  %vm21315_vm1 = vcmask 1043456   ;;  %vm21316_vm2 = vcmask 261120   ;;  %s22493_s20 = scalar_lea.vmem %s21264_s8, %s16081_s15 }
  0x52   : > { %13872 = vmatprep.subr.bf16.mxu0 %v15822_v49  ;;  %v16279_v51 = vld [vmem:[#allocation3 + $0x10] sm:$0xff]  ;;  %v2001_v53 = vrot.slane %v16281_v52, 4  ;;  %v16286_v55 = vld [vmem:[%s16102_s26] sm:$0xff]   ;;  %v1844_v57 = vld [vmem:[#allocation2 + $0x8] sm:$0xff]  ;;  %vm21314_vm3 = vsmask.f32 4352 }
  0x53   : > { %13873 = vmatpush3.bf16.msra.mxu0 %v15822_v49  ;;  %v2002_v54 = vrot.slane %v16279_v51, 4  ;;  %v1843_v56 = vld [vmem:[#allocation2] sm:$0xff]  ;;  %v1845_v60 = vld [vmem:[#allocation2 + $0x10] sm:$0xff]  ;;  %v1846_v61 = vld [vmem:[#allocation2 + $0x18] sm:$0xff]  ;;  %vm21313_vm4 = vsmask.f32 3328 }
  0x54   : > { %13874 = vmatprep.subr.bf16.mxu0 %v15823_v50  ;;  %v1891_v59 = vpack.c.bf16 %v1844_v57, %v1843_v56  ;;  %v1847_v62 = vld [vmem:[#allocation2 + $0x20] sm:$0xff]  ;;  %v1892_v63 = vpack.c.bf16 %v1846_v61, %v1845_v60  ;;  %v1848_v0 = vld [vmem:[#allocation2 + $0x28] sm:$0xff]  ;;  %v1849_v1 = vld [vmem:[#allocation2 + $0x30] sm:$0xff]  ;;  %vm21312_vm5 = vsmask.f32 256  ;;  %s21749_s3 = sld [smem:[#allocation10_spill]] }
  0x55   : > { %v2003_v58 = vsel %vm21315_vm1, %v2001_v53, %v2002_v54  ;;  %v1850_v2 = vld [vmem:[#allocation2 + $0x38] sm:$0xff]  ;;  %v1893_v3 = vpack.c.bf16 %v1848_v0, %v1847_v62  ;;  %v1851_v5 = vld [vmem:[#allocation2 + $0x40] sm:$0xff]  ;;  %v1852_v6 = vld [vmem:[#allocation2 + $0x48] sm:$0xff]  ;;  %vm21311_vm6 = vsmask.f32 7424 }
  0x56   : > { %13876 = vmatprep.mubr.msk.bf16.mxu0 %vm21316_vm2, %v2003_v58  ;;  %1916 = vst.msk [vmem:[#allocation3 + $0x18] sm:$0xff] %vm21316_vm2, %v1891_v59  ;;  %v1894_v4 = vpack.c.bf16 %v1850_v2, %v1849_v1  ;;  %v1853_v7 = vld [vmem:[#allocation2 + $0x50] sm:$0xff]  ;;  %1917 = vst.msk [vmem:[#allocation3 + $0x20] sm:$0xff] %vm21316_vm2, %v1892_v63  ;;  %v1895_v8 = vpack.c.bf16 %v1852_v6, %v1851_v5  ;;  %v1854_v9 = vld [vmem:[#allocation2 + $0x58] sm:$0xff] }
  0x57   : > { %13875 = vmatpush3.bf16.msra.mxu0 %v15823_v50  ;;  %v1855_v10 = vld [vmem:[#allocation2 + $0x60] sm:$0xff]  ;;  %v1856_v11 = vld [vmem:[#allocation2 + $0x68] sm:$0xff]  ;;  %1918 = vst.msk [vmem:[#allocation3 + $0x28] sm:$0xff] %vm21316_vm2, %v1893_v3  ;;  %v1896_v12 = vpack.c.bf16 %v1854_v9, %v1853_v7  ;;  %v1857_v14 = vld [vmem:[#allocation2 + $0x70] sm:$0xff] }
  0x58   : > { %13924 = vmatprep.subr.bf16.mxu0 %v16286_v55  ;;  %1919 = vst.msk [vmem:[#allocation3 + $0x30] sm:$0xff] %vm21316_vm2, %v1894_v4  ;;  %v1897_v13 = vpack.c.bf16 %v1856_v11, %v1855_v10  ;;  %v1858_v15 = vld [vmem:[#allocation2 + $0x78] sm:$0xff]  ;;  %v1859_v16 = vld [vmem:[#allocation2 + $0x80] sm:$0xff]  ;;  %1920 = vst.msk [vmem:[#allocation3 + $0x38] sm:$0xff] %vm21316_vm2, %v1895_v8 }
  0x59   : > { %v1898_v17 = vpack.c.bf16 %v1858_v15, %v1857_v14  ;;  %v1860_v18 = vld [vmem:[#allocation2 + $0x88] sm:$0xff]  ;;  %v1861_v19 = vld [vmem:[#allocation2 + $0x90] sm:$0xff]  ;;  %v1862_v20 = vld [vmem:[#allocation2 + $0x98] sm:$0xff]  ;;  %1921 = vst.msk [vmem:[#allocation3 + $0x40] sm:$0xff] %vm21316_vm2, %v1896_v12 }
  0x5a   : > { %1922 = vst.msk [vmem:[#allocation3 + $0x48] sm:$0xff] %vm21316_vm2, %v1897_v13  ;;  %v1899_v21 = vpack.c.bf16 %v1860_v18, %v1859_v16  ;;  %v1900_v22 = vpack.c.bf16 %v1862_v20, %v1861_v19  ;;  %v1863_v23 = vld [vmem:[#allocation2 + $0xa0] sm:$0xff]  ;;  %v1864_v24 = vld [vmem:[#allocation2 + $0xa8] sm:$0xff]  ;;  %v1865_v25 = vld [vmem:[#allocation2 + $0xb0] sm:$0xff] }
  0x5b   : > { %1923 = vst.msk [vmem:[#allocation3 + $0x50] sm:$0xff] %vm21316_vm2, %v1898_v17  ;;  %v1901_v26 = vpack.c.bf16 %v1864_v24, %v1863_v23  ;;  %v1866_v27 = vld [vmem:[#allocation2 + $0xb8] sm:$0xff]  ;;  %v1867_v29 = vld [vmem:[#allocation2 + $0xc0] sm:$0xff]  ;;  %v1868_v30 = vld [vmem:[#allocation2 + $0xc8] sm:$0xff] }
  0x5c   : > { %1924 = vst.msk [vmem:[#allocation3 + $0x58] sm:$0xff] %vm21316_vm2, %v1899_v21  ;;  %1925 = vst.msk [vmem:[#allocation3 + $0x60] sm:$0xff] %vm21316_vm2, %v1900_v22  ;;  %v1902_v28 = vpack.c.bf16 %v1866_v27, %v1865_v25  ;;  %v1903_v32 = vpack.c.bf16 %v1868_v30, %v1867_v29  ;;  %v1869_v33 = vld [vmem:[#allocation2 + $0xd0] sm:$0xff]  ;;  %v1870_v34 = vld [vmem:[#allocation2 + $0xd8] sm:$0xff] }
  0x5d   : > { %v16303_v31 = vld [vmem:[#allocation3 + $0x18] sm:$0xff]  ;;  %1926 = vst.msk [vmem:[#allocation3 + $0x68] sm:$0xff] %vm21316_vm2, %v1901_v26  ;;  %v16307_v36 = vld [vmem:[#allocation3 + $0x20] sm:$0xff]  ;;  %v1904_v37 = vpack.c.bf16 %v1870_v34, %v1869_v33  ;;  %v1872_v39 = vld [vmem:[#allocation2 + $0xe8] sm:$0xff] }
  0x5e   : > { %v2004_v35 = vrot.slane %v16303_v31, 4  ;;  %1927 = vst.msk [vmem:[#allocation3 + $0x70] sm:$0xff] %vm21316_vm2, %v1902_v28  ;;  %v1871_v38 = vld [vmem:[#allocation2 + $0xe0] sm:$0xff]  ;;  %v2006_v40 = vrot.slane %v16307_v36, 4  ;;  %v16311_v41 = vld [vmem:[#allocation3 + $0x28] sm:$0xff]  ;;  %1928 = vst.msk [vmem:[#allocation3 + $0x78] sm:$0xff] %vm21316_vm2, %v1903_v32 }
  0x5f   : > { %v15825_v42 = vld [vmem:[%s16102_s26 + $0x8] sm:$0xff]   ;;  %v1905_v43 = vpack.c.bf16 %v1872_v39, %v1871_v38  ;;  %v1873_v44 = vld [vmem:[#allocation2 + $0xf0] sm:$0xff]  ;;  %1929 = vst.msk [vmem:[#allocation3 + $0x80] sm:$0xff] %vm21316_vm2, %v1904_v37  ;;  %v1874_v47 = vld [vmem:[#allocation2 + $0xf8] sm:$0xff] }
  0x60   : > { %v2005_v45 = vsel %vm21315_vm1, %v2002_v54, %v2004_v35  ;;  %v16318_v46 = vld [vmem:[#allocation3 + $0x30] sm:$0xff]  ;;  %v1875_v48 = vld [vmem:[#allocation2 + $0x100] sm:$0xff]  ;;  %v2007_v49 = vsel %vm21315_vm1, %v2004_v35, %v2006_v40  ;;  %v1906_v50 = vpack.c.bf16 %v1874_v47, %v1873_v44  ;;  %v1876_v53 = vld [vmem:[#allocation2 + $0x108] sm:$0xff]  ;;  %v2008_v54 = vrot.slane %v16311_v41, 4 }
  0x61   : > { %13877 = vmatmul.mubr.msk.bf16.vlgmr.msra.gmra.mrb[0].mxu0 %vm21316_vm2, %v2005_v45  ;;  %1930 = vst.msk [vmem:[#allocation3 + $0x88] sm:$0xff] %vm21316_vm2, %v1905_v43  ;;  %v1877_v56 = vld [vmem:[#allocation2 + $0x110] sm:$0xff]  ;;  %v1878_v57 = vld [vmem:[#allocation2 + $0x118] sm:$0xff]  ;;  %v2010_v58 = vrot.slane %v16318_v46, 4  ;;  %v1907_v59 = vpack.c.bf16 %v1876_v53, %v1875_v48  ;;  %v1879_v61 = vld [vmem:[#allocation2 + $0x120] sm:$0xff] }
  0x62   : > { %13925 = vmatpush3.bf16.msra.mxu0 %v16286_v55  ;;  %13880 = vmatprep.mubr.msk.bf16.mxu0 %vm21316_vm2, %v2007_v49  ;;  %1931 = vst.msk [vmem:[#allocation3 + $0x90] sm:$0xff] %vm21316_vm2, %v1906_v50  ;;  %v1908_v60 = vpack.c.bf16 %v1878_v57, %v1877_v56  ;;  %v1880_v62 = vld [vmem:[#allocation2 + $0x128] sm:$0xff]  ;;  %v1881_v63 = vld [vmem:[#allocation2 + $0x130] sm:$0xff]  ;;  %v1882_v0 = vld [vmem:[#allocation2 + $0x138] sm:$0xff]  ;;  %v2009_v2 = vsel %vm21315_vm1, %v2006_v40, %v2008_v54 }
  0x63   : > { %13926 = vmatprep.subr.bf16.mxu0 %v15825_v42  ;;  %1932 = vst.msk [vmem:[#allocation3 + $0x98] sm:$0xff] %vm21316_vm2, %v1907_v59  ;;  %v1909_v55 = vpack.c.bf16 %v1880_v62, %v1879_v61  ;;  %v1883_v1 = vld [vmem:[#allocation2 + $0x140] sm:$0xff]  ;;  %v1910_v3 = vpack.c.bf16 %v1882_v0, %v1881_v63  ;;  %v1884_v4 = vld [vmem:[#allocation2 + $0x148] sm:$0xff]  ;;  %v1885_v5 = vld [vmem:[#allocation2 + $0x150] sm:$0xff]  ;;  %v2011_v6 = vsel %vm21315_vm1, %v2008_v54, %v2010_v58 }
  0x64   : > { %1933 = vst.msk [vmem:[#allocation3 + $0xa0] sm:$0xff] %vm21316_vm2, %v1908_v60  ;;  %v16333_v7 = vld [vmem:[#allocation3 + $0x38] sm:$0xff]  ;;  %v1911_v8 = vpack.c.bf16 %v1884_v4, %v1883_v1  ;;  %v1887_v10 = vld [vmem:[#allocation2 + $0x160] sm:$0xff]  ;;  %v1888_v13 = vld [vmem:[#allocation2 + $0x168] sm:$0xff] }
  0x65   : > { %1934 = vst.msk [vmem:[#allocation3 + $0xa8] sm:$0xff] %vm21316_vm2, %v1909_v55  ;;  %v1886_v9 = vld [vmem:[#allocation2 + $0x158] sm:$0xff]  ;;  %v16336_v11 = vld [vmem:[#allocation3 + $0x40] sm:$0xff]  ;;  %1935 = vst.msk [vmem:[#allocation3 + $0xb0] sm:$0xff] %vm21316_vm2, %v1910_v3  ;;  %v1913_v14 = vpack.c.bf16 %v1888_v13, %v1887_v10  ;;  %v2012_v15 = vrot.slane %v16333_v7, 4  ;;  %v21275_v10 = vshll.u32 %v16279_v51, 16 }
  0x66   : > { %13927 = vmatpush3.bf16.msra.mxu0 %v15825_v42  ;;  %v1912_v12 = vpack.c.bf16 %v1886_v9, %v1885_v5  ;;  %1936 = vst.msk [vmem:[#allocation3 + $0xb8] sm:$0xff] %vm21316_vm2, %v1911_v8  ;;  %v16345_v16 = vld [vmem:[%s16102_s26 + $0x20] sm:$0xff]   ;;  %v2014_v17 = vrot.slane %v16336_v11, 4  ;;  %v16352_v20 = vld [vmem:[#allocation3 + $0x48] sm:$0xff]  ;;  %v16354_v21 = vld [vmem:[#allocation3 + $0x50] sm:$0xff]  ;;  %v21276_v8 = vshrl.u32 %v16279_v51, 16 }
  0x67   : > { %1938 = vst.msk [vmem:[#allocation3 + $0xc8] sm:$0xff] %vm21316_vm2, %v1913_v14  ;;  %13976 = vmatprep.subr.bf16.mxu0 %v16345_v16  ;;  %v2013_v18 = vsel %vm21315_vm1, %v2010_v58, %v2012_v15  ;;  %v2016_v22 = vrot.slane %v16352_v20, 4  ;;  %v2018_v23 = vrot.slane %v16354_v21, 4  ;;  %v16362_v26 = vld [vmem:[#allocation3 + $0x58] sm:$0xff]  ;;  %v16364_v27 = vld [vmem:[#allocation3 + $0x60] sm:$0xff]  ;;  %v16372_v33 = vld [vmem:[#allocation3 + $0x68] sm:$0xff] }
  0x68   : > { %1937 = vst.msk [vmem:[#allocation3 + $0xc0] sm:$0xff] %vm21316_vm2, %v1912_v12  ;;  %v2015_v19 = vsel %vm21315_vm1, %v2012_v15, %v2014_v17  ;;  %v2020_v28 = vrot.slane %v16362_v26, 4  ;;  %v2022_v29 = vrot.slane %v16364_v27, 4  ;;  %v16374_v34 = vld [vmem:[#allocation3 + $0x70] sm:$0xff]  ;;  %v2024_v35 = vrot.slane %v16372_v33, 4  ;;  %v16382_v40 = vld [vmem:[#allocation3 + $0x78] sm:$0xff] }
  0x69   : > { %13881 = vmatmul.mubr.msk.bf16.gmra.mrb[4].mxu0 %vm21316_vm2, %v2009_v2  ;;  %v2017_v24 = vsel %vm21315_vm1, %v2014_v17, %v2016_v22  ;;  %v2019_v25 = vsel %vm21315_vm1, %v2016_v22, %v2018_v23  ;;  %v2026_v37 = vrot.slane %v16374_v34, 4  ;;  %v16384_v42 = vld [vmem:[#allocation3 + $0x80] sm:$0xff]  ;;  %v2028_v43 = vrot.slane %v16382_v40, 4  ;;  %v16390_v45 = vld [vmem:[#allocation3 + $0x88] sm:$0xff]  ;;  %v16393_v48 = vld [vmem:[#allocation3 + $0x90] sm:$0xff] }
  0x6a   : > { %13884 = vmatprep.mubr.msk.bf16.mxu0 %vm21316_vm2, %v2011_v6  ;;  %v2021_v30 = vsel %vm21315_vm1, %v2018_v23, %v2020_v28  ;;  %v2023_v32 = vsel %vm21315_vm1, %v2020_v28, %v2022_v29  ;;  %v2025_v38 = vsel %vm21315_vm1, %v2022_v29, %v2024_v35  ;;  %v2030_v44 = vrot.slane %v16384_v42, 4  ;;  %21554 = vst [vmem:[#allocation11_spill] sm:$0xff] %v16393_v48  ;;  %v16402_v57 = vld [vmem:[#allocation3 + $0x98] sm:$0xff]  ;;  %v1940_v6 = vld [vmem:[#allocation3 + $0x8] sm:$0xf8] }
  0x6b   : > { %v2027_v39 = vsel %vm21315_vm1, %v2024_v35, %v2026_v37  ;;  %v2029_v47 = vsel %vm21315_vm1, %v2026_v37, %v2028_v43  ;;  %v2032_v50 = vrot.slane %v16390_v45, 4  ;;  %v2034_v53 = vrot.slane %v16393_v48, 4  ;;  %21555 = vst [vmem:[#allocation12_spill] sm:$0xff] %v16402_v57  ;;  %v16404_v58 = vld [vmem:[#allocation3 + $0xa0] sm:$0xff] }
  0x6c   : > { %v2031_v49 = vsel %vm21315_vm1, %v2028_v43, %v2030_v44  ;;  %21556 = vst [vmem:[#allocation13_spill] sm:$0xff] %v16404_v58  ;;  %v2036_v59 = vrot.slane %v16402_v57, 4  ;;  %v2038_v60 = vrot.slane %v16404_v58, 4  ;;  %v16412_v63 = vld [vmem:[#allocation3 + $0xa8] sm:$0xff]  ;;  %v16414_v55 = vld [vmem:[#allocation3 + $0xb0] sm:$0xff]  ;;  %v2361_v13 = vshrl.u32 %v1940_v6, 16 }
  0x6d   : > { %v2033_v54 = vsel %vm21315_vm1, %v2030_v44, %v2032_v50  ;;  %v2035_v56 = vsel %vm21315_vm1, %v2032_v50, %v2034_v53  ;;  %21557 = vst [vmem:[#allocation14_spill] sm:$0xff] %v16412_v63  ;;  %21558 = vst [vmem:[#allocation15_spill] sm:$0xff] %v16414_v55  ;;  %v2040_v0 = vrot.slane %v16412_v63, 4  ;;  %v2042_v1 = vrot.slane %v16414_v55, 4  ;;  %v16422_v4 = vld [vmem:[#allocation3 + $0xb8] sm:$0xff] }
  0x6e   : > { %v2037_v61 = vsel %vm21315_vm1, %v2034_v53, %v2036_v59  ;;  %v2039_v62 = vsel %vm21315_vm1, %v2036_v59, %v2038_v60  ;;  %21559 = vst [vmem:[#allocation16_spill] sm:$0xff] %v16422_v4  ;;  %v2044_v9 = vrot.slane %v16422_v4, 4  ;;  %v2364_v14 = vshll.u32 %v1940_v6, 16 }
  0x6f   : > { %v2041_v2 = vsel %vm21315_vm1, %v2038_v60, %v2040_v0  ;;  %v2043_v3 = vsel %vm21315_vm1, %v2040_v0, %v2042_v1  ;;  %v16424_v5 = vld [vmem:[#allocation3 + $0xc0] sm:$0xff]  ;;  %v2371_v17 = vrot.slane %v21276_v8, 3  ;;  %v2363_v22 = vrot.slane %v2361_v13, 3  ;;  %v16498_v13 = vld [vmem:[%s16102_s26 + $0x30] sm:$0xff]  }
  0x70   : > { %21560 = vst [vmem:[#allocation17_spill] sm:$0xff] %v16424_v5  ;;  %v2046_v12 = vrot.slane %v16424_v5, 4  ;;  %v2045_v15 = vsel %vm21315_vm1, %v2042_v1, %v2044_v9  ;;  %v2366_v23 = vrot.slane %v2364_v14, 4  ;;  %v16445_v28 = vshll.u32 %v16303_v31, 16  ;;  %v15827_v1 = vld [vmem:[%s16102_s26 + $0x28] sm:$0xff]  }
  0x71   : > { %13885 = vmatmul.mubr.msk.bf16.gmra.mrb[8].mxu0 %vm21316_vm2, %v2013_v18  ;;  %v16450_v35 = vshrl.u32 %v16307_v36, 16  ;;  %v16453_v37 = vshll.u32 %v16307_v36, 16  ;;  %v16467_v50 = vshll.u32 %v16311_v41, 16 }
  0x72   : > { %13888 = vmatprep.mubr.msk.bf16.mxu0 %vm21316_vm2, %v2015_v19  ;;  %v2047_v18 = vsel %vm21315_vm1, %v2044_v9, %v2046_v12  ;;  %v16436_v19 = vld [vmem:[#allocation3 + $0xc8] sm:$0xf]  ;;  %v16492_v9 = vshrl.u32 %v16336_v11, 16 }
  0x73   : > { %v2048_v29 = vrot.slane %v16436_v19, 4  ;;  %v2389_v44 = vrot.slane %v16450_v35, 3 }
  0x79   : > { %13889 = vmatmul.mubr.msk.bf16.gmra.mrb[12].mxu0 %vm21316_vm2, %v2017_v24  ;;  %v2374_v24 = vrot.slane %v21275_v10, 4  ;;  %v16656_v10 = vshrl.u32 %v16424_v5, 16 }
  0x7a   : > { %13892 = vmatprep.mubr.msk.bf16.mxu0 %vm21316_vm2, %v2019_v25  ;;  %v16442_v25 = vshrl.u32 %v16303_v31, 16  ;;  %v2383_v31 = vrot.slane %v16445_v28, 4 }
  0x7b   : > { %21561 = vst [vmem:[#allocation18_spill] sm:$0xff] %v16656_v10 }
  0x81   : > { %13893 = vmatmul.mubr.msk.bf16.gmra.mrb[16].mxu0 %vm21316_vm2, %v2021_v30  ;;  %v2367_v30 = vor.u32 %v2366_v23, %v2363_v22  ;;  %v16510_v22 = vshrl.u32 %v16352_v20, 16  ;;  %v16513_v23 = vshll.u32 %v16352_v20, 16 }
  0x82   : > { %13896 = vmatprep.mubr.msk.bf16.mxu0 %vm21316_vm2, %v2023_v32  ;;  %v2375_v32 = vor.u32 %v2374_v24, %v2371_v17  ;;  %v2425_v17 = vrot.slane %v16492_v9, 3 }
  0x84   : > { %v2376_v43 = vsel %vm21314_vm3, %v2367_v30, %v2375_v32  ;;  %v16519_v30 = vshll.u32 %v16354_v21, 16 }
  0x86   : > { %v2446_v20 = vrot.slane %v16519_v30, 4 }
  0x89   : > { %13897 = vmatmul.mubr.msk.bf16.gmra.mrb[20].mxu0 %vm21316_vm2, %v2025_v38  ;;  %v2049_v38 = vsel %vm21315_vm1, %v2046_v12, %v2048_v29  ;;  %v16495_v12 = vshll.u32 %v16336_v11, 16  ;;  %v16516_v29 = vshrl.u32 %v16354_v21, 16  ;;  %v16530_v21 = vshrl.u32 %v16362_v26, 16 }
  0x8a   : > { %13900 = vmatprep.mubr.msk.bf16.mxu0 %vm21316_vm2, %v2027_v39  ;;  %v2380_v39 = vrot.slane %v16442_v25, 3 }
  0x8c   : > { %v2384_v36 = vor.u32 %v2383_v31, %v2380_v39  ;;  %v2437_v39 = vrot.slane %v16513_v23, 4 }
  0x8e   : > { %v2385_v59 = vsel %vm21314_vm3, %v2375_v32, %v2384_v36 }
  0x91   : > { %13901 = vmatmul.mubr.msk.bf16.gmra.mrb[24].mxu0 %vm21316_vm2, %v2029_v47  ;;  %v2392_v47 = vrot.slane %v16453_v37, 4 }
  0x92   : > { %13904 = vmatprep.mubr.msk.bf16.mxu0 %vm21316_vm2, %v2031_v49  ;;  %v16464_v49 = vshrl.u32 %v16311_v41, 16 }
  0x93   : > { %v2393_v53 = vor.u32 %v2392_v47, %v2389_v44  ;;  %v16533_v47 = vshll.u32 %v16362_v26, 16 }
  0x94   : > { %v2398_v60 = vrot.slane %v16464_v49, 3 }
  0x99   : > { %13905 = vmatmul.mubr.msk.bf16.gmra.mrb[28].mxu0 %vm21316_vm2, %v2033_v54  ;;  %v16470_v54 = vshrl.u32 %v16318_v46, 16 }
  0x9a   : > { %13908 = vmatprep.mubr.msk.bf16.mxu0 %vm21316_vm2, %v2035_v56  ;;  %v16473_v56 = vshll.u32 %v16318_v46, 16 }
  0x9b   : > { %v2407_v0 = vrot.slane %v16470_v54, 3 }
  0x9c   : > { %v2410_v41 = vrot.slane %v16473_v56, 4 }
  0x9e   : > { %v2411_v6 = vor.u32 %v2410_v41, %v2407_v0 }
  0xa1   : > { %13909 = vmatmul.mubr.msk.bf16.gmra.mrb[32].mxu0 %vm21316_vm2, %v2037_v61  ;;  %v2401_v61 = vrot.slane %v16467_v50, 4 }
  0xa2   : > { %13912 = vmatprep.mubr.msk.bf16.mxu0 %vm21316_vm2, %v2039_v62  ;;  %v2394_v62 = vsel %vm21314_vm3, %v2384_v36, %v2393_v53 }
  0xa3   : > { %v2402_v46 = vor.u32 %v2401_v61, %v2398_v60  ;;  %v2452_v61 = vrot.slane %v16530_v21, 3 }
  0xa9   : > { %13913 = vmatmul.mubr.msk.bf16.gmra.mrb[36].mxu0 %vm21316_vm2, %v2041_v2  ;;  %v16486_v2 = vshrl.u32 %v16333_v7, 16 }
  0xaa   : > { %13916 = vmatprep.mubr.msk.bf16.mxu0 %vm21316_vm2, %v2043_v3  ;;  %v16489_v3 = vshll.u32 %v16333_v7, 16  ;;  %v2412_v7 = vsel %vm21314_vm3, %v2402_v46, %v2411_v6 }
  0xab   : > { %v2416_v14 = vrot.slane %v16486_v2, 3 }
  0xb1   : > { %13917 = vmatmul.mubr.msk.bf16.gmra.mrb[40].mxu0 %vm21316_vm2, %v2045_v15  ;;  %v2419_v15 = vrot.slane %v16489_v3, 4 }
  0xb2   : > { %13920 = vmatprep.mubr.msk.bf16.mxu0 %vm21316_vm2, %v2047_v18  ;;  %v2428_v18 = vrot.slane %v16495_v12, 4 }
  0xb3   : > { %v2420_v11 = vor.u32 %v2419_v15, %v2416_v14  ;;  %v16559_v14 = vshll.u32 %v16374_v34, 16 }
  0xb4   : > { %v2429_v24 = vor.u32 %v2428_v18, %v2425_v17 }
  0xb5   : > { %v2421_v32 = vsel %vm21314_vm3, %v2411_v6, %v2420_v11 }
  0xb6   : > { %v2430_v31 = vsel %vm21314_vm3, %v2420_v11, %v2429_v24 }
  0xb9   : > { %13921 = vmatmul.mubr.msk.bf16.gmra.mrb[44].mxu0 %vm21316_vm2, %v2049_v38  ;;  %v2434_v38 = vrot.slane %v16510_v22, 3 }
  0xba   : > { %13928 = vmatprep.mubr.msk.bf16.mxu0 %vm21316_vm2, %v2376_v43  ;;  %v2443_v43 = vrot.slane %v16516_v29, 3 }
  0xbb   : > { %v2438_v44 = vor.u32 %v2437_v39, %v2434_v38  ;;  %v16576_v39 = vshrl.u32 %v16384_v42, 16 }
  0xbc   : > { %v2447_v36 = vor.u32 %v2446_v20, %v2443_v43 }
  0xbd   : > { %v2439_v60 = vsel %vm21314_vm3, %v2429_v24, %v2438_v44 }
  0xbe   : > { %v2448_v0 = vsel %vm21314_vm3, %v2438_v44, %v2447_v36 }
  0xc1   : > { %13929 = vmatmul.mubr.msk.bf16.vlgmr.msra.gmra.mrb[0].mxu0 %vm21316_vm2, %v2385_v59  ;;  %v16539_v59 = vshll.u32 %v16364_v27, 16 }
  0xc2   : > { %13977 = vmatpush3.bf16.msra.mxu0 %v16345_v16  ;;  %13932 = vmatprep.mubr.msk.bf16.mxu0 %vm21316_vm2, %v2394_v62  ;;  %v2403_v16 = vsel %vm21314_vm3, %v2393_v53, %v2402_v46  ;;  %v16536_v53 = vshrl.u32 %v16364_v27, 16  ;;  %v2455_v62 = vrot.slane %v16533_v47, 4  ;;  %v16550_v27 = vshrl.u32 %v16372_v33, 16 }
  0xc3   : > { %13978 = vmatprep.subr.bf16.mxu0 %v15827_v1  ;;  %v2464_v26 = vrot.slane %v16539_v59, 4  ;;  %v16553_v46 = vshll.u32 %v16372_v33, 16  ;;  %v2482_v33 = vrot.slane %v16559_v14, 4 }
  0xc4   : > { %v2461_v41 = vrot.slane %v16536_v53, 3 }
  0xc5   : > { %v2473_v17 = vrot.slane %v16553_v46, 4 }
  0xc6   : > { %13979 = vmatpush3.bf16.msra.mxu0 %v15827_v1  ;;  %v2456_v1 = vor.u32 %v2455_v62, %v2452_v61  ;;  %v2465_v6 = vor.u32 %v2464_v26, %v2461_v41  ;;  %v16593_v62 = vshll.u32 %v16390_v45, 16  ;;  %v16596_v41 = vshrl.u32 %v16393_v48, 16 }
  0xc7   : > { %14028 = vmatprep.subr.bf16.mxu0 %v16498_v13  ;;  %v16599_v26 = vshll.u32 %v16393_v48, 16 }
  0xc8   : > { %v2457_v15 = vsel %vm21314_vm3, %v2447_v36, %v2456_v1  ;;  %v2466_v18 = vsel %vm21314_vm3, %v2456_v1, %v2465_v6 }
  0xc9   : > { %13933 = vmatmul.mubr.msk.bf16.gmra.mrb[4].mxu0 %vm21316_vm2, %v2403_v16  ;;  %v16556_v16 = vshrl.u32 %v16374_v34, 16  ;;  %v16570_v34 = vshrl.u32 %v16382_v40, 16 }
  0xca   : > { %13936 = vmatprep.mubr.msk.bf16.mxu0 %vm21316_vm2, %v2412_v7  ;;  %v2470_v7 = vrot.slane %v16550_v27, 3 }
  0xcb   : > { %v2479_v11 = vrot.slane %v16556_v16, 3  ;;  %v2488_v20 = vrot.slane %v16570_v34, 3 }
  0xcc   : > { %v2474_v24 = vor.u32 %v2473_v17, %v2470_v7  ;;  %v2515_v17 = vrot.slane %v16596_v41, 3 }
  0xcd   : > { %v2483_v38 = vor.u32 %v2482_v33, %v2479_v11  ;;  %v16610_v11 = vshrl.u32 %v16402_v57, 16  ;;  %v16613_v33 = vshll.u32 %v16402_v57, 16 }
  0xce   : > { %v2475_v43 = vsel %vm21314_vm3, %v2465_v6, %v2474_v24 }
  0xcf   : > { %v2484_v36 = vsel %vm21314_vm3, %v2474_v24, %v2483_v38 }
  0xd1   : > { %13937 = vmatmul.mubr.msk.bf16.gmra.mrb[8].mxu0 %vm21316_vm2, %v2421_v32  ;;  %v16573_v32 = vshll.u32 %v16382_v40, 16 }
  0xd2   : > { %13940 = vmatprep.mubr.msk.bf16.mxu0 %vm21316_vm2, %v2430_v31  ;;  %v16579_v31 = vshll.u32 %v16384_v42, 16  ;;  %v16590_v42 = vshrl.u32 %v16390_v45, 16  ;;  %v2518_v45 = vrot.slane %v16599_v26, 4 }
  0xd3   : > { %v2491_v44 = vrot.slane %v16573_v32, 4 }
  0xd4   : > { %v2500_v40 = vrot.slane %v16579_v31, 4  ;;  %v2506_v6 = vrot.slane %v16590_v42, 3  ;;  %v2519_v24 = vor.u32 %v2518_v45, %v2515_v17  ;;  %v16639_v17 = vshll.u32 %v16414_v55, 16 }
  0xd5   : > { %v2492_v61 = vor.u32 %v2491_v44, %v2488_v20  ;;  %v2524_v44 = vrot.slane %v16610_v11, 3 }
  0xd7   : > { %v2493_v1 = vsel %vm21314_vm3, %v2483_v38, %v2492_v61  ;;  %v16616_v38 = vshrl.u32 %v16404_v58, 16 }
  0xd9   : > { %13941 = vmatmul.mubr.msk.bf16.gmra.mrb[12].mxu0 %vm21316_vm2, %v2439_v60  ;;  %v2497_v60 = vrot.slane %v16576_v39, 3 }
  0xda   : > { %13944 = vmatprep.mubr.msk.bf16.mxu0 %vm21316_vm2, %v2448_v0 }
  0xdb   : > { %v2501_v0 = vor.u32 %v2500_v40, %v2497_v60  ;;  %v2533_v40 = vrot.slane %v16616_v38, 3 }
  0xdd   : > { %v2502_v7 = vsel %vm21314_vm3, %v2492_v61, %v2501_v0 }
  0xe1   : > { %13945 = vmatmul.mubr.msk.bf16.gmra.mrb[16].mxu0 %vm21316_vm2, %v2457_v15  ;;  %v2509_v15 = vrot.slane %v16593_v62, 4 }
  0xe2   : > { %13948 = vmatprep.mubr.msk.bf16.mxu0 %vm21316_vm2, %v2466_v18 }
  0xe3   : > { %v2510_v18 = vor.u32 %v2509_v15, %v2506_v6  ;;  %v16630_v6 = vshrl.u32 %v16412_v63, 16 }
  0xe5   : > { %v2511_v20 = vsel %vm21314_vm3, %v2501_v0, %v2510_v18  ;;  %v2520_v60 = vsel %vm21314_vm3, %v2510_v18, %v2519_v24  ;;  %v16633_v0 = vshll.u32 %v16412_v63, 16  ;;  %v2542_v18 = vrot.slane %v16630_v6, 3 }
  0xe9   : > { %13949 = vmatmul.mubr.msk.bf16.gmra.mrb[20].mxu0 %vm21316_vm2, %v2475_v43  ;;  %v16619_v43 = vshll.u32 %v16404_v58, 16  ;;  %v2569_v58 = vrot.slane %v16656_v10, 3 }
  0xea   : > { %13952 = vmatprep.mubr.msk.bf16.mxu0 %vm21316_vm2, %v2484_v36  ;;  %v2527_v36 = vrot.slane %v16613_v33, 4 }
  0xeb   : > { %v2536_v61 = vrot.slane %v16619_v43, 4 }
  0xed   : > { %v2537_v15 = vor.u32 %v2536_v61, %v2533_v40  ;;  %v16649_v40 = vshrl.u32 %v16422_v4, 16 }
  0xf1   : > { %13953 = vmatmul.mubr.msk.bf16.gmra.mrb[24].mxu0 %vm21316_vm2, %v2493_v1  ;;  %v2528_v1 = vor.u32 %v2527_v36, %v2524_v44 }
  0xf2   : > { %13956 = vmatprep.mubr.msk.bf16.mxu0 %vm21316_vm2, %v2502_v7  ;;  %v16636_v7 = vshrl.u32 %v16414_v55, 16  ;;  %v2560_v55 = vrot.slane %v16649_v40, 3 }
  0xf3   : > { %v2529_v45 = vsel %vm21314_vm3, %v2519_v24, %v2528_v1  ;;  %v2538_v44 = vsel %vm21314_vm3, %v2528_v1, %v2537_v15  ;;  %v16653_v24 = vshll.u32 %v16422_v4, 16  ;;  %v16659_v1 = vshll.u32 %v16424_v5, 16 }
  0xf4   : > { %v2551_v36 = vrot.slane %v16636_v7, 3  ;;  %v2904_v4 = vshll.u32 %v16281_v52, 16 }
  0xf5   : > { %21562 = vst [vmem:[#allocation19_spill] sm:$0xff] %v16659_v1  ;;  %v2563_v63 = vrot.slane %v16653_v24, 4 }
  0xf9   : > { %13957 = vmatmul.mubr.msk.bf16.gmra.mrb[28].mxu0 %vm21316_vm2, %v2511_v20  ;;  %v2545_v20 = vrot.slane %v16633_v0, 4 }
  0xfa   : > { %13960 = vmatprep.mubr.msk.bf16.mxu0 %vm21316_vm2, %v2520_v60  ;;  %v2554_v60 = vrot.slane %v16639_v17, 4 }
  0xfb   : > { %v2546_v61 = vor.u32 %v2545_v20, %v2542_v18  ;;  %v2572_v18 = vrot.slane %v16659_v1, 4 }
  0xfc   : > { %v2555_v8 = vor.u32 %v2554_v60, %v2551_v36  ;;  %v2576_v36 = vshrl.u32 %v16436_v19, 16  ;;  %v2579_v60 = vshll.u32 %v16436_v19, 16 }
  0xfd   : > { %v2573_v5 = vor.u32 %v2572_v18, %v2569_v58  ;;  %v21564_v58 = vshll.u32 %v16279_v51, 16 }
  0xfe   : > { %v2556_v20 = vsel %vm21314_vm3, %v2546_v61, %v2555_v8  ;;  %v2578_v1 = vrot.slane %v2576_v36, 3 }
 0x101   : > { %13961 = vmatmul.mubr.msk.bf16.gmra.mrb[32].mxu0 %vm21316_vm2, %v2529_v45  ;;  %v2547_v45 = vsel %vm21314_vm3, %v2537_v15, %v2546_v61  ;;  %v2901_v15 = vshrl.u32 %v16281_v52, 16  ;;  %v2581_v61 = vrot.slane %v2579_v60, 4  ;;  %v2917_v60 = vrot.slane %v16453_v37, 5 }
 0x102   : > { %13964 = vmatprep.mubr.msk.bf16.mxu0 %vm21316_vm2, %v2538_v44  ;;  %v2564_v44 = vor.u32 %v2563_v63, %v2560_v55  ;;  %v2909_v55 = vrot.slane %v21564_v58, 5 }
 0x103   : > { %v2903_v10 = vrot.slane %v2901_v15, 4  ;;  %v2582_v19 = vor.u32 %v2581_v61, %v2578_v1  ;;  %v2921_v1 = vrot.slane %v16467_v50, 5  ;;  %v2924_v61 = vrot.slane %v16470_v54, 4 }
 0x104   : > { %v2565_v57 = vsel %vm21314_vm3, %v2555_v8, %v2564_v44  ;;  %v2574_v48 = vsel %vm21314_vm3, %v2564_v44, %v2573_v5  ;;  %v2912_v44 = vrot.slane %v16442_v25, 4 }
 0x105   : > { %v2583_v8 = vsel %vm21314_vm3, %v2573_v5, %v2582_v19 }
 0x109   : > { %13965 = vmatmul.mubr.msk.bf16.gmra.mrb[36].mxu0 %vm21316_vm2, %v2547_v45  ;;  %v2906_v45 = vrot.slane %v2904_v4, 5  ;;  %v2913_v4 = vrot.slane %v16445_v28, 5 }
 0x10a   : > { %13968 = vmatprep.mubr.msk.bf16.mxu0 %vm21316_vm2, %v2556_v20  ;;  %v21563_v20 = vshrl.u32 %v16279_v51, 16  ;;  %v2916_v51 = vrot.slane %v16450_v35, 4 }
 0x10b   : > { %v2907_v52 = vor.u32 %v2906_v45, %v2903_v10  ;;  %v2920_v10 = vrot.slane %v16464_v49, 4  ;;  %v2925_v45 = vrot.slane %v16473_v56, 5 }
 0x10c   : > { %v2908_v63 = vrot.slane %v21563_v20, 4  ;;  %v15829_v20 = vld [vmem:[%s16102_s26 + $0x38] sm:$0xff]  }
 0x10d   : > { %v2926_v58 = vor.u32 %v2925_v45, %v2924_v61  ;;  %v2944_v45 = vrot.slane %v16530_v21, 4 }
 0x10e   : > { %v2910_v18 = vor.u32 %v2909_v55, %v2908_v63  ;;  %v2922_v63 = vor.u32 %v2921_v1, %v2920_v10  ;;  %v16700_v55 = vld [vmem:[%s16102_s26 + $0x40] sm:$0xff]   ;;  %v2941_v10 = vrot.slane %v16519_v30, 5 }
 0x110   : > { %v2911_v36 = vsel %vm21313_vm4, %v2907_v52, %v2910_v18  ;;  %v2928_v52 = vrot.slane %v16486_v2, 4 }
 0x111   : > { %13969 = vmatmul.mubr.msk.bf16.gmra.mrb[40].mxu0 %vm21316_vm2, %v2565_v57  ;;  %v2918_v57 = vor.u32 %v2917_v60, %v2916_v51  ;;  %v2936_v60 = vrot.slane %v16510_v22, 4 }
 0x112   : > { %13972 = vmatprep.mubr.msk.bf16.mxu0 %vm21316_vm2, %v2574_v48  ;;  %v2914_v48 = vor.u32 %v2913_v4, %v2912_v44  ;;  %v2932_v44 = vrot.slane %v16492_v9, 4 }
 0x113   : > { %v2923_v19 = vsel %vm21313_vm4, %v2918_v57, %v2922_v63 }
 0x114   : > { %v2915_v5 = vsel %vm21313_vm4, %v2910_v18, %v2914_v48  ;;  %v2919_v15 = vsel %vm21313_vm4, %v2914_v48, %v2918_v57  ;;  %v2929_v18 = vrot.slane %v16489_v3, 5  ;;  %v2937_v48 = vrot.slane %v16513_v23, 5 }
 0x116   : > { %v2930_v4 = vor.u32 %v2929_v18, %v2928_v52  ;;  %v2938_v1 = vor.u32 %v2937_v48, %v2936_v60 }
 0x118   : > { %v2931_v51 = vsel %vm21313_vm4, %v2926_v58, %v2930_v4 }
 0x119   : > { %13973 = vmatmul.mubr.msk.bf16.gmra.mrb[44].mxu0 %vm21316_vm2, %v2583_v8  ;;  %v2927_v8 = vsel %vm21313_vm4, %v2922_v63, %v2926_v58  ;;  %v2948_v58 = vrot.slane %v16536_v53, 4 }
 0x11a   : > { %13980 = vmatprep.mubr.msk.bf16.mxu0 %vm21316_vm2, %v2911_v36 }
 0x121   : > { %13981 = vmatmul.mubr.msk.bf16.vlgmr.msra.gmra.mrb[0].mxu0 %vm21316_vm2, %v2915_v5  ;;  %v2940_v5 = vrot.slane %v16516_v29, 4 }
 0x122   : > { %14029 = vmatpush3.bf16.msra.mxu0 %v16498_v13  ;;  %13984 = vmatprep.mubr.msk.bf16.mxu0 %vm21316_vm2, %v2919_v15  ;;  %v2933_v13 = vrot.slane %v16495_v12, 5 }
 0x123   : > { %14030 = vmatprep.subr.bf16.mxu0 %v15829_v20  ;;  %v2942_v15 = vor.u32 %v2941_v10, %v2940_v5  ;;  %v2960_v5 = vrot.slane %v16570_v34, 4  ;;  %v2961_v10 = vrot.slane %v16573_v32, 5 }
 0x124   : > { %v2934_v36 = vor.u32 %v2933_v13, %v2932_v44  ;;  %v2952_v44 = vrot.slane %v16550_v27, 4  ;;  %v2953_v13 = vrot.slane %v16553_v46, 5 }
 0x125   : > { %v2943_v63 = vsel %vm21313_vm4, %v2938_v1, %v2942_v15 }
 0x126   : > { %14031 = vmatpush3.bf16.msra.mxu0 %v15829_v20  ;;  %v2935_v57 = vsel %vm21313_vm4, %v2930_v4, %v2934_v36  ;;  %v2939_v61 = vsel %vm21313_vm4, %v2934_v36, %v2938_v1  ;;  %v2945_v20 = vrot.slane %v16533_v47, 5  ;;  %v2956_v36 = vrot.slane %v16556_v16, 4 }
 0x127   : > { %14080 = vmatprep.subr.bf16.mxu0 %v16700_v55  ;;  %v2954_v60 = vor.u32 %v2953_v13, %v2952_v44  ;;  %v2972_v13 = vrot.slane %v16596_v41, 4 }
 0x128   : > { %v2946_v52 = vor.u32 %v2945_v20, %v2944_v45  ;;  %v1889_v45 = vld [vmem:[#allocation2 + $0x170] sm:$0xff]  ;;  %v1890_v20 = vld [vmem:[#allocation2 + $0x178] sm:$0xff] }
 0x129   : > { %13985 = vmatmul.mubr.msk.bf16.gmra.mrb[4].mxu0 %vm21316_vm2, %v2923_v19  ;;  %v2949_v19 = vrot.slane %v16539_v59, 5 }
 0x12a   : > { %13988 = vmatprep.mubr.msk.bf16.mxu0 %vm21316_vm2, %v2927_v8  ;;  %v2947_v8 = vsel %vm21313_vm4, %v2942_v15, %v2946_v52  ;;  %v2964_v15 = vrot.slane %v16576_v39, 4 }
 0x12b   : > { %v2950_v18 = vor.u32 %v2949_v19, %v2948_v58  ;;  %v2962_v58 = vor.u32 %v2961_v10, %v2960_v5  ;;  %v2980_v10 = vrot.slane %v16616_v38, 4 }
 0x12d   : > { %v2951_v4 = vsel %vm21313_vm4, %v2946_v52, %v2950_v18 }
 0x131   : > { %13989 = vmatmul.mubr.msk.bf16.gmra.mrb[8].mxu0 %vm21316_vm2, %v2931_v51  ;;  %v2957_v51 = vrot.slane %v16559_v14, 5 }
 0x132   : > { %13992 = vmatprep.mubr.msk.bf16.mxu0 %vm21316_vm2, %v2935_v57  ;;  %v2955_v57 = vsel %vm21313_vm4, %v2950_v18, %v2954_v60  ;;  %v2968_v18 = vrot.slane %v16590_v42, 4 }
 0x133   : > { %v2958_v48 = vor.u32 %v2957_v51, %v2956_v36 }
 0x135   : > { %v2959_v1 = vsel %vm21313_vm4, %v2954_v60, %v2958_v48  ;;  %v2963_v52 = vsel %vm21313_vm4, %v2958_v48, %v2962_v58  ;;  %v2976_v48 = vrot.slane %v16610_v11, 4 }
 0x139   : > { %13993 = vmatmul.mubr.msk.bf16.gmra.mrb[12].mxu0 %vm21316_vm2, %v2939_v61  ;;  %v2965_v61 = vrot.slane %v16579_v31, 5 }
 0x13a   : > { %13996 = vmatprep.mubr.msk.bf16.mxu0 %vm21316_vm2, %v2943_v63  ;;  %v1914_v63 = vpack.c.bf16 %v1890_v20, %v1889_v45  ;;  %v2984_v20 = vrot.slane %v16630_v6, 4 }
 0x13b   : > { %v2966_v19 = vor.u32 %v2965_v61, %v2964_v15 }
 0x13c   : > { %1939 = vst.msk [vmem:[#allocation3 + $0xd0] sm:$0xff] %vm21316_vm2, %v1914_v63  ;;  %v2985_v63 = vrot.slane %v16633_v0, 5 }
 0x13d   : > { %v2967_v44 = vsel %vm21313_vm4, %v2962_v58, %v2966_v19 }
 0x141   : > { %13997 = vmatmul.mubr.msk.bf16.gmra.mrb[16].mxu0 %vm21316_vm2, %v2947_v8  ;;  %v2969_v8 = vrot.slane %v16593_v62, 5 }
 0x142   : > { %14000 = vmatprep.mubr.msk.bf16.mxu0 %vm21316_vm2, %v2951_v4  ;;  %v2973_v4 = vrot.slane %v16599_v26, 5 }
 0x143   : > { %v2970_v36 = vor.u32 %v2969_v8, %v2968_v18  ;;  %v2986_v18 = vor.u32 %v2985_v63, %v2984_v20 }
 0x144   : > { %v2974_v51 = vor.u32 %v2973_v4, %v2972_v13  ;;  %v2992_v13 = vrot.slane %v16649_v40, 4  ;;  %v2993_v4 = vrot.slane %v16653_v24, 5 }
 0x145   : > { %v2971_v60 = vsel %vm21313_vm4, %v2966_v19, %v2970_v36  ;;  %v2988_v19 = vrot.slane %v16636_v7, 4 }
 0x146   : > { %v2975_v5 = vsel %vm21313_vm4, %v2970_v36, %v2974_v51 }
 0x149   : > { %14001 = vmatmul.mubr.msk.bf16.gmra.mrb[20].mxu0 %vm21316_vm2, %v2955_v57  ;;  %v2977_v57 = vrot.slane %v16613_v33, 5 }
 0x14a   : > { %14004 = vmatprep.mubr.msk.bf16.mxu0 %vm21316_vm2, %v2959_v1  ;;  %v2981_v1 = vrot.slane %v16619_v43, 5 }
 0x14b   : > { %v2978_v15 = vor.u32 %v2977_v57, %v2976_v48  ;;  %v21566_v48 = vld [vmem:[#allocation19_spill] sm:$0xff] }
 0x14c   : > { %v2982_v61 = vor.u32 %v2981_v1, %v2980_v10  ;;  %v2997_v57 = vrot.slane %v21566_v48, 5  ;;  %v2994_v10 = vor.u32 %v2993_v4, %v2992_v13 }
 0x14d   : > { %v2979_v45 = vsel %vm21313_vm4, %v2974_v51, %v2978_v15  ;;  %v21565_v51 = vld [vmem:[#allocation18_spill] sm:$0xff] }
 0x14e   : > { %v2983_v58 = vsel %vm21313_vm4, %v2978_v15, %v2982_v61 }
 0x151   : > { %14005 = vmatmul.mubr.msk.bf16.gmra.mrb[24].mxu0 %vm21316_vm2, %v2963_v52  ;;  %v2989_v52 = vrot.slane %v16639_v17, 5 }
 0x152   : > { %14008 = vmatprep.mubr.msk.bf16.mxu0 %vm21316_vm2, %v2967_v44  ;;  %v2987_v44 = vsel %vm21313_vm4, %v2982_v61, %v2986_v18  ;;  %v3366_v61 = vld [vmem:[#allocation3 + $0x10] sm:$0x80] }
 0x153   : > { %v2990_v8 = vor.u32 %v2989_v52, %v2988_v19  ;;  %v3398_v52 = vshrl.u32 %v3366_v61, 16  ;;  %v3452_v61 = vrot.slane %v16510_v22, 7 }
 0x155   : > { %v2991_v36 = vsel %vm21313_vm4, %v2986_v18, %v2990_v8  ;;  %v2995_v20 = vsel %vm21313_vm4, %v2990_v8, %v2994_v10  ;;  %v3404_v18 = vrot.slane %v16442_v25, 7  ;;  %v3400_v13 = vrot.slane %v3398_v52, 7 }
 0x156   : > { %v3412_v8 = vrot.slane %v16450_v35, 7  ;;  %v3436_v35 = vrot.slane %v16486_v2, 7 }
 0x157   : > { %v3407_v4 = vor.u32 %v3404_v18, %v16445_v28 }
 0x158   : > { %v3415_v25 = vor.u32 %v3412_v8, %v16453_v37  ;;  %v3439_v37 = vor.u32 %v3436_v35, %v16489_v3  ;;  %v3455_v3 = vor.u32 %v3452_v61, %v16513_v23  ;;  %v3476_v23 = vrot.slane %v16536_v53, 7 }
 0x159   : > { %14009 = vmatmul.mubr.msk.bf16.gmra.mrb[28].mxu0 %vm21316_vm2, %v2971_v60  ;;  %v2996_v60 = vrot.slane %v21565_v51, 4  ;;  %v3500_v53 = vrot.slane %v16570_v34, 7 }
 0x15a   : > { %14012 = vmatprep.mubr.msk.bf16.mxu0 %vm21316_vm2, %v2975_v5  ;;  %v2893_v5 = vld [vmem:[#allocation3 + $0xc8] sm:$0x1f]  ;;  %v3416_v28 = vsel %vm21312_vm5, %v3404_v18, %v3415_v25 }
 0x15b   : > { %v3001_v1 = vshrl.u32 %v2893_v5, 16  ;;  %v3004_v15 = vshll.u32 %v2893_v5, 16 }
 0x15d   : > { %v3003_v63 = vrot.slane %v3001_v1, 4 }
 0x161   : > { %14013 = vmatmul.mubr.msk.bf16.gmra.mrb[32].mxu0 %vm21316_vm2, %v2979_v45  ;;  %v2998_v45 = vor.u32 %v2997_v57, %v2996_v60  ;;  %v3408_v60 = vsel %vm21312_vm5, %v3400_v13, %v3407_v4  ;;  %v3420_v57 = vrot.slane %v16464_v49, 7 }
 0x162   : > { %14016 = vmatprep.mubr.msk.bf16.mxu0 %vm21316_vm2, %v2983_v58  ;;  %v3006_v58 = vrot.slane %v3004_v15, 5  ;;  %v15831_v15 = vld [vmem:[%s16102_s26 + $0x48] sm:$0xff]  }
 0x163   : > { %v2999_v19 = vsel %vm21313_vm4, %v2994_v10, %v2998_v45  ;;  %v3423_v5 = vor.u32 %v3420_v57, %v16467_v50  ;;  %v3428_v10 = vrot.slane %v16470_v54, 7  ;;  %v16801_v50 = vld [vmem:[%s16102_s26 + $0x50] sm:$0xff]  }
 0x165   : > { %v3424_v1 = vsel %vm21312_vm5, %v3412_v8, %v3423_v5  ;;  %v3431_v49 = vor.u32 %v3428_v10, %v16473_v56  ;;  %v3440_v2 = vsel %vm21312_vm5, %v3428_v10, %v3439_v37  ;;  %v16864_v5 = vld [vmem:[#allocation3 + $0xc8] sm:$0xff] }
 0x166   : > { %21567 = vst [vmem:[#allocation18_spill] sm:$0xff] %v16864_v5 }
 0x167   : > { %v3432_v54 = vsel %vm21312_vm5, %v3420_v57, %v3431_v49 }
 0x169   : > { %14017 = vmatmul.mubr.msk.bf16.gmra.mrb[36].mxu0 %vm21316_vm2, %v2987_v44  ;;  %v3007_v44 = vor.u32 %v3006_v58, %v3003_v63  ;;  %v3468_v63 = vrot.slane %v16530_v21, 7  ;;  %v3479_v21 = vor.u32 %v3476_v23, %v16539_v59 }
 0x16a   : > { %14020 = vmatprep.mubr.msk.bf16.mxu0 %vm21316_vm2, %v2991_v36 }
 0x16b   : > { %v3008_v36 = vsel %vm21313_vm4, %v2998_v45, %v3007_v44  ;;  %v3444_v45 = vrot.slane %v16492_v9, 7  ;;  %v3471_v58 = vor.u32 %v3468_v63, %v16533_v47  ;;  %v3492_v47 = vrot.slane %v16556_v16, 7 }
 0x16c   : > { %v3503_v44 = vor.u32 %v3500_v53, %v16573_v32  ;;  %v3516_v16 = vrot.slane %v16590_v42, 7  ;;  %v3524_v32 = vrot.slane %v16596_v41, 7  ;;  %v3548_v41 = vrot.slane %v16630_v6, 7 }
 0x16d   : > { %v3447_v56 = vor.u32 %v3444_v45, %v16495_v12  ;;  %v3456_v9 = vsel %vm21312_vm5, %v3444_v45, %v3455_v3  ;;  %v15868_v3 = vld [vmem:[#allocation3 + $0x28] sm:$0xff] }
 0x16e   : > { %v3504_v13 = vsel %vm21312_vm5, %v3492_v47, %v3503_v44  ;;  %v3519_v4 = vor.u32 %v3516_v16, %v16593_v62  ;;  %v3527_v42 = vor.u32 %v3524_v32, %v16599_v26  ;;  %v3540_v62 = vrot.slane %v16616_v38, 7  ;;  %v21573_v44 = vld [vmem:[#allocation15_spill] sm:$0xff] }
 0x16f   : > { %v3551_v57 = vor.u32 %v3548_v41, %v16633_v0  ;;  %v3564_v38 = vrot.slane %v16649_v40, 7  ;;  %v16871_v0 = vshrl.u32 %v16864_v5, 16 }
 0x171   : > { %14021 = vmatmul.mubr.msk.bf16.gmra.mrb[40].mxu0 %vm21316_vm2, %v2995_v20  ;;  %v3460_v20 = vrot.slane %v16516_v29, 7  ;;  %v3484_v29 = vrot.slane %v16550_v27, 7  ;;  %v3495_v27 = vor.u32 %v3492_v47, %v16559_v14  ;;  %v3552_v25 = vsel %vm21312_vm5, %v3540_v62, %v3551_v57  ;;  %v21570_v47 = vld [vmem:[#allocation12_spill] sm:$0xff] }
 0x172   : > { %14024 = vmatprep.mubr.msk.bf16.mxu0 %vm21316_vm2, %v2999_v19  ;;  %v3580_v40 = vrot.slane %v16871_v0, 7 }
 0x173   : > { %v3463_v22 = vor.u32 %v3460_v20, %v16519_v30  ;;  %v3472_v19 = vsel %vm21312_vm5, %v3460_v20, %v3471_v58  ;;  %v3487_v52 = vor.u32 %v3484_v29, %v16553_v46  ;;  %v3480_v30 = vsel %vm21312_vm5, %v3468_v63, %v3479_v21  ;;  %v15869_v20 = vld [vmem:[#allocation3 + $0x30] sm:$0xff]  ;;  %v15871_v63 = vld [vmem:[#allocation3 + $0x40] sm:$0xff]  ;;  %v15874_v58 = vld [vmem:[#allocation3 + $0x58] sm:$0xff] }
 0x174   : > { %v3496_v59 = vsel %vm21312_vm5, %v3484_v29, %v3495_v27  ;;  %v3508_v46 = vrot.slane %v16576_v39, 7  ;;  %v3532_v39 = vrot.slane %v16610_v11, 7  ;;  %v3543_v11 = vor.u32 %v3540_v62, %v16619_v43  ;;  %v15878_v29 = vld [vmem:[#allocation3 + $0x78] sm:$0xff]  ;;  %v15879_v21 = vld [vmem:[#allocation3 + $0x80] sm:$0xff] }
 0x175   : > { %v3464_v12 = vsel %vm21312_vm5, %v3452_v61, %v3463_v22  ;;  %v3488_v18 = vsel %vm21312_vm5, %v3476_v23, %v3487_v52  ;;  %v3567_v43 = vor.u32 %v3564_v38, %v16653_v24  ;;  %v15833_v61 = vld [vmem:[%s16102_s26 + $0x58] sm:$0xff]   ;;  %v15872_v22 = vld [vmem:[#allocation3 + $0x48] sm:$0xff] }
 0x176   : > { %v3511_v34 = vor.u32 %v3508_v46, %v16579_v31  ;;  %v3535_v8 = vor.u32 %v3532_v39, %v16613_v33  ;;  %v3528_v31 = vsel %vm21312_vm5, %v3516_v16, %v3527_v42  ;;  %v3544_v26 = vsel %vm21312_vm5, %v3532_v39, %v3543_v11  ;;  %v15876_v23 = vld [vmem:[#allocation3 + $0x68] sm:$0xff]  ;;  %v4288_v27 = vld [vmem:[#allocation3 + $0x18] sm:$0xff]  ;;  %v16939_v42 = vld [vmem:[#allocation3 + $0x30] sm:$0xff] }
 0x177   : > { %v3556_v33 = vrot.slane %v16636_v7, 7  ;;  %v3572_v7 = vrot.slane %v21565_v51, 7  ;;  %v15880_v52 = vld [vmem:[#allocation3 + $0x88] sm:$0xff]  ;;  %v4320_v16 = vshrl.u32 %v4288_v27, 16 }
 0x178   : > { %v3512_v14 = vsel %vm21312_vm5, %v3500_v53, %v3511_v34  ;;  %v21572_v53 = vld [vmem:[#allocation14_spill] sm:$0xff] }
 0x179   : > { %14025 = vmatmul.mubr.msk.bf16.gmra.mrb[44].mxu0 %vm21316_vm2, %v3008_v36  ;;  %v3520_v36 = vsel %vm21312_vm5, %v3508_v46, %v3519_v4  ;;  %v3559_v6 = vor.u32 %v3556_v33, %v16639_v17  ;;  %v3568_v10 = vsel %vm21312_vm5, %v3556_v33, %v3567_v43  ;;  %v3575_v17 = vor.u32 %v3572_v7, %v21566_v48 }
 0x17a   : > { %14032 = vmatprep.mubr.msk.bf16.mxu0 %vm21316_vm2, %v3408_v60  ;;  %v3536_v60 = vsel %vm21312_vm5, %v3524_v32, %v3535_v8  ;;  %v4322_v46 = vshll.u32 %v4288_v27, 16  ;;  %v16937_v32 = vld [vmem:[#allocation3 + $0x28] sm:$0xff] }
 0x17b   : > { %v16942_v8 = vshll.u32 %v16937_v32, 16  ;;  %v17033_v27 = vld [vmem:[#allocation3 + $0x68] sm:$0xff] }
 0x17c   : > { %v4324_v34 = vrot.slane %v4322_v46, 1  ;;  %21583 = vst [vmem:[#allocation20_spill] sm:$0xff] %v17033_v27  ;;  %v17037_v46 = vld [vmem:[#allocation3 + $0x70] sm:$0xff] }
 0x17d   : > { %v4337_v11 = vrot.slane %v16942_v8, 1  ;;  %21584 = vst [vmem:[#allocation21_spill] sm:$0xff] %v17037_v46 }
 0x181   : > { %14033 = vmatmul.mubr.msk.bf16.vlgmr.msra.gmra.mrb[0].mxu0 %vm21316_vm2, %v3416_v28  ;;  %v3560_v28 = vsel %vm21312_vm5, %v3548_v41, %v3559_v6  ;;  %v16949_v41 = vshll.u32 %v16939_v42, 16 }
 0x182   : > { %14081 = vmatpush3.bf16.msra.mxu0 %v16700_v55  ;;  %14036 = vmatprep.mubr.msk.bf16.mxu0 %vm21316_vm2, %v3424_v1  ;;  %v3448_v55 = vsel %vm21312_vm5, %v3436_v35, %v3447_v56  ;;  %v16878_v1 = vshll.u32 %v16864_v5, 16  ;;  %v16880_v35 = vld [vmem:[#allocation3 + $0xd0] sm:$0xff]  ;;  %v15867_v56 = vld [vmem:[#allocation3 + $0x20] sm:$0xff] }
 0x183   : > { %14082 = vmatprep.subr.bf16.mxu0 %v15831_v15  ;;  %21568 = vst [vmem:[#allocation19_spill] sm:$0xff] %v16880_v35  ;;  %v16886_v24 = vshrl.u32 %v16880_v35, 16  ;;  %v16892_v37 = vshll.u32 %v16880_v35, 16 }
 0x184   : > { %v3583_v51 = vor.u32 %v16878_v1, %v3580_v40 }
 0x185   : > { %v3588_v49 = vrot.slane %v16886_v24, 7 }
 0x186   : > { %14083 = vmatpush3.bf16.msra.mxu0 %v15831_v15  ;;  %v3576_v15 = vsel %vm21312_vm5, %v3564_v38, %v3575_v17  ;;  %v16959_v38 = vld [vmem:[#allocation3 + $0x40] sm:$0xff]  ;;  %v15835_v17 = vld [vmem:[%s16102_s26 + $0x68] sm:$0xff]  }
 0x187   : > { %14132 = vmatprep.subr.bf16.mxu0 %v16801_v50  ;;  %v3591_v48 = vor.u32 %v16892_v37, %v3588_v49  ;;  %v16981_v49 = vld [vmem:[#allocation3 + $0x48] sm:$0xff] }
 0x188   : > { %21579 = vst [vmem:[#allocation14_spill] sm:$0xff] %v16981_v49 }
 0x189   : > { %14037 = vmatmul.mubr.msk.bf16.gmra.mrb[4].mxu0 %vm21316_vm2, %v3432_v54  ;;  %v3584_v54 = vsel %vm21312_vm5, %v3572_v7, %v3583_v51  ;;  %v3592_v45 = vsel %vm21312_vm5, %v3580_v40, %v3591_v48  ;;  %v16973_v40 = vshll.u32 %v16959_v38, 16 }
 0x18a   : > { %14040 = vmatprep.mubr.msk.bf16.mxu0 %vm21316_vm2, %v3440_v2  ;;  %v15866_v2 = vld [vmem:[#allocation3 + $0x18] sm:$0xff] }
 0x18b   : > { %v4361_v48 = vrot.slane %v16973_v40, 1 }
 0x191   : > { %14041 = vmatmul.mubr.msk.bf16.gmra.mrb[8].mxu0 %vm21316_vm2, %v3448_v55  ;;  %v16906_v55 = vld [vmem:[%s16102_s26 + $0x60] sm:$0xff]  }
 0x192   : > { %14044 = vmatprep.mubr.msk.bf16.mxu0 %vm21316_vm2, %v3456_v9  ;;  %v15870_v9 = vld [vmem:[#allocation3 + $0x38] sm:$0xff] }
 0x199   : > { %14045 = vmatmul.mubr.msk.bf16.gmra.mrb[12].mxu0 %vm21316_vm2, %v3464_v12  ;;  %v15875_v12 = vld [vmem:[#allocation3 + $0x60] sm:$0xff] }
 0x19a   : > { %14048 = vmatprep.mubr.msk.bf16.mxu0 %vm21316_vm2, %v3472_v19  ;;  %v15877_v19 = vld [vmem:[#allocation3 + $0x70] sm:$0xff] }
 0x1a1   : > { %14049 = vmatmul.mubr.msk.bf16.gmra.mrb[16].mxu0 %vm21316_vm2, %v3480_v30  ;;  %v21569_v30 = vld [vmem:[#allocation11_spill] sm:$0xff] }
 0x1a2   : > { %14052 = vmatprep.mubr.msk.bf16.mxu0 %vm21316_vm2, %v3488_v18  ;;  %v21571_v18 = vld [vmem:[#allocation13_spill] sm:$0xff]  ;;  %21576 = vst [vmem:[#allocation11_spill] sm:$0xff] %v16939_v42 }
 0x1a3   : > { %21578 = vst [vmem:[#allocation13_spill] sm:$0xff] %v16959_v38 }
 0x1a9   : > { %14053 = vmatmul.mubr.msk.bf16.gmra.mrb[20].mxu0 %vm21316_vm2, %v3496_v59  ;;  %v21574_v59 = vld [vmem:[#allocation16_spill] sm:$0xff] }
 0x1aa   : > { %14056 = vmatprep.mubr.msk.bf16.mxu0 %vm21316_vm2, %v3504_v13  ;;  %v4289_v13 = vld [vmem:[#allocation3 + $0x20] sm:$0xff] }
 0x1ab   : > { %v4327_v4 = vshll.u32 %v4289_v13, 16 }
 0x1ad   : > { %v4329_v39 = vrot.slane %v4327_v4, 1 }
 0x1b1   : > { %14057 = vmatmul.mubr.msk.bf16.gmra.mrb[24].mxu0 %vm21316_vm2, %v3512_v14  ;;  %v21575_v14 = vld [vmem:[#allocation17_spill] sm:$0xff] }
 0x1b2   : > { %14060 = vmatprep.mubr.msk.bf16.mxu0 %vm21316_vm2, %v3520_v36  ;;  %v4325_v36 = vor.u32 %v4324_v34, %v4320_v16 }
 0x1b4   : > { %v4330_v62 = vsel %vm21311_vm6, %v4325_v36, %v4329_v39  ;;  %v17051_v36 = vshll.u32 %v17037_v46, 16 }
 0x1b9   : > { %14061 = vmatmul.mubr.msk.bf16.gmra.mrb[28].mxu0 %vm21316_vm2, %v3528_v31  ;;  %v4331_v31 = vshrl.u32 %v4289_v13, 16  ;;  %v17040_v13 = vshll.u32 %v17033_v27, 16 }
 0x1ba   : > { %14064 = vmatprep.mubr.msk.bf16.mxu0 %vm21316_vm2, %v3536_v60  ;;  %v16946_v60 = vshrl.u32 %v16937_v32, 16 }
 0x1bb   : > { %v4333_v57 = vor.u32 %v4331_v31, %v4329_v39  ;;  %v4401_v39 = vrot.slane %v17040_v13, 1 }
 0x1bc   : > { %v4341_v33 = vor.u32 %v16946_v60, %v4337_v11 }
 0x1bd   : > { %v4338_v43 = vsel %vm21311_vm6, %v4333_v57, %v4337_v11  ;;  %v4409_v57 = vrot.slane %v17051_v36, 1 }
 0x1c1   : > { %14065 = vmatmul.mubr.msk.bf16.gmra.mrb[32].mxu0 %vm21316_vm2, %v3544_v26  ;;  %v16955_v26 = vld [vmem:[#allocation3 + $0x38] sm:$0xff] }
 0x1c2   : > { %14068 = vmatprep.mubr.msk.bf16.mxu0 %vm21316_vm2, %v3552_v25  ;;  %21577 = vst [vmem:[#allocation12_spill] sm:$0xff] %v16955_v26  ;;  %v4345_v25 = vrot.slane %v16949_v41, 1  ;;  %v16962_v6 = vshll.u32 %v16955_v26, 16 }
 0x1c4   : > { %v4346_v7 = vsel %vm21311_vm6, %v4341_v33, %v4345_v25  ;;  %v4353_v51 = vrot.slane %v16962_v6, 1  ;;  %v17061_v33 = vld [vmem:[#allocation3 + $0x80] sm:$0xff] }
 0x1c5   : > { %21586 = vst [vmem:[#allocation23_spill] sm:$0xff] %v17061_v33 }
 0x1c9   : > { %14069 = vmatmul.mubr.msk.bf16.gmra.mrb[36].mxu0 %vm21316_vm2, %v3560_v28  ;;  %v16966_v28 = vshrl.u32 %v16939_v42, 16 }
 0x1ca   : > { %14072 = vmatprep.mubr.msk.bf16.mxu0 %vm21316_vm2, %v3568_v10  ;;  %v16970_v10 = vshrl.u32 %v16955_v26, 16 }
 0x1d1   : > { %14073 = vmatmul.mubr.msk.bf16.gmra.mrb[40].mxu0 %vm21316_vm2, %v3576_v15  ;;  %v4349_v15 = vor.u32 %v16966_v28, %v4345_v25 }
 0x1d2   : > { %14076 = vmatprep.mubr.msk.bf16.mxu0 %vm21316_vm2, %v3584_v54  ;;  %v4357_v54 = vor.u32 %v16970_v10, %v4353_v51 }
 0x1d9   : > { %14077 = vmatmul.mubr.msk.bf16.gmra.mrb[44].mxu0 %vm21316_vm2, %v3592_v45  ;;  %v16986_v45 = vld [vmem:[%s16102_s26 + $0x70] sm:$0xff]  }
 0x1da   : > { %14084 = vmatprep.mubr.msk.bf16.mxu0 %vm21316_vm2, %v15866_v2  ;;  %v16988_v2 = vld [vmem:[#allocation3 + $0x50] sm:$0xff] }
 0x1db   : > { %21580 = vst [vmem:[#allocation15_spill] sm:$0xff] %v16988_v2 }
 0x1e1   : > { %14085 = vmatmul.mubr.msk.bf16.vlgmr.msra.gmra.mrb[0].mxu0 %vm21316_vm2, %v15867_v56  ;;  %v4354_v56 = vsel %vm21311_vm6, %v4349_v15, %v4353_v51  ;;  %v17075_v15 = vshll.u32 %v17061_v33, 16 }
 0x1e2   : > { %14133 = vmatpush3.bf16.msra.mxu0 %v16801_v50  ;;  %14088 = vmatprep.mubr.msk.bf16.mxu0 %vm21316_vm2, %v15868_v3  ;;  %v15873_v50 = vld [vmem:[#allocation3 + $0x50] sm:$0xff]  ;;  %v16995_v3 = vshrl.u32 %v16959_v38, 16 }
 0x1e3   : > { %14134 = vmatprep.subr.bf16.mxu0 %v15833_v61 }
 0x1e6   : > { %14135 = vmatpush3.bf16.msra.mxu0 %v15833_v61  ;;  %v16991_v61 = vshll.u32 %v16981_v49, 16 }
 0x1e7   : > { %14184 = vmatprep.subr.bf16.mxu0 %v16906_v55 }
 0x1e9   : > { %14089 = vmatmul.mubr.msk.bf16.gmra.mrb[4].mxu0 %vm21316_vm2, %v15869_v20  ;;  %v16999_v20 = vshrl.u32 %v16981_v49, 16 }
 0x1ea   : > { %14092 = vmatprep.mubr.msk.bf16.mxu0 %vm21316_vm2, %v15870_v9  ;;  %v17002_v9 = vshll.u32 %v16988_v2, 16 }
 0x1f1   : > { %14093 = vmatmul.mubr.msk.bf16.gmra.mrb[8].mxu0 %vm21316_vm2, %v15871_v63  ;;  %v4369_v63 = vrot.slane %v16991_v61, 1 }
 0x1f2   : > { %14096 = vmatprep.mubr.msk.bf16.mxu0 %vm21316_vm2, %v15872_v22  ;;  %v4365_v22 = vor.u32 %v16995_v3, %v4361_v48 }
 0x1f9   : > { %14097 = vmatmul.mubr.msk.bf16.gmra.mrb[12].mxu0 %vm21316_vm2, %v15873_v50  ;;  %v17009_v50 = vld [vmem:[#allocation3 + $0x58] sm:$0xff] }
 0x1fa   : > { %14100 = vmatprep.mubr.msk.bf16.mxu0 %vm21316_vm2, %v15874_v58  ;;  %21581 = vst [vmem:[#allocation16_spill] sm:$0xff] %v17009_v50  ;;  %v4373_v58 = vor.u32 %v16999_v20, %v4369_v63 }
 0x201   : > { %14101 = vmatmul.mubr.msk.bf16.gmra.mrb[16].mxu0 %vm21316_vm2, %v15875_v12  ;;  %v4377_v12 = vrot.slane %v17002_v9, 1 }
 0x202   : > { %14104 = vmatprep.mubr.msk.bf16.mxu0 %vm21316_vm2, %v15876_v23  ;;  %v17013_v23 = vld [vmem:[#allocation3 + $0x60] sm:$0xff] }
 0x203   : > { %21582 = vst [vmem:[#allocation17_spill] sm:$0xff] %v17013_v23  ;;  %v17044_v34 = vshrl.u32 %v17013_v23, 16 }
 0x209   : > { %14105 = vmatmul.mubr.msk.bf16.gmra.mrb[20].mxu0 %vm21316_vm2, %v15877_v19  ;;  %v17016_v19 = vshll.u32 %v17009_v50, 16 }
 0x20a   : > { %14108 = vmatprep.mubr.msk.bf16.mxu0 %vm21316_vm2, %v15878_v29  ;;  %v4370_v29 = vsel %vm21311_vm6, %v4365_v22, %v4369_v63  ;;  %v4425_v63 = vrot.slane %v17075_v15, 1  ;;  %v17085_v22 = vld [vmem:[#allocation3 + $0x90] sm:$0xff] }
 0x20b   : > { %21588 = vst [vmem:[#allocation25_spill] sm:$0xff] %v17085_v22 }
 0x211   : > { %14109 = vmatmul.mubr.msk.bf16.gmra.mrb[24].mxu0 %vm21316_vm2, %v15879_v21  ;;  %v17020_v21 = vshrl.u32 %v16988_v2, 16 }
 0x212   : > { %14112 = vmatprep.mubr.msk.bf16.mxu0 %vm21316_vm2, %v15880_v52  ;;  %v4378_v52 = vsel %vm21311_vm6, %v4373_v58, %v4377_v12 }
 0x219   : > { %14113 = vmatmul.mubr.msk.bf16.gmra.mrb[28].mxu0 %vm21316_vm2, %v21569_v30  ;;  %v17024_v30 = vshrl.u32 %v17009_v50, 16  ;;  %v4312_v50 = vld [vmem:[#allocation3 + $0xd8] sm:$0x1] }
 0x21a   : > { %14116 = vmatprep.mubr.msk.bf16.mxu0 %vm21316_vm2, %v21570_v47  ;;  %v17027_v47 = vshll.u32 %v17013_v23, 16  ;;  %v4505_v23 = vrot.slane %v16892_v37, 1  ;;  %v4511_v2 = vshll.u32 %v4312_v50, 16  ;;  %v4922_v50 = vrot.slane %v16966_v28, 3 }
 0x21c   : > { %v4513_v26 = vrot.slane %v4511_v2, 1  ;;  %v4940_v2 = vrot.slane %v16995_v3, 3 }
 0x221   : > { %14117 = vmatmul.mubr.msk.bf16.gmra.mrb[32].mxu0 %vm21316_vm2, %v21571_v18  ;;  %v4385_v18 = vrot.slane %v17016_v19, 1 }
 0x222   : > { %14120 = vmatprep.mubr.msk.bf16.mxu0 %vm21316_vm2, %v21572_v53  ;;  %v4381_v53 = vor.u32 %v17020_v21, %v4377_v12 }
 0x224   : > { %v4386_v16 = vsel %vm21311_vm6, %v4381_v53, %v4385_v18  ;;  %v17099_v53 = vshll.u32 %v17085_v22, 16 }
 0x229   : > { %14121 = vmatmul.mubr.msk.bf16.gmra.mrb[36].mxu0 %vm21316_vm2, %v21573_v44  ;;  %v4389_v44 = vor.u32 %v17024_v30, %v4385_v18 }
 0x22a   : > { %14124 = vmatprep.mubr.msk.bf16.mxu0 %vm21316_vm2, %v21574_v59  ;;  %v4393_v59 = vrot.slane %v17027_v47, 1 }
 0x22c   : > { %v4394_v4 = vsel %vm21311_vm6, %v4389_v44, %v4393_v59  ;;  %v4397_v31 = vor.u32 %v17044_v34, %v4393_v59 }
 0x231   : > { %14125 = vmatmul.mubr.msk.bf16.gmra.mrb[40].mxu0 %vm21316_vm2, %v21575_v14  ;;  %v17048_v14 = vshrl.u32 %v17033_v27, 16  ;;  %v4497_v27 = vrot.slane %v16878_v1, 1 }
 0x232   : > { %14128 = vmatprep.mubr.msk.bf16.mxu0 %vm21316_vm2, %v16864_v5 }
 0x233   : > { %v4405_v11 = vor.u32 %v17048_v14, %v4401_v39 }
 0x239   : > { %14129 = vmatmul.mubr.msk.bf16.gmra.mrb[44].mxu0 %vm21316_vm2, %v16880_v35 }
 0x23a   : > { %14136 = vmatprep.mubr.msk.bf16.mxu0 %vm21316_vm2, %v4330_v62  ;;  %v17057_v62 = vld [vmem:[#allocation3 + $0x78] sm:$0xff] }
 0x23b   : > { %21585 = vst [vmem:[#allocation22_spill] sm:$0xff] %v17057_v62  ;;  %v17064_v25 = vshll.u32 %v17057_v62, 16  ;;  %v17072_v51 = vshrl.u32 %v17057_v62, 16 }
 0x241   : > { %14137 = vmatmul.mubr.msk.bf16.vlgmr.msra.gmra.mrb[0].mxu0 %vm21316_vm2, %v4338_v43  ;;  %v4402_v43 = vsel %vm21311_vm6, %v4397_v31, %v4401_v39  ;;  %v4441_v39 = vrot.slane %v17099_v53, 1  ;;  %v17109_v31 = vld [vmem:[#allocation3 + $0xa0] sm:$0xff] }
 0x242   : > { %14185 = vmatpush3.bf16.msra.mxu0 %v16906_v55  ;;  %14140 = vmatprep.mubr.msk.bf16.mxu0 %vm21316_vm2, %v4346_v7  ;;  %v4362_v55 = vsel %vm21311_vm6, %v4357_v54, %v4361_v48  ;;  %v17068_v7 = vshrl.u32 %v17037_v46, 16  ;;  %v4417_v54 = vrot.slane %v17064_v25, 1  ;;  %21590 = vst [vmem:[#allocation27_spill] sm:$0xff] %v17109_v31 }
 0x243   : > { %14186 = vmatprep.subr.bf16.mxu0 %v15835_v17 }
 0x244   : > { %v4413_v48 = vor.u32 %v17068_v7, %v4409_v57 }
 0x246   : > { %14187 = vmatpush3.bf16.msra.mxu0 %v15835_v17  ;;  %v4410_v17 = vsel %vm21311_vm6, %v4405_v11, %v4409_v57  ;;  %v4418_v12 = vsel %vm21311_vm6, %v4413_v48, %v4417_v54  ;;  %v17123_v48 = vshll.u32 %v17109_v31, 16 }
 0x247   : > { %14236 = vmatprep.subr.bf16.mxu0 %v16986_v45 }
 0x249   : > { %14141 = vmatmul.mubr.msk.bf16.gmra.mrb[4].mxu0 %vm21316_vm2, %v4354_v56  ;;  %v17081_v56 = vld [vmem:[#allocation3 + $0x88] sm:$0xff] }
 0x24a   : > { %14144 = vmatprep.mubr.msk.bf16.mxu0 %vm21316_vm2, %v4362_v55  ;;  %21587 = vst [vmem:[#allocation24_spill] sm:$0xff] %v17081_v56  ;;  %v4421_v55 = vor.u32 %v17072_v51, %v4417_v54  ;;  %v17088_v58 = vshll.u32 %v17081_v56, 16  ;;  %v17096_v18 = vshrl.u32 %v17081_v56, 16 }
 0x24c   : > { %v4433_v44 = vrot.slane %v17088_v58, 1 }
 0x251   : > { %14145 = vmatmul.mubr.msk.bf16.gmra.mrb[8].mxu0 %vm21316_vm2, %v4370_v29  ;;  %v17092_v29 = vshrl.u32 %v17061_v33, 16 }
 0x252   : > { %14148 = vmatprep.mubr.msk.bf16.mxu0 %vm21316_vm2, %v4378_v52  ;;  %v4426_v52 = vsel %vm21311_vm6, %v4421_v55, %v4425_v63 }
 0x253   : > { %v4429_v59 = vor.u32 %v17092_v29, %v4425_v63 }
 0x255   : > { %v4434_v57 = vsel %vm21311_vm6, %v4429_v59, %v4433_v44  ;;  %v17133_v59 = vld [vmem:[#allocation3 + $0xb0] sm:$0xff] }
 0x256   : > { %21592 = vst [vmem:[#allocation29_spill] sm:$0xff] %v17133_v59  ;;  %v17147_v5 = vshll.u32 %v17133_v59, 16 }
 0x259   : > { %14149 = vmatmul.mubr.msk.bf16.gmra.mrb[12].mxu0 %vm21316_vm2, %v4386_v16  ;;  %v17105_v16 = vld [vmem:[#allocation3 + $0x98] sm:$0xff] }
 0x25a   : > { %14152 = vmatprep.mubr.msk.bf16.mxu0 %vm21316_vm2, %v4394_v4  ;;  %21589 = vst [vmem:[#allocation26_spill] sm:$0xff] %v17105_v16  ;;  %v4437_v4 = vor.u32 %v17096_v18, %v4433_v44  ;;  %v17112_v11 = vshll.u32 %v17105_v16, 16  ;;  %v17120_v54 = vshrl.u32 %v17105_v16, 16  ;;  %v4457_v44 = vrot.slane %v17123_v48, 1 }
 0x25c   : > { %v4449_v55 = vrot.slane %v17112_v11, 1 }
 0x261   : > { %14153 = vmatmul.mubr.msk.bf16.gmra.mrb[16].mxu0 %vm21316_vm2, %v4402_v43  ;;  %v17116_v43 = vshrl.u32 %v17085_v22, 16 }
 0x262   : > { %14156 = vmatprep.mubr.msk.bf16.mxu0 %vm21316_vm2, %v4410_v17  ;;  %v4442_v17 = vsel %vm21311_vm6, %v4437_v4, %v4441_v39 }
 0x263   : > { %v4445_v63 = vor.u32 %v17116_v43, %v4441_v39 }
 0x265   : > { %v4450_v35 = vsel %vm21311_vm6, %v4445_v63, %v4449_v55 }
 0x269   : > { %14157 = vmatmul.mubr.msk.bf16.gmra.mrb[20].mxu0 %vm21316_vm2, %v4418_v12  ;;  %v17129_v12 = vld [vmem:[#allocation3 + $0xa8] sm:$0xff] }
 0x26a   : > { %14160 = vmatprep.mubr.msk.bf16.mxu0 %vm21316_vm2, %v4426_v52  ;;  %21591 = vst [vmem:[#allocation28_spill] sm:$0xff] %v17129_v12  ;;  %v4453_v52 = vor.u32 %v17120_v54, %v4449_v55  ;;  %v17136_v4 = vshll.u32 %v17129_v12, 16  ;;  %v17144_v39 = vshrl.u32 %v17129_v12, 16  ;;  %v17153_v55 = vld [vmem:[#allocation3 + $0xb8] sm:$0xff] }
 0x26b   : > { %21593 = vst [vmem:[#allocation30_spill] sm:$0xff] %v17153_v55  ;;  %v17160_v12 = vshll.u32 %v17153_v55, 16 }
 0x26c   : > { %v4465_v16 = vrot.slane %v17136_v4, 1 }
 0x26d   : > { %v4481_v62 = vrot.slane %v17160_v12, 1 }
 0x26e   : > { %v4469_v63 = vor.u32 %v17144_v39, %v4465_v16 }
 0x271   : > { %14161 = vmatmul.mubr.msk.bf16.gmra.mrb[24].mxu0 %vm21316_vm2, %v4434_v57  ;;  %v17140_v57 = vshrl.u32 %v17109_v31, 16  ;;  %v17157_v31 = vld [vmem:[#allocation3 + $0xc0] sm:$0xff] }
 0x272   : > { %14164 = vmatprep.mubr.msk.bf16.mxu0 %vm21316_vm2, %v4442_v17  ;;  %v4458_v17 = vsel %vm21311_vm6, %v4453_v52, %v4457_v44  ;;  %v4473_v52 = vrot.slane %v17147_v5, 1  ;;  %21594 = vst [vmem:[#allocation31_spill] sm:$0xff] %v17157_v31  ;;  %v17171_v33 = vshll.u32 %v17157_v31, 16 }
 0x273   : > { %v4461_v22 = vor.u32 %v17140_v57, %v4457_v44  ;;  %v17168_v44 = vshrl.u32 %v17153_v55, 16  ;;  %v17181_v55 = vshrl.u32 %v17157_v31, 16 }
 0x275   : > { %v4466_v56 = vsel %vm21311_vm6, %v4461_v22, %v4465_v16  ;;  %v4485_v22 = vor.u32 %v17168_v44, %v4481_v62  ;;  %v4489_v16 = vrot.slane %v17171_v33, 1 }
 0x279   : > { %14165 = vmatmul.mubr.msk.bf16.gmra.mrb[28].mxu0 %vm21316_vm2, %v4450_v35  ;;  %v17164_v35 = vshrl.u32 %v17133_v59, 16  ;;  %v4490_v59 = vsel %vm21311_vm6, %v4485_v22, %v4489_v16 }
 0x27a   : > { %14168 = vmatprep.mubr.msk.bf16.mxu0 %vm21316_vm2, %v4458_v17  ;;  %v4474_v17 = vsel %vm21311_vm6, %v4469_v63, %v4473_v52 }
 0x27b   : > { %v4477_v46 = vor.u32 %v17164_v35, %v4473_v52  ;;  %v4493_v52 = vor.u32 %v17181_v55, %v4489_v16  ;;  %v4509_v16 = vor.u32 %v4505_v23, %v16886_v24 }
 0x27d   : > { %v4482_v63 = vsel %vm21311_vm6, %v4477_v46, %v4481_v62  ;;  %v4498_v31 = vsel %vm21311_vm6, %v4493_v52, %v4497_v27  ;;  %v4925_v52 = vrot.slane %v16949_v41, 4 }
 0x281   : > { %14169 = vmatmul.mubr.msk.bf16.gmra.mrb[32].mxu0 %vm21316_vm2, %v4466_v56  ;;  %v4872_v56 = vld [vmem:[#allocation3 + $0x20] sm:$0xf8] }
 0x282   : > { %14172 = vmatprep.mubr.msk.bf16.mxu0 %vm21316_vm2, %v4474_v17  ;;  %v4501_v17 = vor.u32 %v4497_v27, %v16871_v0  ;;  %v4903_v46 = vshrl.u32 %v4872_v56, 16  ;;  %v4906_v62 = vshll.u32 %v4872_v56, 16  ;;  %v4514_v27 = vsel %vm21311_vm6, %v4509_v16, %v4513_v26 }
 0x284   : > { %v4506_v22 = vsel %vm21311_vm6, %v4501_v17, %v4505_v23  ;;  %v4905_v49 = vrot.slane %v4903_v46, 3  ;;  %v4908_v38 = vrot.slane %v4906_v62, 4  ;;  %v4931_v46 = vrot.slane %v16970_v10, 3 }
 0x285   : > { %v4943_v23 = vrot.slane %v16973_v40, 4 }
 0x286   : > { %v4909_v42 = vor.u32 %v4908_v38, %v4905_v49  ;;  %v4926_v38 = vor.u32 %v4925_v52, %v4922_v50  ;;  %v4958_v50 = vrot.slane %v17020_v21, 3  ;;  %v4961_v52 = vrot.slane %v17002_v9, 4 }
 0x289   : > { %14173 = vmatmul.mubr.msk.bf16.gmra.mrb[36].mxu0 %vm21316_vm2, %v4482_v63  ;;  %v4913_v63 = vrot.slane %v16946_v60, 3 }
 0x28a   : > { %14176 = vmatprep.mubr.msk.bf16.mxu0 %vm21316_vm2, %v4490_v59  ;;  %v4916_v59 = vrot.slane %v16942_v8, 4 }
 0x28c   : > { %v4917_v56 = vor.u32 %v4916_v59, %v4913_v63  ;;  %v15837_v63 = vld [vmem:[%s16102_s26 + $0x78] sm:$0xff]   ;;  %v4944_v59 = vor.u32 %v4943_v23, %v4940_v2  ;;  %v4979_v2 = vrot.slane %v17027_v47, 4 }
 0x28e   : > { %v4918_v17 = vsel %vm21314_vm3, %v4909_v42, %v4917_v56  ;;  %v4927_v26 = vsel %vm21314_vm3, %v4917_v56, %v4926_v38  ;;  %v4949_v42 = vrot.slane %v16999_v20, 3  ;;  %v17216_v56 = vld [vmem:[%s16102_s26 + $0x80] sm:$0xff]  }
 0x291   : > { %14177 = vmatmul.mubr.msk.bf16.gmra.mrb[40].mxu0 %vm21316_vm2, %v4498_v31  ;;  %v4934_v31 = vrot.slane %v16962_v6, 4 }
 0x292   : > { %14180 = vmatprep.mubr.msk.bf16.mxu0 %vm21316_vm2, %v4506_v22  ;;  %v4952_v22 = vrot.slane %v16991_v61, 4 }
 0x293   : > { %v4935_v49 = vor.u32 %v4934_v31, %v4931_v46  ;;  %v4967_v46 = vrot.slane %v17024_v30, 3  ;;  %v4962_v31 = vor.u32 %v4961_v52, %v4958_v50  ;;  %v5003_v52 = vrot.slane %v17072_v51, 3 }
 0x294   : > { %v4953_v16 = vor.u32 %v4952_v22, %v4949_v42  ;;  %v4988_v42 = vrot.slane %v17040_v13, 4 }
 0x295   : > { %v4936_v62 = vsel %vm21314_vm3, %v4926_v38, %v4935_v49 }
 0x299   : > { %14181 = vmatmul.mubr.msk.bf16.gmra.mrb[44].mxu0 %vm21316_vm2, %v4514_v27  ;;  %v4945_v27 = vsel %vm21314_vm3, %v4935_v49, %v4944_v59  ;;  %v4963_v49 = vsel %vm21314_vm3, %v4953_v16, %v4962_v31 }
 0x29a   : > { %14188 = vmatprep.mubr.msk.bf16.mxu0 %vm21316_vm2, %v4918_v17  ;;  %v4954_v17 = vsel %vm21314_vm3, %v4944_v59, %v4953_v16  ;;  %v4994_v16 = vrot.slane %v17068_v7, 3 }
 0x2a1   : > { %14189 = vmatmul.mubr.msk.bf16.vlgmr.msra.gmra.mrb[0].mxu0 %vm21316_vm2, %v4927_v26  ;;  %v4976_v26 = vrot.slane %v17044_v34, 3 }
 0x2a2   : > { %14237 = vmatpush3.bf16.msra.mxu0 %v16986_v45  ;;  %14192 = vmatprep.mubr.msk.bf16.mxu0 %vm21316_vm2, %v4936_v62  ;;  %v4970_v45 = vrot.slane %v17016_v19, 4  ;;  %v4985_v62 = vrot.slane %v17048_v14, 3 }
 0x2a3   : > { %14238 = vmatprep.subr.bf16.mxu0 %v15837_v63  ;;  %v4980_v22 = vor.u32 %v4979_v2, %v4976_v26  ;;  %v5021_v2 = vrot.slane %v17096_v18, 3 }
 0x2a4   : > { %v4971_v38 = vor.u32 %v4970_v45, %v4967_v46 }
 0x2a6   : > { %14239 = vmatpush3.bf16.msra.mxu0 %v15837_v63  ;;  %v4972_v23 = vsel %vm21314_vm3, %v4962_v31, %v4971_v38  ;;  %v4989_v63 = vor.u32 %v4988_v42, %v4985_v62  ;;  %v4981_v59 = vsel %vm21314_vm3, %v4971_v38, %v4980_v22  ;;  %v5012_v38 = vrot.slane %v17092_v29, 3 }
 0x2a7   : > { %14288 = vmatprep.subr.bf16.mxu0 %v17216_v56 }
 0x2a8   : > { %v4990_v50 = vsel %vm21314_vm3, %v4980_v22, %v4989_v63 }
 0x2a9   : > { %14193 = vmatmul.mubr.msk.bf16.gmra.mrb[4].mxu0 %vm21316_vm2, %v4945_v27  ;;  %v4997_v27 = vrot.slane %v17051_v36, 4 }
 0x2aa   : > { %14196 = vmatprep.mubr.msk.bf16.mxu0 %vm21316_vm2, %v4954_v17  ;;  %v5006_v17 = vrot.slane %v17064_v25, 4 }
 0x2ab   : > { %v4998_v46 = vor.u32 %v4997_v27, %v4994_v16  ;;  %v5039_v27 = vrot.slane %v17120_v54, 3 }
 0x2ac   : > { %v5007_v45 = vor.u32 %v5006_v17, %v5003_v52 }
 0x2ad   : > { %v4999_v31 = vsel %vm21314_vm3, %v4989_v63, %v4998_v46  ;;  %v5030_v63 = vrot.slane %v17116_v43, 3 }
 0x2ae   : > { %v5008_v26 = vsel %vm21314_vm3, %v4998_v46, %v5007_v45 }
 0x2b1   : > { %14197 = vmatmul.mubr.msk.bf16.gmra.mrb[8].mxu0 %vm21316_vm2, %v4963_v49  ;;  %v5015_v49 = vrot.slane %v17075_v15, 4 }
 0x2b2   : > { %14200 = vmatprep.mubr.msk.bf16.mxu0 %vm21316_vm2, %v4972_v23  ;;  %v5024_v23 = vrot.slane %v17088_v58, 4 }
 0x2b3   : > { %v5016_v62 = vor.u32 %v5015_v49, %v5012_v38  ;;  %v5057_v49 = vrot.slane %v17144_v39, 3 }
 0x2b4   : > { %v5025_v42 = vor.u32 %v5024_v23, %v5021_v2 }
 0x2b5   : > { %v5017_v22 = vsel %vm21314_vm3, %v5007_v45, %v5016_v62  ;;  %v5048_v45 = vrot.slane %v17140_v57, 3 }
 0x2b6   : > { %v5026_v16 = vsel %vm21314_vm3, %v5016_v62, %v5025_v42 }
 0x2b9   : > { %14201 = vmatmul.mubr.msk.bf16.gmra.mrb[12].mxu0 %vm21316_vm2, %v4981_v59  ;;  %v5033_v59 = vrot.slane %v17099_v53, 4 }
 0x2ba   : > { %14204 = vmatprep.mubr.msk.bf16.mxu0 %vm21316_vm2, %v4990_v50  ;;  %v5042_v50 = vrot.slane %v17112_v11, 4 }
 0x2bb   : > { %v5034_v52 = vor.u32 %v5033_v59, %v5030_v63  ;;  %v5075_v59 = vrot.slane %v17168_v44, 3 }
 0x2bc   : > { %v5043_v17 = vor.u32 %v5042_v50, %v5039_v27 }
 0x2bd   : > { %v5035_v46 = vsel %vm21314_vm3, %v5025_v42, %v5034_v52  ;;  %v5066_v42 = vrot.slane %v17164_v35, 3 }
 0x2be   : > { %v5044_v38 = vsel %vm21314_vm3, %v5034_v52, %v5043_v17 }
 0x2c1   : > { %14205 = vmatmul.mubr.msk.bf16.gmra.mrb[16].mxu0 %vm21316_vm2, %v4999_v31  ;;  %v5051_v31 = vrot.slane %v17123_v48, 4 }
 0x2c2   : > { %14208 = vmatprep.mubr.msk.bf16.mxu0 %vm21316_vm2, %v5008_v26  ;;  %v5060_v26 = vrot.slane %v17136_v4, 4 }
 0x2c3   : > { %v5052_v2 = vor.u32 %v5051_v31, %v5048_v45  ;;  %v5093_v31 = vrot.slane %v16871_v0, 3 }
 0x2c4   : > { %v5061_v23 = vor.u32 %v5060_v26, %v5057_v49  ;;  %v17281_v49 = vld [vmem:[#allocation3 + $0xd8] sm:$0xff] }
 0x2c5   : > { %v5053_v62 = vsel %vm21314_vm3, %v5043_v17, %v5052_v2  ;;  %v5084_v17 = vrot.slane %v17181_v55, 3 }
 0x2c6   : > { %v5062_v63 = vsel %vm21314_vm3, %v5052_v2, %v5061_v23 }
 0x2c9   : > { %14209 = vmatmul.mubr.msk.bf16.gmra.mrb[20].mxu0 %vm21316_vm2, %v5017_v22  ;;  %v5069_v22 = vrot.slane %v17147_v5, 4 }
 0x2ca   : > { %14212 = vmatprep.mubr.msk.bf16.mxu0 %vm21316_vm2, %v5026_v16  ;;  %v5078_v16 = vrot.slane %v17160_v12, 4 }
 0x2cb   : > { %v5070_v27 = vor.u32 %v5069_v22, %v5066_v42  ;;  %v5102_v22 = vrot.slane %v16886_v24, 3 }
 0x2cc   : > { %v5079_v50 = vor.u32 %v5078_v16, %v5075_v59 }
 0x2cd   : > { %v5071_v52 = vsel %vm21314_vm3, %v5061_v23, %v5070_v27  ;;  %v21309_v23 = vshrl.u32 %v17281_v49, 16 }
 0x2ce   : > { %v5080_v45 = vsel %vm21314_vm3, %v5070_v27, %v5079_v50 }
 0x2cf   : > { %v5111_v16 = vrot.slane %v21309_v23, 3 }
 0x2d1   : > { %14213 = vmatmul.mubr.msk.bf16.gmra.mrb[24].mxu0 %vm21316_vm2, %v5035_v46  ;;  %v5087_v46 = vrot.slane %v17171_v33, 4 }
 0x2d2   : > { %14216 = vmatprep.mubr.msk.bf16.mxu0 %vm21316_vm2, %v5044_v38  ;;  %v5096_v38 = vrot.slane %v16878_v1, 4 }
 0x2d3   : > { %v5088_v26 = vor.u32 %v5087_v46, %v5084_v17 }
 0x2d4   : > { %v5097_v2 = vor.u32 %v5096_v38, %v5093_v31 }
 0x2d5   : > { %v5089_v42 = vsel %vm21314_vm3, %v5079_v50, %v5088_v26 }
 0x2d6   : > { %v5098_v59 = vsel %vm21314_vm3, %v5088_v26, %v5097_v2 }
 0x2d9   : > { %14217 = vmatmul.mubr.msk.bf16.gmra.mrb[28].mxu0 %vm21316_vm2, %v5053_v62  ;;  %v21310_v62 = vshll.u32 %v17281_v49, 16 }
 0x2da   : > { %14220 = vmatprep.mubr.msk.bf16.mxu0 %vm21316_vm2, %v5062_v63  ;;  %v5105_v63 = vrot.slane %v16892_v37, 4 }
 0x2db   : > { %v5114_v27 = vrot.slane %v21310_v62, 4  ;;  %v17303_v62 = vld [vmem:[#allocation3 + $0x20] sm:$0xf0] }
 0x2dc   : > { %v5106_v17 = vor.u32 %v5105_v63, %v5102_v22  ;;  %v5514_v22 = vrot.slane %v17303_v62, 4  ;;  %v5515_v63 = vrot.slane %v16937_v32, 4  ;;  %v21597_v32 = vld [vmem:[#allocation13_spill] sm:$0xff] }
 0x2de   : > { %v5107_v31 = vsel %vm21314_vm3, %v5097_v2, %v5106_v17  ;;  %v5516_v2 = vsel %vm21315_vm1, %v5514_v22, %v5515_v63 }
 0x2e1   : > { %14221 = vmatmul.mubr.msk.bf16.gmra.mrb[32].mxu0 %vm21316_vm2, %v5071_v52  ;;  %v17295_v52 = vld [vmem:[#allocation3 + $0xe0] sm:$0xf] }
 0x2e2   : > { %14224 = vmatprep.mubr.msk.bf16.mxu0 %vm21316_vm2, %v5080_v45  ;;  %v5118_v50 = vshrl.u32 %v17295_v52, 16  ;;  %v5121_v46 = vshll.u32 %v17295_v52, 16  ;;  %v5115_v45 = vor.u32 %v5114_v27, %v5111_v16  ;;  %v21595_v16 = vld [vmem:[#allocation11_spill] sm:$0xff] }
 0x2e3   : > { %v5517_v27 = vrot.slane %v21595_v16, 4 }
 0x2e4   : > { %v5120_v38 = vrot.slane %v5118_v50, 3  ;;  %v5123_v26 = vrot.slane %v5121_v46, 4  ;;  %v5116_v23 = vsel %vm21314_vm3, %v5106_v17, %v5115_v45  ;;  %v21596_v17 = vld [vmem:[#allocation12_spill] sm:$0xff] }
 0x2e5   : > { %v5519_v50 = vrot.slane %v21596_v17, 4  ;;  %v5518_v46 = vsel %vm21315_vm1, %v5515_v63, %v5517_v27  ;;  %v21599_v63 = vld [vmem:[#allocation15_spill] sm:$0xff]  ;;  %v21601_v17 = vld [vmem:[#allocation17_spill] sm:$0xff] }
 0x2e9   : > { %14225 = vmatmul.mubr.msk.bf16.gmra.mrb[36].mxu0 %vm21316_vm2, %v5089_v42  ;;  %v5124_v42 = vor.u32 %v5123_v26, %v5120_v38  ;;  %v21598_v38 = vld [vmem:[#allocation14_spill] sm:$0xff] }
 0x2ea   : > { %14228 = vmatprep.mubr.msk.bf16.mxu0 %vm21316_vm2, %v5098_v59  ;;  %v5523_v26 = vrot.slane %v21598_v38, 4 }
 0x2eb   : > { %v5125_v59 = vsel %vm21314_vm3, %v5115_v45, %v5124_v42  ;;  %v5521_v45 = vrot.slane %v21597_v32, 4 }
 0x2ed   : > { %v5522_v42 = vsel %vm21315_vm1, %v5519_v50, %v5521_v45  ;;  %v5524_v22 = vsel %vm21315_vm1, %v5521_v45, %v5523_v26  ;;  %v21603_v45 = vld [vmem:[#allocation21_spill] sm:$0xff] }
 0x2ee   : > { %v5533_v38 = vrot.slane %v21603_v45, 4 }
 0x2f1   : > { %14229 = vmatmul.mubr.msk.bf16.gmra.mrb[40].mxu0 %vm21316_vm2, %v5107_v31  ;;  %v15839_v31 = vld [vmem:[%s16102_s26 + $0x88] sm:$0xff]   ;;  %s22350_s26 = scalar_lea.vmem %s21260_s4, %s16081_s15 }
 0x2f2   : > { %14232 = vmatprep.mubr.msk.bf16.mxu0 %vm21316_vm2, %v5116_v23  ;;  %v5520_v23 = vsel %vm21315_vm1, %v5517_v27, %v5519_v50  ;;  %v5529_v50 = vrot.slane %v21601_v17, 4 }
 0x2f9   : > { %14233 = vmatmul.mubr.msk.bf16.gmra.mrb[44].mxu0 %vm21316_vm2, %v5125_v59  ;;  %v5525_v59 = vrot.slane %v21599_v63, 4 }
 0x2fa   : > { %14240 = vmatprep.mubr.msk.bf16.mxu0 %vm21316_vm2, %v5516_v2  ;;  %v21600_v2 = vld [vmem:[#allocation16_spill] sm:$0xff] }
 0x2fb   : > { %v5526_v16 = vsel %vm21315_vm1, %v5523_v26, %v5525_v59  ;;  %v21604_v26 = vld [vmem:[#allocation22_spill] sm:$0xff] }
 0x301   : > { %14241 = vmatmul.mubr.msk.bf16.vlgmr.msra.gmra.mrb[0].mxu0 %vm21316_vm2, %v5518_v46  ;;  %v21602_v46 = vld [vmem:[#allocation20_spill] sm:$0xff] }
 0x302   : > { %14289 = vmatpush3.bf16.msra.mxu0 %v17216_v56  ;;  %14244 = vmatprep.mubr.msk.bf16.mxu0 %vm21316_vm2, %v5520_v23  ;;  %v5527_v56 = vrot.slane %v21600_v2, 4  ;;  %v5531_v23 = vrot.slane %v21602_v46, 4 }
 0x303   : > { %14290 = vmatprep.subr.bf16.mxu0 %v15839_v31 }
 0x304   : > { %v5528_v27 = vsel %vm21315_vm1, %v5525_v59, %v5527_v56  ;;  %v5532_v32 = vsel %vm21315_vm1, %v5529_v50, %v5531_v23  ;;  %v21605_v59 = vld [vmem:[#allocation23_spill] sm:$0xff] }
 0x305   : > { %v5537_v2 = vrot.slane %v21605_v59, 4 }
 0x306   : > { %14291 = vmatpush3.bf16.msra.mxu0 %v15839_v31  ;;  %v5530_v31 = vsel %vm21315_vm1, %v5527_v56, %v5529_v50  ;;  %v21606_v56 = vld [vmem:[#allocation24_spill] sm:$0xff]  ;;  %v21607_v50 = vld [vmem:[#allocation25_spill] sm:$0xff] }
 0x307   : > { %v5541_v46 = vrot.slane %v21607_v50, 4 }
 0x309   : > { %14245 = vmatmul.mubr.msk.bf16.gmra.mrb[4].mxu0 %vm21316_vm2, %v5522_v42  ;;  %v5535_v42 = vrot.slane %v21604_v26, 4 }
 0x30a   : > { %14248 = vmatprep.mubr.msk.bf16.mxu0 %vm21316_vm2, %v5524_v22  ;;  %v5534_v22 = vsel %vm21315_vm1, %v5531_v23, %v5533_v38  ;;  %v21608_v23 = vld [vmem:[#allocation26_spill] sm:$0xff] }
 0x30b   : > { %v5536_v63 = vsel %vm21315_vm1, %v5533_v38, %v5535_v42  ;;  %v21609_v38 = vld [vmem:[#allocation27_spill] sm:$0xff] }
 0x30c   : > { %v5545_v26 = vrot.slane %v21609_v38, 4 }
 0x311   : > { %14249 = vmatmul.mubr.msk.bf16.gmra.mrb[8].mxu0 %vm21316_vm2, %v5526_v16  ;;  %v5539_v16 = vrot.slane %v21606_v56, 4 }
 0x312   : > { %14252 = vmatprep.mubr.msk.bf16.mxu0 %vm21316_vm2, %v5528_v27  ;;  %v5538_v27 = vsel %vm21315_vm1, %v5535_v42, %v5537_v2  ;;  %v21610_v42 = vld [vmem:[#allocation28_spill] sm:$0xff] }
 0x313   : > { %v5540_v17 = vsel %vm21315_vm1, %v5537_v2, %v5539_v16  ;;  %v21611_v2 = vld [vmem:[#allocation29_spill] sm:$0xff] }
 0x314   : > { %v5549_v56 = vrot.slane %v21611_v2, 4 }
 0x319   : > { %14253 = vmatmul.mubr.msk.bf16.gmra.mrb[12].mxu0 %vm21316_vm2, %v5530_v31  ;;  %v5543_v31 = vrot.slane %v21608_v23, 4 }
 0x31a   : > { %14256 = vmatprep.mubr.msk.bf16.mxu0 %vm21316_vm2, %v5532_v32  ;;  %v5542_v32 = vsel %vm21315_vm1, %v5539_v16, %v5541_v46  ;;  %v21612_v16 = vld [vmem:[#allocation30_spill] sm:$0xff] }
 0x31b   : > { %v5544_v45 = vsel %vm21315_vm1, %v5541_v46, %v5543_v31  ;;  %v21613_v46 = vld [vmem:[#allocation31_spill] sm:$0xff] }
 0x31c   : > { %v5553_v23 = vrot.slane %v21613_v46, 4  ;;  %v5561_v46 = vrot.slane %v17295_v52, 4 }
 0x321   : > { %14257 = vmatmul.mubr.msk.bf16.gmra.mrb[16].mxu0 %vm21316_vm2, %v5534_v22  ;;  %v5547_v22 = vrot.slane %v21610_v42, 4 }
 0x322   : > { %14260 = vmatprep.mubr.msk.bf16.mxu0 %vm21316_vm2, %v5536_v63  ;;  %v5546_v63 = vsel %vm21315_vm1, %v5543_v31, %v5545_v26  ;;  %v21614_v31 = vld [vmem:[#allocation18_spill] sm:$0xff] }
 0x323   : > { %v5548_v59 = vsel %vm21315_vm1, %v5545_v26, %v5547_v22  ;;  %v21615_v26 = vld [vmem:[#allocation19_spill] sm:$0xff] }
 0x324   : > { %v5557_v42 = vrot.slane %v21615_v26, 4 }
 0x329   : > { %14261 = vmatmul.mubr.msk.bf16.gmra.mrb[20].mxu0 %vm21316_vm2, %v5538_v27  ;;  %v5551_v27 = vrot.slane %v21612_v16, 4 }
 0x32a   : > { %14264 = vmatprep.mubr.msk.bf16.mxu0 %vm21316_vm2, %v5540_v17  ;;  %v5550_v17 = vsel %vm21315_vm1, %v5547_v22, %v5549_v56  ;;  %v5559_v22 = vrot.slane %v17281_v49, 4 }
 0x32b   : > { %v5552_v50 = vsel %vm21315_vm1, %v5549_v56, %v5551_v27 }
 0x32c   : > { %v5560_v56 = vsel %vm21315_vm1, %v5557_v42, %v5559_v22 }
 0x331   : > { %14265 = vmatmul.mubr.msk.bf16.gmra.mrb[24].mxu0 %vm21316_vm2, %v5542_v32  ;;  %v5555_v32 = vrot.slane %v21614_v31, 4 }
 0x332   : > { %14268 = vmatprep.mubr.msk.bf16.mxu0 %vm21316_vm2, %v5544_v45  ;;  %v5554_v45 = vsel %vm21315_vm1, %v5551_v27, %v5553_v23 }
 0x333   : > { %v5556_v38 = vsel %vm21315_vm1, %v5553_v23, %v5555_v32  ;;  %v5558_v2 = vsel %vm21315_vm1, %v5555_v32, %v5557_v42  ;;  %v5938_v32 = vrot.slane %v16966_v28, 4  ;;  %v5947_v28 = vrot.slane %v16973_v40, 5 }
 0x339   : > { %14269 = vmatmul.mubr.msk.bf16.gmra.mrb[28].mxu0 %vm21316_vm2, %v5546_v63  ;;  %v5927_v63 = vshrl.u32 %v17303_v62, 16 }
 0x33a   : > { %14272 = vmatprep.mubr.msk.bf16.mxu0 %vm21316_vm2, %v5548_v59  ;;  %v5930_v59 = vshll.u32 %v17303_v62, 16  ;;  %v5562_v62 = vsel %vm21315_vm1, %v5559_v22, %v5561_v46  ;;  %v5946_v22 = vrot.slane %v16995_v3, 4  ;;  %v5955_v3 = vrot.slane %v17002_v9, 5 }
 0x33b   : > { %v5929_v16 = vrot.slane %v5927_v63, 4  ;;  %v5950_v63 = vrot.slane %v16999_v20, 4  ;;  %v5959_v20 = vrot.slane %v17016_v19, 5  ;;  %v5966_v46 = vrot.slane %v17048_v14, 4 }
 0x33c   : > { %v5932_v27 = vrot.slane %v5930_v59, 5  ;;  %v5975_v14 = vrot.slane %v17064_v25, 5 }
 0x33e   : > { %v5933_v23 = vor.u32 %v5932_v27, %v5929_v16  ;;  %v5958_v16 = vrot.slane %v17024_v30, 4  ;;  %v5967_v30 = vrot.slane %v17040_v13, 5 }
 0x340   : > { %v5960_v27 = vor.u32 %v5959_v20, %v5958_v16 }
 0x341   : > { %14273 = vmatmul.mubr.msk.bf16.gmra.mrb[32].mxu0 %vm21316_vm2, %v5550_v17  ;;  %v5934_v17 = vrot.slane %v16946_v60, 4  ;;  %v5942_v60 = vrot.slane %v16970_v10, 4  ;;  %v5951_v10 = vrot.slane %v16991_v61, 5 }
 0x342   : > { %14276 = vmatprep.mubr.msk.bf16.mxu0 %vm21316_vm2, %v5552_v50  ;;  %v5935_v50 = vrot.slane %v16942_v8, 5  ;;  %v5943_v8 = vrot.slane %v16962_v6, 5  ;;  %v5948_v6 = vor.u32 %v5947_v28, %v5946_v22  ;;  %v5990_v22 = vrot.slane %v17120_v54, 4 }
 0x343   : > { %v5952_v59 = vor.u32 %v5951_v10, %v5950_v63  ;;  %v5994_v63 = vrot.slane %v17140_v57, 4  ;;  %v5998_v10 = vrot.slane %v17144_v39, 4  ;;  %v5999_v54 = vrot.slane %v17136_v4, 5 }
 0x344   : > { %v5936_v31 = vor.u32 %v5935_v50, %v5934_v17  ;;  %v5944_v52 = vor.u32 %v5943_v8, %v5942_v60  ;;  %v5962_v50 = vrot.slane %v17044_v34, 4  ;;  %v5971_v34 = vrot.slane %v17051_v36, 5 }
 0x345   : > { %v5953_v40 = vsel %vm21313_vm4, %v5948_v6, %v5952_v59  ;;  %v5978_v60 = vrot.slane %v17092_v29, 4  ;;  %v5982_v8 = vrot.slane %v17096_v18, 4  ;;  %v5987_v29 = vrot.slane %v17099_v53, 5 }
 0x346   : > { %v5991_v18 = vrot.slane %v17112_v11, 5  ;;  %v6003_v57 = vrot.slane %v17147_v5, 5  ;;  %v6007_v39 = vrot.slane %v17160_v12, 5  ;;  %v6010_v5 = vrot.slane %v17181_v55, 4 }
 0x347   : > { %v6014_v12 = vrot.slane %v16871_v0, 4  ;;  %v6019_v55 = vrot.slane %v16892_v37, 5 }
 0x348   : > { %v5992_v28 = vor.u32 %v5991_v18, %v5990_v22 }
 0x349   : > { %14277 = vmatmul.mubr.msk.bf16.gmra.mrb[36].mxu0 %vm21316_vm2, %v5554_v45  ;;  %v5939_v45 = vrot.slane %v16949_v41, 5 }
 0x34a   : > { %14280 = vmatprep.mubr.msk.bf16.mxu0 %vm21316_vm2, %v5556_v38  ;;  %v5937_v38 = vsel %vm21313_vm4, %v5933_v23, %v5936_v31  ;;  %v5968_v23 = vor.u32 %v5967_v30, %v5966_v46  ;;  %v6018_v46 = vrot.slane %v16886_v24, 4  ;;  %v5920_v30 = vld [vmem:[#allocation3 + $0xe0] sm:$0x1f] }
 0x34b   : > { %v5940_v26 = vor.u32 %v5939_v45, %v5938_v32  ;;  %v5974_v32 = vrot.slane %v17072_v51, 4  ;;  %v5983_v51 = vrot.slane %v17088_v58, 5  ;;  %v6030_v37 = vshll.u32 %v5920_v30, 16 }
 0x34d   : > { %v5941_v42 = vsel %vm21313_vm4, %v5936_v31, %v5940_v26  ;;  %v5945_v41 = vsel %vm21313_vm4, %v5940_v26, %v5944_v52  ;;  %v5976_v45 = vor.u32 %v5975_v14, %v5974_v32  ;;  %v5984_v26 = vor.u32 %v5983_v51, %v5982_v8 }
 0x351   : > { %14281 = vmatmul.mubr.msk.bf16.gmra.mrb[40].mxu0 %vm21316_vm2, %v5558_v2  ;;  %v5949_v2 = vsel %vm21313_vm4, %v5944_v52, %v5948_v6  ;;  %v6000_v6 = vor.u32 %v5999_v54, %v5998_v10 }
 0x352   : > { %14284 = vmatprep.mubr.msk.bf16.mxu0 %vm21316_vm2, %v5560_v56  ;;  %v5954_v56 = vrot.slane %v17020_v21, 4  ;;  %v5963_v21 = vrot.slane %v17027_v47, 5 }
 0x354   : > { %v5956_v61 = vor.u32 %v5955_v3, %v5954_v56  ;;  %v5964_v19 = vor.u32 %v5963_v21, %v5962_v50  ;;  %v6002_v56 = vrot.slane %v17164_v35, 4  ;;  %v6006_v3 = vrot.slane %v17168_v44, 4 }
 0x356   : > { %v5957_v17 = vsel %vm21313_vm4, %v5952_v59, %v5956_v61  ;;  %v5961_v9 = vsel %vm21313_vm4, %v5956_v61, %v5960_v27  ;;  %v5965_v31 = vsel %vm21313_vm4, %v5960_v27, %v5964_v19  ;;  %v5969_v47 = vsel %vm21313_vm4, %v5964_v19, %v5968_v23 }
 0x357   : > { %v786_v59 = vlaneseq  ;;  %v6008_v16 = vor.u32 %v6007_v39, %v6006_v3  ;;  %v6011_v61 = vrot.slane %v17171_v33, 5  ;;  %v6015_v27 = vrot.slane %v16878_v1, 5 }
 0x358   : > { %v21617_v1 = vshrl.u32 %v17281_v49, 16 }
 0x359   : > { %14285 = vmatmul.mubr.msk.bf16.gmra.mrb[44].mxu0 %vm21316_vm2, %v5562_v62  ;;  %v5970_v62 = vrot.slane %v17068_v7, 4  ;;  %v5979_v7 = vrot.slane %v17075_v15, 5  ;;  %v17456_v4 = vshrl.u32 %v786_v59, 7  ;;  %v6012_v21 = vor.u32 %v6011_v61, %v6010_v5 }
 0x35a   : > { %14292 = vmatprep.mubr.msk.bf16.mxu0 %vm21316_vm2, %v5937_v38  ;;  %v6022_v19 = vrot.slane %v21617_v1, 4 }
 0x35b   : > { %v5972_v13 = vor.u32 %v5971_v34, %v5970_v62  ;;  %v5980_v25 = vor.u32 %v5979_v7, %v5978_v60  ;;  %21616 = vst [vmem:[#allocation11_spill] sm:$0xff] %v17456_v4  ;;  %v789_v20 = vadd.s32 16, %v17456_v4  ;;  %v6013_v33 = vsel %vm21313_vm4, %v6008_v16, %v6012_v21 }
 0x35c   : > { %v6020_v34 = vor.u32 %v6019_v55, %v6018_v46  ;;  %v790_v24 = vadd.s32 24, %v17456_v4  ;;  %v17485_v32 = vmul.u32.u64.low 2863311531, %v17456_v4  ;;  %v17486_v14 = vmul.u32.u64.high 2863311531, %v17456_v4, %v17485_v32 }
 0x35d   : > { %v5973_v38 = vsel %vm21313_vm4, %v5968_v23, %v5972_v13  ;;  %v5977_v36 = vsel %vm21313_vm4, %v5972_v13, %v5976_v45  ;;  %v5981_v52 = vsel %vm21313_vm4, %v5976_v45, %v5980_v25  ;;  %v5985_v15 = vsel %vm21313_vm4, %v5980_v25, %v5984_v26 }
 0x35e   : > { %v21618_v23 = vshll.u32 %v17281_v49, 16  ;;  %v788_v13 = vadd.s32 8, %v17456_v4  ;;  %v6032_v25 = vrot.slane %v6030_v37, 5  ;;  %v797_v61 = vadd.s32 80, %v17456_v4 }
 0x35f   : > { %v795_v55 = vadd.s32 64, %v17456_v4 }
 0x361   : > { %14293 = vmatmul.mubr.msk.bf16.vlgmr.msra.gmra.mrb[0].mxu0 %vm21316_vm2, %v5941_v42  ;;  %v5986_v42 = vrot.slane %v17116_v43, 4  ;;  %v5995_v43 = vrot.slane %v17123_v48, 5 }
 0x362   : > { %14296 = vmatprep.mubr.msk.bf16.mxu0 %vm21316_vm2, %v5945_v41 }
 0x363   : > { %v5988_v58 = vor.u32 %v5987_v29, %v5986_v42  ;;  %v5996_v11 = vor.u32 %v5995_v43, %v5994_v63  ;;  %v793_v29 = vadd.s32 48, %v17456_v4  ;;  %v794_v43 = vadd.s32 56, %v17456_v4 }
 0x365   : > { %v5989_v41 = vsel %vm21313_vm4, %v5984_v26, %v5988_v58  ;;  %v5993_v53 = vsel %vm21313_vm4, %v5988_v58, %v5992_v28  ;;  %v6001_v48 = vsel %vm21313_vm4, %v5996_v11, %v6000_v6  ;;  %v841_v26 = vshrl.u32 %v17486_v14, 4 }
 0x366   : > { %v791_v58 = vadd.s32 32, %v17456_v4 }
 0x367   : > { %v842_v22 = vmul.u32 24, %v841_v26  ;;  %v15841_v26 = vld [vmem:[%s16107_s18 + $0x18] sm:$0xff]  }
 0x369   : > { %14297 = vmatmul.mubr.msk.bf16.gmra.mrb[4].mxu0 %vm21316_vm2, %v5949_v2  ;;  %v5997_v2 = vsel %vm21313_vm4, %v5992_v28, %v5996_v11  ;;  %v843_v10 = vsub.s32 %v17456_v4, %v842_v22  ;;  %v17509_v54 = vmul.u32.u64.low 2863311531, %v791_v58  ;;  %v17510_v11 = vmul.u32.u64.high 2863311531, %v791_v58, %v17509_v54 }
 0x36a   : > { %14300 = vmatprep.mubr.msk.bf16.mxu0 %vm21316_vm2, %v5953_v40  ;;  %v6004_v40 = vor.u32 %v6003_v57, %v6002_v56 }
 0x36b   : > { %vm1363_vm9 = vcmp.ne.s32.totalorder %v843_v10, 0  ;;  %vm1411_vm10 = vcmp.lt.s32.totalorder %v843_v10, 0  ;;  %v1507_v3 = vadd.s32 24, %v843_v10 }
 0x36c   : > { %v6005_v35 = vsel %vm21313_vm4, %v6000_v6, %v6004_v40  ;;  %v6009_v44 = vsel %vm21313_vm4, %v6004_v40, %v6008_v16  ;;  %v17512_v6 = vmul.u32.u64.low 2863311531, %v794_v43  ;;  %v17513_v59 = vmul.u32.u64.high 2863311531, %v794_v43, %v17512_v6  ;;  %vm1459_vm12 = vmand %vm1411_vm10, %vm1363_vm9 }
 0x36d   : > { %v792_v16 = vadd.s32 40, %v17456_v4  ;;  %v21321_v6 = vmov 0.0  }
 0x36e   : > { %v918_v5 = vshrl.u32 %v17513_v59, 4 }
 0x371   : > { %14301 = vmatmul.mubr.msk.bf16.gmra.mrb[8].mxu0 %vm21316_vm2, %v5957_v17  ;;  %v17467_v17 = vmul.u32.u64.low 2863311531, %v789_v20  ;;  %v17468_v50 = vmul.u32.u64.high 2863311531, %v789_v20, %v17467_v17 }
 0x372   : > { %14304 = vmatprep.mubr.msk.bf16.mxu0 %vm21316_vm2, %v5961_v9  ;;  %v6016_v9 = vor.u32 %v6015_v27, %v6014_v12  ;;  %v1555_v12 = vsel %vm1459_vm12, %v1507_v3, %v843_v10 }
 0x373   : > { %v863_v62 = vshrl.u32 %v17468_v50, 4  ;;  %v17522_v17 = vmul.u32.u64.low 2863311531, %v792_v16  ;;  %v17523_v50 = vmul.u32.u64.high 2863311531, %v792_v16, %v17522_v17  ;;  %vm1651_vm12 = vcmp.le.s32.totalorder %v1555_v12, 16 }
 0x374   : > { %v6017_v0 = vsel %vm21313_vm4, %v6012_v21, %v6016_v9  ;;  %v6021_v8 = vsel %vm21313_vm4, %v6016_v9, %v6020_v34  ;;  %v17525_v9 = vmul.u32.u64.low 2863311531, %v797_v61  ;;  %v17526_v46 = vmul.u32.u64.high 2863311531, %v797_v61, %v17525_v9 }
 0x375   : > { %v864_v60 = vmul.u32 24, %v863_v62  ;;  %v17534_v62 = vadd.s32 88, %v17456_v4 }
 0x376   : > { %v951_v14 = vshrl.u32 %v17526_v46, 4  ;;  %v15842_v46 = vld [vmem:[%s16107_s18] sm:$0xff]  }
 0x379   : > { %14305 = vmatmul.mubr.msk.bf16.gmra.mrb[12].mxu0 %vm21316_vm2, %v5965_v31  ;;  %v6023_v31 = vrot.slane %v21618_v23, 5 }
 0x37a   : > { %14308 = vmatprep.mubr.msk.bf16.mxu0 %vm21316_vm2, %v5969_v47  ;;  %v6027_v47 = vshrl.u32 %v5920_v30, 16 }
 0x37b   : > { %v6024_v45 = vor.u32 %v6023_v31, %v6022_v19  ;;  %v17529_v19 = vmul.u32.u64.low 2863311531, %v795_v55  ;;  %v17530_v23 = vmul.u32.u64.high 2863311531, %v795_v55, %v17529_v19  ;;  %v896_v31 = vshrl.u32 %v17523_v50, 4 }
 0x37c   : > { %v6029_v51 = vrot.slane %v6027_v47, 4  ;;  %v15840_v47 = vld [vmem:[%s16107_s18 + $0x10] sm:$0xff]   ;;  %v17659_v19 = vadd.s32 144, %v17456_v4 }
 0x37d   : > { %v897_v32 = vmul.u32 24, %v896_v31  ;;  %14340 = vmatprep.subr.bf16.mxu1 %v15840_v47 }
 0x37e   : > { %14341 = vmatpush3.bf16.msra.mxu1 %v15840_v47 }
 0x37f   : > { %14342 = vmatprep.subr.bf16.mxu1 %v15841_v26 }
 0x381   : > { %14309 = vmatmul.mubr.msk.bf16.gmra.mrb[16].mxu0 %vm21316_vm2, %v5973_v38  ;;  %v17489_v49 = vmul.u32.u64.low 2863311531, %v790_v24  ;;  %v17490_v38 = vmul.u32.u64.high 2863311531, %v790_v24, %v17489_v49 }
 0x382   : > { %14312 = vmatprep.mubr.msk.bf16.mxu0 %vm21316_vm2, %v5977_v36  ;;  %v17492_v7 = vmul.u32.u64.low 2863311531, %v788_v13  ;;  %v17493_v36 = vmul.u32.u64.high 2863311531, %v788_v13, %v17492_v7  ;;  %14343 = vmatpush3.bf16.msra.mxu1 %v15841_v26 }
 0x383   : > { %v874_v42 = vshrl.u32 %v17490_v38, 4  ;;  %v898_v7 = vsub.s32 %v792_v16, %v897_v32  ;;  %14392 = vmatprep.subr.bf16.mxu1 %v15842_v46 }
 0x384   : > { %v852_v18 = vshrl.u32 %v17493_v36, 4  ;;  %v17552_v36 = vadd.s32 72, %v17456_v4 }
 0x385   : > { %v875_v28 = vmul.u32 24, %v874_v42 }
 0x386   : > { %v853_v56 = vmul.u32 24, %v852_v18 }
 0x388   : > { %v854_v40 = vsub.s32 %v788_v13, %v853_v56  ;;  %v929_v13 = vshrl.u32 %v17530_v23, 4 }
 0x389   : > { %14313 = vmatmul.mubr.msk.bf16.gmra.mrb[20].mxu0 %vm21316_vm2, %v5981_v52  ;;  %v6025_v52 = vsel %vm21313_vm4, %v6020_v34, %v6024_v45 }
 0x38a   : > { %14316 = vmatprep.mubr.msk.bf16.mxu0 %vm21316_vm2, %v5985_v15  ;;  %v865_v15 = vsub.s32 %v789_v20, %v864_v60  ;;  %v885_v20 = vshrl.u32 %v17510_v11, 4  ;;  %vm1364_vm0 = vcmp.ne.s32.totalorder %v854_v40, 0  ;;  %v1508_v30 = vadd.s32 24, %v854_v40 }
 0x38c   : > { %vm1365_vm7 = vcmp.ne.s32.totalorder %v865_v15, 0  ;;  %vm1413_vm8 = vcmp.lt.s32.totalorder %v865_v15, 0  ;;  %v886_v21 = vmul.u32 24, %v885_v20 }
 0x38d   : > { %vm1461_vm11 = vmand %vm1413_vm8, %vm1365_vm7  ;;  %vm1412_vm7 = vcmp.lt.s32.totalorder %v854_v40, 0 }
 0x38e   : > { %vm1460_vm9 = vmand %vm1412_vm7, %vm1364_vm0  ;;  %v887_v34 = vsub.s32 %v791_v58, %v886_v21  ;;  %v799_v21 = vadd.s32 96, %v17456_v4 }
 0x390   : > { %vm1367_vm6 = vcmp.ne.s32.totalorder %v887_v34, 0  ;;  %vm1415_vm5 = vcmp.lt.s32.totalorder %v887_v34, 0  ;;  %v1511_v42 = vadd.s32 24, %v887_v34 }
 0x391   : > { %14317 = vmatmul.mubr.msk.bf16.gmra.mrb[24].mxu0 %vm21316_vm2, %v5989_v41  ;;  %v17503_v41 = vmul.u32.u64.low 2863311531, %v793_v29  ;;  %v17504_v63 = vmul.u32.u64.high 2863311531, %v793_v29, %v17503_v41 }
 0x392   : > { %14320 = vmatprep.mubr.msk.bf16.mxu0 %vm21316_vm2, %v5993_v53  ;;  %v6033_v53 = vor.u32 %v6032_v25, %v6029_v51  ;;  %v952_v51 = vmul.u32 24, %v951_v14  ;;  %v930_v25 = vmul.u32 24, %v929_v13 }
 0x393   : > { %v907_v39 = vshrl.u32 %v17504_v63, 4 }
 0x394   : > { %v6034_v57 = vsel %vm21313_vm4, %v6024_v45, %v6033_v53  ;;  %v17542_v45 = vmul.u32.u64.low 2863311531, %v17534_v62  ;;  %v17543_v49 = vmul.u32.u64.high 2863311531, %v17534_v62, %v17542_v45  ;;  %v953_v18 = vsub.s32 %v797_v61, %v952_v51 }
 0x395   : > { %v908_v27 = vmul.u32 24, %v907_v39  ;;  %v931_v11 = vsub.s32 %v795_v55, %v930_v25  ;;  %v802_v55 = vadd.s32 120, %v17456_v4  ;;  %v17836_v51 = vadd.s32 184, %v17456_v4 }
 0x396   : > { %v962_v58 = vshrl.u32 %v17543_v49, 4  ;;  %vm1421_vm3 = vcmp.lt.s32.totalorder %v953_v18, 0  ;;  %v1517_v39 = vadd.s32 24, %v953_v18 }
 0x397   : > { %v909_v1 = vsub.s32 %v793_v29, %v908_v27  ;;  %v1515_v50 = vadd.s32 24, %v931_v11 }
 0x399   : > { %14321 = vmatmul.mubr.msk.bf16.gmra.mrb[28].mxu0 %vm21316_vm2, %v5997_v2  ;;  %v876_v2 = vsub.s32 %v790_v24, %v875_v28  ;;  %v17537_v24 = vsel %vm1460_vm9, %v1508_v30, %v854_v40  ;;  %vm1417_vm7 = vcmp.lt.s32.totalorder %v909_v1, 0  ;;  %v1513_v60 = vadd.s32 24, %v909_v1  ;;  %v6620_v28 = vld [vmem:[#allocation3 + $0x8] sm:$0xf0] }
 0x39a   : > { %14324 = vmatprep.mubr.msk.bf16.mxu0 %vm21316_vm2, %v6001_v48  ;;  %v1509_v48 = vadd.s32 24, %v865_v15  ;;  %v6651_v10 = vrot.slane %v6620_v28, 4  ;;  %v963_v40 = vmul.u32 24, %v962_v58 }
 0x39b   : > { %vm1366_vm13 = vcmp.ne.s32.totalorder %v876_v2, 0  ;;  %vm1414_vm14 = vcmp.lt.s32.totalorder %v876_v2, 0 }
 0x39c   : > { %vm1462_vm15 = vmand %vm1414_vm14, %vm1366_vm13  ;;  %v964_v61 = vsub.s32 %v17534_v62, %v963_v40  ;;  %v17661_v31 = vmul.u32.u64.low 2863311531, %v799_v21  ;;  %v17662_v62 = vmul.u32.u64.high 2863311531, %v799_v21, %v17661_v31 }
 0x3a1   : > { %14325 = vmatmul.mubr.msk.bf16.gmra.mrb[32].mxu0 %vm21316_vm2, %v6005_v35  ;;  %v1510_v35 = vadd.s32 24, %v876_v2 }
 0x3a2   : > { %14328 = vmatprep.mubr.msk.bf16.mxu0 %vm21316_vm2, %v6009_v44  ;;  %v1557_v44 = vsel %vm1461_vm11, %v1509_v48, %v865_v15  ;;  %vm1603_vm11 = vcmp.ge.s32.totalorder %v1555_v12, 1  ;;  %v17567_v15 = vld [vmem:[#allocation3 + $0x10] sm:$0xff] }
 0x3a3   : > { %vm1605_vm8 = vcmp.ge.s32.totalorder %v1557_v44, 1  ;;  %vm1653_vm10 = vcmp.le.s32.totalorder %v1557_v44, 16  ;;  %vm17556_vm9 = vmand %vm1603_vm11, %vm1651_vm12  ;;  %21625 = vst [vmem:[#allocation12_spill] sm:$0xff] %v17567_v15  ;;  %vm1368_vm12 = vcmp.ne.s32.totalorder %v898_v7, 0  ;;  %v21317_v41 = vrot.slane %v17567_v15, 4 }
 0x3a4   : > { %vm17547_vm0 = vmand %vm1605_vm8, %vm1653_vm10  ;;  %v801_v44 = vadd.s32 112, %v17456_v4 }
 0x3a5   : > { %v17596_v59 = vsel %vm17547_vm0, 1.0, %v21321_v6  ;;  %v6653_v16 = vsel %vm21315_vm1, %v6651_v10, %v21317_v41  ;;  %vm1422_vm1 = vcmp.lt.s32.totalorder %v964_v61, 0  ;;  %v17855_v10 = vadd.s32 208, %v17456_v4 }
 0x3a6   : > { %21632 = vst [vmem:[#allocation13_spill] sm:$0xff] %v17596_v59  ;;  %14344 = vmatprep.mubr.msk.bf16.mxu1 %vm21316_vm2, %v6653_v16 }
 0x3a9   : > { %14329 = vmatmul.mubr.msk.bf16.gmra.mrb[36].mxu0 %vm21316_vm2, %v6013_v33  ;;  %v1558_v33 = vsel %vm1462_vm15, %v1510_v35, %v876_v2  ;;  %vm1369_vm15 = vcmp.ne.s32.totalorder %v909_v1, 0  ;;  %v17601_v2 = vsel %vm17556_vm9, 1.0, %v21321_v6 }
 0x3aa   : > { %14332 = vmatprep.mubr.msk.bf16.mxu0 %vm21316_vm2, %v6017_v0  ;;  %v919_v0 = vmul.u32 24, %v918_v5  ;;  %vm1606_vm13 = vcmp.ge.s32.totalorder %v1558_v33, 1  ;;  %vm1654_vm14 = vcmp.le.s32.totalorder %v1558_v33, 16  ;;  %vm17571_vm11 = vmand %vm1417_vm7, %vm1369_vm15  ;;  %vm1373_vm7 = vcmp.ne.s32.totalorder %v953_v18, 0  ;;  %21633 = vst [vmem:[#allocation14_spill] sm:$0xff] %v17601_v2 }
 0x3ab   : > { %vm17563_vm8 = vmand %vm1606_vm13, %vm1654_vm14  ;;  %vm1416_vm14 = vcmp.lt.s32.totalorder %v898_v7, 0  ;;  %v17605_v56 = vsel %vm17571_vm11, %v1513_v60, %v909_v1  ;;  %vm1371_vm11 = vcmp.ne.s32.totalorder %v931_v11, 0  ;;  %v1518_v1 = vadd.s32 24, %v964_v61 }
 0x3ac   : > { %v920_v37 = vsub.s32 %v794_v43, %v919_v0  ;;  %vm17579_vm13 = vmand %vm1415_vm5, %vm1367_vm6  ;;  %v17584_v43 = vmul.u32.u64.low 2863311531, %v17552_v36  ;;  %v17585_v53 = vmul.u32.u64.high 2863311531, %v17552_v36, %v17584_v43  ;;  %v17624_v20 = vsel %vm17563_vm8, 1.0, %v21321_v6 }
 0x3ad   : > { %v17610_v48 = vsel %vm17579_vm13, %v1511_v42, %v887_v34  ;;  %vm17614_vm5 = vmand %vm1416_vm14, %vm1368_vm12  ;;  %21636 = vst [vmem:[#allocation15_spill] sm:$0xff] %v17624_v20  ;;  %vm1652_vm6 = vcmp.le.s32.totalorder %v17537_v24, 16  ;;  %vm1609_vm9 = vcmp.ge.s32.totalorder %v17605_v56, 1  ;;  %vm1419_vm8 = vcmp.lt.s32.totalorder %v931_v11, 0 }
 0x3ae   : > { %vm1370_vm10 = vcmp.ne.s32.totalorder %v920_v37, 0  ;;  %vm1418_vm4 = vcmp.lt.s32.totalorder %v920_v37, 0  ;;  %v1514_v29 = vadd.s32 24, %v920_v37  ;;  %vm1469_vm0 = vmand %vm1421_vm3, %vm1373_vm7  ;;  %v940_v5 = vshrl.u32 %v17585_v53, 4 }
 0x3af   : > { %vm17589_vm15 = vmand %vm1418_vm4, %vm1370_vm10  ;;  %vm1604_vm4 = vcmp.ge.s32.totalorder %v17537_v24, 1  ;;  %vm1657_vm10 = vcmp.le.s32.totalorder %v17605_v56, 16  ;;  %vm1607_vm12 = vcmp.ge.s32.totalorder %v17610_v48, 1  ;;  %vm1655_vm13 = vcmp.le.s32.totalorder %v17610_v48, 16 }
 0x3b0   : > { %v17629_v35 = vsel %vm17589_vm15, %v1514_v29, %v920_v37  ;;  %v941_v27 = vmul.u32 24, %v940_v5  ;;  %v17645_v17 = vsel %vm1469_vm0, %v1517_v39, %v953_v18  ;;  %vm1467_vm15 = vmand %vm1419_vm8, %vm1371_vm11  ;;  %vm1374_vm7 = vcmp.ne.s32.totalorder %v964_v61, 0 }
 0x3b1   : > { %14333 = vmatmul.mubr.msk.bf16.gmra.mrb[40].mxu0 %vm21316_vm2, %v6021_v8  ;;  %vm1610_vm3 = vcmp.ge.s32.totalorder %v17629_v35, 1  ;;  %vm1658_vm14 = vcmp.le.s32.totalorder %v17629_v35, 16  ;;  %v17651_v33 = vmul.u32.u64.low 2863311531, %v801_v44  ;;  %v17652_v30 = vmul.u32.u64.high 2863311531, %v801_v44, %v17651_v33  ;;  %vm1470_vm11 = vmand %vm1422_vm1, %vm1374_vm7 }
 0x3b2   : > { %14336 = vmatprep.mubr.msk.bf16.mxu0 %vm21316_vm2, %v6025_v52  ;;  %v942_v9 = vsub.s32 %v17552_v36, %v941_v27  ;;  %v17655_v0 = vadd.s32 104, %v17456_v4  ;;  %v1563_v23 = vsel %vm1467_vm15, %v1515_v50, %v931_v11  ;;  %v17668_v37 = vadd.s32 128, %v17456_v4  ;;  %vm17680_vm1 = vmand %vm1604_vm4, %vm1652_vm6 }
 0x3b3   : > { %v17664_v34 = vmul.u32.u64.low 2863311531, %v802_v55  ;;  %v17665_v47 = vmul.u32.u64.high 2863311531, %v802_v55, %v17664_v34  ;;  %v995_v32 = vshrl.u32 %v17652_v30, 4  ;;  %v1566_v49 = vsel %vm1470_vm11, %v1518_v1, %v964_v61  ;;  %vm17698_vm4 = vmand %vm1609_vm9, %vm1657_vm10 }
 0x3b4   : > { %vm1372_vm8 = vcmp.ne.s32.totalorder %v942_v9, 0  ;;  %v17673_v14 = vmul.u32.u64.low 2863311531, %v17655_v0  ;;  %v17674_v13 = vmul.u32.u64.high 2863311531, %v17655_v0, %v17673_v14  ;;  %v1516_v38 = vadd.s32 24, %v942_v9  ;;  %vm17723_vm9 = vmand %vm1610_vm3, %vm1658_vm14 }
 0x3b5   : > { %vm1611_vm15 = vcmp.ge.s32.totalorder %v1563_v23, 1  ;;  %vm1659_vm7 = vcmp.le.s32.totalorder %v1563_v23, 16  ;;  %v996_v8 = vmul.u32 24, %v995_v32  ;;  %v973_v24 = vshrl.u32 %v17662_v62, 4 }
 0x3b6   : > { %v1006_v25 = vshrl.u32 %v17665_v47, 4  ;;  %v17704_v26 = vmul.u32.u64.low 2863311531, %v17668_v37  ;;  %v17705_v52 = vmul.u32.u64.high 2863311531, %v17668_v37, %v17704_v26  ;;  %v17708_v42 = vadd.s32 152, %v17456_v4 }
 0x3b7   : > { %v997_v22 = vsub.s32 %v801_v44, %v996_v8  ;;  %v974_v18 = vmul.u32 24, %v973_v24  ;;  %v984_v58 = vshrl.u32 %v17674_v13, 4  ;;  %vm1662_vm10 = vcmp.le.s32.totalorder %v1566_v49, 16 }
 0x3b8   : > { %v1007_v43 = vmul.u32 24, %v1006_v25  ;;  %v17737_v48 = vmul.u32.u64.low 2863311531, %v17708_v42  ;;  %v17738_v3 = vmul.u32.u64.high 2863311531, %v17708_v42, %v17737_v48  ;;  %v17743_v39 = vsel %vm17680_vm1, 1.0, %v21321_v6  ;;  %vm17760_vm1 = vmand %vm1611_vm15, %vm1659_vm7 }
 0x3b9   : > { %14337 = vmatmul.mubr.msk.bf16.gmra.mrb[44].mxu0 %vm21316_vm2, %v6034_v57  ;;  %v1512_v57 = vadd.s32 24, %v898_v7  ;;  %vm1420_vm2 = vcmp.lt.s32.totalorder %v942_v9, 0  ;;  %vm1377_vm11 = vcmp.ne.s32.totalorder %v997_v22, 0  ;;  %v1521_v54 = vadd.s32 24, %v997_v22  ;;  %21650 = vst [vmem:[#allocation16_spill] sm:$0xff] %v17743_v39 }
 0x3ba   : > { %vm17689_vm0 = vmand %vm1420_vm2, %vm1372_vm8  ;;  %vm1425_vm8 = vcmp.lt.s32.totalorder %v997_v22, 0  ;;  %v975_v11 = vsub.s32 %v799_v21, %v974_v18  ;;  %v1008_v56 = vsub.s32 %v802_v55, %v1007_v43  ;;  %vm21651_vm14 = vcmp.le.s32.totalorder %v17645_v17, 16 }
 0x3bb   : > { %v1560_v12 = vsel %vm17614_vm5, %v1512_v57, %v898_v7  ;;  %v17685_v60 = vmul.u32.u64.low 2863311531, %v17659_v19  ;;  %v17686_v7 = vmul.u32.u64.high 2863311531, %v17659_v19, %v17685_v60  ;;  %vm17714_vm2 = vmand %vm1607_vm12, %vm1655_vm13  ;;  %v1564_v63 = vsel %vm17689_vm0, %v1516_v38, %v942_v9 }
 0x3bc   : > { %vm1656_vm5 = vcmp.le.s32.totalorder %v1560_v12, 16  ;;  %vm21647_vm12 = vcmp.ge.s32.totalorder %v1560_v12, 1  ;;  %vm1473_vm3 = vmand %vm1425_vm8, %vm1377_vm11  ;;  %v985_v57 = vmul.u32 24, %v984_v58  ;;  %vm1660_vm11 = vcmp.le.s32.totalorder %v1564_v63, 16 }
 0x3bd   : > { %v1039_v53 = vshrl.u32 %v17686_v7, 4  ;;  %vm17732_vm13 = vmand %vm21647_vm12, %vm1656_vm5  ;;  %vm21652_vm5 = vcmp.ge.s32.totalorder %v17645_v17, 1  ;;  %vm1612_vm12 = vcmp.ge.s32.totalorder %v1564_v63, 1  ;;  %v1569_v16 = vsel %vm1473_vm3, %v1521_v54, %v997_v22 }
 0x3be   : > { %vm17749_vm0 = vmand %vm21652_vm5, %vm21651_vm14  ;;  %v17756_v35 = vsel %vm17698_vm4, 1.0, %v21321_v6  ;;  %vm1375_vm8 = vcmp.ne.s32.totalorder %v975_v11, 0  ;;  %vm1423_vm6 = vcmp.lt.s32.totalorder %v975_v11, 0  ;;  %v17767_v44 = vsel %vm17714_vm2, 1.0, %v21321_v6 }
 0x3bf   : > { %21655 = vst [vmem:[#allocation17_spill] sm:$0xff] %v17756_v35  ;;  %v1040_v61 = vmul.u32 24, %v1039_v53  ;;  %21658 = vst [vmem:[#allocation20_spill] sm:$0xff] %v17767_v44  ;;  %vm21659_vm3 = vcmp.ge.s32.totalorder %v1566_v49, 1  ;;  %vm1617_vm4 = vcmp.ge.s32.totalorder %v1569_v16, 1  ;;  %vm1665_vm5 = vcmp.le.s32.totalorder %v1569_v16, 16 }
 0x3c0   : > { %vm17771_vm14 = vmand %vm21659_vm3, %vm1662_vm10  ;;  %v986_v27 = vsub.s32 %v17655_v0, %v985_v57  ;;  %v17779_v17 = vsel %vm17723_vm9, 1.0, %v21321_v6  ;;  %vm1378_vm7 = vcmp.ne.s32.totalorder %v1008_v56, 0  ;;  %vm1426_vm2 = vcmp.lt.s32.totalorder %v1008_v56, 0 }
 0x3c1   : > { %21662 = vst [vmem:[#allocation21_spill] sm:$0xff] %v17779_v17  ;;  %vm17781_vm15 = vmand %vm1612_vm12, %vm1660_vm11  ;;  %v1017_v21 = vshrl.u32 %v17705_v52, 4  ;;  %v17789_v9 = vsel %vm17732_vm13, 1.0, %v21321_v6  ;;  %v1519_v55 = vadd.s32 24, %v975_v11  ;;  %v1522_v0 = vadd.s32 24, %v1008_v56 }
 0x3c2   : > { %21665 = vst [vmem:[#allocation22_spill] sm:$0xff] %v17789_v9  ;;  %vm17792_vm10 = vmand %vm1423_vm6, %vm1375_vm8  ;;  %vm1376_vm9 = vcmp.ne.s32.totalorder %v986_v27, 0  ;;  %vm1424_vm12 = vcmp.lt.s32.totalorder %v986_v27, 0  ;;  %v1041_v1 = vsub.s32 %v17659_v19, %v1040_v61  ;;  %v17804_v23 = vsel %vm17749_vm0, 1.0, %v21321_v6 }
 0x3c3   : > { %vm1713_vm11 = vmand %vm1617_vm4, %vm1665_vm5  ;;  %21668 = vst [vmem:[#allocation23_spill] sm:$0xff] %v17804_v23  ;;  %v17809_v31 = vsel %vm17760_vm1, 1.0, %v21321_v6  ;;  %v1520_v62 = vadd.s32 24, %v986_v27  ;;  %v804_v34 = vadd.s32 136, %v17456_v4  ;;  %v17817_v19 = vsel %vm17771_vm14, 1.0, %v21321_v6 }
 0x3c4   : > { %21669 = vst [vmem:[#allocation24_spill] sm:$0xff] %v17809_v31  ;;  %vm1474_vm6 = vmand %vm1426_vm2, %vm1378_vm7  ;;  %v17822_v47 = vsel %vm17781_vm15, 1.0, %v21321_v6  ;;  %v1018_v32 = vmul.u32 24, %v1017_v21  ;;  %v1050_v14 = vshrl.u32 %v17738_v3, 4  ;;  %v17826_v13 = vsel %vm1713_vm11, 1.0, %v21321_v6 }
 0x3c5   : > { %21670 = vst [vmem:[#allocation25_spill] sm:$0xff] %v17817_v19  ;;  %21671 = vst [vmem:[#allocation26_spill] sm:$0xff] %v17822_v47  ;;  %v1567_v45 = vsel %vm17792_vm10, %v1519_v55, %v975_v11  ;;  %v809_v49 = vadd.s32 176, %v17456_v4  ;;  %v807_v38 = vadd.s32 160, %v17456_v4  ;;  %v1570_v60 = vsel %vm1474_vm6, %v1522_v0, %v1008_v56 }
 0x3c6   : > { %vm1472_vm13 = vmand %vm1424_vm12, %vm1376_vm9  ;;  %21672 = vst [vmem:[#allocation27_spill] sm:$0xff] %v17826_v13  ;;  %vm1381_vm0 = vcmp.ne.s32.totalorder %v1041_v1, 0  ;;  %vm1429_vm1 = vcmp.lt.s32.totalorder %v1041_v1, 0  ;;  %v1051_v7 = vmul.u32 24, %v1050_v14  ;;  %vm1615_vm8 = vcmp.ge.s32.totalorder %v1567_v45, 1 }
 0x3c7   : > { %v1568_v36 = vsel %vm1472_vm13, %v1520_v62, %v986_v27  ;;  %v17832_v8 = vmul.u32.u64.low 2863311531, %v804_v34  ;;  %v17833_v24 = vmul.u32.u64.high 2863311531, %v804_v34, %v17832_v8  ;;  %vm1663_vm3 = vcmp.le.s32.totalorder %v1567_v45, 16  ;;  %vm1477_vm14 = vmand %vm1429_vm1, %vm1381_vm0 }
 0x3c8   : > { %v1525_v25 = vadd.s32 24, %v1041_v1  ;;  %v1019_v26 = vsub.s32 %v17668_v37, %v1018_v32  ;;  %v17839_v52 = vmul.u32.u64.low 2863311531, %v809_v49  ;;  %v17840_v29 = vmul.u32.u64.high 2863311531, %v809_v49, %v17839_v52  ;;  %vm17860_vm9 = vmand %vm1615_vm8, %vm1663_vm3 }
 0x3c9   : > { %v17842_v22 = vmul.u32.u64.low 2863311531, %v807_v38  ;;  %v17843_v18 = vmul.u32.u64.high 2863311531, %v807_v38, %v17842_v22  ;;  %vm1618_vm4 = vcmp.ge.s32.totalorder %v1570_v60, 1  ;;  %vm1666_vm5 = vcmp.le.s32.totalorder %v1570_v60, 16 }
 0x3ca   : > { %vm1616_vm15 = vcmp.ge.s32.totalorder %v1568_v36, 1  ;;  %v1052_v58 = vsub.s32 %v17708_v42, %v1051_v7  ;;  %v1028_v28 = vshrl.u32 %v17833_v24, 4  ;;  %v17852_v37 = vadd.s32 168, %v17456_v4  ;;  %vm17871_vm11 = vmand %vm1618_vm4, %vm1666_vm5 }
 0x3cb   : > { %v17848_v63 = vmul.u32.u64.low 2863311531, %v17836_v51  ;;  %v17849_v43 = vmul.u32.u64.high 2863311531, %v17836_v51, %v17848_v63  ;;  %vm1664_vm7 = vcmp.le.s32.totalorder %v1568_v36, 16  ;;  %v1573_v53 = vsel %vm1477_vm14, %v1525_v25, %v1041_v1 }
 0x3cc   : > { %vm1379_vm2 = vcmp.ne.s32.totalorder %v1019_v26, 0  ;;  %vm1427_vm10 = vcmp.lt.s32.totalorder %v1019_v26, 0  ;;  %v1523_v54 = vadd.s32 24, %v1019_v26  ;;  %v1029_v11 = vmul.u32 24, %v1028_v28  ;;  %vm17878_vm13 = vmand %vm1616_vm15, %vm1664_vm7 }
 0x3cd   : > { %v1083_v42 = vshrl.u32 %v17840_v29, 4  ;;  %vm1382_vm12 = vcmp.ne.s32.totalorder %v1052_v58, 0  ;;  %v1061_v57 = vshrl.u32 %v17843_v18, 4  ;;  %vm1430_vm6 = vcmp.lt.s32.totalorder %v1052_v58, 0  ;;  %vm17888_vm8 = vmand %vm1427_vm10, %vm1379_vm2 }
 0x3ce   : > { %v17866_v48 = vmul.u32.u64.low 2863311531, %v17852_v37  ;;  %v17867_v3 = vmul.u32.u64.high 2863311531, %v17852_v37, %v17866_v48  ;;  %v1030_v16 = vsub.s32 %v804_v34, %v1029_v11  ;;  %v1094_v61 = vshrl.u32 %v17849_v43, 4  ;;  %vm17893_vm14 = vmand %vm1430_vm6, %vm1382_vm12 }
 0x3cf   : > { %v1084_v5 = vmul.u32 24, %v1083_v42  ;;  %vm1621_vm0 = vcmp.ge.s32.totalorder %v1573_v53, 1  ;;  %v1062_v27 = vmul.u32 24, %v1061_v57  ;;  %vm1669_vm1 = vcmp.le.s32.totalorder %v1573_v53, 16 }
 0x3d0   : > { %v17883_v50 = vmul.u32.u64.low 2863311531, %v17855_v10  ;;  %v17884_v21 = vmul.u32.u64.high 2863311531, %v17855_v10, %v17883_v50  ;;  %v1526_v55 = vadd.s32 24, %v1052_v58  ;;  %vm1380_vm3 = vcmp.ne.s32.totalorder %v1030_v16, 0  ;;  %vm1717_vm7 = vmand %vm1621_vm0, %vm1669_vm1 }
 0x3d1   : > { %v1085_v0 = vsub.s32 %v809_v49, %v1084_v5  ;;  %vm1428_vm4 = vcmp.lt.s32.totalorder %v1030_v16, 0  ;;  %v1063_v62 = vsub.s32 %v807_v38, %v1062_v27  ;;  %v1095_v34 = vmul.u32 24, %v1094_v61 }
 0x3d2   : > { %v1072_v32 = vshrl.u32 %v17867_v3, 4  ;;  %v17901_v14 = vsel %vm17860_vm9, 1.0, %v21321_v6  ;;  %v17906_v45 = vsel %vm17871_vm11, 1.0, %v21321_v6  ;;  %v1571_v49 = vsel %vm17888_vm8, %v1523_v54, %v1019_v26  ;;  %vm1476_vm9 = vmand %vm1428_vm4, %vm1380_vm3 }
 0x3d3   : > { %21683 = vst [vmem:[#allocation28_spill] sm:$0xff] %v17901_v14  ;;  %21684 = vst [vmem:[#allocation29_spill] sm:$0xff] %v17906_v45  ;;  %vm1385_vm5 = vcmp.ne.s32.totalorder %v1085_v0, 0  ;;  %vm1433_vm15 = vcmp.lt.s32.totalorder %v1085_v0, 0  ;;  %v1524_v38 = vadd.s32 24, %v1030_v16  ;;  %vm1383_vm2 = vcmp.ne.s32.totalorder %v1063_v62, 0 }
 0x3d4   : > { %vm1431_vm10 = vcmp.lt.s32.totalorder %v1063_v62, 0  ;;  %v17915_v60 = vsel %vm17878_vm13, 1.0, %v21321_v6  ;;  %v1574_v7 = vsel %vm17893_vm14, %v1526_v55, %v1052_v58  ;;  %v1096_v36 = vsub.s32 %v17836_v51, %v1095_v34  ;;  %vm17923_vm12 = vmand %vm1433_vm15, %vm1385_vm5 }
 0x3d5   : > { %21685 = vst [vmem:[#allocation30_spill] sm:$0xff] %v17915_v60  ;;  %v811_v8 = vadd.s32 192, %v17456_v4  ;;  %v1529_v25 = vadd.s32 24, %v1085_v0  ;;  %v1527_v26 = vadd.s32 24, %v1063_v62  ;;  %v1073_v52 = vmul.u32 24, %v1072_v32  ;;  %vm1479_vm6 = vmand %vm1431_vm10, %vm1383_vm2 }
 0x3d6   : > { %v1127_v29 = vshrl.u32 %v17884_v21, 4  ;;  %v17929_v22 = vsel %vm1717_vm7, 1.0, %v21321_v6  ;;  %vm1619_vm11 = vcmp.ge.s32.totalorder %v1571_v49, 1  ;;  %vm1386_vm13 = vcmp.ne.s32.totalorder %v1096_v36, 0 }
 0x3d7   : > { %21688 = vst [vmem:[#allocation31_spill] sm:$0xff] %v17929_v22  ;;  %vm1434_vm0 = vcmp.lt.s32.totalorder %v1096_v36, 0  ;;  %vm1667_vm1 = vcmp.le.s32.totalorder %v1571_v49, 16  ;;  %v1572_v51 = vsel %vm1476_vm9, %v1524_v38, %v1030_v16  ;;  %v1530_v18 = vadd.s32 24, %v1096_v36 }
 0x3d8   : > { %v814_v58 = vadd.s32 216, %v17456_v4  ;;  %vm1622_vm8 = vcmp.ge.s32.totalorder %v1574_v7, 1  ;;  %vm1482_vm3 = vmand %vm1434_vm0, %vm1386_vm13  ;;  %v1128_v28 = vmul.u32 24, %v1127_v29  ;;  %vm1670_vm14 = vcmp.le.s32.totalorder %v1574_v7, 16 }
 0x3d9   : > { %v17932_v63 = vmul.u32.u64.low 2863311531, %v811_v8  ;;  %v17933_v43 = vmul.u32.u64.high 2863311531, %v811_v8, %v17932_v63  ;;  %v1577_v53 = vsel %vm17923_vm12, %v1529_v25, %v1085_v0  ;;  %v1575_v54 = vsel %vm1479_vm6, %v1527_v26, %v1063_v62  ;;  %vm17973_vm6 = vmand %vm1619_vm11, %vm1667_vm1 }
 0x3da   : > { %v1074_v11 = vsub.s32 %v17852_v37, %v1073_v52  ;;  %vm1620_vm4 = vcmp.ge.s32.totalorder %v1572_v51, 1  ;;  %v17939_v42 = vadd.s32 200, %v17456_v4  ;;  %v17942_v56 = vadd.s32 240, %v17456_v4 }
 0x3db   : > { %v17945_v57 = vadd.s32 224, %v17456_v4  ;;  %vm1668_vm5 = vcmp.le.s32.totalorder %v1572_v51, 16  ;;  %v1578_v48 = vsel %vm1482_vm3, %v1530_v18, %v1096_v36  ;;  %vm1625_vm15 = vcmp.ge.s32.totalorder %v1577_v53, 1 }
 0x3dc   : > { %v17947_v3 = vmul.u32.u64.low 2863311531, %v814_v58  ;;  %v17948_v40 = vmul.u32.u64.high 2863311531, %v814_v58, %v17947_v3  ;;  %vm1673_vm7 = vcmp.le.s32.totalorder %v1577_v53, 16  ;;  %vm1623_vm2 = vcmp.ge.s32.totalorder %v1575_v54, 1  ;;  %vm17994_vm11 = vmand %vm1620_vm4, %vm1668_vm5 }
 0x3dd   : > { %v1129_v37 = vsub.s32 %v17855_v10, %v1128_v28  ;;  %vm1671_vm10 = vcmp.le.s32.totalorder %v1575_v54, 16  ;;  %vm1384_vm9 = vcmp.ne.s32.totalorder %v1074_v11, 0  ;;  %vm1432_vm12 = vcmp.lt.s32.totalorder %v1074_v11, 0  ;;  %vm18011_vm4 = vmand %vm1625_vm15, %vm1673_vm7 }
 0x3de   : > { %v1105_v16 = vshrl.u32 %v17933_v43, 4  ;;  %v17953_v5 = vmul.u32.u64.low 2863311531, %v17939_v42  ;;  %v17954_v61 = vmul.u32.u64.high 2863311531, %v17939_v42, %v17953_v5  ;;  %v17957_v12 = vadd.s32 248, %v17456_v4  ;;  %vm17962_vm0 = vmand %vm1432_vm12, %vm1384_vm9 }
 0x3df   : > { %v1528_v27 = vadd.s32 24, %v1074_v11  ;;  %v17960_v21 = vadd.s32 232, %v17456_v4  ;;  %vm1389_vm3 = vcmp.ne.s32.totalorder %v1129_v37, 0  ;;  %v1138_v46 = vshrl.u32 %v17948_v40, 4  ;;  %vm17983_vm9 = vmand %vm1622_vm8, %vm1670_vm14 }
 0x3e0   : > { %v1106_v50 = vmul.u32 24, %v1105_v16  ;;  %v17968_v55 = vmul.u32.u64.low 2863311531, %v17942_v56  ;;  %v17969_v0 = vmul.u32.u64.high 2863311531, %v17942_v56, %v17968_v55  ;;  %vm1437_vm13 = vcmp.lt.s32.totalorder %v1129_v37, 0  ;;  %vm18034_vm12 = vmand %vm1623_vm2, %vm1671_vm10 }
 0x3e1   : > { %v17978_v34 = vmul.u32.u64.low 2863311531, %v17945_v57  ;;  %v17979_v32 = vmul.u32.u64.high 2863311531, %v17945_v57, %v17978_v34  ;;  %v1139_v36 = vmul.u32 24, %v1138_v46  ;;  %v1116_v24 = vshrl.u32 %v17954_v61, 4  ;;  %vm18001_vm14 = vmand %vm1437_vm13, %vm1389_vm3 }
 0x3e2   : > { %v1107_v62 = vsub.s32 %v811_v8, %v1106_v50  ;;  %v17989_v49 = vmul.u32.u64.low 2863311531, %v17957_v12  ;;  %v17990_v25 = vmul.u32.u64.high 2863311531, %v17957_v12, %v17989_v49  ;;  %v1576_v7 = vsel %vm17962_vm0, %v1528_v27, %v1074_v11 }
 0x3e3   : > { %v1533_v26 = vadd.s32 24, %v1129_v37  ;;  %v1140_v18 = vsub.s32 %v814_v58, %v1139_v36  ;;  %v1171_v28 = vshrl.u32 %v17969_v0, 4  ;;  %v18007_v51 = vadd.s32 272, %v17456_v4 }
 0x3e4   : > { %vm1387_vm1 = vcmp.ne.s32.totalorder %v1107_v62, 0  ;;  %vm1435_vm8 = vcmp.lt.s32.totalorder %v1107_v62, 0  ;;  %v1531_v29 = vadd.s32 24, %v1107_v62  ;;  %v1117_v43 = vmul.u32 24, %v1116_v24 }
 0x3e5   : > { %v1149_v11 = vshrl.u32 %v17979_v32, 4  ;;  %v18017_v3 = vmul.u32.u64.low 2863311531, %v17960_v21  ;;  %v18018_v40 = vmul.u32.u64.high 2863311531, %v17960_v21, %v18017_v3  ;;  %v18023_v58 = vsel %vm17973_vm6, 1.0, %v21321_v6  ;;  %vm1483_vm7 = vmand %vm1435_vm8, %vm1387_vm1 }
 0x3e6   : > { %21701 = vst [vmem:[#allocation18_spill] sm:$0xff] %v18023_v58  ;;  %v18028_v53 = vsel %vm17983_vm9, 1.0, %v21321_v6  ;;  %vm1624_vm5 = vcmp.ge.s32.totalorder %v1576_v7, 1  ;;  %vm1672_vm15 = vcmp.le.s32.totalorder %v1576_v7, 16  ;;  %v1581_v5 = vsel %vm18001_vm14, %v1533_v26, %v1129_v37 }
 0x3e7   : > { %21702 = vst [vmem:[#allocation19_spill] sm:$0xff] %v18028_v53  ;;  %vm1390_vm6 = vcmp.ne.s32.totalorder %v1140_v18, 0  ;;  %vm1438_vm13 = vcmp.lt.s32.totalorder %v1140_v18, 0  ;;  %v1172_v61 = vmul.u32 24, %v1171_v28  ;;  %v18043_v27 = vsel %vm17994_vm11, 1.0, %v21321_v6  ;;  %vm18056_vm2 = vmand %vm1624_vm5, %vm1672_vm15 }
 0x3e8   : > { %21705 = vst [vmem:[#allocation32_spill] sm:$0xff] %v18043_v27  ;;  %vm21706_vm0 = vcmp.le.s32.totalorder %v1578_v48, 16  ;;  %vm21707_vm3 = vcmp.ge.s32.totalorder %v1578_v48, 1  ;;  %v1182_v54 = vshrl.u32 %v17990_v25, 4  ;;  %v1579_v55 = vsel %vm1483_vm7, %v1531_v29, %v1107_v62  ;;  %vm1486_vm1 = vmand %vm1438_vm13, %vm1390_vm6 }
 0x3e9   : > { %vm18047_vm9 = vmand %vm21707_vm3, %vm21706_vm0  ;;  %v18053_v10 = vmul.u32.u64.low 2863311531, %v18007_v51  ;;  %v18054_v46 = vmul.u32.u64.high 2863311531, %v18007_v51, %v18053_v10  ;;  %v1534_v0 = vadd.s32 24, %v1140_v18  ;;  %v1118_v1 = vsub.s32 %v17939_v42, %v1117_v43 }
 0x3ea   : > { %v1150_v34 = vmul.u32 24, %v1149_v11  ;;  %v18064_v48 = vsel %vm18011_vm4, 1.0, %v21321_v6  ;;  %vm1629_vm10 = vcmp.ge.s32.totalorder %v1581_v5, 1  ;;  %vm1677_vm11 = vcmp.le.s32.totalorder %v1581_v5, 16 }
 0x3eb   : > { %21712 = vst [vmem:[#allocation33_spill] sm:$0xff] %v18064_v48  ;;  %v1173_v32 = vsub.s32 %v17942_v56, %v1172_v61  ;;  %v18072_v62 = vsel %vm18034_vm12, 1.0, %v21321_v6  ;;  %v1183_v38 = vmul.u32 24, %v1182_v54  ;;  %v1160_v42 = vshrl.u32 %v18018_v40, 4  ;;  %vm1725_vm14 = vmand %vm1629_vm10, %vm1677_vm11 }
 0x3ec   : > { %21713 = vst [vmem:[#allocation34_spill] sm:$0xff] %v18072_v62  ;;  %v819_v36 = vadd.s32 256, %v17456_v4  ;;  %v18079_v24 = vsel %vm18047_vm9, 1.0, %v21321_v6  ;;  %v18084_v49 = vsel %vm18056_vm2, 1.0, %v21321_v6  ;;  %vm1627_vm8 = vcmp.ge.s32.totalorder %v1579_v55, 1 }
 0x3ed   : > { %21714 = vst [vmem:[#allocation35_spill] sm:$0xff] %v18079_v24  ;;  %21715 = vst [vmem:[#allocation36_spill] sm:$0xff] %v18084_v49  ;;  %v18087_v56 = vadd.s32 280, %v17456_v4  ;;  %vm1675_vm4 = vcmp.le.s32.totalorder %v1579_v55, 16  ;;  %v1582_v25 = vsel %vm1486_vm1, %v1534_v0, %v1140_v18  ;;  %vm1388_vm5 = vcmp.ne.s32.totalorder %v1118_v1, 0 }
 0x3ee   : > { %v1151_v8 = vsub.s32 %v17945_v57, %v1150_v34  ;;  %vm1436_vm15 = vcmp.lt.s32.totalorder %v1118_v1, 0  ;;  %vm1393_vm7 = vcmp.ne.s32.totalorder %v1173_v32, 0  ;;  %v1184_v7 = vsub.s32 %v17957_v12, %v1183_v38  ;;  %vm18099_vm6 = vmand %vm1627_vm8, %vm1675_vm4 }
 0x3ef   : > { %v1161_v26 = vmul.u32 24, %v1160_v42  ;;  %vm1441_vm12 = vcmp.lt.s32.totalorder %v1173_v32, 0  ;;  %v1215_v52 = vshrl.u32 %v18054_v46, 4  ;;  %v18096_v63 = vsel %vm1725_vm14, 1.0, %v21321_v6  ;;  %vm1484_vm3 = vmand %vm1436_vm15, %vm1388_vm5 }
 0x3f0   : > { %v18092_v29 = vmul.u32.u64.low 2863311531, %v819_v36  ;;  %v18093_v28 = vmul.u32.u64.high 2863311531, %v819_v36, %v18092_v29  ;;  %21716 = vst [vmem:[#allocation37_spill] sm:$0xff] %v18096_v63  ;;  %vm1630_vm13 = vcmp.ge.s32.totalorder %v1582_v25, 1  ;;  %vm1678_vm0 = vcmp.le.s32.totalorder %v1582_v25, 16  ;;  %vm1489_vm10 = vmand %vm1441_vm12, %vm1393_vm7 }
 0x3f1   : > { %v1532_v57 = vadd.s32 24, %v1118_v1  ;;  %v1537_v12 = vadd.s32 24, %v1173_v32  ;;  %vm1391_vm9 = vcmp.ne.s32.totalorder %v1151_v8, 0  ;;  %vm1439_vm2 = vcmp.lt.s32.totalorder %v1151_v8, 0  ;;  %vm18108_vm1 = vmand %vm1630_vm13, %vm1678_vm0 }
 0x3f2   : > { %v18104_v43 = vadd.s32 264, %v17456_v4  ;;  %v1535_v11 = vadd.s32 24, %v1151_v8  ;;  %vm1394_vm11 = vcmp.ne.s32.totalorder %v1184_v7, 0  ;;  %v1162_v3 = vsub.s32 %v17960_v21, %v1161_v26  ;;  %vm1487_vm14 = vmand %vm1439_vm2, %vm1391_vm9 }
 0x3f3   : > { %v1216_v40 = vmul.u32 24, %v1215_v52  ;;  %vm1442_vm8 = vcmp.lt.s32.totalorder %v1184_v7, 0  ;;  %v1193_v5 = vshrl.u32 %v18093_v28, 4  ;;  %v18117_v54 = vsel %vm1484_vm3, %v1532_v57, %v1118_v1 }
 0x3f4   : > { %v18114_v61 = vmul.u32.u64.low 2863311531, %v18087_v56  ;;  %v18115_v50 = vmul.u32.u64.high 2863311531, %v18087_v56, %v18114_v61  ;;  %vm1392_vm4 = vcmp.ne.s32.totalorder %v1162_v3, 0  ;;  %vm1440_vm5 = vcmp.lt.s32.totalorder %v1162_v3, 0  ;;  %vm18131_vm15 = vmand %vm1442_vm8, %vm1394_vm11 }
 0x3f5   : > { %v18120_v10 = vadd.s32 304, %v17456_v4  ;;  %v18122_v21 = vsel %vm1489_vm10, %v1537_v12, %v1173_v32  ;;  %v1538_v46 = vadd.s32 24, %v1184_v7  ;;  %v1217_v37 = vsub.s32 %v18007_v51, %v1216_v40  ;;  %vm1488_vm7 = vmand %vm1440_vm5, %vm1392_vm4 }
 0x3f6   : > { %v1194_v55 = vmul.u32 24, %v1193_v5  ;;  %v18128_v0 = vsel %vm18099_vm6, 1.0, %v21321_v6  ;;  %v1536_v34 = vadd.s32 24, %v1162_v3  ;;  %v18142_v51 = vsel %vm18108_vm1, 1.0, %v21321_v6 }
 0x3f7   : > { %21721 = vst [vmem:[#allocation38_spill] sm:$0xff] %v18128_v0  ;;  %v18136_v38 = vmul.u32.u64.low 2863311531, %v18104_v43  ;;  %v18137_v42 = vmul.u32.u64.high 2863311531, %v18104_v43, %v18136_v38  ;;  %21724 = vst [vmem:[#allocation39_spill] sm:$0xff] %v18142_v51  ;;  %v18144_v32 = vsel %vm1487_vm14, %v1535_v11, %v1151_v8  ;;  %vm1397_vm12 = vcmp.ne.s32.totalorder %v1217_v37, 0 }
 0x3f8   : > { %v18147_v25 = vadd.s32 288, %v17456_v4  ;;  %vm1628_vm6 = vcmp.ge.s32.totalorder %v18117_v54, 1  ;;  %vm1676_vm13 = vcmp.le.s32.totalorder %v18117_v54, 16  ;;  %vm1633_vm0 = vcmp.ge.s32.totalorder %v18122_v21, 1 }
 0x3f9   : > { %vm1681_vm3 = vcmp.le.s32.totalorder %v18122_v21, 16  ;;  %vm1445_vm9 = vcmp.lt.s32.totalorder %v1217_v37, 0  ;;  %v1195_v26 = vsub.s32 %v819_v36, %v1194_v55  ;;  %v1226_v52 = vshrl.u32 %v18115_v50, 4 }
 0x3fa   : > { %v18156_v8 = vsel %vm18131_vm15, %v1538_v46, %v1184_v7  ;;  %v1541_v29 = vadd.s32 24, %v1217_v37  ;;  %v18159_v28 = vmul.u32.u64.low 2863311531, %v18120_v10  ;;  %v18160_v18 = vmul.u32.u64.high 2863311531, %v18120_v10, %v18159_v28  ;;  %vm18166_vm10 = vmand %vm1445_vm9, %vm1397_vm12 }
 0x3fb   : > { %vm1631_vm2 = vcmp.ge.s32.totalorder %v18144_v32, 1  ;;  %v18163_v57 = vsel %vm1488_vm7, %v1536_v34, %v1162_v3  ;;  %vm1395_vm11 = vcmp.ne.s32.totalorder %v1195_v26, 0  ;;  %vm1443_vm1 = vcmp.lt.s32.totalorder %v1195_v26, 0 }
 0x3fc   : > { %v18171_v36 = vadd.s32 312, %v17456_v4  ;;  %vm1679_vm8 = vcmp.le.s32.totalorder %v18144_v32, 16  ;;  %v1539_v7 = vadd.s32 24, %v1195_v26  ;;  %v1227_v11 = vmul.u32 24, %v1226_v52  ;;  %vm1491_vm5 = vmand %vm1443_vm1, %vm1395_vm11 }
 0x3fd   : > { %v1204_v40 = vshrl.u32 %v18137_v42, 4  ;;  %vm1634_vm14 = vcmp.ge.s32.totalorder %v18156_v8, 1  ;;  %vm1682_vm4 = vcmp.le.s32.totalorder %v18156_v8, 16  ;;  %v18182_v5 = vadd.s32 296, %v17456_v4 }
 0x3fe   : > { %v18178_v3 = vmul.u32.u64.low 2863311531, %v18147_v25  ;;  %v18179_v16 = vmul.u32.u64.high 2863311531, %v18147_v25, %v18178_v3  ;;  %v1589_v61 = vsel %vm18166_vm10, %v1541_v29, %v1217_v37  ;;  %v1228_v50 = vsub.s32 %v18087_v56, %v1227_v11 }
 0x3ff   : > { %v18190_v46 = vadd.s32 336, %v17456_v4  ;;  %v1205_v55 = vmul.u32 24, %v1204_v40  ;;  %v1259_v1 = vshrl.u32 %v18160_v18, 4  ;;  %v1587_v42 = vsel %vm1491_vm5, %v1539_v7, %v1195_v26 }
 0x400   : > { %v18194_v34 = vmul.u32.u64.low 2863311531, %v18171_v36  ;;  %v18195_v38 = vmul.u32.u64.high 2863311531, %v18171_v36, %v18194_v34  ;;  %vm1398_vm12 = vcmp.ne.s32.totalorder %v1228_v50, 0  ;;  %vm1446_vm9 = vcmp.lt.s32.totalorder %v1228_v50, 0 }
 0x401   : > { %v1542_v52 = vadd.s32 24, %v1228_v50  ;;  %vm1637_vm11 = vcmp.ge.s32.totalorder %v1589_v61, 1  ;;  %vm1494_vm1 = vmand %vm1446_vm9, %vm1398_vm12  ;;  %v1206_v37 = vsub.s32 %v18104_v43, %v1205_v55  ;;  %v1260_v29 = vmul.u32 24, %v1259_v1 }
 0x402   : > { %v1237_v56 = vshrl.u32 %v18179_v16, 4  ;;  %vm1685_vm10 = vcmp.le.s32.totalorder %v1589_v61, 16  ;;  %v18200_v28 = vmul.u32.u64.low 2863311531, %v18182_v5  ;;  %v18201_v12 = vmul.u32.u64.high 2863311531, %v18182_v5, %v18200_v28  ;;  %vm18210_vm12 = vmand %vm1628_vm6, %vm1676_vm13 }
 0x403   : > { %v18204_v18 = vadd.s32 320, %v17456_v4  ;;  %v1590_v26 = vsel %vm1494_vm1, %v1542_v52, %v1228_v50  ;;  %vm1396_vm5 = vcmp.ne.s32.totalorder %v1206_v37, 0  ;;  %vm1444_vm7 = vcmp.lt.s32.totalorder %v1206_v37, 0  ;;  %vm18218_vm9 = vmand %vm1633_vm0, %vm1681_vm3 }
 0x404   : > { %v1540_v11 = vadd.s32 24, %v1206_v37  ;;  %v1261_v40 = vsub.s32 %v18120_v10, %v1260_v29  ;;  %v1238_v3 = vmul.u32 24, %v1237_v56  ;;  %v1270_v16 = vshrl.u32 %v18195_v38, 4  ;;  %vm1492_vm15 = vmand %vm1444_vm7, %vm1396_vm5 }
 0x405   : > { %v18225_v54 = vmul.u32.u64.low 2863311531, %v18190_v46  ;;  %v18226_v50 = vmul.u32.u64.high 2863311531, %v18190_v46, %v18225_v54  ;;  %v18229_v55 = vadd.s32 344, %v17456_v4  ;;  %vm18235_vm6 = vmand %vm1631_vm2, %vm1679_vm8  ;;  %v18241_v52 = vadd.s32 328, %v17456_v4 }
 0x406   : > { %v1588_v10 = vsel %vm1492_vm15, %v1540_v11, %v1206_v37  ;;  %vm1401_vm13 = vcmp.ne.s32.totalorder %v1261_v40, 0  ;;  %vm1449_vm0 = vcmp.lt.s32.totalorder %v1261_v40, 0  ;;  %v1545_v1 = vadd.s32 24, %v1261_v40  ;;  %vm18247_vm2 = vmand %vm1634_vm14, %vm1682_vm4 }
 0x407   : > { %vm1497_vm7 = vmand %vm1449_vm0, %vm1401_vm13  ;;  %v1239_v34 = vsub.s32 %v18147_v25, %v1238_v3  ;;  %v1271_v38 = vmul.u32 24, %v1270_v16  ;;  %v21733_v32 = vmov 0  ;;  %v1248_v29 = vshrl.u32 %v18201_v12, 4 }
 0x408   : > { %v21734_v32 = vsel %vm18247_vm2, 4294967295, %v21733_v32  ;;  %v1593_v37 = vsel %vm1497_vm7, %v1545_v1, %v1261_v40  ;;  %v18253_v56 = vmul.u32.u64.low 2863311531, %v18204_v18  ;;  %v18254_v28 = vmul.u32.u64.high 2863311531, %v18204_v18, %v18253_v56  ;;  %vm18266_vm7 = vmand %vm1637_vm11, %vm1685_vm10 }
 0x409   : > { %vm21735_vm8 = vcmp.le.s32.totalorder %v18163_v57, 16  ;;  %vm21736_vm15 = vcmp.ge.s32.totalorder %v18163_v57, 1  ;;  %v21737_v25 = vmov 0  ;;  %vm1399_vm0 = vcmp.ne.s32.totalorder %v1239_v34, 0 }
 0x40a   : > { %vm18260_vm5 = vmand %vm21736_vm15, %vm21735_vm8  ;;  %v21739_v8 = vmov 0  ;;  %vm1447_vm3 = vcmp.lt.s32.totalorder %v1239_v34, 0  ;;  %v1543_v12 = vadd.s32 24, %v1239_v34  ;;  %v1272_v11 = vsub.s32 %v18171_v36, %v1271_v38 }
 0x40b   : > { %v21738_v25 = vsel %vm18260_vm5, 4294967295, %v21737_v25  ;;  %v21740_v8 = vsel %vm18266_vm7, 4294967295, %v21739_v8  ;;  %v1249_v40 = vmul.u32 24, %v1248_v29  ;;  %vm1495_vm8 = vmand %vm1447_vm3, %vm1399_vm0  ;;  %v1303_v57 = vshrl.u32 %v18226_v50, 4 }
 0x40c   : > { %v18273_v3 = vmul.u32.u64.low 2863311531, %v18229_v55  ;;  %v18274_v16 = vmul.u32.u64.high 2863311531, %v18229_v55, %v18273_v3  ;;  %vm21741_vm15 = vcmp.le.s32.totalorder %v1587_v42, 16  ;;  %vm21742_vm14 = vcmp.ge.s32.totalorder %v1587_v42, 1 }
 0x40d   : > { %vm18278_vm4 = vmand %vm21742_vm14, %vm21741_vm15  ;;  %v1591_v54 = vsel %vm1495_vm8, %v1543_v12, %v1239_v34  ;;  %vm1402_vm11 = vcmp.ne.s32.totalorder %v1272_v11, 0  ;;  %vm1450_vm10 = vcmp.lt.s32.totalorder %v1272_v11, 0  ;;  %v1546_v1 = vadd.s32 24, %v1272_v11  ;;  %v18342_v3 = vld [vmem:[%s21749_s3] ss:$0 sm:$0xff] }
 0x40e   : > { %vm1689_vm13 = vcmp.le.s32.totalorder %v1593_v37, 16  ;;  %vm1639_vm7 = vcmp.ge.s32.totalorder %v1591_v54, 1  ;;  %vm1687_vm1 = vcmp.le.s32.totalorder %v1591_v54, 16  ;;  %vm1498_vm3 = vmand %vm1450_vm10, %vm1402_vm11  ;;  %v1250_v36 = vsub.s32 %v18182_v5, %v1249_v40 }
 0x40f   : > { %vm21745_vm0 = vcmp.le.s32.totalorder %v1590_v26, 16  ;;  %vm21746_vm5 = vcmp.ge.s32.totalorder %v1590_v26, 1  ;;  %v1304_v42 = vmul.u32 24, %v1303_v57  ;;  %v1281_v38 = vshrl.u32 %v18254_v28, 4 }
 0x410   : > { %vm18285_vm2 = vmand %vm21746_vm5, %vm21745_vm0  ;;  %v18291_v34 = vmul.u32.u64.low 2863311531, %v18241_v52  ;;  %v18292_v29 = vmul.u32.u64.high 2863311531, %v18241_v52, %v18291_v34  ;;  %v18297_v56 = vsel %vm18210_vm12, 1.0, %v21321_v6  ;;  %v18302_v5 = vsel %vm18218_vm9, 1.0, %v21321_v6 }
 0x411   : > { %21750 = vst [vmem:[#allocation40_spill] sm:$0xff] %v18297_v56  ;;  %21751 = vst [vmem:[#allocation41_spill] sm:$0xff] %v18302_v5  ;;  %v18307_v26 = vsel %vm18235_vm6, 1.0, %v21321_v6  ;;  %vm21753_vm5 = vcmp.le.s32.totalorder %v1588_v10, 16  ;;  %vm21754_vm14 = vcmp.ge.s32.totalorder %v1588_v10, 1  ;;  %vm1400_vm15 = vcmp.ne.s32.totalorder %v1250_v36, 0 }
 0x412   : > { %21752 = vst [vmem:[#allocation42_spill] sm:$0xff] %v18307_v26  ;;  %vm18311_vm8 = vmand %vm21754_vm14, %vm21753_vm5  ;;  %vm21757_vm12 = vcmp.ge.s32.totalorder %v1593_v37, 1  ;;  %v1594_v7 = vsel %vm1498_vm3, %v1546_v1, %v1272_v11  ;;  %vm1448_vm9 = vcmp.lt.s32.totalorder %v1250_v36, 0  ;;  %v1282_v12 = vmul.u32 24, %v1281_v38 }
 0x413   : > { %vm18317_vm11 = vmand %vm21757_vm12, %vm1689_vm13  ;;  %v18322_v21 = vadd.s32 368, %v17456_v4  ;;  %vm21760_vm6 = vnez %v21734_v32  ;;  %vm21762_vm10 = vnez %v21738_v25  ;;  %v1544_v11 = vadd.s32 24, %v1250_v36 }
 0x414   : > { %v18327_v10 = vsel %vm21760_vm6, 1.0, %v21321_v6  ;;  %v18332_v40 = vsel %vm21762_vm10, 1.0, %v21321_v6  ;;  %vm18336_vm13 = vmand %vm1639_vm7, %vm1687_vm1  ;;  %v1314_v57 = vshrl.u32 %v18274_v16, 4  ;;  %vm21766_vm3 = vnez %v21740_v8 }
 0x415   : > { %21761 = vst [vmem:[#allocation43_spill] sm:$0xff] %v18327_v10  ;;  %21763 = vst [vmem:[#allocation44_spill] sm:$0xff] %v18332_v40  ;;  %v18347_v32 = vsel %vm21766_vm3, 1.0, %v21321_v6  ;;  %v18352_v25 = vsel %vm18278_vm4, 1.0, %v21321_v6  ;;  %v18357_v54 = vsel %vm18285_vm2, 1.0, %v21321_v6  ;;  %v1305_v16 = vsub.s32 %v18190_v46, %v1304_v42 }
 0x416   : > { %21767 = vst [vmem:[#allocation45_spill] sm:$0xff] %v18347_v32  ;;  %21768 = vst [vmem:[#allocation46_spill] sm:$0xff] %v18352_v25  ;;  %vm1642_vm7 = vcmp.ge.s32.totalorder %v1594_v7, 1  ;;  %vm1690_vm0 = vcmp.le.s32.totalorder %v1594_v7, 16  ;;  %v1283_v8 = vsub.s32 %v18204_v18, %v1282_v12  ;;  %v1315_v1 = vmul.u32 24, %v1314_v57 }
 0x417   : > { %21769 = vst [vmem:[#allocation47_spill] sm:$0xff] %v18357_v54  ;;  %vm1496_vm1 = vmand %vm1448_vm9, %vm1400_vm15  ;;  %v18365_v61 = vsel %vm18311_vm8, 1.0, %v21321_v6  ;;  %v1292_v34 = vshrl.u32 %v18292_v29, 4  ;;  %v18369_v50 = vmul.u32.u64.low 2863311531, %v18322_v21  ;;  %v18370_v30 = vmul.u32.u64.high 2863311531, %v18322_v21, %v18369_v50 }
 0x418   : > { %21770 = vst [vmem:[#allocation48_spill] sm:$0xff] %v18365_v61  ;;  %v18376_v18 = vsel %vm18317_vm11, 1.0, %v21321_v6  ;;  %v18381_v42 = vsel %vm18336_vm13, 1.0, %v21321_v6  ;;  %v18383_v28 = vsel %vm1496_vm1, %v1544_v11, %v1250_v36  ;;  %vm1738_vm2 = vmand %vm1642_vm7, %vm1690_vm0  ;;  %vm1405_vm4 = vcmp.ne.s32.totalorder %v1305_v16, 0 }
 0x419   : > { %21771 = vst [vmem:[#allocation49_spill] sm:$0xff] %v18376_v18  ;;  %21772 = vst [vmem:[#allocation50_spill] sm:$0xff] %v18381_v42  ;;  %vm1453_vm5 = vcmp.lt.s32.totalorder %v1305_v16, 0  ;;  %v18388_v57 = vadd.s32 352, %v17456_v4  ;;  %vm1403_vm14 = vcmp.ne.s32.totalorder %v1283_v8, 0  ;;  %v1316_v37 = vsub.s32 %v18229_v55, %v1315_v1 }
 0x41a   : > { %vm1451_vm8 = vcmp.lt.s32.totalorder %v1283_v8, 0  ;;  %v1293_v11 = vmul.u32 24, %v1292_v34  ;;  %v18394_v7 = vsel %vm1738_vm2, 1.0, %v21321_v6  ;;  %v1549_v42 = vadd.s32 24, %v1305_v16  ;;  %vm1501_vm11 = vmand %vm1453_vm5, %vm1405_vm4 }
 0x41b   : > { %21773 = vst [vmem:[#allocation51_spill] sm:$0xff] %v18394_v7  ;;  %v1547_v18 = vadd.s32 24, %v1283_v8  ;;  %vm1640_vm15 = vcmp.ge.s32.totalorder %v18383_v28, 1  ;;  %vm1688_vm12 = vcmp.le.s32.totalorder %v18383_v28, 16  ;;  %vm1406_vm9 = vcmp.ne.s32.totalorder %v1316_v37, 0  ;;  %vm18405_vm10 = vmand %vm1451_vm8, %vm1403_vm14 }
 0x41c   : > { %vm1454_vm6 = vcmp.lt.s32.totalorder %v1316_v37, 0  ;;  %vm21778_vm1 = vcmask 261120  }
 0x41d   : > { %vm18418_vm13 = vmand %vm1454_vm6, %vm1406_vm9 }
 0x41e   : > { %vm21779_vm0 = vmmov %vm21778_vm1 }
 0x434   : > { %v14294_v38 = vpop.f32.mrb[0].mxu0 }
 0x435   : > { %v6401_v33 = vadd.f32 %v14294_v38, %v18342_v3  ;;  %v6153_v46 = vpop.f32.mrb[1].mxu0 }
 0x436   : > { %v6399_v29 = vadd.f32 %v18342_v3, %v6153_v46  ;;  %v14295_v12 = vpop.f32.mrb[2].mxu0 }
 0x437   : > { %v6449_v43 = vmax.f32 %v6401_v33, 0.0  ;;  %v6402_v38 = vadd.f32 %v14295_v12, %v18342_v3  ;;  %v6156_v50 = vpop.f32.mrb[3].mxu0  ;;  %v1294_v12 = vsub.s32 %v18241_v52, %v1293_v11 }
 0x438   : > { %v6447_v41 = vmax.f32 %v6399_v29, 0.0  ;;  %v6400_v36 = vadd.f32 %v18342_v3, %v6156_v50  ;;  %v1550_v29 = vadd.s32 24, %v1316_v37  ;;  %v1347_v50 = vshrl.u32 %v18370_v30, 4 }
 0x439   : > { %v6450_v46 = vmax.f32 %v6402_v38, 0.0  ;;  %v6497_v61 = vmul.f32 %v17596_v59, %v6449_v43  ;;  %vm1404_vm3 = vcmp.ne.s32.totalorder %v1294_v12, 0  ;;  %v1595_v30 = vsel %vm18405_vm10, %v1547_v18, %v1283_v8  ;;  %vm18448_vm10 = vmand %vm1640_vm15, %vm1688_vm12 }
 0x43a   : > { %v6448_v33 = vmax.f32 %v6400_v36, 0.0  ;;  %v6495_v55 = vmul.f32 %v17601_v2, %v6447_v41  ;;  %v18413_v36 = vmul.u32.u64.low 2863311531, %v18388_v57  ;;  %v18414_v6 = vmul.u32.u64.high 2863311531, %v18388_v57, %v18413_v36  ;;  %vm21784_vm15 = vmmov %vm21779_vm0 }
 0x43b   : > { %v6498_v1 = vmul.f32 %v17624_v20, %v6450_v46  ;;  %v1597_v2 = vsel %vm1501_vm11, %v1549_v42, %v1305_v16  ;;  %v18426_v36 = vadd.s32 376, %v17456_v4  ;;  %vm1452_vm7 = vcmp.lt.s32.totalorder %v1294_v12, 0 }
 0x43c   : > { %v6496_v43 = vmul.f32 %v17743_v39, %v6448_v33  ;;  %v14298_v38 = vpop.f32.mrb[4].mxu0  ;;  %v1598_v34 = vsel %vm18418_vm13, %v1550_v29, %v1316_v37  ;;  %vm1500_vm2 = vmand %vm1452_vm7, %vm1404_vm3  ;;  %v1348_v8 = vmul.u32 24, %v1347_v50  ;;  %vm1645_vm4 = vcmp.ge.s32.totalorder %v1597_v2, 1 }
 0x43d   : > { %v6544_v41 = vpack.c.bf16 %v6498_v1, %v6497_v61  ;;  %v6405_v46 = vadd.f32 %v14298_v38, %v18342_v3  ;;  %v6169_v20 = vpop.f32.mrb[5].mxu0  ;;  %v1548_v1 = vadd.s32 24, %v1294_v12  ;;  %v1325_v38 = vshrl.u32 %v18414_v6, 4 }
 0x43e   : > { %v6543_v52 = vpack.c.bf16 %v6496_v43, %v6495_v55  ;;  %v6403_v11 = vadd.f32 %v18342_v3, %v6169_v20  ;;  %v14299_v33 = vpop.f32.mrb[6].mxu0  ;;  %vm1693_vm5 = vcmp.le.s32.totalorder %v1597_v2, 16  ;;  %vm1643_vm14 = vcmp.ge.s32.totalorder %v1595_v30, 1 }
 0x43f   : > { %6568 = vst.msk [vmem:[#allocation3 + $0x20] sm:$0xff] %vm21778_vm1, %v6544_v41  ;;  %v6453_v61 = vmax.f32 %v6405_v46, 0.0  ;;  %v6406_v16 = vadd.f32 %v14299_v33, %v18342_v3  ;;  %v6172_v42 = vpop.f32.mrb[7].mxu0  ;;  %v1596_v43 = vsel %vm1500_vm2, %v1548_v1, %v1294_v12  ;;  %vm1691_vm8 = vcmp.le.s32.totalorder %v1595_v30, 16  ;;  %vm18457_vm3 = vmand %vm1645_vm4, %vm1693_vm5 }
 0x440   : > { %6567 = vst.msk [vmem:[#allocation3 + $0x18] sm:$0xff] %vm21779_vm0, %v6543_v52  ;;  %v6451_v55 = vmax.f32 %v6403_v11, 0.0  ;;  %v6404_v20 = vadd.f32 %v18342_v3, %v6172_v42  ;;  %vm1646_vm11 = vcmp.ge.s32.totalorder %v1598_v34, 1  ;;  %v18439_v59 = vsub.s32 %v18322_v21, %v1348_v8  ;;  %vm18471_vm12 = vmand %vm1643_vm14, %vm1691_vm8 }
 0x441   : > { %v6454_v18 = vmax.f32 %v6406_v16, 0.0  ;;  %v6501_v46 = vmul.f32 %v17756_v35, %v6453_v61  ;;  %vm1694_vm9 = vcmp.le.s32.totalorder %v1598_v34, 16  ;;  %vm1644_vm6 = vcmp.ge.s32.totalorder %v1596_v43, 1  ;;  %vm21795_vm14 = vmmov %vm21779_vm0 }
 0x442   : > { %v6452_v41 = vmax.f32 %v6404_v20, 0.0  ;;  %v6499_v37 = vmul.f32 %v17767_v44, %v6451_v55  ;;  %vm1692_vm13 = vcmp.le.s32.totalorder %v1596_v43, 16  ;;  %v1326_v21 = vmul.u32 24, %v1325_v38  ;;  %vm1742_vm2 = vmand %vm1646_vm11, %vm1694_vm9 }
 0x443   : > { %v6502_v52 = vmul.f32 %v17779_v17, %v6454_v18  ;;  %v18462_v28 = vmul.u32.u64.low 2863311531, %v18426_v36  ;;  %v18463_v20 = vmul.u32.u64.high 2863311531, %v18426_v36, %v18462_v28  ;;  %vm1409_vm1 = vcmp.ne.s32.totalorder %v18439_v59, 0  ;;  %vm18496_vm4 = vmand %vm1644_vm6, %vm1692_vm13 }
 0x444   : > { %v6500_v29 = vmul.f32 %v17789_v9, %v6452_v41  ;;  %v14302_v50 = vpop.f32.mrb[8].mxu0  ;;  %vm1457_vm7 = vcmp.lt.s32.totalorder %v18439_v59, 0  ;;  %v1327_v34 = vsub.s32 %v18388_v57, %v1326_v21  ;;  %vm21793_vm5 = vcmask 1043456   ;;  %vm21801_vm9 = vmmov %vm21779_vm0 }
 0x445   : > { %v6546_v6 = vpack.c.bf16 %v6502_v52, %v6501_v46  ;;  %v6409_v12 = vadd.f32 %v14302_v50, %v18342_v3  ;;  %v6185_v11 = vpop.f32.mrb[9].mxu0  ;;  %v15843_v50 = vld [vmem:[%s16107_s18 + $0x8] sm:$0xff]   ;;  %v1553_v28 = vadd.s32 24, %v18439_v59  ;;  %vm18520_vm8 = vmand %vm1457_vm7, %vm1409_vm1 }
 0x446   : > { %v6545_v61 = vpack.c.bf16 %v6500_v29, %v6499_v37  ;;  %v6407_v16 = vadd.f32 %v18342_v3, %v6185_v11  ;;  %v14303_v42 = vpop.f32.mrb[10].mxu0  ;;  %v18453_v1 = vld [vmem:[#allocation3 + $0x20] sm:$0xff]  ;;  %vm21799_vm11 = vmmov %vm21793_vm5  ;;  %vm1407_vm6 = vcmp.ne.s32.totalorder %v1327_v34, 0 }
 0x447   : > { %6570 = vst.msk [vmem:[#allocation3 + $0x30] sm:$0xff] %vm21784_vm15, %v6546_v6  ;;  %v6457_v8 = vmax.f32 %v6409_v12, 0.0  ;;  %v6410_v18 = vadd.f32 %v14303_v42, %v18342_v3  ;;  %v6188_v38 = vpop.f32.mrb[11].mxu0  ;;  %v18467_v41 = vld [vmem:[#allocation3 + $0x18] sm:$0xff]  ;;  %v6656_v29 = vrot.slane %v18453_v1, 4  ;;  %v21787_v6 = vmov 0.0   ;;  %vm21802_vm13 = vmmov %vm21779_vm0 }
 0x448   : > { %6569 = vst.msk [vmem:[#allocation3 + $0x28] sm:$0xff] %vm21779_vm0, %v6545_v61  ;;  %v6455_v46 = vmax.f32 %v6407_v16, 0.0  ;;  %v6408_v52 = vadd.f32 %v18342_v3, %v6188_v38  ;;  %v6654_v37 = vrot.slane %v18467_v41, 4  ;;  %v18487_v12 = vsel %vm18448_vm10, 1.0, %v21787_v6  ;;  %vm21804_vm1 = vmmov %vm21793_vm5 }
 0x449   : > { %v6458_v30 = vmax.f32 %v6410_v18, 0.0  ;;  %21788 = vst [vmem:[#allocation52_spill] sm:$0xff] %v18487_v12  ;;  %v18492_v11 = vsel %vm18457_vm3, 1.0, %v21787_v6  ;;  %v21792_v42 = vrot.slane %v17567_v15, 4  ;;  %v18507_v55 = vsel %vm18471_vm12, 1.0, %v21787_v6  ;;  %vm21803_vm3 = vmmov %vm21779_vm0 }
 0x44a   : > { %21789 = vst [vmem:[#allocation53_spill] sm:$0xff] %v18492_v11  ;;  %v6456_v16 = vmax.f32 %v6408_v52, 0.0  ;;  %21794 = vst [vmem:[#allocation54_spill] sm:$0xff] %v18507_v55  ;;  %v6505_v43 = vmul.f32 %v17804_v23, %v6457_v8  ;;  %v18514_v57 = vsel %vm1742_vm2, 1.0, %v21787_v6  ;;  %v18525_v38 = vadd.s32 360, %v17456_v4  ;;  %v15881_v52 = vld [vmem:[%s16107_s18] sm:$0xff]  }
 0x44b   : > { %v6655_v33 = vsel %vm21793_vm5, %v21792_v42, %v6654_v37  ;;  %v6506_v18 = vmul.f32 %v17817_v19, %v6458_v30  ;;  %21796 = vst [vmem:[#allocation55_spill] sm:$0xff] %v18514_v57  ;;  %v6503_v8 = vmul.f32 %v17809_v31, %v6455_v46  ;;  %v6657_v42 = vsel %vm21799_vm11, %v6654_v37, %v6656_v29  ;;  %v18538_v46 = vld [vmem:[#allocation3 + $0x8] sm:$0xf8]  ;;  %vm21805_vm7 = vmmov %vm21804_vm1 }
 0x44c   : > { %14345 = vmatmul.mubr.msk.bf16.vlgmr.msra.gmra.mrb[0].mxu1 %vm21795_vm14, %v6655_v33  ;;  %v6504_v2 = vmul.f32 %v17822_v47, %v6456_v16  ;;  %v14306_v30 = vpop.f32.mrb[12].mxu0  ;;  %v18534_v33 = vsel %vm18496_vm4, 1.0, %v21787_v6  ;;  %vm1455_vm10 = vcmp.lt.s32.totalorder %v1327_v34, 0  ;;  %v18541_v16 = vld [vmem:[%s16107_s18 + $0x20] sm:$0xff]   ;;  %vm21806_vm2 = vmmov %vm21803_vm3 }
 0x44d   : > { %14393 = vmatpush3.bf16.msra.mxu1 %v15881_v52  ;;  %21800 = vst [vmem:[#allocation56_spill] sm:$0xff] %v18534_v33  ;;  %v6548_v19 = vpack.c.bf16 %v6506_v18, %v6505_v43  ;;  %v6413_v23 = vadd.f32 %v14306_v30, %v18342_v3  ;;  %14348 = vmatprep.mubr.msk.bf16.mxu1 %vm21801_vm9, %v6657_v42  ;;  %v6201_v4 = vpop.f32.mrb[13].mxu0  ;;  %v1551_v18 = vadd.s32 24, %v1327_v34  ;;  %vm1503_vm15 = vmand %vm1455_vm10, %vm1407_vm6 }
 0x44e   : > { %14394 = vmatprep.subr.bf16.mxu1 %v15843_v50  ;;  %v6547_v52 = vpack.c.bf16 %v6504_v2, %v6503_v8  ;;  %v6411_v37 = vadd.f32 %v18342_v3, %v6201_v4  ;;  %v14307_v47 = vpop.f32.mrb[14].mxu0  ;;  %v18544_v61 = vld [vmem:[#allocation3 + $0x30] sm:$0xff]  ;;  %v1601_v43 = vsel %vm18520_vm8, %v1553_v28, %v18439_v59  ;;  %v1358_v4 = vshrl.u32 %v18463_v20, 4  ;;  %vm21807_vm4 = vmmov %vm21806_vm2 }
 0x44f   : > { %6572 = vst.msk [vmem:[#allocation3 + $0x40] sm:$0xff] %vm21802_vm13, %v6548_v19  ;;  %v6461_v30 = vmax.f32 %v6413_v23, 0.0  ;;  %v6414_v42 = vadd.f32 %v14307_v47, %v18342_v3  ;;  %v6204_v31 = vpop.f32.mrb[15].mxu0  ;;  %v18551_v9 = vld [vmem:[#allocation3 + $0x28] sm:$0xff]  ;;  %v6660_v8 = vrot.slane %v18544_v61, 4  ;;  %vm1649_vm12 = vcmp.ge.s32.totalorder %v1601_v43, 1  ;;  %vm21809_vm8 = vmmov %vm21806_vm2 }
 0x450   : > { %6571 = vst.msk [vmem:[#allocation3 + $0x38] sm:$0xff] %vm21803_vm3, %v6547_v52  ;;  %v6459_v2 = vmax.f32 %v6411_v37, 0.0  ;;  %v6412_v17 = vadd.f32 %v18342_v3, %v6204_v31  ;;  %v6658_v59 = vrot.slane %v18551_v9, 4  ;;  %vm1697_vm0 = vcmp.le.s32.totalorder %v1601_v43, 16  ;;  %vm21810_vm6 = vmmov %vm21806_vm2 }
 0x451   : > { %14395 = vmatpush3.bf16.msra.mxu1 %v15843_v50  ;;  %v6462_v28 = vmax.f32 %v6414_v42, 0.0  ;;  %v6509_v50 = vmul.f32 %v17826_v13, %v6461_v30  ;;  %v1599_v37 = vsel %vm1503_vm15, %v1551_v18, %v1327_v34  ;;  %v1359_v23 = vmul.u32 24, %v1358_v4  ;;  %vm1745_vm11 = vmand %vm1649_vm12, %vm1697_vm0 }
 0x452   : > { %14444 = vmatprep.subr.bf16.mxu1 %v18541_v16  ;;  %v6460_v20 = vmax.f32 %v6412_v17, 0.0  ;;  %v6659_v21 = vsel %vm21804_vm1, %v6656_v29, %v6658_v59  ;;  %v6661_v31 = vsel %vm21805_vm7, %v6658_v59, %v6660_v8  ;;  %v6507_v47 = vmul.f32 %v17901_v14, %v6459_v2  ;;  %vm21812_vm3 = vmmov %vm21804_vm1  ;;  %v21858_v14 = vld [vmem:[#allocation50_spill] sm:$0xff] }
 0x453   : > { %v6510_v52 = vmul.f32 %v17906_v45, %v6462_v28  ;;  %v18573_v17 = vmul.u32.u64.low 2863311531, %v18525_v38  ;;  %v18574_v29 = vmul.u32.u64.high 2863311531, %v18525_v38, %v18573_v17  ;;  %v21808_v59 = vshrl.u32 %v18467_v41, 16  ;;  %vm21813_vm15 = vmmov %vm21804_vm1 }
 0x454   : > { %14349 = vmatmul.mubr.msk.bf16.gmra.mrb[4].mxu1 %vm21806_vm2, %v6659_v21  ;;  %v6508_v42 = vmul.f32 %v17915_v60, %v6460_v20  ;;  %v14310_v19 = vpop.f32.mrb[16].mxu0  ;;  %v1360_v34 = vsub.s32 %v18426_v36, %v1359_v23  ;;  %vm1647_vm5 = vcmp.ge.s32.totalorder %v1599_v37, 1  ;;  %vm1695_vm14 = vcmp.le.s32.totalorder %v1599_v37, 16  ;;  %vm21815_vm1 = vmmov %vm21806_vm2 }
 0x455   : > { %14352 = vmatprep.mubr.msk.bf16.mxu1 %vm21807_vm4, %v6661_v31  ;;  %v7029_v30 = vrot.slane %v21808_v59, 3  ;;  %v6550_v13 = vpack.c.bf16 %v6510_v52, %v6509_v50  ;;  %v6417_v28 = vadd.f32 %v14310_v19, %v18342_v3  ;;  %v6217_v21 = vpop.f32.mrb[17].mxu0  ;;  %vm1743_vm12 = vmand %vm1647_vm5, %vm1695_vm14 }
 0x456   : > { %v6549_v18 = vpack.c.bf16 %v6508_v42, %v6507_v47  ;;  %v6415_v4 = vadd.f32 %v18342_v3, %v6217_v21  ;;  %v14311_v2 = vpop.f32.mrb[18].mxu0  ;;  %v18581_v20 = vld [vmem:[#allocation3 + $0x40] sm:$0xff]  ;;  %vm1410_vm9 = vcmp.ne.s32.totalorder %v1360_v34, 0  ;;  %vm1458_vm10 = vcmp.lt.s32.totalorder %v1360_v34, 0  ;;  %vm21816_vm7 = vmmov %vm21815_vm1 }
 0x457   : > { %6574 = vst.msk [vmem:[#allocation3 + $0x50] sm:$0xff] %vm21809_vm8, %v6550_v13  ;;  %v6465_v31 = vmax.f32 %v6417_v28, 0.0  ;;  %v6418_v17 = vadd.f32 %v14311_v2, %v18342_v3  ;;  %v6220_v59 = vpop.f32.mrb[19].mxu0  ;;  %v18585_v50 = vld [vmem:[#allocation3 + $0x38] sm:$0xff]  ;;  %v6664_v19 = vrot.slane %v18581_v20, 4  ;;  %v21811_v13 = vshll.u32 %v18467_v41, 16  ;;  %vm1506_vm13 = vmand %vm1458_vm10, %vm1410_vm9 }
 0x458   : > { %6573 = vst.msk [vmem:[#allocation3 + $0x48] sm:$0xff] %vm21810_vm6, %v6549_v18  ;;  %v6463_v36 = vmax.f32 %v6415_v4, 0.0  ;;  %v6416_v23 = vadd.f32 %v18342_v3, %v6220_v59  ;;  %v6662_v47 = vrot.slane %v18585_v50, 4  ;;  %v1554_v28 = vadd.s32 24, %v1360_v34  ;;  %vm21820_vm5 = vmmov %vm21815_vm1 }
 0x459   : > { %v7032_v52 = vrot.slane %v21811_v13, 4  ;;  %v6466_v42 = vmax.f32 %v6418_v17, 0.0  ;;  %v1336_v21 = vshrl.u32 %v18574_v29, 4  ;;  %v18599_v18 = vsel %vm1745_vm11, 1.0, %v21787_v6  ;;  %vm21821_vm8 = vmmov %vm21815_vm1 }
 0x45a   : > { %v6464_v2 = vmax.f32 %v6416_v23, 0.0  ;;  %v6663_v43 = vsel %vm21812_vm3, %v6660_v8, %v6662_v47  ;;  %v6665_v60 = vsel %vm21813_vm15, %v6662_v47, %v6664_v19  ;;  %21814 = vst [vmem:[#allocation57_spill] sm:$0xff] %v18599_v18  ;;  %v6513_v4 = vmul.f32 %v17929_v22, %v6465_v31  ;;  %vm21823_vm6 = vmmov %vm21812_vm3 }
 0x45b   : > { %v6514_v59 = vmul.f32 %v18028_v53, %v6466_v42  ;;  %v1602_v17 = vsel %vm1506_vm13, %v1554_v28, %v1360_v34  ;;  %v1337_v13 = vmul.u32 24, %v1336_v21  ;;  %v6511_v29 = vmul.f32 %v18023_v58, %v6463_v36  ;;  %vm21824_vm10 = vmmov %vm21812_vm3 }
 0x45c   : > { %14353 = vmatmul.mubr.msk.bf16.gmra.mrb[8].mxu1 %vm21815_vm1, %v6663_v43  ;;  %v6512_v8 = vmul.f32 %v18043_v27, %v6464_v2  ;;  %v14314_v23 = vpop.f32.mrb[20].mxu0  ;;  %vm1650_vm0 = vcmp.ge.s32.totalorder %v1602_v17, 1  ;;  %vm1698_vm2 = vcmp.le.s32.totalorder %v1602_v17, 16  ;;  %v18611_v31 = vsel %vm1743_vm12, 1.0, %v21787_v6  ;;  %vm21825_vm13 = vmmov %vm21815_vm1 }
 0x45d   : > { %14356 = vmatprep.mubr.msk.bf16.mxu1 %vm21816_vm7, %v6665_v60  ;;  %v6552_v47 = vpack.c.bf16 %v6514_v59, %v6513_v4  ;;  %v6421_v37 = vadd.f32 %v14314_v23, %v18342_v3  ;;  %v6233_v45 = vpop.f32.mrb[21].mxu0  ;;  %21817 = vst [vmem:[#allocation58_spill] sm:$0xff] %v18611_v31  ;;  %v1338_v42 = vsub.s32 %v18525_v38, %v1337_v13  ;;  %vm18617_vm4 = vmand %vm1650_vm0, %vm1698_vm2  ;;  %v21353_v2 = vshll.u32 %v18453_v1, 16 }
 0x45e   : > { %v6551_v34 = vpack.c.bf16 %v6512_v8, %v6511_v29  ;;  %v6419_v28 = vadd.f32 %v18342_v3, %v6233_v45  ;;  %v14315_v36 = vpop.f32.mrb[22].mxu0  ;;  %v18615_v21 = vld [vmem:[#allocation3 + $0x50] sm:$0xff]  ;;  %v18622_v43 = vor.u32 %v7032_v52, %v7029_v30  ;;  %v18636_v23 = vsel %vm18617_vm4, 1.0, %v21787_v6  ;;  %vm21826_vm3 = vmmov %vm21815_vm1 }
 0x45f   : > { %6576 = vst.msk [vmem:[#allocation3 + $0x60] sm:$0xff] %vm21820_vm5, %v6552_v47  ;;  %v6469_v4 = vmax.f32 %v6421_v37, 0.0  ;;  %v6422_v59 = vadd.f32 %v14315_v36, %v18342_v3  ;;  %v6236_v38 = vpop.f32.mrb[23].mxu0  ;;  %v18626_v17 = vld [vmem:[#allocation3 + $0x48] sm:$0xff]  ;;  %v6668_v45 = vrot.slane %v18615_v21, 4  ;;  %vm1408_vm14 = vcmp.ne.s32.totalorder %v1338_v42, 0  ;;  %vm21828_vm7 = vmmov %vm21826_vm3 }
 0x460   : > { %6575 = vst.msk [vmem:[#allocation3 + $0x58] sm:$0xff] %vm21821_vm8, %v6551_v34  ;;  %v6467_v13 = vmax.f32 %v6419_v28, 0.0  ;;  %v6420_v29 = vadd.f32 %v18342_v3, %v6236_v38  ;;  %v6666_v8 = vrot.slane %v18626_v17, 4  ;;  %vm1456_vm11 = vcmp.lt.s32.totalorder %v1338_v42, 0  ;;  %21822 = vst [vmem:[#allocation59_spill] sm:$0xff] %v18636_v23 }
 0x461   : > { %v6517_v30 = vmul.f32 %v18064_v48, %v6469_v4  ;;  %v6470_v52 = vmax.f32 %v6422_v59, 0.0  ;;  %vm1504_vm9 = vmand %vm1456_vm11, %vm1408_vm14  ;;  %v1552_v47 = vadd.s32 24, %v1338_v42  ;;  %v21350_v59 = vshrl.u32 %v18453_v1, 16 }
 0x462   : > { %v6515_v37 = vmul.f32 %v18072_v62, %v6467_v13  ;;  %v6468_v36 = vmax.f32 %v6420_v29, 0.0  ;;  %v6667_v34 = vsel %vm21823_vm6, %v6664_v19, %v6666_v8  ;;  %v6669_v28 = vsel %vm21824_vm10, %v6666_v8, %v6668_v45  ;;  %vm21829_vm0 = vmmov %vm21826_vm3 }
 0x463   : > { %v6518_v38 = vmul.f32 %v18079_v24, %v6470_v52  ;;  %v1600_v4 = vsel %vm1504_vm9, %v1552_v47, %v1338_v42  ;;  %v21354_v19 = vshrl.u32 %v18551_v9, 16  ;;  %v7038_v42 = vrot.slane %v21350_v59, 3  ;;  %vm21831_vm4 = vmmov %vm21823_vm6 }
 0x464   : > { %14357 = vmatmul.mubr.msk.bf16.gmra.mrb[12].mxu1 %vm21825_vm13, %v6667_v34  ;;  %v6516_v60 = vmul.f32 %v18084_v49, %v6468_v36  ;;  %v14318_v48 = vpop.f32.mrb[24].mxu0  ;;  %vm1648_vm15 = vcmp.ge.s32.totalorder %v1600_v4, 1  ;;  %vm1696_vm12 = vcmp.le.s32.totalorder %v1600_v4, 16  ;;  %v7041_v52 = vrot.slane %v21353_v2, 4  ;;  %vm21832_vm5 = vmmov %vm21831_vm4 }
 0x465   : > { %14360 = vmatprep.mubr.msk.bf16.mxu1 %vm21826_vm3, %v6669_v28  ;;  %v6554_v13 = vpack.c.bf16 %v6518_v38, %v6517_v30  ;;  %v6425_v29 = vadd.f32 %v14318_v48, %v18342_v3  ;;  %v6249_v8 = vpop.f32.mrb[25].mxu0  ;;  %vm1744_vm1 = vmand %vm1648_vm15, %vm1696_vm12  ;;  %v7047_v48 = vrot.slane %v21354_v19, 3  ;;  %v21361_v19 = vshll.u32 %v18551_v9, 16 }
 0x466   : > { %v6553_v47 = vpack.c.bf16 %v6516_v60, %v6515_v37  ;;  %v6423_v36 = vadd.f32 %v18342_v3, %v6249_v8  ;;  %v14319_v34 = vpop.f32.mrb[26].mxu0  ;;  %v18654_v28 = vld [vmem:[#allocation3 + $0x60] sm:$0xff]  ;;  %v18657_v4 = vsel %vm1744_vm1, 1.0, %v21787_v6  ;;  %v7042_v37 = vor.u32 %v7041_v52, %v7038_v42  ;;  %vm21833_vm14 = vmmov %vm21829_vm0 }
 0x467   : > { %21827 = vst [vmem:[#allocation60_spill] sm:$0xff] %v18657_v4  ;;  %6578 = vst.msk [vmem:[#allocation3 + $0x70] sm:$0xff] %vm21828_vm7, %v6554_v13  ;;  %v6473_v30 = vmax.f32 %v6425_v29, 0.0  ;;  %v6426_v38 = vadd.f32 %v14319_v34, %v18342_v3  ;;  %v6252_v59 = vpop.f32.mrb[27].mxu0  ;;  %v18663_v49 = vld [vmem:[#allocation3 + $0x58] sm:$0xff]  ;;  %v6672_v60 = vrot.slane %v18654_v28, 4 }
 0x468   : > { %6577 = vst.msk [vmem:[#allocation3 + $0x68] sm:$0xff] %vm21829_vm0, %v6553_v47  ;;  %v6471_v8 = vmax.f32 %v6423_v36, 0.0  ;;  %v6424_v6 = vadd.f32 %v18342_v3, %v6252_v59  ;;  %v6670_v2 = vrot.slane %v18663_v49, 4  ;;  %vm21830_vm2 = vsmask.f32 4352  ;;  %vm21834_vm8 = vmmov %vm21829_vm0 }
 0x469   : > { %v6521_v13 = vmul.f32 %v18096_v63, %v6473_v30  ;;  %v6474_v29 = vmax.f32 %v6426_v38, 0.0  ;;  %v18673_v34 = vsel %vm21830_vm2, %v18622_v43, %v7042_v37  ;;  %v21364_v24 = vshrl.u32 %v18544_v61, 16  ;;  %vm21835_vm11 = vmmov %vm21829_vm0 }
 0x46a   : > { %v6519_v42 = vmul.f32 %v18128_v0, %v6471_v8  ;;  %v6472_v52 = vmax.f32 %v6424_v6, 0.0  ;;  %v6671_v47 = vsel %vm21831_vm4, %v6668_v45, %v6670_v2  ;;  %v6673_v59 = vsel %vm21832_vm5, %v6670_v2, %v6672_v60  ;;  %vm21836_vm9 = vmmov %vm21830_vm2 }
 0x46b   : > { %v6522_v36 = vmul.f32 %v18142_v51, %v6474_v29  ;;  %v7050_v30 = vrot.slane %v21361_v19, 4  ;;  %v7056_v38 = vrot.slane %v21364_v24, 3  ;;  %v21373_v63 = vshll.u32 %v18544_v61, 16  ;;  %vm21837_vm6 = vmmov %vm21829_vm0 }
 0x46c   : > { %14361 = vmatmul.mubr.msk.bf16.gmra.mrb[16].mxu1 %vm21833_vm14, %v6671_v47  ;;  %v6520_v62 = vmul.f32 %v18297_v56, %v6472_v52  ;;  %v14322_v8 = vpop.f32.mrb[28].mxu0  ;;  %v21372_v45 = vshrl.u32 %v18585_v50, 16  ;;  %v21371_v2 = vshll.u32 %v18585_v50, 16  ;;  %vm21839_vm10 = vmmov %vm21831_vm4 }
 0x46d   : > { %14364 = vmatprep.mubr.msk.bf16.mxu1 %vm21834_vm8, %v6673_v59  ;;  %v6556_v29 = vpack.c.bf16 %v6522_v36, %v6521_v13  ;;  %v6429_v47 = vadd.f32 %v14322_v8, %v18342_v3  ;;  %v6265_v19 = vpop.f32.mrb[29].mxu0  ;;  %v7051_v51 = vor.u32 %v7050_v30, %v7047_v48  ;;  %v7059_v24 = vrot.slane %v21373_v63, 4  ;;  %vm21840_vm13 = vmmov %vm21831_vm4 }
 0x46e   : > { %v6555_v0 = vpack.c.bf16 %v6520_v62, %v6519_v42  ;;  %v6427_v52 = vadd.f32 %v18342_v3, %v6265_v19  ;;  %v14323_v56 = vpop.f32.mrb[30].mxu0  ;;  %v18695_v27 = vld [vmem:[#allocation3 + $0x70] sm:$0xff]  ;;  %v7065_v59 = vrot.slane %v21372_v45, 3  ;;  %v7068_v6 = vrot.slane %v21371_v2, 4  ;;  %vm21841_vm3 = vmmov %vm21829_vm0 }
 0x46f   : > { %6580 = vst.msk [vmem:[#allocation3 + $0x80] sm:$0xff] %vm21835_vm11, %v6556_v29  ;;  %v6477_v13 = vmax.f32 %v6429_v47, 0.0  ;;  %v6430_v48 = vadd.f32 %v14323_v56, %v18342_v3  ;;  %v6268_v36 = vpop.f32.mrb[31].mxu0  ;;  %v18703_v30 = vld [vmem:[#allocation3 + $0x68] sm:$0xff]  ;;  %v6676_v62 = vrot.slane %v18695_v27, 4  ;;  %v18707_v19 = vsel %vm21836_vm9, %v7042_v37, %v7051_v51  ;;  %vm21842_vm15 = vmmov %vm21830_vm2 }
 0x470   : > { %6579 = vst.msk [vmem:[#allocation3 + $0x78] sm:$0xff] %vm21837_vm6, %v6555_v0  ;;  %v6475_v42 = vmax.f32 %v6427_v52, 0.0  ;;  %v6428_v8 = vadd.f32 %v18342_v3, %v6268_v36  ;;  %v6674_v2 = vrot.slane %v18703_v30, 4  ;;  %v7060_v45 = vor.u32 %v7059_v24, %v7056_v38  ;;  %vm21843_vm12 = vmmov %vm21830_vm2 }
 0x471   : > { %v6525_v29 = vmul.f32 %v18302_v5, %v6477_v13  ;;  %v6478_v47 = vmax.f32 %v6430_v48, 0.0  ;;  %v7069_v56 = vor.u32 %v7068_v6, %v7065_v59  ;;  %v21838_v63 = vshrl.u32 %v18581_v20, 16  ;;  %vm21844_vm1 = vmmov %vm21829_vm0 }
 0x472   : > { %v6523_v58 = vmul.f32 %v18307_v26, %v6475_v42  ;;  %v6476_v22 = vmax.f32 %v6428_v8, 0.0  ;;  %v6675_v37 = vsel %vm21839_vm10, %v6672_v60, %v6674_v2  ;;  %v6677_v0 = vsel %vm21840_vm13, %v6674_v2, %v6676_v62  ;;  %vm21845_vm7 = vmmov %vm21829_vm0 }
 0x473   : > { %v7074_v53 = vrot.slane %v21838_v63, 3  ;;  %v6526_v52 = vmul.f32 %v18327_v10, %v6478_v47  ;;  %v18721_v24 = vsel %vm21842_vm15, %v7051_v51, %v7060_v45  ;;  %v18724_v38 = vsel %vm21843_vm12, %v7060_v45, %v7069_v56  ;;  %vm21847_vm5 = vmmov %vm21831_vm4 }
 0x474   : > { %14365 = vmatmul.mubr.msk.bf16.gmra.mrb[20].mxu1 %vm21841_vm3, %v6675_v37  ;;  %v21380_v6 = vshll.u32 %v18581_v20, 16  ;;  %v6524_v63 = vmul.f32 %v18332_v40, %v6476_v22  ;;  %v14326_v59 = vpop.f32.mrb[32].mxu0  ;;  %v21381_v60 = vshrl.u32 %v18626_v17, 16  ;;  %v21384_v2 = vshll.u32 %v18626_v17, 16  ;;  %vm21848_vm14 = vmmov %vm21829_vm0 }
 0x475   : > { %14368 = vmatprep.mubr.msk.bf16.mxu1 %vm21844_vm1, %v6677_v0  ;;  %v6558_v48 = vpack.c.bf16 %v6526_v52, %v6525_v29  ;;  %v6433_v51 = vadd.f32 %v14326_v59, %v18342_v3  ;;  %v6281_v36 = vpop.f32.mrb[33].mxu0  ;;  %vm21849_vm8 = vmmov %vm21830_vm2  ;;  %v21406_v5 = vshrl.u32 %v18703_v30, 16 }
 0x476   : > { %v7077_v45 = vrot.slane %v21380_v6, 4  ;;  %v6557_v8 = vpack.c.bf16 %v6524_v63, %v6523_v58  ;;  %v6431_v22 = vadd.f32 %v18342_v3, %v6281_v36  ;;  %v14327_v47 = vpop.f32.mrb[34].mxu0  ;;  %v18737_v37 = vld [vmem:[#allocation3 + $0x80] sm:$0xff]  ;;  %v7083_v0 = vrot.slane %v21381_v60, 3  ;;  %vm21852_vm11 = vmmov %vm21829_vm0 }
 0x477   : > { %v7086_v29 = vrot.slane %v21384_v2, 4  ;;  %6582 = vst.msk [vmem:[#allocation3 + $0x90] sm:$0xff] %vm21845_vm7, %v6558_v48  ;;  %v6481_v52 = vmax.f32 %v6433_v51, 0.0  ;;  %v6434_v59 = vadd.f32 %v14327_v47, %v18342_v3  ;;  %v6284_v6 = vpop.f32.mrb[35].mxu0  ;;  %v18745_v13 = vld [vmem:[#allocation3 + $0x78] sm:$0xff]  ;;  %v6680_v58 = vrot.slane %v18737_v37, 4  ;;  %vm21853_vm9 = vmmov %vm21829_vm0 }
 0x478   : > { %v7078_v63 = vor.u32 %v7077_v45, %v7074_v53  ;;  %6581 = vst.msk [vmem:[#allocation3 + $0x88] sm:$0xff] %vm21829_vm0, %v6557_v8  ;;  %v6479_v36 = vmax.f32 %v6431_v22, 0.0  ;;  %v6432_v42 = vadd.f32 %v18342_v3, %v6284_v6  ;;  %v6678_v60 = vrot.slane %v18745_v13, 4  ;;  %vm21854_vm6 = vmmov %vm21830_vm2 }
 0x479   : > { %v7087_v40 = vor.u32 %v7086_v29, %v7083_v0  ;;  %v6529_v2 = vmul.f32 %v18347_v32, %v6481_v52  ;;  %v6482_v48 = vmax.f32 %v6434_v59, 0.0  ;;  %v21846_v47 = vshrl.u32 %v18615_v21, 16  ;;  %v21851_v52 = vld [vmem:[#allocation48_spill] sm:$0xff]  ;;  %vm21855_vm10 = vmmov %vm21829_vm0 }
 0x47a   : > { %v18753_v51 = vsel %vm21830_vm2, %v7069_v56, %v7078_v63  ;;  %v6527_v26 = vmul.f32 %v18352_v25, %v6479_v36  ;;  %v6480_v53 = vmax.f32 %v6432_v42, 0.0  ;;  %v6679_v45 = vsel %vm21831_vm4, %v6676_v62, %v6678_v60  ;;  %vm21859_vm13 = vmmov %vm21831_vm4 }
 0x47b   : > { %v7092_v10 = vrot.slane %v21846_v47, 3  ;;  %v6681_v8 = vsel %vm21847_vm5, %v6678_v60, %v6680_v58  ;;  %v6530_v6 = vmul.f32 %v18357_v54, %v6482_v48  ;;  %v18763_v22 = vsel %vm21849_vm8, %v7078_v63, %v7087_v40  ;;  %vm21860_vm3 = vmmov %vm21831_vm4 }
 0x47c   : > { %14369 = vmatmul.mubr.msk.bf16.gmra.mrb[24].mxu1 %vm21848_vm14, %v6679_v45  ;;  %v21850_v56 = vshll.u32 %v18615_v21, 16  ;;  %v21395_v29 = vshrl.u32 %v18663_v49, 16  ;;  %v6528_v59 = vmul.f32 %v21851_v52, %v6480_v53  ;;  %v14330_v36 = vpop.f32.mrb[36].mxu0  ;;  %v21394_v62 = vshll.u32 %v18663_v49, 16  ;;  %vm21861_vm15 = vmmov %vm21829_vm0 }
 0x47d   : > { %14372 = vmatprep.mubr.msk.bf16.mxu1 %vm21852_vm11, %v6681_v8  ;;  %v21393_v60 = vshrl.u32 %v18654_v28, 16  ;;  %v6560_v48 = vpack.c.bf16 %v6530_v6, %v6529_v2  ;;  %v6437_v63 = vadd.f32 %v14330_v36, %v18342_v3  ;;  %v6297_v47 = vpop.f32.mrb[37].mxu0  ;;  %vm21862_vm12 = vmmov %vm21830_vm2 }
 0x47e   : > { %v7095_v0 = vrot.slane %v21850_v56, 4  ;;  %v7101_v56 = vrot.slane %v21395_v29, 3  ;;  %v6559_v54 = vpack.c.bf16 %v6528_v59, %v6527_v26  ;;  %v6435_v53 = vadd.f32 %v18342_v3, %v6297_v47  ;;  %v14331_v52 = vpop.f32.mrb[38].mxu0  ;;  %v18777_v25 = vld [vmem:[#allocation3 + $0x90] sm:$0xff]  ;;  %vm21863_vm1 = vmmov %vm21829_vm0 }
 0x47f   : > { %v7104_v8 = vrot.slane %v21394_v62, 4  ;;  %v7110_v42 = vrot.slane %v21393_v60, 3  ;;  %6584 = vst.msk [vmem:[#allocation3 + $0xa0] sm:$0xff] %vm21853_vm9, %v6560_v48  ;;  %v6485_v2 = vmax.f32 %v6437_v63, 0.0  ;;  %v6300_v6 = vpop.f32.mrb[39].mxu0  ;;  %v6684_v26 = vrot.slane %v18777_v25, 4  ;;  %vm21864_vm7 = vmmov %vm21830_vm2 }
 0x480   : > { %v7096_v45 = vor.u32 %v7095_v0, %v7092_v10  ;;  %v6438_v10 = vadd.f32 %v14331_v52, %v18342_v3  ;;  %v18785_v0 = vld [vmem:[#allocation3 + $0x88] sm:$0xff]  ;;  %6583 = vst.msk [vmem:[#allocation3 + $0x98] sm:$0xff] %vm21855_vm10, %v6559_v54  ;;  %v6483_v36 = vmax.f32 %v6435_v53, 0.0  ;;  %v6436_v47 = vadd.f32 %v18342_v3, %v6300_v6  ;;  %v21856_v48 = vld [vmem:[#allocation49_spill] sm:$0xff]  ;;  %vm21866_vm2 = vmmov %vm21829_vm0 }
 0x481   : > { %v6682_v60 = vrot.slane %v18785_v0, 4  ;;  %v7105_v62 = vor.u32 %v7104_v8, %v7101_v56  ;;  %v6533_v63 = vmul.f32 %v21856_v48, %v6485_v2  ;;  %v21857_v52 = vshll.u32 %v18654_v28, 16  ;;  %vm21868_vm4 = vmmov %vm21860_vm3 }
 0x482   : > { %v18789_v59 = vsel %vm21854_vm6, %v7087_v40, %v7096_v45  ;;  %v6486_v29 = vmax.f32 %v6438_v10, 0.0  ;;  %v6531_v44 = vmul.f32 %v21858_v14, %v6483_v36  ;;  %v6484_v40 = vmax.f32 %v6436_v47, 0.0  ;;  %vm21869_vm5 = vmmov %vm21860_vm3 }
 0x483   : > { %v7113_v32 = vrot.slane %v21857_v52, 4  ;;  %v6683_v35 = vsel %vm21859_vm13, %v6680_v58, %v6682_v60  ;;  %v6685_v54 = vsel %vm21860_vm3, %v6682_v60, %v6684_v26  ;;  %v18804_v56 = vsel %vm21862_vm12, %v7096_v45, %v7105_v62  ;;  %vm21870_vm14 = vmmov %vm21829_vm0 }
 0x484   : > { %v6534_v53 = vmul.f32 %v18394_v7, %v6486_v29  ;;  %14373 = vmatmul.mubr.msk.bf16.gmra.mrb[28].mxu1 %vm21861_vm15, %v6683_v35  ;;  %v7119_v2 = vrot.slane %v21406_v5, 3  ;;  %v6532_v10 = vmul.f32 %v18487_v12, %v6484_v40  ;;  %v14334_v6 = vpop.f32.mrb[40].mxu0  ;;  %v21407_v58 = vshll.u32 %v18703_v30, 16  ;;  %vm21871_vm8 = vmmov %vm21854_vm6 }
 0x485   : > { %v7114_v8 = vor.u32 %v7113_v32, %v7110_v42  ;;  %14376 = vmatprep.mubr.msk.bf16.mxu1 %vm21863_vm1, %v6685_v54  ;;  %v21408_v60 = vshrl.u32 %v18695_v27, 16  ;;  %v6441_v35 = vadd.f32 %v14334_v6, %v18342_v3  ;;  %v6313_v45 = vpop.f32.mrb[41].mxu0  ;;  %v21867_v7 = vshrl.u32 %v18745_v13, 16  ;;  %vm21872_vm11 = vmmov %vm21854_vm6 }
 0x486   : > { %v6562_v36 = vpack.c.bf16 %v6534_v53, %v6533_v63  ;;  %v6561_v47 = vpack.c.bf16 %v6532_v10, %v6531_v44  ;;  %v6439_v52 = vadd.f32 %v18342_v3, %v6313_v45  ;;  %v14335_v40 = vpop.f32.mrb[42].mxu0  ;;  %v18819_v54 = vld [vmem:[#allocation3 + $0xa0] sm:$0xff]  ;;  %v7122_v5 = vrot.slane %v21407_v58, 4  ;;  %vm21873_vm9 = vmmov %vm21829_vm0 }
 0x487   : > { %v18815_v32 = vsel %vm21864_vm7, %v7105_v62, %v7114_v8  ;;  %v7128_v63 = vrot.slane %v21408_v60, 3  ;;  %v6489_v53 = vmax.f32 %v6441_v35, 0.0  ;;  %v6442_v62 = vadd.f32 %v14335_v40, %v18342_v3  ;;  %v6316_v6 = vpop.f32.mrb[43].mxu0  ;;  %v18827_v29 = vld [vmem:[#allocation3 + $0x98] sm:$0xff]  ;;  %vm21874_vm6 = vmmov %vm21829_vm0 }
 0x488   : > { %6586 = vst.msk [vmem:[#allocation3 + $0xb0] sm:$0xff] %vm21829_vm0, %v6562_v36  ;;  %v6688_v44 = vrot.slane %v18819_v54, 4  ;;  %v21865_v10 = vshll.u32 %v18695_v27, 16  ;;  %v6487_v42 = vmax.f32 %v6439_v52, 0.0  ;;  %v6440_v58 = vadd.f32 %v18342_v3, %v6316_v6  ;;  %vm21876_vm10 = vmmov %vm21829_vm0 }
 0x489   : > { %6585 = vst.msk [vmem:[#allocation3 + $0xa8] sm:$0xff] %vm21866_vm2, %v6561_v47  ;;  %v6686_v60 = vrot.slane %v18827_v29, 4  ;;  %v7123_v12 = vor.u32 %v7122_v5, %v7119_v2  ;;  %v6537_v36 = vmul.f32 %v18492_v11, %v6489_v53  ;;  %v6490_v35 = vmax.f32 %v6442_v62, 0.0  ;;  %vm21877_vm13 = vmmov %vm21864_vm7 }
 0x48a   : > { %v7131_v45 = vrot.slane %v21865_v10, 4  ;;  %v7137_v14 = vrot.slane %v21867_v7, 3  ;;  %v6535_v48 = vmul.f32 %v18507_v55, %v6487_v42  ;;  %v6488_v39 = vmax.f32 %v6440_v58, 0.0  ;;  %vm21879_vm15 = vmmov %vm21860_vm3 }
 0x48b   : > { %v6687_v10 = vsel %vm21868_vm4, %v6684_v26, %v6686_v60  ;;  %v6689_v47 = vsel %vm21869_vm5, %v6686_v60, %v6688_v44  ;;  %v6538_v52 = vmul.f32 %v18514_v57, %v6490_v35  ;;  %v18844_v5 = vsel %vm21871_vm8, %v7114_v8, %v7123_v12  ;;  %v15882_v60 = vld [vmem:[%s21749_s3] ss:$0 sm:$0xff]  ;;  %vm21880_vm12 = vmmov %vm21829_vm0 }
 0x48c   : > { %v7132_v40 = vor.u32 %v7131_v45, %v7128_v63  ;;  %14377 = vmatmul.mubr.msk.bf16.gmra.mrb[32].mxu1 %vm21870_vm14, %v6687_v10  ;;  %v21415_v63 = vshll.u32 %v18745_v13, 16  ;;  %v6536_v7 = vmul.f32 %v18534_v33, %v6488_v39  ;;  %v14338_v42 = vpop.f32.mrb[44].mxu0  ;;  %v21418_v26 = vshrl.u32 %v18737_v37, 16  ;;  %vm21881_vm1 = vmmov %vm21864_vm7 }
 0x48d   : > { %14380 = vmatprep.mubr.msk.bf16.mxu1 %vm21873_vm9, %v6689_v47  ;;  %v21421_v58 = vshll.u32 %v18737_v37, 16  ;;  %v6564_v53 = vpack.c.bf16 %v6538_v52, %v6537_v36  ;;  %v6445_v8 = vadd.f32 %v14338_v42, %v18342_v3  ;;  %v6329_v62 = vpop.f32.mrb[45].mxu0  ;;  %vm21883_vm7 = vmmov %vm21829_vm0  ;;  %v21913_v11 = vshrl.u32 %v18581_v20, 16 }
 0x48e   : > { %v18847_v2 = vsel %vm21872_vm11, %v7123_v12, %v7132_v40  ;;  %v7140_v12 = vrot.slane %v21415_v63, 4  ;;  %v6563_v39 = vpack.c.bf16 %v6536_v7, %v6535_v48  ;;  %v6443_v45 = vadd.f32 %v18342_v3, %v6329_v62  ;;  %v14339_v35 = vpop.f32.mrb[46].mxu0  ;;  %vm21886_vm2 = vmmov %vm21881_vm1 }
 0x48f   : > { %v18860_v10 = vld [vmem:[#allocation3 + $0xb0] sm:$0xff]  ;;  %v7146_v47 = vrot.slane %v21418_v26, 3  ;;  %v7149_v36 = vrot.slane %v21421_v58, 4  ;;  %6588 = vst.msk [vmem:[#allocation3 + $0xc0] sm:$0xff] %vm21874_vm6, %v6564_v53  ;;  %v6493_v52 = vmax.f32 %v6445_v8, 0.0  ;;  %v6446_v42 = vadd.f32 %v14339_v35, %v18342_v3  ;;  %v6332_v63 = vpop.f32.mrb[47].mxu0  ;;  %vm21887_vm4 = vmmov %vm21829_vm0 }
 0x490   : > { %v18868_v6 = vld [vmem:[#allocation3 + $0xa8] sm:$0xff]  ;;  %v6692_v48 = vrot.slane %v18860_v10, 4  ;;  %v7141_v7 = vor.u32 %v7140_v12, %v7137_v14  ;;  %6587 = vst.msk [vmem:[#allocation3 + $0xb8] sm:$0xff] %vm21876_vm10, %v6563_v39  ;;  %v6491_v62 = vmax.f32 %v6443_v45, 0.0  ;;  %v6444_v33 = vadd.f32 %v15882_v60, %v6332_v63  ;;  %vm21892_vm5 = vmmov %vm21860_vm3 }
 0x491   : > { %21875 = vst [vmem:[#allocation61_spill] sm:$0xff] %v18868_v6  ;;  %v6690_v26 = vrot.slane %v18868_v6, 4  ;;  %v7150_v57 = vor.u32 %v7149_v36, %v7146_v47  ;;  %v6541_v58 = vmul.f32 %v18599_v18, %v6493_v52  ;;  %v6494_v53 = vmax.f32 %v6446_v42, 0.0  ;;  %vm21893_vm14 = vmmov %vm21860_vm3 }
 0x492   : > { %v18876_v8 = vsel %vm21877_vm13, %v7132_v40, %v7141_v7  ;;  %v21878_v3 = vshrl.u32 %v18785_v0, 16  ;;  %v6539_v55 = vmul.f32 %v18611_v31, %v6491_v62  ;;  %v6492_v14 = vmax.f32 %v6444_v33, 0.0  ;;  %vm21894_vm8 = vmmov %vm21881_vm1 }
 0x493   : > { %v6691_v12 = vsel %vm21860_vm3, %v6688_v44, %v6690_v26  ;;  %v6693_v39 = vsel %vm21879_vm15, %v6690_v26, %v6692_v48  ;;  %v6542_v63 = vmul.f32 %v18636_v23, %v6494_v53  ;;  %v18886_v60 = vsel %vm21881_vm1, %v7141_v7, %v7150_v57  ;;  %vm21895_vm11 = vmmov %vm21881_vm1 }
 0x494   : > { %v7155_v35 = vrot.slane %v21878_v3, 3  ;;  %14381 = vmatmul.mubr.msk.bf16.gmra.mrb[36].mxu1 %vm21880_vm12, %v6691_v12  ;;  %v21882_v40 = vshll.u32 %v18785_v0, 16  ;;  %v21427_v47 = vshrl.u32 %v18777_v25, 16  ;;  %v6540_v36 = vmul.f32 %v18657_v4, %v6492_v14  ;;  %vm21896_vm9 = vmmov %vm21829_vm0 }
 0x495   : > { %14384 = vmatprep.mubr.msk.bf16.mxu1 %vm21883_vm7, %v6693_v39  ;;  %v21426_v33 = vshll.u32 %v18777_v25, 16  ;;  %v21425_v44 = vshrl.u32 %v18827_v29, 16  ;;  %v21424_v26 = vshll.u32 %v18827_v29, 16  ;;  %v6566_v52 = vpack.c.bf16 %v6542_v63, %v6541_v58  ;;  %vm21897_vm6 = vmmov %vm21829_vm0 }
 0x496   : > { %v7158_v45 = vrot.slane %v21882_v40, 4  ;;  %v7164_v7 = vrot.slane %v21427_v47, 3  ;;  %v21432_v62 = vshrl.u32 %v18819_v54, 16  ;;  %v6565_v53 = vpack.c.bf16 %v6540_v36, %v6539_v55  ;;  %v18899_v3 = vld [vmem:[#allocation3 + $0xc0] sm:$0xff]  ;;  %vm21898_vm10 = vmmov %vm21881_vm1 }
 0x497   : > { %21884 = vst [vmem:[#allocation62_spill] sm:$0xff] %v18899_v3  ;;  %v7167_v14 = vrot.slane %v21426_v33, 4  ;;  %v7173_v12 = vrot.slane %v21425_v44, 3  ;;  %v7176_v39 = vrot.slane %v21424_v26, 4  ;;  %6590 = vst.msk [vmem:[#allocation3 + $0xd0] sm:$0xff] %vm21829_vm0, %v6566_v52  ;;  %v18908_v58 = vld [vmem:[#allocation3 + $0xb8] sm:$0xff] }
 0x498   : > { %v7159_v42 = vor.u32 %v7158_v45, %v7155_v35  ;;  %21885 = vst [vmem:[#allocation63_spill] sm:$0xff] %v18908_v58  ;;  %v6696_v35 = vrot.slane %v18899_v3, 4  ;;  %v7182_v55 = vrot.slane %v21432_v62, 3  ;;  %v21437_v40 = vshll.u32 %v18819_v54, 16  ;;  %6589 = vst.msk [vmem:[#allocation3 + $0xc8] sm:$0xff] %vm21887_vm4, %v6565_v53 }
 0x499   : > { %v6694_v45 = vrot.slane %v18908_v58, 4  ;;  %v21888_v36 = vshrl.u32 %v18538_v46, 16  ;;  %v7168_v52 = vor.u32 %v7167_v14, %v7164_v7  ;;  %v7177_v44 = vor.u32 %v7176_v39, %v7173_v12  ;;  %vm21901_vm13 = vmmov %vm21881_vm1 }
 0x49a   : > { %v18912_v63 = vsel %vm21886_vm2, %v7150_v57, %v7159_v42  ;;  %v21889_v33 = vshll.u32 %v18538_v46, 16  ;;  %v21890_v57 = vshrl.u32 %v17567_v15, 16  ;;  %v21891_v23 = vshll.u32 %v17567_v15, 16  ;;  %vm21902_vm15 = vmmov %vm21881_vm1 }
 0x49b   : > { %v7012_v26 = vrot.slane %v21888_v36, 3  ;;  %v7185_v31 = vrot.slane %v21437_v40, 4  ;;  %v6695_v53 = vsel %vm21892_vm5, %v6692_v48, %v6694_v45  ;;  %v6697_v18 = vsel %vm21893_vm14, %v6694_v45, %v6696_v35  ;;  %vm21903_vm12 = vmmov %vm21829_vm0 }
 0x49c   : > { %v7015_v47 = vrot.slane %v21889_v33, 4  ;;  %v7020_v4 = vrot.slane %v21890_v57, 3  ;;  %v7023_v62 = vrot.slane %v21891_v23, 4  ;;  %v18932_v36 = vsel %vm21894_vm8, %v7159_v42, %v7168_v52  ;;  %14385 = vmatmul.mubr.msk.bf16.gmra.mrb[40].mxu1 %vm21896_vm9, %v6695_v53  ;;  %vm21905_vm1 = vmmov %vm21829_vm0 }
 0x49d   : > { %v18935_v7 = vsel %vm21895_vm11, %v7168_v52, %v7177_v44  ;;  %v18938_v46 = vor.u32 %v7185_v31, %v7182_v55  ;;  %14388 = vmatprep.mubr.msk.bf16.mxu1 %vm21897_vm6, %v6697_v18  ;;  %v21899_v48 = vshrl.u32 %v18467_v41, 16  ;;  %v21900_v42 = vshll.u32 %v18467_v41, 16  ;;  %vm21925_vm5 = vmmov %vm21905_vm1 }
 0x49e   : > { %v7016_v23 = vor.u32 %v7015_v47, %v7012_v26  ;;  %v7024_v39 = vor.u32 %v7023_v62, %v7020_v4  ;;  %v18963_v41 = vshll.u32 %v18868_v6, 16  ;;  %v18966_v4 = vshrl.u32 %v18860_v10, 16  ;;  %vm21929_vm8 = vmmov %vm21905_vm1 }
 0x49f   : > { %v18943_v33 = vsel %vm21898_vm10, %v7177_v44, %v18938_v46  ;;  %v7560_v14 = vrot.slane %v21899_v48, 4  ;;  %v7561_v12 = vrot.slane %v21900_v42, 5  ;;  %v18949_v45 = vld [vmem:[#allocation3 + $0xc8] sm:$0xf]  ;;  %v18957_v44 = vshrl.u32 %v18868_v6, 16 }
 0x4a0   : > { %v6698_v52 = vrot.slane %v18949_v45, 4  ;;  %v7025_v31 = vsel %vm21901_vm13, %v7016_v23, %v7024_v39  ;;  %v7034_v47 = vsel %vm21902_vm15, %v7024_v39, %v18622_v43  ;;  %v18969_v62 = vshll.u32 %v18860_v10, 16  ;;  %vm21950_vm15 = vmmov %vm21905_vm1 }
 0x4a1   : > { %v18959_v26 = vor.u32 %v7561_v12, %v7560_v14  ;;  %v21906_v43 = vshll.u32 %v18453_v1, 16  ;;  %v21907_v53 = vshrl.u32 %v18551_v9, 16  ;;  %v21908_v48 = vshll.u32 %v18551_v9, 16 }
 0x4a2   : > { %v6699_v18 = vsel %vm21860_vm3, %v6696_v35, %v6698_v52  ;;  %v21904_v35 = vshrl.u32 %v18453_v1, 16  ;;  %v21909_v42 = vshrl.u32 %v18544_v61, 16  ;;  %v18983_v10 = vshrl.u32 %v18908_v58, 16 }
 0x4a3   : > { %v7565_v57 = vrot.slane %v21906_v43, 5  ;;  %v7568_v23 = vrot.slane %v21907_v53, 4  ;;  %v7569_v14 = vrot.slane %v21908_v48, 5  ;;  %v18986_v39 = vshll.u32 %v18908_v58, 16 }
 0x4a4   : > { %14389 = vmatmul.mubr.msk.bf16.gmra.mrb[44].mxu1 %vm21903_vm12, %v6699_v18  ;;  %v7564_v55 = vrot.slane %v21904_v35, 4  ;;  %v7572_v12 = vrot.slane %v21909_v42, 4  ;;  %v18989_v52 = vshrl.u32 %v18899_v3, 16  ;;  %v21910_v1 = vshll.u32 %v18544_v61, 16 }
 0x4a5   : > { %14396 = vmatprep.mubr.msk.bf16.mxu1 %vm21905_vm1, %v7025_v31  ;;  %v7570_v35 = vor.u32 %v7569_v14, %v7568_v23  ;;  %v21911_v9 = vshrl.u32 %v18585_v50, 16  ;;  %v21912_v53 = vshll.u32 %v18585_v50, 16  ;;  %v18998_v42 = vshll.u32 %v18899_v3, 16  ;;  %v15845_v14 = vld [vmem:[%s16107_s18 + $0x28] sm:$0xff]  }
 0x4a6   : > { %v7573_v31 = vrot.slane %v21910_v1, 5  ;;  %v7566_v18 = vor.u32 %v7565_v57, %v7564_v55  ;;  %v7580_v58 = vrot.slane %v21913_v11, 4  ;;  %v21914_v6 = vshll.u32 %v18581_v20, 16 }
 0x4a7   : > { %v7576_v43 = vrot.slane %v21911_v9, 4  ;;  %v7577_v48 = vrot.slane %v21912_v53, 5  ;;  %vm21915_vm7 = vsmask.f32 3328  ;;  %v21917_v50 = vshrl.u32 %v18626_v17, 16 }
 0x4a8   : > { %v7574_v40 = vor.u32 %v7573_v31, %v7572_v12  ;;  %v7581_v15 = vrot.slane %v21914_v6, 5  ;;  %v19006_v61 = vsel %vm21915_vm7, %v18959_v26, %v7566_v18  ;;  %vm21916_vm0 = vmmov %vm21915_vm7  ;;  %v21919_v11 = vshll.u32 %v18626_v17, 16 }
 0x4a9   : > { %v19009_v55 = vsel %vm21916_vm0, %v7566_v18, %v7570_v35  ;;  %v7578_v57 = vor.u32 %v7577_v48, %v7576_v43  ;;  %v7584_v23 = vrot.slane %v21917_v50, 4  ;;  %vm21918_vm2 = vmmov %vm21916_vm0  ;;  %v21920_v6 = vshrl.u32 %v18615_v21, 16 }
 0x4aa   : > { %v19015_v12 = vsel %vm21918_vm2, %v7570_v35, %v7574_v40  ;;  %v7582_v1 = vor.u32 %v7581_v15, %v7580_v58  ;;  %v7585_v20 = vrot.slane %v21919_v11, 5  ;;  %vm21921_vm4 = vmmov %vm21916_vm0  ;;  %v21922_v18 = vshll.u32 %v18615_v21, 16 }
 0x4ab   : > { %v7588_v31 = vrot.slane %v21920_v6, 4  ;;  %v19022_v9 = vsel %vm21921_vm4, %v7574_v40, %v7578_v57  ;;  %v21923_v53 = vshrl.u32 %v18663_v49, 16  ;;  %v21924_v35 = vshll.u32 %v18663_v49, 16  ;;  %vm21926_vm14 = vmmov %vm21916_vm0 }
 0x4ac   : > { %v7589_v43 = vrot.slane %v21922_v18, 5  ;;  %14397 = vmatmul.mubr.msk.bf16.vlgmr.msra.gmra.mrb[0].mxu1 %vm21925_vm5, %v7034_v47  ;;  %v19032_v15 = vsel %vm21926_vm14, %v7578_v57, %v7582_v1  ;;  %v7586_v17 = vor.u32 %v7585_v20, %v7584_v23  ;;  %v21927_v58 = vshrl.u32 %v18654_v28, 16  ;;  %v19046_v23 = vld [vmem:[%s16107_s18 + $0x30] sm:$0xff]   ;;  %vm21932_vm11 = vmmov %vm21916_vm0 }
 0x4ad   : > { %v7592_v48 = vrot.slane %v21923_v53, 4  ;;  %v7593_v50 = vrot.slane %v21924_v35, 5  ;;  %v21928_v11 = vshll.u32 %v18654_v28, 16  ;;  %14445 = vmatpush3.bf16.msra.mxu1 %v18541_v16  ;;  %14400 = vmatprep.mubr.msk.bf16.mxu1 %vm21929_vm8, %v18673_v34  ;;  %v21930_v18 = vshrl.u32 %v18703_v30, 16  ;;  %vm21935_vm9 = vmmov %vm21916_vm0 }
 0x4ae   : > { %v7596_v40 = vrot.slane %v21927_v58, 4  ;;  %v7590_v6 = vor.u32 %v7589_v43, %v7588_v31  ;;  %v21931_v57 = vshll.u32 %v18703_v30, 16  ;;  %14446 = vmatprep.subr.bf16.mxu1 %v15845_v14  ;;  %v19049_v20 = vsel %vm21932_vm11, %v7582_v1, %v7586_v17  ;;  %vm21936_vm6 = vmmov %vm21916_vm0 }
 0x4af   : > { %v7597_v21 = vrot.slane %v21928_v11, 5  ;;  %v7594_v49 = vor.u32 %v7593_v50, %v7592_v48  ;;  %v7600_v47 = vrot.slane %v21930_v18, 4  ;;  %v21933_v16 = vshrl.u32 %v18695_v27, 16  ;;  %vm21938_vm10 = vmmov %vm21916_vm0 }
 0x4b0   : > { %v7601_v53 = vrot.slane %v21931_v57, 5  ;;  %v21934_v34 = vshll.u32 %v18695_v27, 16  ;;  %v19056_v43 = vsel %vm21935_vm9, %v7586_v17, %v7590_v6  ;;  %v21937_v50 = vshrl.u32 %v18745_v13, 16  ;;  %vm21941_vm13 = vmmov %vm21916_vm0 }
 0x4b1   : > { %v7598_v28 = vor.u32 %v7597_v21, %v7596_v40  ;;  %v7604_v35 = vrot.slane %v21933_v16, 4  ;;  %v19059_v48 = vsel %vm21936_vm6, %v7590_v6, %v7594_v49  ;;  %v21939_v11 = vshll.u32 %v18745_v13, 16  ;;  %14447 = vmatpush3.bf16.msra.mxu1 %v15845_v14  ;;  %vm21945_vm3 = vmmov %vm21916_vm0 }
 0x4b2   : > { %v7605_v31 = vrot.slane %v21934_v34, 5  ;;  %v7602_v30 = vor.u32 %v7601_v53, %v7600_v47  ;;  %v7608_v58 = vrot.slane %v21937_v50, 4  ;;  %v21940_v27 = vshrl.u32 %v18737_v37, 16  ;;  %14496 = vmatprep.subr.bf16.mxu1 %v19046_v23  ;;  %vm21951_vm12 = vmmov %vm21916_vm0 }
 0x4b3   : > { %v19064_v1 = vsel %vm21938_vm10, %v7594_v49, %v7598_v28  ;;  %v7609_v21 = vrot.slane %v21939_v11, 5  ;;  %v21942_v6 = vshll.u32 %v18737_v37, 16  ;;  %v21943_v57 = vshrl.u32 %v18785_v0, 16  ;;  %vm21954_vm7 = vmmov %vm21916_vm0 }
 0x4b4   : > { %v7606_v40 = vor.u32 %v7605_v31, %v7604_v35  ;;  %v7612_v18 = vrot.slane %v21940_v27, 4  ;;  %v19071_v17 = vsel %vm21941_vm13, %v7598_v28, %v7602_v30  ;;  %v21944_v49 = vshll.u32 %v18785_v0, 16  ;;  %14401 = vmatmul.mubr.msk.bf16.gmra.mrb[4].mxu1 %vm21950_vm15, %v18707_v19  ;;  %vm21955_vm2 = vmmov %vm21916_vm0 }
 0x4b5   : > { %v7613_v47 = vrot.slane %v21942_v6, 5  ;;  %v7616_v53 = vrot.slane %v21943_v57, 4  ;;  %v7610_v35 = vor.u32 %v7609_v21, %v7608_v58  ;;  %v21946_v14 = vshrl.u32 %v18777_v25, 16  ;;  %14404 = vmatprep.mubr.msk.bf16.mxu1 %vm21905_vm1, %v18721_v24  ;;  %vm21956_vm4 = vmmov %vm21916_vm0 }
 0x4b6   : > { %v7617_v16 = vrot.slane %v21944_v49, 5  ;;  %v19081_v13 = vsel %vm21945_vm3, %v7602_v30, %v7606_v40  ;;  %v21947_v28 = vshll.u32 %v18777_v25, 16  ;;  %v21948_v11 = vshrl.u32 %v18827_v29, 16  ;;  %vm21957_vm5 = vmmov %vm21916_vm0 }
 0x4b7   : > { %v7620_v34 = vrot.slane %v21946_v14, 4  ;;  %v7614_v37 = vor.u32 %v7613_v47, %v7612_v18  ;;  %v21949_v0 = vshll.u32 %v18827_v29, 16  ;;  %v19094_v30 = vsel %vm21951_vm12, %v7606_v40, %v7610_v35  ;;  %vm21958_vm14 = vmmov %vm21916_vm0 }
 0x4b8   : > { %v7621_v31 = vrot.slane %v21947_v28, 5  ;;  %v7618_v50 = vor.u32 %v7617_v16, %v7616_v53  ;;  %v7624_v27 = vrot.slane %v21948_v11, 4  ;;  %v21952_v21 = vshrl.u32 %v18819_v54, 16  ;;  %vm21959_vm8 = vmmov %vm21916_vm0 }
 0x4b9   : > { %v7625_v6 = vrot.slane %v21949_v0, 5  ;;  %v21953_v25 = vshll.u32 %v18819_v54, 16  ;;  %v19103_v47 = vsel %vm21954_vm7, %v7610_v35, %v7614_v37  ;;  %v7632_v40 = vrot.slane %v18957_v44, 4  ;;  %vm21960_vm11 = vmmov %vm21916_vm0 }
 0x4ba   : > { %v7622_v58 = vor.u32 %v7621_v31, %v7620_v34  ;;  %v7628_v57 = vrot.slane %v21952_v21, 4  ;;  %v19106_v29 = vsel %vm21916_vm0, %v7614_v37, %v7618_v50  ;;  %v7633_v16 = vrot.slane %v18963_v41, 5  ;;  %vm21961_vm9 = vmmov %vm21905_vm1 }
 0x4bb   : > { %v7629_v18 = vrot.slane %v21953_v25, 5  ;;  %v7626_v19 = vor.u32 %v7625_v6, %v7624_v27  ;;  %v7636_v54 = vrot.slane %v18966_v4, 4  ;;  %v7637_v24 = vrot.slane %v18969_v62, 5  ;;  %vm21962_vm6 = vmmov %vm21916_vm0  ;;  %v19154_v25 = vld [vmem:[#allocation3 + $0x20] sm:$0xff] }
 0x4bc   : > { %v19110_v53 = vsel %vm21955_vm2, %v7618_v50, %v7622_v58  ;;  %v7640_v35 = vrot.slane %v18983_v10, 4  ;;  %v7641_v34 = vrot.slane %v18986_v39, 5  ;;  %v7634_v31 = vor.u32 %v7633_v16, %v7632_v40  ;;  %14405 = vmatmul.mubr.msk.bf16.gmra.mrb[8].mxu1 %vm21961_vm9, %v18724_v38  ;;  %vm21963_vm10 = vmmov %vm21905_vm1  ;;  %v19152_v38 = vld [vmem:[#allocation3 + $0x18] sm:$0xff] }
 0x4bd   : > { %v7630_v49 = vor.u32 %v7629_v18, %v7628_v57  ;;  %v19115_v14 = vsel %vm21956_vm4, %v7622_v58, %v7626_v19  ;;  %v7644_v37 = vrot.slane %v18989_v52, 4  ;;  %v7645_v50 = vrot.slane %v18998_v42, 5  ;;  %14408 = vmatprep.mubr.msk.bf16.mxu1 %vm21963_vm10, %v18753_v51  ;;  %vm21964_vm13 = vmmov %vm21905_vm1 }
 0x4be   : > { %v7638_v11 = vor.u32 %v7637_v24, %v7636_v54  ;;  %v7642_v27 = vor.u32 %v7641_v34, %v7640_v35  ;;  %vm21965_vm3 = vmmov %vm21905_vm1  ;;  %v8195_v18 = vrot.slane %v18957_v44, 7  ;;  %v8203_v51 = vrot.slane %v18966_v4, 7 }
 0x4bf   : > { %v19121_v28 = vsel %vm21957_vm5, %v7626_v19, %v7630_v49  ;;  %v19126_v0 = vsel %vm21958_vm14, %v7630_v49, %v7634_v31  ;;  %v19128_v6 = vor.u32 %v7645_v50, %v7644_v37  ;;  %vm21966_vm15 = vmmov %vm21905_vm1  ;;  %v8211_v19 = vrot.slane %v18983_v10, 7 }
 0x4c0   : > { %v19131_v58 = vsel %vm21959_vm8, %v7634_v31, %v7638_v11  ;;  %v19134_v21 = vsel %vm21960_vm11, %v7638_v11, %v7642_v27  ;;  %vm21967_vm12 = vmmov %vm21905_vm1  ;;  %v21445_v40 = vshll.u32 %v19154_v25, 16  ;;  %vm21969_vm0 = vsmask.f32 256 }
 0x4c1   : > { %v19140_v57 = vsel %vm21962_vm6, %v7642_v27, %v19128_v6  ;;  %v8214_v49 = vor.u32 %v8211_v19, %v18986_v39  ;;  %vm21968_vm7 = vmmov %vm21905_vm1  ;;  %v21446_v34 = vshrl.u32 %v19154_v25, 16  ;;  %vm21973_vm5 = vsmask.f32 7424 }
 0x4c2   : > { %vm21970_vm2 = vmmov %vm21969_vm0  ;;  %v8975_v37 = vrot.slane %v21445_v40, 1  ;;  %v7191_v27 = vrot.slane %v18957_v44, 3 }
 0x4c3   : > { %v19178_v24 = vsel %vm21970_vm2, %v8203_v51, %v8214_v49  ;;  %vm21971_vm4 = vmmov %vm21969_vm0 }
 0x4c4   : > { %14409 = vmatmul.mubr.msk.bf16.gmra.mrb[12].mxu1 %vm21964_vm13, %v18763_v22  ;;  %v21444_v22 = vrot.slane %v18989_v52, 7  ;;  %v19193_v50 = vor.u32 %v8975_v37, %v21446_v34  ;;  %vm21975_vm14 = vmmov %vm21905_vm1  ;;  %vm21981_vm13 = vsmask.f32 4352 }
 0x4c5   : > { %14412 = vmatprep.mubr.msk.bf16.mxu1 %vm21965_vm3, %v18789_v59  ;;  %v21447_v59 = vshll.u32 %v19152_v38, 16  ;;  %vm21976_vm8 = vmmov %vm21905_vm1 }
 0x4c6   : > { %v8222_v16 = vor.u32 %v21444_v22, %v18998_v42  ;;  %21972 = vst [vmem:[#allocation64_spill] sm:$0xff] %v19193_v50  ;;  %vm21977_vm11 = vmmov %vm21905_vm1 }
 0x4c7   : > { %v8970_v31 = vrot.slane %v21447_v59, 1  ;;  %vm21978_vm9 = vmmov %vm21905_vm1 }
 0x4c8   : > { %v19181_v35 = vsel %vm21971_vm4, %v8211_v19, %v8222_v16  ;;  %vm21979_vm6 = vmmov %vm21905_vm1  ;;  %v8954_v16 = vld [vmem:[#allocation3 + $0xb0] sm:$0xff]  ;;  %vm22003_vm4 = vsmask.f32 3328 }
 0x4c9   : > { %vm21980_vm10 = vmmov %vm21905_vm1 }
 0x4ca   : > { %vm21982_vm3 = vmmov %vm21905_vm1 }
 0x4cb   : > { %vm22001_vm2 = vmmov %vm21982_vm3 }
 0x4cc   : > { %14413 = vmatmul.mubr.msk.bf16.gmra.mrb[16].mxu1 %vm21966_vm15, %v18804_v56  ;;  %v19163_v56 = vor.u32 %v8195_v18, %v18963_v41  ;;  %vm21983_vm15 = vmmov %vm21981_vm13 }
 0x4cd   : > { %14416 = vmatprep.mubr.msk.bf16.mxu1 %vm21967_vm12, %v18815_v32  ;;  %v8206_v32 = vor.u32 %v8203_v51, %v18969_v62  ;;  %v7200_v51 = vrot.slane %v18966_v4, 3  ;;  %v7221_v4 = vrot.slane %v18998_v42, 4  ;;  %vm21984_vm12 = vmmov %vm21905_vm1 }
 0x4cf   : > { %v19175_v54 = vsel %vm21969_vm0, %v8195_v18, %v8206_v32  ;;  %v7194_v18 = vrot.slane %v18963_v41, 4  ;;  %v7218_v41 = vrot.slane %v18989_v52, 3 }
 0x4d4   : > { %14417 = vmatmul.mubr.msk.bf16.gmra.mrb[20].mxu1 %vm21905_vm1, %v18844_v5  ;;  %v21448_v5 = vshrl.u32 %v19152_v38, 16  ;;  %vm21989_vm1 = vmmov %vm21981_vm13 }
 0x4d5   : > { %14420 = vmatprep.mubr.msk.bf16.mxu1 %vm21968_vm7, %v18847_v2  ;;  %vm21996_vm7 = vmmov %vm21982_vm3 }
 0x4d6   : > { %v8971_v2 = vor.u32 %v8970_v31, %v21448_v5  ;;  %v7222_v31 = vor.u32 %v7221_v4, %v7218_v41  ;;  %vm21997_vm0 = vmmov %vm21989_vm1 }
 0x4d8   : > { %v19196_v11 = vsel %vm21973_vm5, %v8971_v2, %v8975_v37  ;;  %v8955_v37 = vld [vmem:[#allocation3 + $0xb8] sm:$0xff]  ;;  %vm22004_vm5 = vmmov %vm21997_vm0 }
 0x4d9   : > { %21974 = vst [vmem:[#allocation65_spill] sm:$0xff] %v19196_v11  ;;  %v19242_v4 = vshll.u32 %v8955_v37, 16 }
 0x4db   : > { %21994 = vst [vmem:[#allocation71_spill] sm:$0xff] %v19242_v4  ;;  %v9724_v59 = vrot.slane %v19242_v4, 4 }
 0x4dc   : > { %14421 = vmatmul.mubr.msk.bf16.gmra.mrb[24].mxu1 %vm21975_vm14, %v18876_v8  ;;  %v7203_v8 = vrot.slane %v18969_v62, 4  ;;  %v15883_v62 = vld [vmem:[#allocation3 + $0x8] sm:$0xf0]  ;;  %vm22007_vm14 = vmmov %vm21997_vm0 }
 0x4dd   : > { %14424 = vmatprep.mubr.msk.bf16.mxu1 %vm21976_vm8, %v18886_v60  ;;  %v7195_v60 = vor.u32 %v7194_v18, %v7191_v27  ;;  %v7549_v32 = vshrl.u32 %v15883_v62, 16  ;;  %vm22008_vm8 = vmmov %vm21997_vm0 }
 0x4de   : > { %v7204_v19 = vor.u32 %v7203_v8, %v7200_v51  ;;  %v19233_v51 = vld [vmem:[#allocation3 + $0xc0] sm:$0xff] }
 0x4df   : > { %v7196_v44 = vsel %vm21981_vm13, %v18938_v46, %v7195_v60  ;;  %v7228_v46 = vshll.u32 %v18949_v45, 16  ;;  %v7551_v2 = vrot.slane %v7549_v32, 4  ;;  %21988 = vst [vmem:[#allocation69_spill] sm:$0xff] %v19233_v51  ;;  %v19251_v22 = vshll.u32 %v19233_v51, 16  ;;  %vm22015_vm13 = vmmov %vm22001_vm2 }
 0x4e1   : > { %v7230_v41 = vrot.slane %v7228_v46, 4  ;;  %21999 = vst [vmem:[#allocation73_spill] sm:$0xff] %v19251_v22  ;;  %v9733_v11 = vrot.slane %v19251_v22, 4 }
 0x4e4   : > { %14425 = vmatmul.mubr.msk.bf16.gmra.mrb[28].mxu1 %vm21977_vm11, %v18912_v63  ;;  %v7209_v63 = vrot.slane %v18983_v10, 3  ;;  %v19223_v10 = vld [vmem:[#allocation3 + $0xa8] sm:$0xff]  ;;  %vm22010_vm11 = vmmov %vm22001_vm2 }
 0x4e5   : > { %14428 = vmatprep.mubr.msk.bf16.mxu1 %vm21978_vm9, %v18932_v36  ;;  %v7212_v36 = vrot.slane %v18986_v39, 4  ;;  %21985 = vst [vmem:[#allocation66_spill] sm:$0xff] %v19223_v10  ;;  %v7225_v39 = vshrl.u32 %v18949_v45, 16  ;;  %v19228_v18 = vshll.u32 %v19223_v10, 16  ;;  %v19231_v42 = vshrl.u32 %v19223_v10, 16  ;;  %vm22011_vm9 = vmmov %vm21997_vm0 }
 0x4e6   : > { %v19240_v45 = vshrl.u32 %v8954_v16, 16 }
 0x4e7   : > { %v7213_v49 = vor.u32 %v7212_v36, %v7209_v63  ;;  %21986 = vst [vmem:[#allocation67_spill] sm:$0xff] %v19228_v18  ;;  %21987 = vst [vmem:[#allocation68_spill] sm:$0xff] %v19231_v42  ;;  %v9706_v46 = vrot.slane %v19228_v18, 4 }
 0x4e8   : > { %21993 = vst [vmem:[#allocation70_spill] sm:$0xff] %v19240_v45 }
 0x4e9   : > { %v7214_v8 = vsel %vm21989_vm1, %v7204_v19, %v7213_v49  ;;  %v7223_v32 = vsel %vm21997_vm0, %v7213_v49, %v7222_v31  ;;  %vm22024_vm0 = vmmov %vm22001_vm2 }
 0x4ec   : > { %14429 = vmatmul.mubr.msk.bf16.gmra.mrb[32].mxu1 %vm21979_vm6, %v18935_v7  ;;  %v7205_v7 = vsel %vm21983_vm15, %v7195_v60, %v7204_v19  ;;  %v21990_v60 = vld [vmem:[#allocation12_spill] sm:$0xff]  ;;  %vm22013_vm6 = vmmov %vm22001_vm2  ;;  %vm22017_vm15 = vcmask 1043456  }
 0x4ed   : > { %14432 = vmatprep.mubr.msk.bf16.mxu1 %vm21980_vm10, %v18943_v33  ;;  %v7552_v33 = vshll.u32 %v15883_v62, 16  ;;  %v21991_v63 = vshrl.u32 %v21990_v60, 16  ;;  %v19244_v62 = vshrl.u32 %v8955_v37, 16  ;;  %vm22014_vm10 = vmmov %vm22003_vm4 }
 0x4ef   : > { %v7554_v27 = vrot.slane %v7552_v33, 5  ;;  %v7556_v36 = vrot.slane %v21991_v63, 4  ;;  %21995 = vst [vmem:[#allocation72_spill] sm:$0xff] %v19244_v62  ;;  %v21998_v33 = vshll.u32 %v21990_v60, 16  ;;  %v19254_v63 = vshrl.u32 %v19233_v51, 16 }
 0x4f1   : > { %v7557_v19 = vrot.slane %v21998_v33, 5  ;;  %22000 = vst [vmem:[#allocation74_spill] sm:$0xff] %v19254_v63  ;;  %v7555_v40 = vor.u32 %v7554_v27, %v7551_v2  ;;  %v9721_v33 = vrot.slane %v19244_v62, 3 }
 0x4f3   : > { %v7558_v5 = vor.u32 %v7557_v19, %v7556_v36  ;;  %v9725_v3 = vor.u32 %v9724_v59, %v9721_v33  ;;  %v15847_v59 = vld [vmem:[%s16107_s18 + $0x38] sm:$0xff]   ;;  %v10648_v19 = vrot.slane %v19240_v45, 4  ;;  %v10656_v33 = vrot.slane %v19254_v63, 4 }
 0x4f4   : > { %14433 = vmatmul.mubr.msk.bf16.gmra.mrb[36].mxu1 %vm21982_vm3, %v7196_v44  ;;  %v19238_v44 = vshll.u32 %v8954_v16, 16  ;;  %vm22016_vm3 = vmmov %vm22001_vm2 }
 0x4f5   : > { %14436 = vmatprep.mubr.msk.bf16.mxu1 %vm21984_vm12, %v7205_v7  ;;  %v7227_v7 = vrot.slane %v7225_v39, 3  ;;  %v9703_v39 = vrot.slane %v19231_v42, 3  ;;  %v7559_v2 = vsel %vm22003_vm4, %v7555_v40, %v7558_v5  ;;  %v7563_v40 = vsel %vm22014_vm10, %v7558_v5, %v18959_v26  ;;  %vm22019_vm12 = vmmov %vm22017_vm15 }
 0x4f6   : > { %21992 = vst [vmem:[#allocation12_spill] sm:$0xff] %v19238_v44  ;;  %v9715_v49 = vrot.slane %v19238_v44, 4  ;;  %vm22021_vm1 = vmmov %vm22019_vm12 }
 0x4f7   : > { %v7231_v34 = vor.u32 %v7230_v41, %v7227_v7  ;;  %v19261_v60 = vor.u32 %v9706_v46, %v9703_v39  ;;  %vm22026_vm4 = vmmov %vm22024_vm0  ;;  %v10649_v46 = vrot.slane %v19238_v44, 5 }
 0x4f9   : > { %22002 = vst [vmem:[#allocation75_spill] sm:$0xff] %v19261_v60  ;;  %v7232_v41 = vsel %vm22007_vm14, %v7222_v31, %v7231_v34  ;;  %v21451_v34 = vrot.slane %v19223_v10, 4  ;;  %v21450_v31 = vrot.slane %v19233_v51, 4  ;;  %vm22030_vm14 = vmmov %vm22024_vm0 }
 0x4fc   : > { %14437 = vmatmul.mubr.msk.bf16.gmra.mrb[40].mxu1 %vm21996_vm7, %v7214_v8  ;;  %v9712_v8 = vrot.slane %v19240_v45, 3  ;;  %vm22023_vm7 = vmmov %vm22001_vm2 }
 0x4fd   : > { %14440 = vmatprep.mubr.msk.bf16.mxu1 %vm22001_vm2, %v7223_v32  ;;  %v9730_v32 = vrot.slane %v19254_v63, 3  ;;  %vm22025_vm2 = vmmov %vm22024_vm0  ;;  %v19553_v63 = vld [vmem:[#allocation3 + $0x98] sm:$0xff] }
 0x4fe   : > { %v9716_v50 = vor.u32 %v9715_v49, %v9712_v8  ;;  %v10653_v49 = vrot.slane %v19242_v4, 5  ;;  %22086 = vst [vmem:[#allocation95_spill] sm:$0xff] %v19553_v63  ;;  %v19571_v4 = vld [vmem:[#allocation3 + $0xa0] sm:$0xff] }
 0x4ff   : > { %v19272_v7 = vor.u32 %v9733_v11, %v9730_v32  ;;  %v10197_v11 = vrot.slane %v8955_v37, 4  ;;  %v10645_v37 = vrot.slane %v19228_v18, 5  ;;  %v10657_v32 = vrot.slane %v19251_v22, 5  ;;  %22092 = vst [vmem:[#allocation98_spill] sm:$0xff] %v19571_v4 }
 0x500   : > { %v19270_v27 = vsel %vm22004_vm5, %v19261_v60, %v9716_v50  ;;  %v19276_v39 = vsel %vm22008_vm8, %v9716_v50, %v9725_v3  ;;  %v19293_v50 = vld [vmem:[%s16107_s18 + $0x40] sm:$0xff]   ;;  %vm22029_vm5 = vmmov %vm22024_vm0  ;;  %v19591_v18 = vshll.u32 %v19571_v4, 16 }
 0x501   : > { %22005 = vst [vmem:[#allocation76_spill] sm:$0xff] %v19270_v27  ;;  %22006 = vst [vmem:[#allocation77_spill] sm:$0xff] %v19272_v7  ;;  %v19281_v36 = vsel %vm22011_vm9, %v9725_v3, %v19272_v7  ;;  %v10195_v3 = vrot.slane %v8954_v16, 4  ;;  %v10644_v16 = vrot.slane %v19231_v42, 4  ;;  %v19547_v27 = vld [vmem:[#allocation3 + $0x90] sm:$0xff]  ;;  %v19578_v42 = vshll.u32 %v19553_v63, 16 }
 0x502   : > { %22009 = vst [vmem:[#allocation78_spill] sm:$0xff] %v19276_v39  ;;  %22012 = vst [vmem:[#allocation79_spill] sm:$0xff] %v19281_v36  ;;  %v19575_v44 = vshll.u32 %v19547_v27, 16 }
 0x503   : > { %v19299_v26 = vsel %vm22017_vm15, %v21451_v34, %v10195_v3  ;;  %v19302_v5 = vsel %vm22019_vm12, %v10195_v3, %v10197_v11  ;;  %v19326_v8 = vor.u32 %v10645_v37, %v10644_v16  ;;  %vm22031_vm8 = vmmov %vm22014_vm10  ;;  %v19475_v34 = vld [vmem:[#allocation3 + $0x60] sm:$0xff]  ;;  %22085 = vst [vmem:[#allocation94_spill] sm:$0xff] %v19547_v27 }
 0x504   : > { %14441 = vmatmul.mubr.msk.bf16.gmra.mrb[44].mxu1 %vm22010_vm11, %v7232_v41  ;;  %22018 = vst [vmem:[#allocation80_spill] sm:$0xff] %v19299_v26  ;;  %22020 = vst [vmem:[#allocation81_spill] sm:$0xff] %v19302_v5  ;;  %v19523_v26 = vld [vmem:[#allocation3 + $0x80] sm:$0xff] }
 0x505   : > { %14448 = vmatprep.mubr.msk.bf16.mxu1 %vm22013_vm6, %v7559_v2  ;;  %22028 = vst [vmem:[#allocation84_spill] sm:$0xff] %v19326_v8  ;;  %vm22034_vm11 = vmmov %vm22031_vm8  ;;  %v19551_v60 = vshll.u32 %v19523_v26, 16 }
 0x506   : > { %vm22036_vm9 = vmmov %vm22031_vm8  ;;  %22080 = vst [vmem:[#allocation92_spill] sm:$0xff] %v19523_v26 }
 0x507   : > { %vm22039_vm6 = vmmov %vm22024_vm0 }
 0x508   : > { %vm22040_vm10 = vmmov %vm22024_vm0 }
 0x509   : > { %vm22043_vm15 = vmmov %vm22024_vm0 }
 0x50a   : > { %vm22044_vm12 = vmmov %vm22024_vm0 }
 0x50c   : > { %14449 = vmatmul.mubr.msk.bf16.vlgmr.msra.gmra.mrb[0].mxu1 %vm22015_vm13, %v7563_v40  ;;  %vm22041_vm13 = vmmov %vm22024_vm0 }
 0x50d   : > { %14497 = vmatpush3.bf16.msra.mxu1 %v19046_v23  ;;  %14452 = vmatprep.mubr.msk.bf16.mxu1 %vm22016_vm3, %v19006_v61  ;;  %v19307_v61 = vsel %vm22021_vm1, %v10197_v11, %v21450_v31  ;;  %v19318_v23 = vld [vmem:[#allocation3 + $0xd8] sm:$0xff]  ;;  %vm22042_vm3 = vmmov %vm22024_vm0 }
 0x50e   : > { %14498 = vmatprep.subr.bf16.mxu1 %v15847_v59  ;;  %22022 = vst [vmem:[#allocation82_spill] sm:$0xff] %v19307_v61  ;;  %22027 = vst [vmem:[#allocation83_spill] sm:$0xff] %v19318_v23 }
 0x50f   : > { %vm22045_vm1 = vmmov %vm22024_vm0 }
 0x511   : > { %14499 = vmatpush3.bf16.msra.mxu1 %v15847_v59  ;;  %v19340_v59 = vor.u32 %v10657_v32, %v10656_v33  ;;  %v19402_v33 = vld [vmem:[#allocation3 + $0x38] sm:$0xff] }
 0x512   : > { %14548 = vmatprep.subr.bf16.mxu1 %v19293_v50 }
 0x513   : > { %22033 = vst [vmem:[#allocation86_spill] sm:$0xff] %v19340_v59 }
 0x514   : > { %14453 = vmatmul.mubr.msk.bf16.gmra.mrb[4].mxu1 %vm22023_vm7, %v19009_v55  ;;  %v21453_v55 = vshrl.u32 %v19318_v23, 16  ;;  %vm22046_vm7 = vmmov %vm22024_vm0 }
 0x515   : > { %14456 = vmatprep.mubr.msk.bf16.mxu1 %vm22024_vm0, %v19015_v12  ;;  %v21452_v12 = vshll.u32 %v19318_v23, 16  ;;  %v19529_v23 = vld [vmem:[#allocation3 + $0x88] sm:$0xff] }
 0x516   : > { %22082 = vst [vmem:[#allocation93_spill] sm:$0xff] %v19529_v23  ;;  %v19556_v22 = vshll.u32 %v19529_v23, 16 }
 0x517   : > { %v10669_v40 = vrot.slane %v21452_v12, 5 }
 0x51c   : > { %14457 = vmatmul.mubr.msk.bf16.gmra.mrb[8].mxu1 %vm22025_vm2, %v19022_v9  ;;  %v10652_v9 = vrot.slane %v19244_v62, 4  ;;  %vm22047_vm2 = vmmov %vm22024_vm0 }
 0x51d   : > { %14460 = vmatprep.mubr.msk.bf16.mxu1 %vm22026_vm4, %v19032_v15  ;;  %v10650_v15 = vor.u32 %v10649_v46, %v10648_v19  ;;  %vm22048_vm4 = vmmov %vm22024_vm0  ;;  %v22055_v46 = vshrl.u32 %v19154_v25, 16 }
 0x51e   : > { %v10654_v41 = vor.u32 %v10653_v49, %v10652_v9  ;;  %v19399_v49 = vld [vmem:[#allocation3 + $0x30] sm:$0xff] }
 0x51f   : > { %v19338_v2 = vsel %vm22031_vm8, %v19326_v8, %v10650_v15  ;;  %vm22052_vm8 = vmmov %vm22024_vm0  ;;  %v8059_v9 = vrot.slane %v22055_v46, 7  ;;  %v19505_v8 = vld [vmem:[#allocation3 + $0x78] sm:$0xff] }
 0x520   : > { %22032 = vst [vmem:[#allocation85_spill] sm:$0xff] %v19338_v2  ;;  %v19347_v3 = vsel %vm22034_vm11, %v10650_v15, %v10654_v41  ;;  %vm22054_vm11 = vmmov %vm22036_vm9  ;;  %v19503_v2 = vshll.u32 %v19475_v34, 16  ;;  %v19532_v7 = vshll.u32 %v19505_v8, 16 }
 0x521   : > { %22035 = vst [vmem:[#allocation87_spill] sm:$0xff] %v19347_v3  ;;  %v19499_v3 = vld [vmem:[#allocation3 + $0x70] sm:$0xff]  ;;  %22076 = vst [vmem:[#allocation91_spill] sm:$0xff] %v19505_v8 }
 0x522   : > { %22074 = vst [vmem:[#allocation90_spill] sm:$0xff] %v19499_v3  ;;  %v19527_v10 = vshll.u32 %v19499_v3, 16 }
 0x524   : > { %14461 = vmatmul.mubr.msk.bf16.gmra.mrb[12].mxu1 %vm22029_vm5, %v19049_v20  ;;  %v10668_v20 = vrot.slane %v21453_v55, 4  ;;  %vm22049_vm5 = vmmov %vm22024_vm0  ;;  %v19481_v55 = vld [vmem:[#allocation3 + $0x68] sm:$0xff] }
 0x525   : > { %14464 = vmatprep.mubr.msk.bf16.mxu1 %vm22030_vm14, %v19056_v43  ;;  %v19351_v43 = vsel %vm22036_vm9, %v10654_v41, %v19340_v59  ;;  %vm22050_vm14 = vmmov %vm22024_vm0  ;;  %v19508_v51 = vshll.u32 %v19481_v55, 16 }
 0x526   : > { %22037 = vst [vmem:[#allocation88_spill] sm:$0xff] %v19351_v43  ;;  %v19353_v11 = vor.u32 %v10669_v40, %v10668_v20  ;;  %vm22056_vm9 = vmmov %vm22024_vm0  ;;  %v19410_v20 = vshrl.u32 %v19399_v49, 16 }
 0x528   : > { %22038 = vst [vmem:[#allocation89_spill] sm:$0xff] %v19353_v11 }
 0x52c   : > { %14465 = vmatmul.mubr.msk.bf16.gmra.mrb[16].mxu1 %vm22039_vm6, %v19059_v48  ;;  %v7542_v48 = vld [vmem:[#allocation3 + $0xc8] sm:$0x1f]  ;;  %vm22057_vm6 = vsmask.f32 256 }
 0x52d   : > { %14468 = vmatprep.mubr.msk.bf16.mxu1 %vm22040_vm10, %v19064_v1  ;;  %v7649_v1 = vshrl.u32 %v7542_v48, 16  ;;  %vm22058_vm10 = vmmov %vm22024_vm0 }
 0x534   : > { %14469 = vmatmul.mubr.msk.bf16.gmra.mrb[20].mxu1 %vm22041_vm13, %v19071_v17  ;;  %v7652_v17 = vshll.u32 %v7542_v48, 16  ;;  %v19414_v48 = vshrl.u32 %v19402_v33, 16  ;;  %vm22060_vm13 = vmmov %vm22057_vm6 }
 0x535   : > { %14472 = vmatprep.mubr.msk.bf16.mxu1 %vm22042_vm3, %v19081_v13  ;;  %v8014_v13 = vld [vmem:[#allocation3 + $0x10] sm:$0x80]  ;;  %vm22061_vm3 = vmmov %vm22024_vm0 }
 0x53c   : > { %14473 = vmatmul.mubr.msk.bf16.gmra.mrb[24].mxu1 %vm22043_vm15, %v19094_v30  ;;  %v7651_v30 = vrot.slane %v7649_v1, 4  ;;  %v15849_v1 = vld [vmem:[%s16107_s18 + $0x48] sm:$0xff]   ;;  %vm22062_vm15 = vmmov %vm22057_vm6 }
 0x53d   : > { %14476 = vmatprep.mubr.msk.bf16.mxu1 %vm22044_vm12, %v19103_v47  ;;  %v7654_v47 = vrot.slane %v7652_v17, 5  ;;  %vm22063_vm12 = vmmov %vm22024_vm0 }
 0x544   : > { %14477 = vmatmul.mubr.msk.bf16.gmra.mrb[28].mxu1 %vm22045_vm1, %v19106_v29  ;;  %v8045_v29 = vshrl.u32 %v8014_v13, 16  ;;  %v8075_v13 = vrot.slane %v19410_v20, 7  ;;  %vm22064_vm1 = vmmov %vm22057_vm6 }
 0x545   : > { %14480 = vmatprep.mubr.msk.bf16.mxu1 %vm22046_vm7, %v19110_v53  ;;  %v22051_v53 = vshrl.u32 %v19152_v38, 16  ;;  %vm22065_vm7 = vmmov %vm22024_vm0 }
 0x546   : > { %v8047_v16 = vrot.slane %v8045_v29, 7  ;;  %v19422_v29 = vld [vmem:[#allocation3 + $0x40] sm:$0xff] }
 0x54c   : > { %14481 = vmatmul.mubr.msk.bf16.gmra.mrb[32].mxu1 %vm22024_vm0, %v19115_v14  ;;  %v8051_v14 = vrot.slane %v22051_v53, 7  ;;  %v19427_v53 = vshll.u32 %v19399_v49, 16  ;;  %vm22066_vm0 = vmmov %vm22064_vm1 }
 0x54d   : > { %14484 = vmatprep.mubr.msk.bf16.mxu1 %vm22047_vm2, %v19121_v28  ;;  %v19385_v28 = vld [vmem:[#allocation3 + $0x28] sm:$0xff] }
 0x54e   : > { %v19390_v19 = vshrl.u32 %v19385_v28, 16  ;;  %v19405_v32 = vshll.u32 %v19385_v28, 16 }
 0x550   : > { %v8067_v15 = vrot.slane %v19390_v19, 7 }
 0x552   : > { %v8070_v40 = vor.u32 %v19405_v32, %v8067_v15 }
 0x554   : > { %14485 = vmatmul.mubr.msk.bf16.gmra.mrb[36].mxu1 %vm22048_vm4, %v19126_v0  ;;  %v7655_v0 = vor.u32 %v7654_v47, %v7651_v30  ;;  %v8071_v30 = vsel %vm22062_vm15, %v8059_v9, %v8070_v40  ;;  %v8083_v47 = vrot.slane %v19414_v48, 7  ;;  %v19455_v40 = vshll.u32 %v19422_v29, 16  ;;  %vm22067_vm4 = vmmov %vm22066_vm0 }
 0x555   : > { %14488 = vmatprep.mubr.msk.bf16.mxu1 %vm22049_vm5, %v19131_v58  ;;  %v22053_v58 = vshll.u32 %v19152_v38, 16  ;;  %vm22068_vm5 = vmmov %vm22047_vm2 }
 0x556   : > { %vm22079_vm15 = vmmov %vm22066_vm0 }
 0x557   : > { %v8054_v37 = vor.u32 %v22053_v58, %v8051_v14  ;;  %v8078_v58 = vor.u32 %v19427_v53, %v8075_v13 }
 0x559   : > { %v8079_v46 = vsel %vm22064_vm1, %v8067_v15, %v8078_v58  ;;  %vm22083_vm1 = vmmov %vm22066_vm0 }
 0x55c   : > { %14489 = vmatmul.mubr.msk.bf16.gmra.mrb[40].mxu1 %vm22050_vm14, %v19134_v21  ;;  %v7656_v21 = vsel %vm22054_vm11, %v19128_v6, %v7655_v0  ;;  %v22059_v6 = vshll.u32 %v19154_v25, 16  ;;  %v19429_v0 = vld [vmem:[#allocation3 + $0x48] sm:$0xff]  ;;  %vm22069_vm14 = vmmov %vm22066_vm0 }
 0x55d   : > { %14492 = vmatprep.mubr.msk.bf16.mxu1 %vm22052_vm8, %v19140_v57  ;;  %v8055_v57 = vsel %vm22057_vm6, %v8047_v16, %v8054_v37  ;;  %v19435_v16 = vld [vmem:[%s16107_s18 + $0x50] sm:$0xff]   ;;  %v19439_v37 = vshrl.u32 %v19422_v29, 16  ;;  %vm22070_vm8 = vmmov %vm22047_vm2 }
 0x55e   : > { %v8062_v41 = vor.u32 %v22059_v6, %v8059_v9  ;;  %vm22071_vm11 = vmmov %vm22066_vm0 }
 0x55f   : > { %v8091_v9 = vrot.slane %v19439_v37, 7  ;;  %vm22073_vm6 = vmmov %vm22066_vm0 }
 0x560   : > { %v8063_v17 = vsel %vm22060_vm13, %v8051_v14, %v8062_v41  ;;  %v19432_v14 = vshll.u32 %v19402_v33, 16  ;;  %v19451_v41 = vld [vmem:[#allocation3 + $0x50] sm:$0xff]  ;;  %vm22077_vm13 = vmmov %vm22066_vm0 }
 0x561   : > { %v8094_v15 = vor.u32 %v19455_v40, %v8091_v9  ;;  %v19479_v12 = vshll.u32 %v19451_v41, 16 }
 0x564   : > { %14493 = vmatmul.mubr.msk.bf16.gmra.mrb[44].mxu1 %vm22056_vm9, %v7656_v21  ;;  %v19443_v21 = vshrl.u32 %v19429_v0, 16  ;;  %vm22072_vm9 = vmmov %vm22047_vm2 }
 0x565   : > { %14500 = vmatprep.mubr.msk.bf16.mxu1 %vm22058_vm10, %v8055_v57  ;;  %vm22075_vm10 = vmmov %vm22047_vm2 }
 0x566   : > { %v8099_v6 = vrot.slane %v19443_v21, 7 }
 0x56c   : > { %14501 = vmatmul.mubr.msk.bf16.vlgmr.msra.gmra.mrb[0].mxu1 %vm22061_vm3, %v8063_v17  ;;  %v19460_v17 = vshll.u32 %v19429_v0, 16  ;;  %vm22078_vm3 = vmmov %vm22047_vm2 }
 0x56d   : > { %14549 = vmatpush3.bf16.msra.mxu1 %v19293_v50  ;;  %14504 = vmatprep.mubr.msk.bf16.mxu1 %vm22063_vm12, %v8071_v30  ;;  %v8086_v50 = vor.u32 %v19432_v14, %v8083_v47  ;;  %v19464_v30 = vshrl.u32 %v19451_v41, 16  ;;  %vm22081_vm12 = vmmov %vm22047_vm2 }
 0x56e   : > { %14550 = vmatprep.subr.bf16.mxu1 %v15849_v1 }
 0x56f   : > { %v8087_v57 = vsel %vm22066_vm0, %v8075_v13, %v8086_v50  ;;  %v8102_v13 = vor.u32 %v19460_v17, %v8099_v6  ;;  %v8095_v50 = vsel %vm22067_vm4, %v8083_v47, %v8094_v15  ;;  %v19488_v15 = vshrl.u32 %v19475_v34, 16  ;;  %vm22089_vm4 = vmmov %vm22066_vm0 }
 0x571   : > { %14551 = vmatpush3.bf16.msra.mxu1 %v15849_v1  ;;  %v19457_v1 = vld [vmem:[#allocation3 + $0x58] sm:$0xff] }
 0x572   : > { %14600 = vmatprep.subr.bf16.mxu1 %v19435_v16  ;;  %v19468_v58 = vshrl.u32 %v19457_v1, 16  ;;  %v19484_v11 = vshll.u32 %v19457_v1, 16 }
 0x574   : > { %14505 = vmatmul.mubr.msk.bf16.gmra.mrb[4].mxu1 %vm22065_vm7, %v8079_v46  ;;  %v8107_v46 = vrot.slane %v19464_v30, 7  ;;  %v8115_v31 = vrot.slane %v19468_v58, 7  ;;  %vm22084_vm7 = vmmov %vm22047_vm2 }
 0x575   : > { %14508 = vmatprep.mubr.msk.bf16.mxu1 %vm22047_vm2, %v8087_v57  ;;  %v8103_v57 = vsel %vm22069_vm14, %v8091_v9, %v8102_v13  ;;  %v19492_v13 = vshrl.u32 %v19481_v55, 16  ;;  %vm22091_vm14 = vmmov %vm22066_vm0 }
 0x576   : > { %v8110_v47 = vor.u32 %v19479_v12, %v8107_v46  ;;  %v8118_v9 = vor.u32 %v19484_v11, %v8115_v31 }
 0x577   : > { %v8131_v43 = vrot.slane %v19492_v13, 7 }
 0x578   : > { %v8119_v59 = vsel %vm22073_vm6, %v8107_v46, %v8118_v9  ;;  %v19516_v9 = vshrl.u32 %v19505_v8, 16  ;;  %vm22096_vm6 = vmmov %vm22066_vm0 }
 0x579   : > { %v8134_v46 = vor.u32 %v19508_v51, %v8131_v43 }
 0x57a   : > { %v8147_v5 = vrot.slane %v19516_v9, 7 }
 0x57c   : > { %14509 = vmatmul.mubr.msk.bf16.gmra.mrb[8].mxu1 %vm22068_vm5, %v8095_v50  ;;  %v8111_v50 = vsel %vm22071_vm11, %v8099_v6, %v8110_v47  ;;  %v19512_v47 = vshrl.u32 %v19499_v3, 16  ;;  %vm22090_vm5 = vmmov %vm22047_vm2 }
 0x57d   : > { %14512 = vmatprep.mubr.msk.bf16.mxu1 %vm22070_vm8, %v8103_v57  ;;  %v8123_v57 = vrot.slane %v19488_v15, 7  ;;  %vm22093_vm8 = vmmov %vm22047_vm2 }
 0x57e   : > { %vm22094_vm11 = vmmov %vm22066_vm0 }
 0x57f   : > { %v8126_v6 = vor.u32 %v19503_v2, %v8123_v57  ;;  %v8135_v61 = vsel %vm22079_vm15, %v8123_v57, %v8134_v46  ;;  %v8150_v57 = vor.u32 %v19532_v7, %v8147_v5  ;;  %v19540_v46 = vshrl.u32 %v19529_v23, 16  ;;  %vm22100_vm15 = vmmov %vm22066_vm0 }
 0x581   : > { %v8163_v39 = vrot.slane %v19540_v46, 7 }
 0x584   : > { %14513 = vmatmul.mubr.msk.bf16.gmra.mrb[12].mxu1 %vm22072_vm9, %v8111_v50  ;;  %v8139_v50 = vrot.slane %v19512_v47, 7  ;;  %vm22095_vm9 = vmmov %vm22047_vm2 }
 0x585   : > { %14516 = vmatprep.mubr.msk.bf16.mxu1 %vm22075_vm10, %v8119_v59  ;;  %v8127_v59 = vsel %vm22077_vm13, %v8115_v31, %v8126_v6  ;;  %v19536_v6 = vshrl.u32 %v19523_v26, 16  ;;  %vm22097_vm10 = vmmov %vm22047_vm2 }
 0x586   : > { %v8142_v31 = vor.u32 %v19527_v10, %v8139_v50  ;;  %v8151_v36 = vsel %vm22066_vm0, %v8139_v50, %v8150_v57  ;;  %v8166_v50 = vor.u32 %v19556_v22, %v8163_v39  ;;  %v19564_v57 = vshrl.u32 %v19553_v63, 16  ;;  %vm22098_vm13 = vmmov %vm22066_vm0 }
 0x588   : > { %22088 = vst [vmem:[#allocation97_spill] sm:$0xff] %v19564_v57  ;;  %v8179_v62 = vrot.slane %v19564_v57, 7 }
 0x58c   : > { %14517 = vmatmul.mubr.msk.bf16.gmra.mrb[16].mxu1 %vm22078_vm3, %v8127_v59  ;;  %v8155_v59 = vrot.slane %v19536_v6, 7  ;;  %vm22099_vm3 = vmmov %vm22047_vm2 }
 0x58d   : > { %14520 = vmatprep.mubr.msk.bf16.mxu1 %vm22081_vm12, %v8135_v61  ;;  %v8143_v61 = vsel %vm22083_vm1, %v8131_v43, %v8142_v31  ;;  %v19560_v31 = vshrl.u32 %v19547_v27, 16  ;;  %vm22101_vm12 = vmmov %vm22047_vm2 }
 0x58e   : > { %v8158_v43 = vor.u32 %v19551_v60, %v8155_v59  ;;  %v8167_v45 = vsel %vm22091_vm14, %v8155_v59, %v8166_v50  ;;  %vm22103_vm1 = vmmov %vm22047_vm2 }
 0x58f   : > { %22087 = vst [vmem:[#allocation96_spill] sm:$0xff] %v19560_v31  ;;  %vm22107_vm0 = vmmov %vm22103_vm1 }
 0x590   : > { %vm22112_vm14 = vmmov %vm22107_vm0 }
 0x594   : > { %14521 = vmatmul.mubr.msk.bf16.gmra.mrb[20].mxu1 %vm22084_vm7, %v8143_v61  ;;  %v8171_v61 = vrot.slane %v19560_v31, 7  ;;  %vm22105_vm7 = vmmov %vm22103_vm1 }
 0x595   : > { %14524 = vmatprep.mubr.msk.bf16.mxu1 %vm22047_vm2, %v8151_v36  ;;  %v8159_v36 = vsel %vm22089_vm4, %v8147_v5, %v8158_v43  ;;  %v19582_v43 = vshrl.u32 %v19571_v4, 16  ;;  %vm22109_vm2 = vmmov %vm22089_vm4 }
 0x596   : > { %v8174_v5 = vor.u32 %v19575_v44, %v8171_v61  ;;  %vm22110_vm4 = vmmov %vm22107_vm0 }
 0x597   : > { %v8187_v50 = vrot.slane %v19582_v43, 7 }
 0x598   : > { %v8175_v59 = vsel %vm22094_vm11, %v8163_v39, %v8174_v5  ;;  %v19599_v5 = vld [vmem:[#allocation3 + $0xc8] sm:$0xff]  ;;  %vm22114_vm11 = vmmov %vm22107_vm0 }
 0x599   : > { %v8190_v31 = vor.u32 %v19591_v18, %v8187_v50  ;;  %v8199_v39 = vsel %vm22100_vm15, %v8187_v50, %v19163_v56  ;;  %22102 = vst [vmem:[#allocation99_spill] sm:$0xff] %v19599_v5  ;;  %v19612_v56 = vshll.u32 %v19599_v5, 16  ;;  %vm22120_vm15 = vmmov %vm22107_vm0 }
 0x59b   : > { %v8191_v57 = vsel %vm22098_vm13, %v8179_v62, %v8190_v31  ;;  %vm22118_vm13 = vmmov %vm22107_vm0 }
 0x59c   : > { %14525 = vmatmul.mubr.msk.bf16.gmra.mrb[24].mxu1 %vm22090_vm5, %v8159_v36  ;;  %v8182_v36 = vor.u32 %v19578_v42, %v8179_v62  ;;  %vm22111_vm5 = vmmov %vm22109_vm2 }
 0x59d   : > { %14528 = vmatprep.mubr.msk.bf16.mxu1 %vm22093_vm8, %v8167_v45  ;;  %vm22113_vm8 = vmmov %vm22107_vm0 }
 0x59e   : > { %v8183_v45 = vsel %vm22096_vm6, %v8171_v61, %v8182_v36  ;;  %v19602_v61 = vshrl.u32 %v19599_v5, 16  ;;  %vm22116_vm6 = vmmov %vm22107_vm0 }
 0x5a0   : > { %v8227_v36 = vrot.slane %v19602_v61, 7 }
 0x5a2   : > { %v8230_v31 = vor.u32 %v19612_v56, %v8227_v36 }
 0x5a4   : > { %14529 = vmatmul.mubr.msk.bf16.gmra.mrb[28].mxu1 %vm22095_vm9, %v8175_v59  ;;  %v19607_v59 = vld [vmem:[#allocation3 + $0xd0] sm:$0xff]  ;;  %vm22115_vm9 = vmmov %vm22107_vm0 }
 0x5a5   : > { %14532 = vmatprep.mubr.msk.bf16.mxu1 %vm22097_vm10, %v8183_v45  ;;  %22104 = vst [vmem:[#allocation100_spill] sm:$0xff] %v19607_v59  ;;  %v19615_v62 = vshrl.u32 %v19607_v59, 16  ;;  %vm22117_vm10 = vmmov %vm22107_vm0 }
 0x5a7   : > { %22106 = vst [vmem:[#allocation101_spill] sm:$0xff] %v19615_v62 }
 0x5ac   : > { %14533 = vmatmul.mubr.msk.bf16.gmra.mrb[32].mxu1 %vm22099_vm3, %v8191_v57  ;;  %v8235_v57 = vrot.slane %v19615_v62, 7  ;;  %v15851_v62 = vld [vmem:[%s16107_s18 + $0x58] sm:$0xff]   ;;  %vm22119_vm3 = vmmov %vm22107_vm0 }
 0x5ad   : > { %14536 = vmatprep.mubr.msk.bf16.mxu1 %vm22101_vm12, %v8199_v39  ;;  %vm22121_vm12 = vmmov %vm22107_vm0 }
 0x5b4   : > { %14537 = vmatmul.mubr.msk.bf16.gmra.mrb[36].mxu1 %vm22103_vm1, %v19175_v54  ;;  %v22108_v54 = vrot.slane %v18989_v52, 7  ;;  %v15852_v52 = vld [vmem:[%s16107_s18 + $0x60] sm:$0xff]   ;;  %vm22122_vm1 = vmmov %vm22107_vm0 }
 0x5b5   : > { %14540 = vmatprep.mubr.msk.bf16.mxu1 %vm22105_vm7, %v19178_v24  ;;  %v19626_v24 = vshll.u32 %v19607_v59, 16  ;;  %vm22123_vm7 = vmmov %vm22107_vm0 }
 0x5b6   : > { %v8231_v50 = vsel %vm22109_vm2, %v22108_v54, %v8230_v31  ;;  %vm22124_vm2 = vmmov %vm22107_vm0  ;;  %v15853_v54 = vld [vmem:[%s16107_s18 + $0x68] sm:$0xff]  }
 0x5b7   : > { %v8238_v45 = vor.u32 %v19626_v24, %v8235_v57  ;;  %v8991_v57 = vrot.slane %v19427_v53, 1 }
 0x5b9   : > { %v8239_v39 = vsel %vm22111_vm5, %v8227_v36, %v8238_v45  ;;  %vm22126_vm5 = vmmov %vm22107_vm0  ;;  %v8983_v36 = vrot.slane %v19405_v32, 1 }
 0x5bb   : > { %v8987_v31 = vor.u32 %v8983_v36, %v19390_v19 }
 0x5bc   : > { %14541 = vmatmul.mubr.msk.bf16.gmra.mrb[40].mxu1 %vm22107_vm0, %v19181_v35  ;;  %v22133_v35 = vld [vmem:[#allocation63_spill] sm:$0xff] }
 0x5bd   : > { %14544 = vmatprep.mubr.msk.bf16.mxu1 %vm22110_vm4, %v8231_v50  ;;  %vm22125_vm4 = vmmov %vm22107_vm0  ;;  %v22141_v50 = vld [vmem:[#allocation64_spill] sm:$0xff] }
 0x5c4   : > { %14545 = vmatmul.mubr.msk.bf16.gmra.mrb[44].mxu1 %vm22112_vm14, %v8239_v39  ;;  %vm22127_vm14 = vmmov %vm22107_vm0 }
 0x5c5   : > { %14552 = vmatprep.mubr.msk.bf16.mxu1 %vm22113_vm8, %v19152_v38  ;;  %vm22128_vm8 = vmmov %vm22107_vm0  ;;  %v22130_v38 = vld [vmem:[#allocation61_spill] sm:$0xff] }
 0x5cc   : > { %14553 = vmatmul.mubr.msk.bf16.vlgmr.msra.gmra.mrb[0].mxu1 %vm22114_vm11, %v19154_v25  ;;  %vm22129_vm11 = vmmov %vm22107_vm0  ;;  %v15884_v25 = vld [vmem:[#allocation3 + $0xb0] sm:$0xff] }
 0x5cd   : > { %14601 = vmatpush3.bf16.msra.mxu1 %v19435_v16  ;;  %14556 = vmatprep.mubr.msk.bf16.mxu1 %vm22115_vm9, %v19385_v28  ;;  %vm22131_vm9 = vmmov %vm22107_vm0  ;;  %v22135_v16 = vld [vmem:[#allocation62_spill] sm:$0xff] }
 0x5ce   : > { %14602 = vmatprep.subr.bf16.mxu1 %v15851_v62 }
 0x5d1   : > { %14603 = vmatpush3.bf16.msra.mxu1 %v15851_v62  ;;  %v22139_v62 = vld [vmem:[#allocation65_spill] sm:$0xff] }
 0x5d2   : > { %14652 = vmatprep.subr.bf16.mxu1 %v15852_v52 }
 0x5d4   : > { %14557 = vmatmul.mubr.msk.bf16.gmra.mrb[4].mxu1 %vm22116_vm6, %v19399_v49  ;;  %vm22132_vm6 = vmmov %vm22107_vm0 }
 0x5d5   : > { %14560 = vmatprep.mubr.msk.bf16.mxu1 %vm22117_vm10, %v19402_v33  ;;  %vm22134_vm10 = vmmov %vm22107_vm0 }
 0x5dc   : > { %14561 = vmatmul.mubr.msk.bf16.gmra.mrb[8].mxu1 %vm22118_vm13, %v19422_v29  ;;  %vm22136_vm13 = vmmov %vm22107_vm0 }
 0x5dd   : > { %14564 = vmatprep.mubr.msk.bf16.mxu1 %vm22119_vm3, %v19429_v0  ;;  %vm22137_vm3 = vmmov %vm22107_vm0 }
 0x5e4   : > { %14565 = vmatmul.mubr.msk.bf16.gmra.mrb[12].mxu1 %vm22120_vm15, %v19451_v41  ;;  %vm22138_vm15 = vmmov %vm22107_vm0 }
 0x5e5   : > { %14568 = vmatprep.mubr.msk.bf16.mxu1 %vm22121_vm12, %v19457_v1  ;;  %vm22140_vm12 = vmmov %vm22107_vm0 }
 0x5ec   : > { %14569 = vmatmul.mubr.msk.bf16.gmra.mrb[16].mxu1 %vm22122_vm1, %v19475_v34  ;;  %vm22142_vm1 = vsmask.f32 7424 }
 0x5ed   : > { %14572 = vmatprep.mubr.msk.bf16.mxu1 %vm22123_vm7, %v19481_v55  ;;  %v8984_v45 = vsel %vm22142_vm1, %v22141_v50, %v8983_v36  ;;  %vm22143_vm7 = vmmov %vm22107_vm0 }
 0x5f4   : > { %14573 = vmatmul.mubr.msk.bf16.gmra.mrb[20].mxu1 %vm22107_vm0, %v19499_v3  ;;  %vm22144_vm0 = vmmov %vm22142_vm1 }
 0x5f5   : > { %14576 = vmatprep.mubr.msk.bf16.mxu1 %vm22124_vm2, %v19505_v8  ;;  %v8992_v39 = vsel %vm22144_vm0, %v8987_v31, %v8991_v57  ;;  %v9015_v31 = vrot.slane %v19460_v17, 1  ;;  %vm22157_vm1 = vmmov %vm22144_vm0 }
 0x5f7   : > { %v9019_v50 = vor.u32 %v9015_v31, %v19443_v21 }
 0x5fc   : > { %14577 = vmatmul.mubr.msk.bf16.gmra.mrb[24].mxu1 %vm22125_vm4, %v19523_v26  ;;  %vm22145_vm4 = vmmov %vm22144_vm0 }
 0x5fd   : > { %14580 = vmatprep.mubr.msk.bf16.mxu1 %vm22126_vm5, %v19529_v23  ;;  %vm22146_vm5 = vmmov %vm22124_vm2  ;;  %v22181_v23 = vld [vmem:[#allocation73_spill] sm:$0xff] }
 0x604   : > { %14581 = vmatmul.mubr.msk.bf16.gmra.mrb[28].mxu1 %vm22127_vm14, %v19547_v27  ;;  %vm22147_vm14 = vmmov %vm22144_vm0  ;;  %v22180_v27 = vld [vmem:[#allocation70_spill] sm:$0xff] }
 0x605   : > { %14584 = vmatprep.mubr.msk.bf16.mxu1 %vm22128_vm8, %v19553_v63  ;;  %vm22148_vm8 = vmmov %vm22124_vm2 }
 0x60c   : > { %14585 = vmatmul.mubr.msk.bf16.gmra.mrb[32].mxu1 %vm22129_vm11, %v19571_v4  ;;  %vm22149_vm11 = vmmov %vm22144_vm0  ;;  %v22175_v4 = vld [vmem:[#allocation12_spill] sm:$0xff] }
 0x60d   : > { %14588 = vmatprep.mubr.msk.bf16.mxu1 %vm22131_vm9, %v22130_v38  ;;  %v8999_v38 = vrot.slane %v19432_v14, 1  ;;  %vm22150_vm9 = vmmov %vm22124_vm2  ;;  %v9119_v63 = vrot.slane %v22175_v4, 1 }
 0x614   : > { %14589 = vmatmul.mubr.msk.bf16.gmra.mrb[36].mxu1 %vm22132_vm6, %v15884_v25  ;;  %v19694_v25 = vld [vmem:[%s16107_s18 + $0x70] sm:$0xff]   ;;  %vm22151_vm6 = vmmov %vm22144_vm0 }
 0x615   : > { %14592 = vmatprep.mubr.msk.bf16.mxu1 %vm22134_vm10, %v22133_v35  ;;  %v9003_v35 = vor.u32 %v8999_v38, %v19414_v48  ;;  %vm22152_vm10 = vmmov %vm22124_vm2 }
 0x61c   : > { %14593 = vmatmul.mubr.msk.bf16.gmra.mrb[40].mxu1 %vm22136_vm13, %v22135_v16  ;;  %v8995_v16 = vor.u32 %v8991_v57, %v19410_v20  ;;  %v9023_v57 = vrot.slane %v19479_v12, 1  ;;  %vm22153_vm13 = vmmov %vm22144_vm0 }
 0x61d   : > { %14596 = vmatprep.mubr.msk.bf16.mxu1 %vm22137_vm3, %v19599_v5  ;;  %vm22154_vm3 = vmmov %vm22124_vm2 }
 0x61e   : > { %v9000_v36 = vsel %vm22145_vm4, %v8995_v16, %v8999_v38  ;;  %v9031_v38 = vrot.slane %v19484_v11, 1  ;;  %v9027_v16 = vor.u32 %v9023_v57, %v19464_v30  ;;  %vm22159_vm4 = vmmov %vm22144_vm0 }
 0x624   : > { %14597 = vmatmul.mubr.msk.bf16.gmra.mrb[44].mxu1 %vm22138_vm15, %v19607_v59  ;;  %vm22155_vm15 = vmmov %vm22144_vm0  ;;  %v9103_v59 = vrot.slane %v19591_v18, 1 }
 0x625   : > { %14604 = vmatprep.mubr.msk.bf16.mxu1 %vm22140_vm12, %v22139_v62  ;;  %v9007_v62 = vrot.slane %v19455_v40, 1  ;;  %vm22156_vm12 = vmmov %vm22124_vm2 }
 0x62c   : > { %14605 = vmatmul.mubr.msk.bf16.vlgmr.msra.gmra.mrb[0].mxu1 %vm22143_vm7, %v8984_v45  ;;  %v9011_v45 = vor.u32 %v9007_v62, %v19439_v37  ;;  %vm22158_vm7 = vmmov %vm22124_vm2 }
 0x62d   : > { %14653 = vmatpush3.bf16.msra.mxu1 %v15852_v52  ;;  %14608 = vmatprep.mubr.msk.bf16.mxu1 %vm22124_vm2, %v8992_v39  ;;  %v9008_v52 = vsel %vm22147_vm14, %v9003_v35, %v9007_v62  ;;  %v9024_v39 = vsel %vm22151_vm6, %v9019_v50, %v9023_v57  ;;  %v9035_v35 = vor.u32 %v9031_v38, %v19468_v58  ;;  %vm22161_vm14 = vmmov %vm22144_vm0 }
 0x62e   : > { %14654 = vmatprep.subr.bf16.mxu1 %v15853_v54  ;;  %v9032_v62 = vsel %vm22153_vm13, %v9027_v16, %v9031_v38  ;;  %v9063_v38 = vrot.slane %v19532_v7, 1  ;;  %vm22165_vm6 = vmmov %vm22144_vm0 }
 0x62f   : > { %vm22169_vm13 = vmmov %vm22144_vm0 }
 0x631   : > { %14655 = vmatpush3.bf16.msra.mxu1 %v15853_v54  ;;  %v9016_v54 = vsel %vm22149_vm11, %v9011_v45, %v9015_v31  ;;  %v9047_v31 = vrot.slane %v19508_v51, 1  ;;  %vm22163_vm11 = vmmov %vm22144_vm0 }
 0x632   : > { %14704 = vmatprep.subr.bf16.mxu1 %v19694_v25 }
 0x633   : > { %v9051_v50 = vor.u32 %v9047_v31, %v19492_v13 }
 0x634   : > { %14609 = vmatmul.mubr.msk.bf16.gmra.mrb[4].mxu1 %vm22146_vm5, %v9000_v36  ;;  %v9039_v36 = vrot.slane %v19503_v2, 1  ;;  %vm22160_vm5 = vmmov %vm22124_vm2 }
 0x635   : > { %14612 = vmatprep.mubr.msk.bf16.mxu1 %vm22148_vm8, %v9008_v52  ;;  %vm22162_vm8 = vmmov %vm22124_vm2 }
 0x636   : > { %v9040_v52 = vsel %vm22155_vm15, %v9035_v35, %v9039_v36  ;;  %v9043_v45 = vor.u32 %v9039_v36, %v19488_v15  ;;  %v9067_v35 = vor.u32 %v9063_v38, %v19516_v9  ;;  %vm22171_vm15 = vmmov %vm22144_vm0 }
 0x638   : > { %v9048_v57 = vsel %vm22157_vm1, %v9043_v45, %v9047_v31  ;;  %v9079_v31 = vrot.slane %v19556_v22, 1  ;;  %vm22176_vm1 = vmmov %vm22144_vm0 }
 0x63c   : > { %14613 = vmatmul.mubr.msk.bf16.gmra.mrb[8].mxu1 %vm22150_vm9, %v9016_v54  ;;  %v9055_v54 = vrot.slane %v19527_v10, 1  ;;  %vm22164_vm9 = vmmov %vm22124_vm2 }
 0x63d   : > { %14616 = vmatprep.mubr.msk.bf16.mxu1 %vm22152_vm10, %v9024_v39  ;;  %vm22166_vm10 = vmmov %vm22124_vm2 }
 0x63e   : > { %v9056_v39 = vsel %vm22144_vm0, %v9051_v50, %v9055_v54  ;;  %v9059_v16 = vor.u32 %v9055_v54, %v19512_v47  ;;  %v9083_v50 = vor.u32 %v9079_v31, %v19540_v46 }
 0x640   : > { %v9064_v36 = vsel %vm22159_vm4, %v9059_v16, %v9063_v38  ;;  %v9095_v38 = vrot.slane %v19578_v42, 1  ;;  %vm22182_vm4 = vmmov %vm22144_vm0 }
 0x644   : > { %14617 = vmatmul.mubr.msk.bf16.gmra.mrb[12].mxu1 %vm22154_vm3, %v9032_v62  ;;  %v9071_v62 = vrot.slane %v19551_v60, 1  ;;  %vm22170_vm3 = vmmov %vm22124_vm2 }
 0x645   : > { %14620 = vmatprep.mubr.msk.bf16.mxu1 %vm22156_vm12, %v9040_v52  ;;  %vm22173_vm12 = vmmov %vm22124_vm2 }
 0x646   : > { %v9072_v52 = vsel %vm22161_vm14, %v9067_v35, %v9071_v62  ;;  %v9075_v45 = vor.u32 %v9071_v62, %v19536_v6  ;;  %v22167_v35 = vld [vmem:[#allocation97_spill] sm:$0xff]  ;;  %vm22184_vm14 = vmmov %vm22144_vm0 }
 0x647   : > { %v9099_v16 = vor.u32 %v9095_v38, %v22167_v35 }
 0x648   : > { %v9080_v54 = vsel %vm22163_vm11, %v9075_v45, %v9079_v31  ;;  %v22172_v45 = vld [vmem:[#allocation67_spill] sm:$0xff]  ;;  %vm22187_vm11 = vmmov %vm22144_vm0 }
 0x649   : > { %v9104_v31 = vsel %vm22171_vm15, %v9099_v16, %v9103_v59  ;;  %v22179_v16 = vld [vmem:[#allocation72_spill] sm:$0xff]  ;;  %vm22194_vm15 = vsmask.f32 4352 }
 0x64c   : > { %14621 = vmatmul.mubr.msk.bf16.gmra.mrb[16].mxu1 %vm22158_vm7, %v9048_v57  ;;  %v9087_v57 = vrot.slane %v19575_v44, 1  ;;  %vm22177_vm7 = vmmov %vm22124_vm2 }
 0x64d   : > { %14624 = vmatprep.mubr.msk.bf16.mxu1 %vm22124_vm2, %v9056_v39 }
 0x64e   : > { %v9088_v39 = vsel %vm22165_vm6, %v9083_v50, %v9087_v57  ;;  %v22174_v50 = vld [vmem:[#allocation68_spill] sm:$0xff]  ;;  %vm22189_vm6 = vmmov %vm22144_vm0 }
 0x654   : > { %14625 = vmatmul.mubr.msk.bf16.gmra.mrb[20].mxu1 %vm22160_vm5, %v9064_v36  ;;  %v22168_v36 = vld [vmem:[#allocation96_spill] sm:$0xff]  ;;  %vm22183_vm5 = vmmov %vm22124_vm2 }
 0x655   : > { %14628 = vmatprep.mubr.msk.bf16.mxu1 %vm22162_vm8, %v9072_v52  ;;  %v9091_v52 = vor.u32 %v9087_v57, %v22168_v36  ;;  %vm22185_vm8 = vmmov %vm22124_vm2 }
 0x657   : > { %v9096_v62 = vsel %vm22169_vm13, %v9091_v52, %v9095_v38  ;;  %v22178_v52 = vld [vmem:[#allocation71_spill] sm:$0xff]  ;;  %vm22192_vm13 = vmmov %vm22144_vm0 }
 0x65c   : > { %14629 = vmatmul.mubr.msk.bf16.gmra.mrb[24].mxu1 %vm22164_vm9, %v9080_v54  ;;  %v9111_v54 = vrot.slane %v22172_v45, 1  ;;  %vm22188_vm9 = vmmov %vm22124_vm2 }
 0x65d   : > { %14632 = vmatprep.mubr.msk.bf16.mxu1 %vm22166_vm10, %v9088_v39  ;;  %v9107_v39 = vor.u32 %v9103_v59, %v19582_v43  ;;  %vm22190_vm10 = vmmov %vm22124_vm2 }
 0x65e   : > { %v9115_v5 = vor.u32 %v22174_v50, %v9111_v54  ;;  %v9135_v50 = vrot.slane %v22181_v23, 1 }
 0x65f   : > { %v9112_v57 = vsel %vm22176_vm1, %v9107_v39, %v9111_v54  ;;  %v9143_v54 = vrot.slane %v19612_v56, 1  ;;  %vm22196_vm1 = vmmov %vm22194_vm15 }
 0x660   : > { %v9120_v38 = vsel %vm22144_vm0, %v9115_v5, %v9119_v63  ;;  %v9518_v5 = vld [vmem:[#allocation3 + $0x20] sm:$0xf8]  ;;  %vm22198_vm0 = vmmov %vm22196_vm1 }
 0x661   : > { %v9147_v39 = vor.u32 %v9143_v54, %v19602_v61  ;;  %v9552_v23 = vshll.u32 %v9518_v5, 16 }
 0x664   : > { %14633 = vmatmul.mubr.msk.bf16.gmra.mrb[28].mxu1 %vm22170_vm3, %v9096_v62  ;;  %v9127_v62 = vrot.slane %v22178_v52, 1  ;;  %vm22193_vm3 = vmmov %vm22124_vm2 }
 0x665   : > { %14636 = vmatprep.mubr.msk.bf16.mxu1 %vm22173_vm12, %v9104_v31  ;;  %v9123_v31 = vor.u32 %v22180_v27, %v9119_v63  ;;  %v9151_v63 = vrot.slane %v19626_v24, 1  ;;  %v9549_v27 = vshrl.u32 %v9518_v5, 16  ;;  %vm22195_vm12 = vmmov %vm22124_vm2 }
 0x666   : > { %v9131_v45 = vor.u32 %v22179_v16, %v9127_v62 }
 0x667   : > { %v9128_v59 = vsel %vm22182_vm4, %v9123_v31, %v9127_v62  ;;  %v9559_v31 = vrot.slane %v19390_v19, 3  ;;  %vm22199_vm4 = vmmov %vm22198_vm0 }
 0x668   : > { %v9136_v4 = vsel %vm22184_vm14, %v9131_v45, %v9135_v50  ;;  %v9152_v45 = vsel %vm22189_vm6, %v9147_v39, %v9151_v63  ;;  %v9571_v39 = vrot.slane %v19427_v53, 4  ;;  %vm22201_vm14 = vmmov %vm22198_vm0 }
 0x669   : > { %vm22205_vm6 = vmmov %vm22198_vm0 }
 0x66c   : > { %14637 = vmatmul.mubr.msk.bf16.gmra.mrb[32].mxu1 %vm22177_vm7, %v9112_v57  ;;  %v8959_v57 = vld [vmem:[#allocation3 + $0xd8] sm:$0x1]  ;;  %vm22197_vm7 = vmmov %vm22124_vm2 }
 0x66d   : > { %14640 = vmatprep.mubr.msk.bf16.mxu1 %vm22124_vm2, %v9120_v38  ;;  %v22186_v38 = vld [vmem:[#allocation74_spill] sm:$0xff]  ;;  %v9157_v16 = vshll.u32 %v8959_v57, 16  ;;  %v9568_v57 = vrot.slane %v19410_v20, 3 }
 0x66e   : > { %v9139_v52 = vor.u32 %v22186_v38, %v9135_v50  ;;  %v9554_v50 = vrot.slane %v9552_v23, 4  ;;  %v22191_v38 = vld [vmem:[#allocation101_spill] sm:$0xff] }
 0x66f   : > { %v9155_v26 = vor.u32 %v9151_v63, %v22191_v38  ;;  %v9159_v8 = vrot.slane %v9157_v16, 1  ;;  %v9572_v63 = vor.u32 %v9571_v39, %v9568_v57  ;;  %v15855_v16 = vld [vmem:[%s16107_s18 + $0x78] sm:$0xff]   ;;  %v9604_v57 = vrot.slane %v19464_v30, 3 }
 0x670   : > { %v9144_v62 = vsel %vm22187_vm11, %v9139_v52, %v9143_v54  ;;  %v9607_v39 = vrot.slane %v19479_v12, 4  ;;  %vm22203_vm11 = vmmov %vm22198_vm0 }
 0x671   : > { %v9160_v54 = vsel %vm22192_vm13, %v9155_v26, %v9159_v8  ;;  %v9586_v8 = vrot.slane %v19439_v37, 3  ;;  %vm22207_vm13 = vmmov %vm22198_vm0 }
 0x674   : > { %14641 = vmatmul.mubr.msk.bf16.gmra.mrb[36].mxu1 %vm22183_vm5, %v9128_v59  ;;  %v9562_v59 = vrot.slane %v19405_v32, 4  ;;  %vm22200_vm5 = vmmov %vm22124_vm2 }
 0x675   : > { %14644 = vmatprep.mubr.msk.bf16.mxu1 %vm22185_vm8, %v9136_v4  ;;  %v9551_v4 = vrot.slane %v9549_v27, 3  ;;  %v9580_v27 = vrot.slane %v19432_v14, 4  ;;  %vm22202_vm8 = vmmov %vm22124_vm2 }
 0x676   : > { %v9563_v5 = vor.u32 %v9562_v59, %v9559_v31  ;;  %v9595_v31 = vrot.slane %v19443_v21, 3  ;;  %v9598_v59 = vrot.slane %v19460_v17, 4 }
 0x677   : > { %v9555_v3 = vor.u32 %v9554_v50, %v9551_v4  ;;  %v19798_v4 = vld [vmem:[%s16107_s18 + $0x80] sm:$0xff]  }
 0x678   : > { %v9573_v26 = vsel %vm22196_vm1, %v9563_v5, %v9572_v63  ;;  %vm22211_vm1 = vmmov %vm22198_vm0 }
 0x679   : > { %v9564_v52 = vsel %vm22194_vm15, %v9555_v3, %v9563_v5  ;;  %v9599_v5 = vor.u32 %v9598_v59, %v9595_v31  ;;  %vm22209_vm15 = vmmov %vm22198_vm0 }
 0x67c   : > { %14645 = vmatmul.mubr.msk.bf16.gmra.mrb[40].mxu1 %vm22188_vm9, %v9144_v62  ;;  %v9577_v62 = vrot.slane %v19414_v48, 3  ;;  %vm22204_vm9 = vmmov %vm22124_vm2 }
 0x67d   : > { %14648 = vmatprep.mubr.msk.bf16.mxu1 %vm22190_vm10, %v9152_v45  ;;  %v9589_v45 = vrot.slane %v19455_v40, 4  ;;  %vm22206_vm10 = vmmov %vm22124_vm2 }
 0x67e   : > { %v9581_v23 = vor.u32 %v9580_v27, %v9577_v62  ;;  %v9616_v62 = vrot.slane %v19484_v11, 4  ;;  %v9608_v27 = vor.u32 %v9607_v39, %v9604_v57  ;;  %v9649_v39 = vrot.slane %v19516_v9, 3 }
 0x67f   : > { %v9590_v50 = vor.u32 %v9589_v45, %v9586_v8  ;;  %v9631_v45 = vrot.slane %v19492_v13, 3 }
 0x680   : > { %v9582_v3 = vsel %vm22198_vm0, %v9572_v63, %v9581_v23 }
 0x684   : > { %14649 = vmatmul.mubr.msk.bf16.gmra.mrb[44].mxu1 %vm22193_vm3, %v9160_v54  ;;  %v9591_v54 = vsel %vm22199_vm4, %v9581_v23, %v9590_v50  ;;  %v9622_v23 = vrot.slane %v19488_v15, 3  ;;  %vm22208_vm3 = vmmov %vm22124_vm2 }
 0x685   : > { %14656 = vmatprep.mubr.msk.bf16.mxu1 %vm22195_vm12, %v9564_v52  ;;  %v9613_v52 = vrot.slane %v19468_v58, 3  ;;  %vm22210_vm12 = vmmov %vm22124_vm2 }
 0x686   : > { %vm22213_vm4 = vmmov %vm22198_vm0 }
 0x687   : > { %v9617_v63 = vor.u32 %v9616_v62, %v9613_v52 }
 0x689   : > { %v9618_v8 = vsel %vm22205_vm6, %v9608_v27, %v9617_v63  ;;  %vm22219_vm6 = vmmov %vm22198_vm0 }
 0x68c   : > { %14657 = vmatmul.mubr.msk.bf16.vlgmr.msra.gmra.mrb[0].mxu1 %vm22197_vm7, %v9573_v26  ;;  %v9625_v26 = vrot.slane %v19503_v2, 4  ;;  %vm22212_vm7 = vmmov %vm22124_vm2 }
 0x68d   : > { %14705 = vmatpush3.bf16.msra.mxu1 %v19694_v25  ;;  %14660 = vmatprep.mubr.msk.bf16.mxu1 %vm22124_vm2, %v9582_v3  ;;  %v9600_v25 = vsel %vm22201_vm14, %v9590_v50, %v9599_v5  ;;  %v9634_v3 = vrot.slane %v19508_v51, 4  ;;  %vm22215_vm14 = vmmov %vm22198_vm0 }
 0x68e   : > { %14706 = vmatprep.subr.bf16.mxu1 %v15855_v16  ;;  %v9626_v31 = vor.u32 %v9625_v26, %v9622_v23  ;;  %v9667_v26 = vrot.slane %v19540_v46, 3 }
 0x68f   : > { %v9635_v59 = vor.u32 %v9634_v3, %v9631_v45 }
 0x690   : > { %v9627_v50 = vsel %vm22207_vm13, %v9617_v63, %v9626_v31  ;;  %v9658_v63 = vrot.slane %v19536_v6, 3  ;;  %vm22221_vm13 = vmmov %vm22198_vm0 }
 0x691   : > { %14707 = vmatpush3.bf16.msra.mxu1 %v15855_v16  ;;  %v9609_v16 = vsel %vm22203_vm11, %v9599_v5, %v9608_v27  ;;  %v9640_v5 = vrot.slane %v19512_v47, 3  ;;  %v9636_v57 = vsel %vm22209_vm15, %v9626_v31, %v9635_v59  ;;  %vm22217_vm11 = vmmov %vm22198_vm0 }
 0x692   : > { %14756 = vmatprep.subr.bf16.mxu1 %v19798_v4  ;;  %vm22224_vm15 = vmmov %vm22198_vm0 }
 0x694   : > { %14661 = vmatmul.mubr.msk.bf16.gmra.mrb[4].mxu1 %vm22200_vm5, %v9591_v54  ;;  %v9643_v54 = vrot.slane %v19527_v10, 4  ;;  %vm22214_vm5 = vmmov %vm22124_vm2 }
 0x695   : > { %14664 = vmatprep.mubr.msk.bf16.mxu1 %vm22202_vm8, %v9600_v25  ;;  %v9652_v25 = vrot.slane %v19532_v7, 4  ;;  %vm22216_vm8 = vmmov %vm22124_vm2 }
 0x696   : > { %v9644_v52 = vor.u32 %v9643_v54, %v9640_v5  ;;  %v9685_v54 = vrot.slane %v22167_v35, 3 }
 0x697   : > { %v9653_v62 = vor.u32 %v9652_v25, %v9649_v39 }
 0x698   : > { %v9645_v27 = vsel %vm22211_vm1, %v9635_v59, %v9644_v52  ;;  %v9676_v59 = vrot.slane %v22168_v36, 3  ;;  %vm22227_vm1 = vmmov %vm22124_vm2 }
 0x699   : > { %v9654_v23 = vsel %vm22198_vm0, %v9644_v52, %v9653_v62  ;;  %vm22231_vm0 = vmmov %vm22227_vm1 }
 0x69c   : > { %14665 = vmatmul.mubr.msk.bf16.gmra.mrb[8].mxu1 %vm22204_vm9, %v9609_v16  ;;  %v9661_v16 = vrot.slane %v19551_v60, 4  ;;  %vm22218_vm9 = vmmov %vm22124_vm2 }
 0x69d   : > { %14668 = vmatprep.mubr.msk.bf16.mxu1 %vm22206_vm10, %v9618_v8  ;;  %v9670_v8 = vrot.slane %v19556_v22, 4  ;;  %vm22220_vm10 = vmmov %vm22124_vm2 }
 0x69e   : > { %v9662_v45 = vor.u32 %v9661_v16, %v9658_v63 }
 0x69f   : > { %v9671_v3 = vor.u32 %v9670_v8, %v9667_v26  ;;  %v22223_v26 = vld [vmem:[#allocation75_spill] sm:$0xff] }
 0x6a0   : > { %v9663_v31 = vsel %vm22213_vm4, %v9653_v62, %v9662_v45  ;;  %v9694_v62 = vrot.slane %v19582_v43, 3 }
 0x6a1   : > { %v9672_v5 = vsel %vm22215_vm14, %v9662_v45, %v9671_v3  ;;  %v22226_v45 = vld [vmem:[#allocation76_spill] sm:$0xff]  ;;  %vm22239_vm14 = vmmov %vm22231_vm0 }
 0x6a4   : > { %14669 = vmatmul.mubr.msk.bf16.gmra.mrb[12].mxu1 %vm22208_vm3, %v9627_v50  ;;  %v9679_v50 = vrot.slane %v19575_v44, 4  ;;  %vm22222_vm3 = vmmov %vm22124_vm2 }
 0x6a5   : > { %14672 = vmatprep.mubr.msk.bf16.mxu1 %vm22210_vm12, %v9636_v57  ;;  %v9688_v57 = vrot.slane %v19578_v42, 4  ;;  %vm22225_vm12 = vmmov %vm22124_vm2 }
 0x6a6   : > { %v9680_v39 = vor.u32 %v9679_v50, %v9676_v59  ;;  %v22228_v59 = vld [vmem:[#allocation78_spill] sm:$0xff] }
 0x6a7   : > { %v9689_v25 = vor.u32 %v9688_v57, %v9685_v54  ;;  %v9748_v54 = vrot.slane %v22191_v38, 3  ;;  %v9751_v57 = vrot.slane %v19626_v24, 4 }
 0x6a8   : > { %v9681_v52 = vsel %vm22217_vm11, %v9671_v3, %v9680_v39  ;;  %v9739_v3 = vrot.slane %v19602_v61, 3  ;;  %vm22241_vm11 = vmmov %vm22231_vm0 }
 0x6a9   : > { %v9690_v63 = vsel %vm22219_vm6, %v9680_v39, %v9689_v25  ;;  %v22230_v39 = vld [vmem:[#allocation79_spill] sm:$0xff]  ;;  %vm22243_vm6 = vmmov %vm22231_vm0 }
 0x6ac   : > { %14673 = vmatmul.mubr.msk.bf16.gmra.mrb[16].mxu1 %vm22212_vm7, %v9645_v27  ;;  %v9697_v27 = vrot.slane %v19591_v18, 4  ;;  %vm22229_vm7 = vmmov %vm22227_vm1 }
 0x6ad   : > { %14676 = vmatprep.mubr.msk.bf16.mxu1 %vm22124_vm2, %v9654_v23  ;;  %vm22233_vm2 = vmmov %vm22213_vm4 }
 0x6ae   : > { %v9698_v16 = vor.u32 %v9697_v27, %v9694_v62  ;;  %v22234_v62 = vld [vmem:[#allocation83_spill] sm:$0xff]  ;;  %vm22237_vm4 = vmmov %vm22231_vm0 }
 0x6af   : > { %v22235_v27 = vshrl.u32 %v22234_v62, 16 }
 0x6b0   : > { %v9699_v23 = vsel %vm22221_vm13, %v9689_v25, %v9698_v16  ;;  %v9708_v8 = vsel %vm22224_vm15, %v9698_v16, %v22223_v26  ;;  %v22232_v25 = vld [vmem:[#allocation77_spill] sm:$0xff]  ;;  %v22236_v16 = vshll.u32 %v22234_v62, 16  ;;  %vm22245_vm13 = vmmov %vm22231_vm0 }
 0x6b1   : > { %vm22247_vm15 = vmmov %vm22231_vm0 }
 0x6b4   : > { %14677 = vmatmul.mubr.msk.bf16.gmra.mrb[20].mxu1 %vm22214_vm5, %v9663_v31  ;;  %v9742_v31 = vrot.slane %v19612_v56, 4  ;;  %vm22238_vm5 = vmmov %vm22233_vm2 }
 0x6b5   : > { %14680 = vmatprep.mubr.msk.bf16.mxu1 %vm22216_vm8, %v9672_v5  ;;  %v19858_v5 = vld [vmem:[#allocation3 + $0xe0] sm:$0xf]  ;;  %vm22240_vm8 = vmmov %vm22233_vm2 }
 0x6b6   : > { %v9743_v50 = vor.u32 %v9742_v31, %v9739_v3  ;;  %v9764_v26 = vshrl.u32 %v19858_v5, 16 }
 0x6b8   : > { %v9766_v31 = vrot.slane %v9764_v26, 3 }
 0x6bc   : > { %14681 = vmatmul.mubr.msk.bf16.gmra.mrb[24].mxu1 %vm22218_vm9, %v9681_v52  ;;  %v9744_v52 = vsel %vm22233_vm2, %v22232_v25, %v9743_v50  ;;  %vm22242_vm9 = vmmov %vm22233_vm2 }
 0x6bd   : > { %14684 = vmatprep.mubr.msk.bf16.mxu1 %vm22220_vm10, %v9690_v63  ;;  %v9757_v63 = vrot.slane %v22235_v27, 3  ;;  %v19877_v27 = vld [vmem:[#allocation3 + $0x20] sm:$0xf0]  ;;  %vm22244_vm10 = vcmask 1043456  }
 0x6c4   : > { %14685 = vmatmul.mubr.msk.bf16.gmra.mrb[28].mxu1 %vm22222_vm3, %v9699_v23  ;;  %v9760_v23 = vrot.slane %v22236_v16, 4  ;;  %vm22246_vm3 = vmmov %vm22244_vm10 }
 0x6c5   : > { %14688 = vmatprep.mubr.msk.bf16.mxu1 %vm22225_vm12, %v9708_v8  ;;  %v9767_v8 = vshll.u32 %v19858_v5, 16  ;;  %vm22248_vm12 = vmmov %vm22246_vm3 }
 0x6c6   : > { %v9761_v3 = vor.u32 %v9760_v23, %v9757_v63  ;;  %v10165_v63 = vrot.slane %v19402_v33, 4  ;;  %v15857_v23 = vld [vmem:[%s16107_s18 + $0x88] sm:$0xff]   ;;  %vm22251_vm2 = vmmov %vm22246_vm3 }
 0x6cc   : > { %14689 = vmatmul.mubr.msk.bf16.gmra.mrb[32].mxu1 %vm22227_vm1, %v22226_v45  ;;  %v9752_v45 = vor.u32 %v9751_v57, %v9748_v54  ;;  %v10160_v54 = vrot.slane %v19877_v27, 4  ;;  %vm22249_vm1 = vmmov %vm22231_vm0 }
 0x6cd   : > { %14692 = vmatprep.mubr.msk.bf16.mxu1 %vm22229_vm7, %v22228_v59  ;;  %v9769_v59 = vrot.slane %v9767_v8, 4  ;;  %v10167_v8 = vrot.slane %v19422_v29, 4  ;;  %vm22250_vm7 = vmmov %vm22246_vm3 }
 0x6ce   : > { %v9762_v25 = vsel %vm22240_vm8, %v9752_v45, %v9761_v3  ;;  %vm22255_vm8 = vmmov %vm22251_vm2 }
 0x6cf   : > { %v9770_v62 = vor.u32 %v9769_v59, %v9766_v31  ;;  %v10177_v59 = vrot.slane %v19481_v55, 4  ;;  %v22267_v55 = vld [vmem:[#allocation92_spill] sm:$0xff] }
 0x6d1   : > { %v9771_v16 = vsel %vm22242_vm9, %v9761_v3, %v9770_v62  ;;  %v10171_v3 = vrot.slane %v19451_v41, 4  ;;  %vm22257_vm9 = vmmov %vm22251_vm2  ;;  %v22262_v62 = vld [vmem:[#allocation91_spill] sm:$0xff] }
 0x6d4   : > { %14693 = vmatmul.mubr.msk.bf16.gmra.mrb[36].mxu1 %vm22231_vm0, %v22230_v39  ;;  %v9753_v39 = vsel %vm22238_vm5, %v9743_v50, %v9752_v45  ;;  %v10163_v50 = vrot.slane %v19399_v49, 4  ;;  %v10169_v45 = vrot.slane %v19429_v0, 4  ;;  %v10168_v49 = vsel %vm22250_vm7, %v10165_v63, %v10167_v8  ;;  %vm22253_vm5 = vmmov %vm22251_vm2 }
 0x6d5   : > { %14696 = vmatprep.mubr.msk.bf16.mxu1 %vm22237_vm4, %v9744_v52  ;;  %v10161_v52 = vrot.slane %v19385_v28, 4  ;;  %vm22252_vm4 = vmmov %vm22231_vm0  ;;  %v10175_v0 = vrot.slane %v19475_v34, 4 }
 0x6d6   : > { %v10166_v28 = vsel %vm22248_vm12, %v10163_v50, %v10165_v63  ;;  %v10170_v33 = vsel %vm22251_vm2, %v10167_v8, %v10169_v45  ;;  %v10172_v31 = vsel %vm22253_vm5, %v10169_v45, %v10171_v3  ;;  %vm22265_vm12 = vmmov %vm22251_vm2  ;;  %v22272_v8 = vld [vmem:[#allocation95_spill] sm:$0xff] }
 0x6d7   : > { %v10162_v57 = vsel %vm22244_vm10, %v10160_v54, %v10161_v52  ;;  %v10164_v26 = vsel %vm22246_vm3, %v10161_v52, %v10163_v50  ;;  %vm22259_vm10 = vmmov %vm22251_vm2  ;;  %v10181_v52 = vrot.slane %v22262_v62, 4  ;;  %v10183_v54 = vrot.slane %v22267_v55, 4  ;;  %v22288_v62 = vld [vmem:[#allocation99_spill] sm:$0xff] }
 0x6d8   : > { %v10178_v41 = vsel %vm22259_vm10, %v10175_v0, %v10177_v59  ;;  %vm22263_vm3 = vmmov %vm22251_vm2  ;;  %v10189_v45 = vrot.slane %v22272_v8, 4 }
 0x6d9   : > { %vm22269_vm7 = vmmov %vm22251_vm2 }
 0x6da   : > { %v10184_v63 = vsel %vm22269_vm7, %v10181_v52, %v10183_v54  ;;  %vm22273_vm5 = vmmov %vm22251_vm2 }
 0x6db   : > { %vm22282_vm10 = vmmov %vm22251_vm2 }
 0x6dc   : > { %14697 = vmatmul.mubr.msk.bf16.gmra.mrb[40].mxu1 %vm22239_vm14, %v9753_v39  ;;  %vm22254_vm14 = vmmov %vm22231_vm0 }
 0x6dd   : > { %14700 = vmatprep.mubr.msk.bf16.mxu1 %vm22241_vm11, %v9762_v25  ;;  %vm22256_vm11 = vmmov %vm22231_vm0 }
 0x6de   : > { %vm22294_vm7 = vmmov %vm22231_vm0 }
 0x6e4   : > { %14701 = vmatmul.mubr.msk.bf16.gmra.mrb[44].mxu1 %vm22243_vm6, %v9771_v16  ;;  %vm22258_vm6 = vmmov %vm22231_vm0 }
 0x6e5   : > { %14708 = vmatprep.mubr.msk.bf16.mxu1 %vm22245_vm13, %v10162_v57  ;;  %vm22260_vm13 = vmmov %vm22231_vm0  ;;  %v22268_v57 = vld [vmem:[#allocation93_spill] sm:$0xff] }
 0x6e6   : > { %v10185_v50 = vrot.slane %v22268_v57, 4  ;;  %v22295_v57 = vld [vmem:[#allocation100_spill] sm:$0xff] }
 0x6ec   : > { %14709 = vmatmul.mubr.msk.bf16.vlgmr.msra.gmra.mrb[0].mxu1 %vm22247_vm15, %v10164_v26  ;;  %vm22264_vm15 = vmmov %vm22231_vm0  ;;  %v22271_v26 = vld [vmem:[#allocation94_spill] sm:$0xff] }
 0x6ed   : > { %14757 = vmatpush3.bf16.msra.mxu1 %v19798_v4  ;;  %14712 = vmatprep.mubr.msk.bf16.mxu1 %vm22249_vm1, %v10166_v28  ;;  %v10173_v4 = vrot.slane %v19457_v1, 4  ;;  %v22261_v1 = vld [vmem:[#allocation90_spill] sm:$0xff]  ;;  %vm22266_vm1 = vmmov %vm22231_vm0  ;;  %v10187_v28 = vrot.slane %v22271_v26, 4  ;;  %v10573_v26 = vshrl.u32 %v19877_v27, 16 }
 0x6ee   : > { %14758 = vmatprep.subr.bf16.mxu1 %v15857_v23  ;;  %v10179_v25 = vrot.slane %v22261_v1, 4  ;;  %v22284_v1 = vld [vmem:[#allocation80_spill] sm:$0xff] }
 0x6ef   : > { %v10174_v29 = vsel %vm22255_vm8, %v10171_v3, %v10173_v4  ;;  %v10176_v39 = vsel %vm22257_vm9, %v10173_v4, %v10175_v0  ;;  %vm22275_vm8 = vmmov %vm22251_vm2  ;;  %v22277_v3 = vld [vmem:[#allocation98_spill] sm:$0xff] }
 0x6f0   : > { %v10180_v16 = vsel %vm22263_vm3, %v10177_v59, %v10179_v25  ;;  %v10182_v34 = vsel %vm22265_vm12, %v10179_v25, %v10181_v52  ;;  %v10191_v4 = vrot.slane %v22277_v3, 4  ;;  %vm22278_vm9 = vmmov %vm22251_vm2  ;;  %v22286_v25 = vld [vmem:[#allocation81_spill] sm:$0xff]  ;;  %v10201_v52 = vrot.slane %v22288_v62, 4 }
 0x6f1   : > { %14759 = vmatpush3.bf16.msra.mxu1 %v15857_v23  ;;  %v10186_v23 = vsel %vm22251_vm2, %v10183_v54, %v10185_v50  ;;  %vm22285_vm3 = vmmov %vm22231_vm0  ;;  %v10207_v3 = vrot.slane %v19858_v5, 4  ;;  %v10592_v62 = vrot.slane %v19439_v37, 4  ;;  %v10601_v37 = vrot.slane %v19479_v12, 5 }
 0x6f2   : > { %vm22290_vm12 = vmmov %vm22231_vm0 }
 0x6f4   : > { %14713 = vmatmul.mubr.msk.bf16.gmra.mrb[4].mxu1 %vm22231_vm0, %v10168_v49  ;;  %v10188_v49 = vsel %vm22273_vm5, %v10185_v50, %v10187_v28  ;;  %v10203_v50 = vrot.slane %v22295_v57, 4 }
 0x6f5   : > { %14716 = vmatprep.mubr.msk.bf16.mxu1 %vm22252_vm4, %v10170_v33  ;;  %vm22270_vm4 = vmmov %vm22231_vm0  ;;  %v10190_v33 = vsel %vm22275_vm8, %v10187_v28, %v10189_v45  ;;  %v10576_v28 = vshll.u32 %v19877_v27, 16 }
 0x6fc   : > { %14717 = vmatmul.mubr.msk.bf16.gmra.mrb[8].mxu1 %vm22254_vm14, %v10172_v31  ;;  %vm22274_vm14 = vmmov %vm22231_vm0  ;;  %v10192_v31 = vsel %vm22278_vm9, %v10189_v45, %v10191_v4 }
 0x6fd   : > { %14720 = vmatprep.mubr.msk.bf16.mxu1 %vm22256_vm11, %v10174_v29  ;;  %vm22276_vm11 = vmmov %vm22231_vm0  ;;  %v22280_v29 = vld [vmem:[#allocation66_spill] sm:$0xff] }
 0x6fe   : > { %v22281_v0 = vrot.slane %v22280_v29, 4 }
 0x700   : > { %v10194_v59 = vsel %vm22282_vm10, %v10191_v4, %v22281_v0  ;;  %v10575_v4 = vrot.slane %v10573_v26, 4 }
 0x704   : > { %14721 = vmatmul.mubr.msk.bf16.gmra.mrb[12].mxu1 %vm22258_vm6, %v10176_v39  ;;  %vm22279_vm6 = vmmov %vm22231_vm0  ;;  %v15858_v39 = vld [vmem:[%s16117_s14] sm:$0xff]  }
 0x705   : > { %14724 = vmatprep.mubr.msk.bf16.mxu1 %vm22260_vm13, %v10178_v41  ;;  %v15859_v41 = vld [vmem:[%s16117_s14 + $0x8] sm:$0xff]   ;;  %vm22283_vm13 = vmmov %vm22231_vm0  ;;  %14808 = vmatprep.subr.bf16.mxu0 %v15858_v39 }
 0x706   : > { %14809 = vmatpush3.bf16.msra.mxu0 %v15858_v39  ;;  %v10585_v39 = vrot.slane %v19427_v53, 5 }
 0x707   : > { %14810 = vmatprep.subr.bf16.mxu0 %v15859_v41 }
 0x70a   : > { %14811 = vmatpush3.bf16.msra.mxu0 %v15859_v41  ;;  %v10589_v41 = vrot.slane %v19432_v14, 5 }
 0x70c   : > { %14725 = vmatmul.mubr.msk.bf16.gmra.mrb[16].mxu1 %vm22264_vm15, %v10180_v16  ;;  %vm22287_vm15 = vmmov %vm22231_vm0  ;;  %v22289_v16 = vld [vmem:[#allocation82_spill] sm:$0xff] }
 0x70d   : > { %14728 = vmatprep.mubr.msk.bf16.mxu1 %vm22266_vm1, %v10182_v34  ;;  %v22291_v34 = vld [vmem:[#allocation69_spill] sm:$0xff]  ;;  %vm22293_vm1 = vmmov %vm22251_vm2 }
 0x70e   : > { %v22292_v55 = vrot.slane %v22291_v34, 4  ;;  %vm22297_vm2 = vmmov %vm22285_vm3 }
 0x70f   : > { %vm22299_vm5 = vmmov %vm22297_vm2 }
 0x710   : > { %v10202_v54 = vsel %vm22293_vm1, %v22292_v55, %v10201_v52  ;;  %vm22301_vm8 = vmmov %vm22297_vm2  ;;  %v10600_v55 = vrot.slane %v19464_v30, 4  ;;  %v10609_v30 = vrot.slane %v19503_v2, 5 }
 0x711   : > { %vm22303_vm9 = vmmov %vm22297_vm2 }
 0x712   : > { %vm22305_vm10 = vmmov %vm22297_vm2 }
 0x714   : > { %14729 = vmatmul.mubr.msk.bf16.gmra.mrb[20].mxu1 %vm22231_vm0, %v10184_v63  ;;  %v15885_v63 = vld [vmem:[#allocation3 + $0xd8] sm:$0xff]  ;;  %vm22296_vm0 = vmmov %vm22293_vm1 }
 0x715   : > { %14732 = vmatprep.mubr.msk.bf16.mxu1 %vm22270_vm4, %v10186_v23  ;;  %v10205_v23 = vrot.slane %v15885_v63, 4  ;;  %v10204_v8 = vsel %vm22296_vm0, %v10201_v52, %v10203_v50  ;;  %vm22298_vm4 = vmmov %vm22296_vm0  ;;  %v10596_v52 = vrot.slane %v19443_v21, 4  ;;  %v10605_v21 = vrot.slane %v19484_v11, 5 }
 0x716   : > { %v10608_v63 = vrot.slane %v19488_v15, 4  ;;  %v10617_v15 = vrot.slane %v19527_v10, 5 }
 0x717   : > { %v10206_v45 = vsel %vm22298_vm4, %v10203_v50, %v10205_v23 }
 0x718   : > { %v10610_v11 = vor.u32 %v10609_v30, %v10608_v63 }
 0x71c   : > { %14733 = vmatmul.mubr.msk.bf16.gmra.mrb[24].mxu1 %vm22274_vm14, %v10188_v49  ;;  %v10580_v49 = vrot.slane %v19390_v19, 4  ;;  %vm22300_vm14 = vmmov %vm22296_vm0 }
 0x71d   : > { %14736 = vmatprep.mubr.msk.bf16.mxu1 %vm22276_vm11, %v10190_v33  ;;  %v10581_v33 = vrot.slane %v19405_v32, 5  ;;  %v10208_v0 = vsel %vm22300_vm14, %v10205_v23, %v10207_v3  ;;  %vm22302_vm11 = vsmask.f32 3328  ;;  %v10588_v32 = vrot.slane %v19414_v48, 4 }
 0x71e   : > { %v10597_v48 = vrot.slane %v19460_v17, 5  ;;  %v10602_v17 = vor.u32 %v10601_v37, %v10600_v55  ;;  %v10612_v23 = vrot.slane %v19492_v13, 4  ;;  %v10621_v13 = vrot.slane %v19532_v7, 5 }
 0x71f   : > { %v10582_v29 = vor.u32 %v10581_v33, %v10580_v49  ;;  %v10624_v3 = vrot.slane %v19536_v6, 4  ;;  %v10633_v6 = vrot.slane %v19575_v44, 5 }
 0x724   : > { %14737 = vmatmul.mubr.msk.bf16.gmra.mrb[28].mxu1 %vm22279_vm6, %v10192_v31  ;;  %v10578_v31 = vrot.slane %v10576_v28, 5  ;;  %vm22304_vm6 = vmmov %vm22302_vm11 }
 0x725   : > { %14740 = vmatprep.mubr.msk.bf16.mxu1 %vm22283_vm13, %v10194_v59  ;;  %v10584_v59 = vrot.slane %v19410_v20, 4  ;;  %v10593_v20 = vrot.slane %v19455_v40, 5  ;;  %vm22306_vm13 = vmmov %vm22304_vm6 }
 0x726   : > { %v10579_v27 = vor.u32 %v10578_v31, %v10575_v4  ;;  %vm22310_vm1 = vmmov %vm22304_vm6  ;;  %v10628_v4 = vrot.slane %v19540_v46, 4  ;;  %v10637_v46 = vrot.slane %v19578_v42, 5  ;;  %v22331_v42 = vld [vmem:[#allocation84_spill] sm:$0xff] }
 0x727   : > { %v10586_v5 = vor.u32 %v10585_v39, %v10584_v59  ;;  %v10594_v14 = vor.u32 %v10593_v20, %v10592_v62  ;;  %vm22312_vm0 = vmmov %vm22310_vm1  ;;  %v10566_v62 = vld [vmem:[#allocation3 + $0xe0] sm:$0x1f]  ;;  %v10664_v20 = vrot.slane %v22191_v38, 4 }
 0x728   : > { %v10583_v19 = vsel %vm22302_vm11, %v10579_v27, %v10582_v29  ;;  %vm22313_vm4 = vmmov %vm22312_vm0  ;;  %v10636_v27 = vrot.slane %v22167_v35, 4 }
 0x729   : > { %vm22315_vm14 = vmmov %vm22312_vm0 }
 0x72a   : > { %vm22317_vm11 = vmmov %vm22312_vm0  ;;  %v10638_v59 = vor.u32 %v10637_v46, %v10636_v27 }
 0x72c   : > { %14741 = vmatmul.mubr.msk.bf16.gmra.mrb[32].mxu1 %vm22285_vm3, %v22284_v1  ;;  %v10590_v1 = vor.u32 %v10589_v41, %v10588_v32  ;;  %vm22307_vm3 = vmmov %vm22297_vm2 }
 0x72d   : > { %14744 = vmatprep.mubr.msk.bf16.mxu1 %vm22287_vm15, %v22286_v25  ;;  %v10587_v25 = vsel %vm22304_vm6, %v10582_v29, %v10586_v5  ;;  %vm22308_vm15 = vmmov %vm22304_vm6 }
 0x72e   : > { %v10591_v53 = vsel %vm22306_vm13, %v10586_v5, %v10590_v1  ;;  %v10595_v34 = vsel %vm22308_vm15, %v10590_v1, %v10594_v14  ;;  %vm22319_vm6 = vmmov %vm22312_vm0  ;;  %v22334_v5 = vld [vmem:[#allocation85_spill] sm:$0xff]  ;;  %v22336_v1 = vld [vmem:[#allocation87_spill] sm:$0xff] }
 0x72f   : > { %vm22321_vm13 = vmmov %vm22312_vm0 }
 0x730   : > { %vm22323_vm15 = vmmov %vm22312_vm0 }
 0x734   : > { %14745 = vmatmul.mubr.msk.bf16.gmra.mrb[36].mxu1 %vm22290_vm12, %v22289_v16  ;;  %v10598_v16 = vor.u32 %v10597_v48, %v10596_v52  ;;  %vm22309_vm12 = vmmov %vm22297_vm2  ;;  %v22338_v52 = vld [vmem:[#allocation88_spill] sm:$0xff]  ;;  %v22340_v48 = vld [vmem:[#allocation86_spill] sm:$0xff] }
 0x735   : > { %14748 = vmatprep.mubr.msk.bf16.mxu1 %vm22294_vm7, %v10202_v54  ;;  %v10604_v54 = vrot.slane %v19468_v58, 4  ;;  %vm22311_vm7 = vmmov %vm22297_vm2  ;;  %v10613_v58 = vrot.slane %v19508_v51, 5 }
 0x736   : > { %v10599_v40 = vsel %vm22310_vm1, %v10594_v14, %v10598_v16  ;;  %v10603_v50 = vsel %vm22312_vm0, %v10598_v16, %v10602_v17  ;;  %vm22325_vm1 = vmmov %vm22312_vm0 }
 0x737   : > { %v10606_v57 = vor.u32 %v10605_v21, %v10604_v54  ;;  %v10614_v26 = vor.u32 %v10613_v58, %v10612_v23  ;;  %v15860_v21 = vld [vmem:[%s16122_s27] sm:$0xff]  }
 0x738   : > { %14860 = vmatprep.subr.bf16.mxu1 %v15860_v21  ;;  %v22351_v58 = vld [vmem:[#allocation13_spill] sm:$0xff] }
 0x739   : > { %v10607_v12 = vsel %vm22313_vm4, %v10602_v17, %v10606_v57  ;;  %v10611_v28 = vsel %vm22315_vm14, %v10606_v57, %v10610_v11  ;;  %v10615_v2 = vsel %vm22317_vm11, %v10610_v11, %v10614_v26  ;;  %vm22327_vm4 = vmmov %vm22312_vm0  ;;  %v15861_v17 = vld [vmem:[%s16122_s27 + $0x8] sm:$0xff]   ;;  %v20054_v57 = vld [vmem:[%s22350_s26] ss:$0 sm:$0xff]  ;;  %s22470_s27 = scalar_lea.vmem %s21262_s6, %s16081_s15  ;;  %s22640_s15 = sld [smem:[#allocation4_spill]] }
 0x73a   : > { %vm22329_vm14 = vmmov %vm22312_vm0 }
 0x73b   : > { %vm22332_vm11 = vmmov %vm22312_vm0 }
 0x73c   : > { %14749 = vmatmul.mubr.msk.bf16.gmra.mrb[40].mxu1 %vm22297_vm2, %v10204_v8  ;;  %v10616_v8 = vrot.slane %v19512_v47, 4  ;;  %v10625_v47 = vrot.slane %v19551_v60, 5 }
 0x73d   : > { %14752 = vmatprep.mubr.msk.bf16.mxu1 %vm22299_vm5, %v10206_v45  ;;  %vm22314_vm5 = vmmov %vm22297_vm2  ;;  %v10620_v45 = vrot.slane %v19516_v9, 4  ;;  %v10629_v9 = vrot.slane %v19556_v22, 5 }
 0x73e   : > { %v10618_v51 = vor.u32 %v10617_v15, %v10616_v8  ;;  %v10626_v7 = vor.u32 %v10625_v47, %v10624_v3  ;;  %v22352_v8 = vld [vmem:[#allocation14_spill] sm:$0xff] }
 0x73f   : > { %v10622_v49 = vor.u32 %v10621_v13, %v10620_v45  ;;  %v10630_v31 = vor.u32 %v10629_v9, %v10628_v4  ;;  %v22353_v45 = vld [vmem:[#allocation15_spill] sm:$0xff]  ;;  %v15886_v9 = vld [vmem:[#allocation2 + $0x18] sm:$0xff]  ;;  %p13347_p8 = scmp.ne.s32.totalorder %s22640_s15, 1 }
 0x740   : > { %v10619_v33 = vsel %vm22319_vm6, %v10614_v26, %v10618_v51  ;;  %vm22335_vm6 = vmmov %vm22297_vm2 }
 0x741   : > { %v10623_v10 = vsel %vm22321_vm13, %v10618_v51, %v10622_v49  ;;  %v10627_v29 = vsel %vm22323_vm15, %v10622_v49, %v10626_v7  ;;  %v10631_v60 = vsel %vm22325_vm1, %v10626_v7, %v10630_v31  ;;  %vm22339_vm13 = vmmov %vm22297_vm2  ;;  %v22354_v49 = vld [vmem:[#allocation16_spill] sm:$0xff] }
 0x742   : > { %vm22342_vm15 = vmmov %vm22297_vm2 }
 0x743   : > { %vm22344_vm1 = vmmov %vm22297_vm2 }
 0x744   : > { %14753 = vmatmul.mubr.msk.bf16.gmra.mrb[44].mxu1 %vm22301_vm8, %v10208_v0  ;;  %vm22316_vm8 = vmmov %vm22297_vm2  ;;  %v10632_v0 = vrot.slane %v22168_v36, 4  ;;  %v10641_v36 = vrot.slane %v19591_v18, 5  ;;  %v10660_v18 = vrot.slane %v19602_v61, 4  ;;  %v10673_v61 = vshrl.u32 %v10566_v62, 16 }
 0x745   : > { %14760 = vmatprep.mubr.msk.bf16.mxu1 %vm22303_vm9, %v10583_v19  ;;  %vm22318_vm9 = vmmov %vm22297_vm2  ;;  %v10640_v19 = vrot.slane %v19582_v43, 4  ;;  %v10661_v43 = vrot.slane %v19612_v56, 5  ;;  %v10676_v56 = vshll.u32 %v10566_v62, 16  ;;  %v22362_v62 = vld [vmem:[#allocation22_spill] sm:$0xff] }
 0x746   : > { %v10634_v22 = vor.u32 %v10633_v6, %v10632_v0  ;;  %v15887_v0 = vld [vmem:[#allocation2] sm:$0xff] }
 0x747   : > { %v10642_v32 = vor.u32 %v10641_v36, %v10640_v19  ;;  %v10678_v55 = vrot.slane %v10676_v56, 5  ;;  %v22359_v19 = vld [vmem:[#allocation17_spill] sm:$0xff] }
 0x748   : > { %v10635_v39 = vsel %vm22312_vm0, %v10630_v31, %v10634_v22  ;;  %v10639_v44 = vsel %vm22327_vm4, %v10634_v22, %v10638_v59 }
 0x749   : > { %v10643_v35 = vsel %vm22329_vm14, %v10638_v59, %v10642_v32  ;;  %v10647_v41 = vsel %vm22332_vm11, %v10642_v32, %v22331_v42  ;;  %v15889_v59 = vld [vmem:[#allocation2 + $0x10] sm:$0xff]  ;;  %v22360_v42 = vld [vmem:[#allocation20_spill] sm:$0xff] }
 0x74c   : > { %14761 = vmatmul.mubr.msk.bf16.vlgmr.msra.gmra.mrb[0].mxu1 %vm22305_vm10, %v10587_v25  ;;  %vm22320_vm10 = vmmov %vm22297_vm2  ;;  %v10662_v25 = vor.u32 %v10661_v43, %v10660_v18  ;;  %v22361_v43 = vld [vmem:[#allocation21_spill] sm:$0xff] }
 0x74d   : > { %14764 = vmatprep.mubr.msk.bf16.mxu1 %vm22307_vm3, %v10591_v53  ;;  %vm22322_vm3 = vmmov %vm22297_vm2  ;;  %v10665_v53 = vrot.slane %v19626_v24, 5  ;;  %v22345_v24 = vld [vmem:[#allocation89_spill] sm:$0xff]  ;;  %14861 = vmatpush3.bf16.msra.mxu1 %v15860_v21  ;;  %v15893_v21 = vld [vmem:[#allocation2 + $0x30] sm:$0xff] }
 0x74e   : > { %14862 = vmatprep.subr.bf16.mxu1 %v15861_v17 }
 0x74f   : > { %v10666_v16 = vor.u32 %v10665_v53, %v10664_v20 }
 0x751   : > { %14863 = vmatpush3.bf16.msra.mxu1 %v15861_v17 }
 0x754   : > { %14765 = vmatmul.mubr.msk.bf16.gmra.mrb[4].mxu1 %vm22309_vm12, %v10595_v34  ;;  %vm22324_vm12 = vmmov %vm22297_vm2  ;;  %v10675_v34 = vrot.slane %v10673_v61, 4  ;;  %v15890_v61 = vld [vmem:[#allocation2 + $0x38] sm:$0xff] }
 0x755   : > { %14768 = vmatprep.mubr.msk.bf16.mxu1 %vm22311_vm7, %v10599_v40  ;;  %vm22326_vm7 = vmmov %vm22297_vm2 }
 0x756   : > { %v10679_v40 = vor.u32 %v10678_v55, %v10675_v34  ;;  %v15891_v55 = vld [vmem:[#allocation2 + $0x20] sm:$0xff] }
 0x75c   : > { %14769 = vmatmul.mubr.msk.bf16.gmra.mrb[8].mxu1 %vm22297_vm2, %v10603_v50 }
 0x75d   : > { %14772 = vmatprep.mubr.msk.bf16.mxu1 %vm22314_vm5, %v10607_v12  ;;  %vm22328_vm5 = vmmov %vm22297_vm2 }
 0x764   : > { %14773 = vmatmul.mubr.msk.bf16.gmra.mrb[12].mxu1 %vm22316_vm8, %v10611_v28  ;;  %vm22330_vm8 = vmmov %vm22297_vm2 }
 0x765   : > { %14776 = vmatprep.mubr.msk.bf16.mxu1 %vm22318_vm9, %v10615_v2  ;;  %vm22333_vm9 = vmmov %vm22297_vm2 }
 0x76c   : > { %14777 = vmatmul.mubr.msk.bf16.gmra.mrb[16].mxu1 %vm22320_vm10, %v10619_v33  ;;  %vm22337_vm10 = vmmov %vm22297_vm2 }
 0x76d   : > { %14780 = vmatprep.mubr.msk.bf16.mxu1 %vm22322_vm3, %v10623_v10  ;;  %vm22341_vm3 = vmmov %vm22312_vm0 }
 0x76e   : > { %v10663_v14 = vsel %vm22341_vm3, %v22340_v48, %v10662_v25 }
 0x774   : > { %14781 = vmatmul.mubr.msk.bf16.gmra.mrb[20].mxu1 %vm22324_vm12, %v10627_v29  ;;  %vm22343_vm12 = vmmov %vm22312_vm0 }
 0x775   : > { %14784 = vmatprep.mubr.msk.bf16.mxu1 %vm22326_vm7, %v10631_v60  ;;  %v10667_v38 = vsel %vm22343_vm12, %v10662_v25, %v10666_v16  ;;  %vm22346_vm7 = vmmov %vm22312_vm0  ;;  %v15888_v60 = vld [vmem:[#allocation2 + $0x8] sm:$0xff] }
 0x776   : > { %v10671_v37 = vsel %vm22346_vm7, %v10666_v16, %v22345_v24  ;;  %vm22347_vm0 = vmmov %vm22344_vm1 }
 0x777   : > { %vm22349_vm4 = vmmov %vm22347_vm0 }
 0x778   : > { %vm22364_vm14 = vmmov %vm22347_vm0 }
 0x779   : > { %vm22374_vm11 = vmmov %vm22347_vm0 }
 0x77a   : > { %vm22413_vm12 = vmmov %vm22347_vm0 }
 0x77b   : > { %vm22423_vm7 = vmmov %vm22347_vm0 }
 0x77c   : > { %14785 = vmatmul.mubr.msk.bf16.gmra.mrb[24].mxu1 %vm22297_vm2, %v10635_v39  ;;  %vm22348_vm2 = vmmov %vm22341_vm3 }
 0x77d   : > { %14788 = vmatprep.mubr.msk.bf16.mxu1 %vm22328_vm5, %v10639_v44  ;;  %v10680_v54 = vsel %vm22348_vm2, %v22345_v24, %v10679_v40  ;;  %vm22363_vm5 = vmmov %vm22347_vm0  ;;  %v15892_v24 = vld [vmem:[#allocation2 + $0x28] sm:$0xff] }
 0x77e   : > { %vm22403_vm3 = vmmov %vm22347_vm0 }
 0x77f   : > { %vm22432_vm2 = vmmov %vm22347_vm0 }
 0x784   : > { %14789 = vmatmul.mubr.msk.bf16.gmra.mrb[28].mxu1 %vm22330_vm8, %v10643_v35  ;;  %vm22373_vm8 = vmmov %vm22347_vm0 }
 0x785   : > { %14792 = vmatprep.mubr.msk.bf16.mxu1 %vm22333_vm9, %v10647_v41  ;;  %vm22383_vm9 = vmmov %vm22347_vm0 }
 0x78c   : > { %14793 = vmatmul.mubr.msk.bf16.gmra.mrb[32].mxu1 %vm22335_vm6, %v22334_v5  ;;  %vm22384_vm6 = vmmov %vm22347_vm0 }
 0x78d   : > { %14796 = vmatprep.mubr.msk.bf16.mxu1 %vm22337_vm10, %v22336_v1  ;;  %vm22393_vm10 = vmmov %vm22347_vm0 }
 0x794   : > { %14797 = vmatmul.mubr.msk.bf16.gmra.mrb[36].mxu1 %vm22339_vm13, %v22338_v52  ;;  %vm22394_vm13 = vmmov %vm22347_vm0 }
 0x795   : > { %14800 = vmatprep.mubr.msk.bf16.mxu1 %vm22342_vm15, %v10663_v14  ;;  %vm22404_vm15 = vmmov %vm22347_vm0 }
 0x79c   : > { %14801 = vmatmul.mubr.msk.bf16.gmra.mrb[40].mxu1 %vm22344_vm1, %v10667_v38  ;;  %vm22414_vm1 = vmmov %vm22347_vm0 }
 0x79d   : > { %14804 = vmatprep.mubr.msk.bf16.mxu1 %vm22347_vm0, %v10671_v37 }
 0x7a4   : > { %14805 = vmatmul.mubr.msk.bf16.gmra.mrb[44].mxu1 %vm22349_vm4, %v10680_v54  ;;  %vm22433_vm4 = vmmov %vm22347_vm0 }
 0x81f   : > { %v14762_v50 = vpop.f32.mrb[0].mxu1 }
 0x820   : > { %v11047_v63 = vadd.f32 %v14762_v50, %v20054_v57  ;;  %v10799_v30 = vpop.f32.mrb[1].mxu1  ;;  %v22369_v50 = vld [vmem:[#allocation23_spill] sm:$0xff] }
 0x821   : > { %v11045_v12 = vadd.f32 %v20054_v57, %v10799_v30  ;;  %v14763_v23 = vpop.f32.mrb[2].mxu1 }
 0x822   : > { %v11095_v11 = vmul.f32 %v22351_v58, %v11047_v63  ;;  %v11048_v26 = vadd.f32 %v14763_v23, %v20054_v57  ;;  %v10802_v28 = vpop.f32.mrb[3].mxu1 }
 0x823   : > { %v11093_v15 = vmul.f32 %v22352_v8, %v11045_v12  ;;  %v11046_v2 = vadd.f32 %v20054_v57, %v10802_v28 }
 0x824   : > { %v11096_v13 = vmul.f32 %v22353_v45, %v11048_v26  ;;  %v11143_v3 = vmul.f32 0.1, %v11095_v11  ;;  %v22370_v11 = vld [vmem:[#allocation24_spill] sm:$0xff] }
 0x825   : > { %v11141_v51 = vmul.f32 0.1, %v11093_v15  ;;  %v11094_v33 = vmul.f32 %v22354_v49, %v11046_v2  ;;  %v22371_v2 = vld [vmem:[#allocation25_spill] sm:$0xff] }
 0x826   : > { %v11144_v47 = vmul.f32 0.1, %v11096_v13  ;;  %v20072_v39 = vadd.f32 %v15889_v59, %v11143_v3  ;;  %v15896_v59 = vld [vmem:[#allocation2 + $0x48] sm:$0xff] }
 0x827   : > { %v11142_v10 = vmul.f32 0.1, %v11094_v33  ;;  %v14766_v4 = vpop.f32.mrb[4].mxu1  ;;  %v20067_v6 = vadd.f32 %v15887_v0, %v11141_v51  ;;  %v22372_v33 = vld [vmem:[#allocation26_spill] sm:$0xff] }
 0x828   : > { %v20064_v7 = vadd.f32 %v15886_v9, %v11144_v47  ;;  %v11051_v31 = vadd.f32 %v14766_v4, %v20054_v57  ;;  %v10815_v29 = vpop.f32.mrb[5].mxu1  ;;  %22358 = vst [vmem:[#allocation65_spill] sm:$0xff] %v20072_v39 }
 0x829   : > { %22356 = vst [vmem:[#allocation63_spill] sm:$0xff] %v20067_v6  ;;  %v20069_v27 = vadd.f32 %v15888_v60, %v11142_v10  ;;  %v11049_v46 = vadd.f32 %v20054_v57, %v10815_v29  ;;  %v14767_v22 = vpop.f32.mrb[6].mxu1 }
 0x82a   : > { %22355 = vst [vmem:[#allocation61_spill] sm:$0xff] %v20064_v7  ;;  %v11099_v36 = vmul.f32 %v22359_v19, %v11051_v31  ;;  %v11052_v44 = vadd.f32 %v14767_v22, %v20054_v57  ;;  %v10818_v32 = vpop.f32.mrb[7].mxu1  ;;  %v11238_v18 = vpack.c.bf16 %v20064_v7, %v20072_v39  ;;  %v15894_v31 = vld [vmem:[#allocation2 + $0x58] sm:$0xff]  ;;  %v22449_v7 = vld [vmem:[#allocation54_spill] sm:$0xff] }
 0x82b   : > { %22357 = vst [vmem:[#allocation62_spill] sm:$0xff] %v20069_v27  ;;  %v11237_v35 = vpack.c.bf16 %v20069_v27, %v20067_v6  ;;  %v11097_v41 = vmul.f32 %v22360_v42, %v11049_v46  ;;  %v11050_v5 = vadd.f32 %v20054_v57, %v10818_v32  ;;  %v15895_v46 = vld [vmem:[#allocation2 + $0x40] sm:$0xff] }
 0x82c   : > { %v11100_v1 = vmul.f32 %v22361_v43, %v11052_v44  ;;  %v11147_v53 = vmul.f32 0.1, %v11099_v36 }
 0x82d   : > { %v11145_v25 = vmul.f32 0.1, %v11097_v41  ;;  %v11098_v20 = vmul.f32 %v22362_v62, %v11050_v5  ;;  %14812 = vmatprep.mubr.msk.bf16.mxu0 %vm22363_vm5, %v11237_v35  ;;  %v15897_v35 = vld [vmem:[#allocation2 + $0x50] sm:$0xff]  ;;  %vm22442_vm5 = vmmov %vm22347_vm0 }
 0x82e   : > { %v11148_v52 = vmul.f32 0.1, %v11100_v1  ;;  %14813 = vmatmul.mubr.msk.bf16.vlgmr.msra.gmra.mrb[48].mxu0 %vm22364_vm14, %v11238_v18  ;;  %v20094_v17 = vadd.f32 %v15893_v21, %v11147_v53  ;;  %v22379_v5 = vld [vmem:[#allocation27_spill] sm:$0xff]  ;;  %v22380_v53 = vld [vmem:[#allocation28_spill] sm:$0xff]  ;;  %vm22443_vm14 = vmmov %vm22347_vm0 }
 0x82f   : > { %v11146_v48 = vmul.f32 0.1, %v11098_v20  ;;  %v14770_v14 = vpop.f32.mrb[8].mxu1  ;;  %v20089_v38 = vadd.f32 %v15891_v55, %v11145_v25  ;;  %v22382_v55 = vld [vmem:[#allocation30_spill] sm:$0xff] }
 0x830   : > { %v20086_v56 = vadd.f32 %v15890_v61, %v11148_v52  ;;  %v11055_v16 = vadd.f32 %v14770_v14, %v20054_v57  ;;  %v10831_v34 = vpop.f32.mrb[9].mxu1  ;;  %22368 = vst [vmem:[#allocation67_spill] sm:$0xff] %v20094_v17  ;;  %v22381_v61 = vld [vmem:[#allocation29_spill] sm:$0xff] }
 0x831   : > { %22366 = vst [vmem:[#allocation97_spill] sm:$0xff] %v20089_v38  ;;  %v20091_v37 = vadd.f32 %v15892_v24, %v11146_v48  ;;  %v11053_v40 = vadd.f32 %v20054_v57, %v10831_v34  ;;  %v14771_v54 = vpop.f32.mrb[10].mxu1 }
 0x832   : > { %22365 = vst [vmem:[#allocation64_spill] sm:$0xff] %v20086_v56  ;;  %v11103_v63 = vmul.f32 %v22369_v50, %v11055_v16  ;;  %v11056_v30 = vadd.f32 %v14771_v54, %v20054_v57  ;;  %v10834_v12 = vpop.f32.mrb[11].mxu1  ;;  %v11240_v15 = vpack.c.bf16 %v20086_v56, %v20094_v17  ;;  %v22439_v56 = vld [vmem:[#allocation50_spill] sm:$0xff] }
 0x833   : > { %22367 = vst [vmem:[#allocation96_spill] sm:$0xff] %v20091_v37  ;;  %v11239_v23 = vpack.c.bf16 %v20091_v37, %v20089_v38  ;;  %v11101_v26 = vmul.f32 %v22370_v11, %v11053_v40  ;;  %v11054_v28 = vadd.f32 %v20054_v57, %v10834_v12 }
 0x834   : > { %v11104_v13 = vmul.f32 %v22371_v2, %v11056_v30  ;;  %v11151_v47 = vmul.f32 0.1, %v11103_v63  ;;  %v15898_v30 = vld [vmem:[#allocation2 + $0x78] sm:$0xff] }
 0x835   : > { %v11149_v51 = vmul.f32 0.1, %v11101_v26  ;;  %v11102_v3 = vmul.f32 %v22372_v33, %v11054_v28  ;;  %14816 = vmatprep.mubr.msk.bf16.mxu0 %vm22373_vm8, %v11239_v23  ;;  %v15899_v28 = vld [vmem:[#allocation2 + $0x60] sm:$0xff]  ;;  %vm22452_vm8 = vmmov %vm22347_vm0 }
 0x836   : > { %v11152_v10 = vmul.f32 0.1, %v11104_v13  ;;  %14817 = vmatmul.mubr.msk.bf16.gmra.mrb[52].mxu0 %vm22374_vm11, %v11240_v15  ;;  %v20116_v41 = vadd.f32 %v15897_v35, %v11151_v47  ;;  %v15900_v13 = vld [vmem:[#allocation2 + $0x68] sm:$0xff]  ;;  %vm22453_vm11 = vmmov %vm22347_vm0 }
 0x837   : > { %v11150_v4 = vmul.f32 0.1, %v11102_v3  ;;  %v14774_v9 = vpop.f32.mrb[12].mxu1  ;;  %v20111_v22 = vadd.f32 %v15895_v46, %v11149_v51 }
 0x838   : > { %v20108_v29 = vadd.f32 %v15894_v31, %v11152_v10  ;;  %v11059_v0 = vadd.f32 %v14774_v9, %v20054_v57  ;;  %v10847_v60 = vpop.f32.mrb[13].mxu1  ;;  %22378 = vst [vmem:[#allocation72_spill] sm:$0xff] %v20116_v41  ;;  %v15901_v10 = vld [vmem:[#allocation2 + $0x70] sm:$0xff] }
 0x839   : > { %22376 = vst [vmem:[#allocation12_spill] sm:$0xff] %v20111_v22  ;;  %v20113_v36 = vadd.f32 %v15896_v59, %v11150_v4  ;;  %v11057_v44 = vadd.f32 %v20054_v57, %v10847_v60  ;;  %v14775_v32 = vpop.f32.mrb[14].mxu1  ;;  %v22389_v9 = vld [vmem:[#allocation31_spill] sm:$0xff]  ;;  %v22390_v59 = vld [vmem:[#allocation18_spill] sm:$0xff] }
 0x83a   : > { %22375 = vst [vmem:[#allocation68_spill] sm:$0xff] %v20108_v29  ;;  %v11107_v18 = vmul.f32 %v22379_v5, %v11059_v0  ;;  %v11060_v1 = vadd.f32 %v14775_v32, %v20054_v57  ;;  %v10850_v25 = vpop.f32.mrb[15].mxu1  ;;  %v11242_v14 = vpack.c.bf16 %v20108_v29, %v20116_v41  ;;  %v22429_v29 = vld [vmem:[#allocation46_spill] sm:$0xff] }
 0x83b   : > { %22377 = vst [vmem:[#allocation71_spill] sm:$0xff] %v20113_v36  ;;  %v11241_v20 = vpack.c.bf16 %v20113_v36, %v20111_v22  ;;  %v11105_v52 = vmul.f32 %v22380_v53, %v11057_v44  ;;  %v11058_v48 = vadd.f32 %v20054_v57, %v10850_v25 }
 0x83c   : > { %v11108_v16 = vmul.f32 %v22381_v61, %v11060_v1  ;;  %v11155_v40 = vmul.f32 0.1, %v11107_v18  ;;  %v22391_v18 = vld [vmem:[#allocation19_spill] sm:$0xff] }
 0x83d   : > { %v11153_v34 = vmul.f32 0.1, %v11105_v52  ;;  %v11106_v24 = vmul.f32 %v22382_v55, %v11058_v48  ;;  %14820 = vmatprep.mubr.msk.bf16.mxu0 %vm22383_vm9, %v11241_v20  ;;  %v22392_v20 = vld [vmem:[#allocation32_spill] sm:$0xff]  ;;  %vm22462_vm9 = vmmov %vm22347_vm0 }
 0x83e   : > { %v11156_v54 = vmul.f32 0.1, %v11108_v16  ;;  %14821 = vmatmul.mubr.msk.bf16.gmra.mrb[56].mxu0 %vm22384_vm6, %v11242_v14  ;;  %v20138_v4 = vadd.f32 %v15901_v10, %v11155_v40  ;;  %v22399_v10 = vld [vmem:[#allocation33_spill] sm:$0xff]  ;;  %vm22463_vm6 = vmmov %vm22347_vm0 }
 0x83f   : > { %v11154_v21 = vmul.f32 0.1, %v11106_v24  ;;  %v14778_v63 = vpop.f32.mrb[16].mxu1  ;;  %v20133_v15 = vadd.f32 %v15899_v28, %v11153_v34  ;;  %v15902_v24 = vld [vmem:[#allocation2 + $0x98] sm:$0xff] }
 0x840   : > { %v20130_v12 = vadd.f32 %v15898_v30, %v11156_v54  ;;  %v11063_v23 = vadd.f32 %v14778_v63, %v20054_v57  ;;  %v10863_v26 = vpop.f32.mrb[17].mxu1  ;;  %22388 = vst [vmem:[#allocation101_spill] sm:$0xff] %v20138_v4  ;;  %v15903_v63 = vld [vmem:[#allocation2 + $0x80] sm:$0xff] }
 0x841   : > { %22386 = vst [vmem:[#allocation73_spill] sm:$0xff] %v20133_v15  ;;  %v20135_v51 = vadd.f32 %v15900_v13, %v11154_v21  ;;  %v11061_v3 = vadd.f32 %v20054_v57, %v10863_v26  ;;  %v14779_v47 = vpop.f32.mrb[18].mxu1 }
 0x842   : > { %22385 = vst [vmem:[#allocation70_spill] sm:$0xff] %v20130_v12  ;;  %v11111_v31 = vmul.f32 %v22389_v9, %v11063_v23  ;;  %v11064_v0 = vadd.f32 %v14779_v47, %v20054_v57  ;;  %v10866_v60 = vpop.f32.mrb[19].mxu1  ;;  %v11244_v35 = vpack.c.bf16 %v20130_v12, %v20138_v4  ;;  %v15904_v23 = vld [vmem:[#allocation2 + $0x88] sm:$0xff] }
 0x843   : > { %22387 = vst [vmem:[#allocation74_spill] sm:$0xff] %v20135_v51  ;;  %v11243_v46 = vpack.c.bf16 %v20135_v51, %v20133_v15  ;;  %v11109_v44 = vmul.f32 %v22390_v59, %v11061_v3  ;;  %v11062_v32 = vadd.f32 %v20054_v57, %v10866_v60  ;;  %v15905_v3 = vld [vmem:[#allocation2 + $0x90] sm:$0xff]  ;;  %v22420_v12 = vld [vmem:[#allocation42_spill] sm:$0xff] }
 0x844   : > { %v11112_v1 = vmul.f32 %v22391_v18, %v11064_v0  ;;  %v11159_v48 = vmul.f32 0.1, %v11111_v31 }
 0x845   : > { %v11157_v25 = vmul.f32 0.1, %v11109_v44  ;;  %v11110_v52 = vmul.f32 %v22392_v20, %v11062_v32  ;;  %14824 = vmatprep.mubr.msk.bf16.mxu0 %vm22393_vm10, %v11243_v46  ;;  %v22400_v44 = vld [vmem:[#allocation34_spill] sm:$0xff]  ;;  %vm22468_vm10 = vmmov %vm22347_vm0 }
 0x846   : > { %v11160_v14 = vmul.f32 0.1, %v11112_v1  ;;  %14825 = vmatmul.mubr.msk.bf16.gmra.mrb[60].mxu0 %vm22394_vm13, %v11244_v35  ;;  %v20160_v47 = vadd.f32 %v15905_v3, %v11159_v48  ;;  %v22402_v48 = vld [vmem:[#allocation36_spill] sm:$0xff]  ;;  %v15907_v3 = vld [vmem:[#allocation2 + $0xa0] sm:$0xff]  ;;  %vm22469_vm13 = vmmov %vm22347_vm0 }
 0x847   : > { %v11158_v16 = vmul.f32 0.1, %v11110_v52  ;;  %v14782_v34 = vpop.f32.mrb[20].mxu1  ;;  %v20155_v30 = vadd.f32 %v15903_v63, %v11157_v25  ;;  %v22401_v25 = vld [vmem:[#allocation35_spill] sm:$0xff]  ;;  %v15906_v63 = vld [vmem:[#allocation2 + $0xb8] sm:$0xff] }
 0x848   : > { %v20152_v40 = vadd.f32 %v15902_v24, %v11160_v14  ;;  %v11067_v54 = vadd.f32 %v14782_v34, %v20054_v57  ;;  %v10879_v21 = vpop.f32.mrb[21].mxu1  ;;  %22398 = vst [vmem:[#allocation79_spill] sm:$0xff] %v20160_v47 }
 0x849   : > { %22396 = vst [vmem:[#allocation76_spill] sm:$0xff] %v20155_v30  ;;  %v20157_v26 = vadd.f32 %v15904_v23, %v11158_v16  ;;  %v11065_v28 = vadd.f32 %v20054_v57, %v10879_v21  ;;  %v14783_v13 = vpop.f32.mrb[22].mxu1 }
 0x84a   : > { %22395 = vst [vmem:[#allocation75_spill] sm:$0xff] %v20152_v40  ;;  %v11115_v31 = vmul.f32 %v22399_v10, %v11067_v54  ;;  %v11068_v0 = vadd.f32 %v14783_v13, %v20054_v57  ;;  %v10882_v60 = vpop.f32.mrb[23].mxu1  ;;  %v11246_v1 = vpack.c.bf16 %v20152_v40, %v20160_v47  ;;  %v22410_v40 = vld [vmem:[#allocation38_spill] sm:$0xff] }
 0x84b   : > { %22397 = vst [vmem:[#allocation78_spill] sm:$0xff] %v20157_v26  ;;  %v11245_v46 = vpack.c.bf16 %v20157_v26, %v20155_v30  ;;  %v11113_v32 = vmul.f32 %v22400_v44, %v11065_v28  ;;  %v11066_v35 = vadd.f32 %v20054_v57, %v10882_v60 }
 0x84c   : > { %v11116_v52 = vmul.f32 %v22401_v25, %v11068_v0  ;;  %v11163_v34 = vmul.f32 0.1, %v11115_v31  ;;  %v15908_v0 = vld [vmem:[#allocation2 + $0xa8] sm:$0xff] }
 0x84d   : > { %v11161_v14 = vmul.f32 0.1, %v11113_v32  ;;  %v11114_v16 = vmul.f32 %v22402_v48, %v11066_v35  ;;  %14828 = vmatprep.mubr.msk.bf16.mxu0 %vm22403_vm3, %v11245_v46  ;;  %v15909_v35 = vld [vmem:[#allocation2 + $0xb0] sm:$0xff]  ;;  %vm22471_vm3 = vmmov %vm22347_vm0 }
 0x84e   : > { %v11164_v24 = vmul.f32 0.1, %v11116_v52  ;;  %14829 = vmatmul.mubr.msk.bf16.gmra.mrb[64].mxu0 %vm22404_vm15, %v11246_v1  ;;  %v20182_v52 = vadd.f32 %v15909_v35, %v11163_v34  ;;  %v22409_v1 = vld [vmem:[#allocation37_spill] sm:$0xff]  ;;  %v22412_v34 = vld [vmem:[#allocation40_spill] sm:$0xff]  ;;  %vm22472_vm15 = vmmov %vm22347_vm0 }
 0x84f   : > { %v11162_v54 = vmul.f32 0.1, %v11114_v16  ;;  %v14786_v21 = vpop.f32.mrb[24].mxu1  ;;  %v20177_v60 = vadd.f32 %v15907_v3, %v11161_v14 }
 0x850   : > { %v20174_v23 = vadd.f32 %v15906_v63, %v11164_v24  ;;  %v11071_v28 = vadd.f32 %v14786_v21, %v20054_v57  ;;  %v10895_v13 = vpop.f32.mrb[25].mxu1  ;;  %22408 = vst [vmem:[#allocation91_spill] sm:$0xff] %v20182_v52 }
 0x851   : > { %22406 = vst [vmem:[#allocation83_spill] sm:$0xff] %v20177_v60  ;;  %v20179_v32 = vadd.f32 %v15908_v0, %v11162_v54  ;;  %v11069_v46 = vadd.f32 %v20054_v57, %v10895_v13  ;;  %v14787_v31 = vpop.f32.mrb[26].mxu1  ;;  %v22411_v13 = vld [vmem:[#allocation39_spill] sm:$0xff] }
 0x852   : > { %22405 = vst [vmem:[#allocation77_spill] sm:$0xff] %v20174_v23  ;;  %v11119_v16 = vmul.f32 %v22409_v1, %v11071_v28  ;;  %v11072_v24 = vadd.f32 %v14787_v31, %v20054_v57  ;;  %v10898_v63 = vpop.f32.mrb[27].mxu1  ;;  %v11248_v54 = vpack.c.bf16 %v20174_v23, %v20182_v52  ;;  %v15911_v23 = vld [vmem:[#allocation2 + $0xc0] sm:$0xff] }
 0x853   : > { %22407 = vst [vmem:[#allocation90_spill] sm:$0xff] %v20179_v32  ;;  %v11247_v21 = vpack.c.bf16 %v20179_v32, %v20177_v60  ;;  %v11117_v14 = vmul.f32 %v22410_v40, %v11069_v46  ;;  %v11070_v3 = vadd.f32 %v20054_v57, %v10898_v63  ;;  %v15910_v60 = vld [vmem:[#allocation2 + $0xd8] sm:$0xff] }
 0x854   : > { %v11120_v0 = vmul.f32 %v22411_v13, %v11072_v24  ;;  %v11167_v28 = vmul.f32 0.1, %v11119_v16  ;;  %v15912_v24 = vld [vmem:[#allocation2 + $0xc8] sm:$0xff] }
 0x855   : > { %v11165_v47 = vmul.f32 0.1, %v11117_v14  ;;  %v11118_v35 = vmul.f32 %v22412_v34, %v11070_v3  ;;  %14832 = vmatprep.mubr.msk.bf16.mxu0 %vm22413_vm12, %v11247_v21  ;;  %v15913_v3 = vld [vmem:[#allocation2 + $0xd0] sm:$0xff]  ;;  %vm22473_vm12 = vmmov %vm22347_vm0 }
 0x856   : > { %v11168_v31 = vmul.f32 0.1, %v11120_v0  ;;  %14833 = vmatmul.mubr.msk.bf16.gmra.mrb[68].mxu0 %vm22414_vm1, %v11248_v54  ;;  %v20204_v0 = vadd.f32 %v15913_v3, %v11167_v28  ;;  %v22419_v54 = vld [vmem:[#allocation41_spill] sm:$0xff]  ;;  %v22422_v28 = vld [vmem:[#allocation44_spill] sm:$0xff]  ;;  %vm22474_vm1 = vmmov %vm22347_vm0 }
 0x857   : > { %v11166_v26 = vmul.f32 0.1, %v11118_v35  ;;  %v14790_v32 = vpop.f32.mrb[28].mxu1  ;;  %v20199_v52 = vadd.f32 %v15911_v23, %v11165_v47 }
 0x858   : > { %v20196_v46 = vadd.f32 %v15910_v60, %v11168_v31  ;;  %v11075_v63 = vadd.f32 %v14790_v32, %v20054_v57  ;;  %v10911_v30 = vpop.f32.mrb[29].mxu1  ;;  %22418 = vst [vmem:[#allocation95_spill] sm:$0xff] %v20204_v0 }
 0x859   : > { %22416 = vst [vmem:[#allocation93_spill] sm:$0xff] %v20199_v52  ;;  %v20201_v14 = vadd.f32 %v15912_v24, %v11166_v26  ;;  %v11073_v21 = vadd.f32 %v20054_v57, %v10911_v30  ;;  %v14791_v16 = vpop.f32.mrb[30].mxu1  ;;  %v22421_v30 = vld [vmem:[#allocation43_spill] sm:$0xff] }
 0x85a   : > { %22415 = vst [vmem:[#allocation92_spill] sm:$0xff] %v20196_v46  ;;  %v11123_v35 = vmul.f32 %v22419_v54, %v11075_v63  ;;  %v11076_v60 = vadd.f32 %v14791_v16, %v20054_v57  ;;  %v10914_v31 = vpop.f32.mrb[31].mxu1  ;;  %v11250_v26 = vpack.c.bf16 %v20196_v46, %v20204_v0  ;;  %v15915_v46 = vld [vmem:[#allocation2 + $0xe0] sm:$0xff] }
 0x85b   : > { %22417 = vst [vmem:[#allocation94_spill] sm:$0xff] %v20201_v14  ;;  %v11249_v32 = vpack.c.bf16 %v20201_v14, %v20199_v52  ;;  %v11121_v47 = vmul.f32 %v22420_v12, %v11073_v21  ;;  %v11074_v23 = vadd.f32 %v20054_v57, %v10914_v31  ;;  %v15914_v52 = vld [vmem:[#allocation2 + $0xf8] sm:$0xff] }
 0x85c   : > { %v11124_v24 = vmul.f32 %v22421_v30, %v11076_v60  ;;  %v11171_v63 = vmul.f32 0.1, %v11123_v35  ;;  %v15916_v60 = vld [vmem:[#allocation2 + $0xe8] sm:$0xff] }
 0x85d   : > { %v11169_v4 = vmul.f32 0.1, %v11121_v47  ;;  %v11122_v3 = vmul.f32 %v22422_v28, %v11074_v23  ;;  %14836 = vmatprep.mubr.msk.bf16.mxu0 %vm22423_vm7, %v11249_v32  ;;  %v15917_v23 = vld [vmem:[#allocation2 + $0xf0] sm:$0xff]  ;;  %vm22475_vm7 = vmmov %vm22347_vm0 }
 0x85e   : > { %v11172_v16 = vmul.f32 0.1, %v11124_v24  ;;  %14837 = vmatmul.mubr.msk.bf16.gmra.mrb[72].mxu0 %vm22347_vm0, %v11250_v26  ;;  %v20226_v24 = vadd.f32 %v15917_v23, %v11171_v63  ;;  %v22428_v26 = vld [vmem:[#allocation45_spill] sm:$0xff]  ;;  %v22431_v63 = vld [vmem:[#allocation48_spill] sm:$0xff] }
 0x85f   : > { %v11170_v51 = vmul.f32 0.1, %v11122_v3  ;;  %v14794_v14 = vpop.f32.mrb[32].mxu1  ;;  %v20221_v0 = vadd.f32 %v15915_v46, %v11169_v4 }
 0x860   : > { %v20218_v21 = vadd.f32 %v15914_v52, %v11172_v16  ;;  %v11079_v31 = vadd.f32 %v14794_v14, %v20054_v57  ;;  %v10927_v15 = vpop.f32.mrb[33].mxu1  ;;  %22427 = vst [vmem:[#allocation81_spill] sm:$0xff] %v20226_v24 }
 0x861   : > { %22425 = vst [vmem:[#allocation66_spill] sm:$0xff] %v20221_v0  ;;  %v20223_v47 = vadd.f32 %v15916_v60, %v11170_v51  ;;  %v11077_v32 = vadd.f32 %v20054_v57, %v10927_v15  ;;  %v14795_v35 = vpop.f32.mrb[34].mxu1  ;;  %v22430_v15 = vld [vmem:[#allocation47_spill] sm:$0xff] }
 0x862   : > { %22424 = vst [vmem:[#allocation98_spill] sm:$0xff] %v20218_v21  ;;  %v11127_v3 = vmul.f32 %v22428_v26, %v11079_v31  ;;  %v11080_v52 = vadd.f32 %v14795_v35, %v20054_v57  ;;  %v10930_v16 = vpop.f32.mrb[35].mxu1  ;;  %v11252_v51 = vpack.c.bf16 %v20218_v21, %v20226_v24  ;;  %v15919_v21 = vld [vmem:[#allocation2 + $0x100] sm:$0xff] }
 0x863   : > { %22426 = vst [vmem:[#allocation80_spill] sm:$0xff] %v20223_v47  ;;  %v11251_v14 = vpack.c.bf16 %v20223_v47, %v20221_v0  ;;  %v11125_v4 = vmul.f32 %v22429_v29, %v11077_v32  ;;  %v11078_v46 = vadd.f32 %v20054_v57, %v10930_v16  ;;  %v15918_v0 = vld [vmem:[#allocation2 + $0x118] sm:$0xff] }
 0x864   : > { %v11128_v60 = vmul.f32 %v22430_v15, %v11080_v52  ;;  %v11175_v31 = vmul.f32 0.1, %v11127_v3  ;;  %v15920_v52 = vld [vmem:[#allocation2 + $0x108] sm:$0xff] }
 0x865   : > { %v11173_v41 = vmul.f32 0.1, %v11125_v4  ;;  %v11126_v23 = vmul.f32 %v22431_v63, %v11078_v46  ;;  %14840 = vmatprep.mubr.msk.bf16.mxu0 %vm22432_vm2, %v11251_v14  ;;  %v15921_v46 = vld [vmem:[#allocation2 + $0x110] sm:$0xff]  ;;  %vm22476_vm2 = vmmov %vm22347_vm0 }
 0x866   : > { %v11176_v35 = vmul.f32 0.1, %v11128_v60  ;;  %14841 = vmatmul.mubr.msk.bf16.gmra.mrb[76].mxu0 %vm22433_vm4, %v11252_v51  ;;  %v20248_v60 = vadd.f32 %v15921_v46, %v11175_v31  ;;  %v22438_v51 = vld [vmem:[#allocation49_spill] sm:$0xff]  ;;  %v22441_v31 = vld [vmem:[#allocation52_spill] sm:$0xff]  ;;  %vm22477_vm4 = vmmov %vm22347_vm0 }
 0x867   : > { %v11174_v36 = vmul.f32 0.1, %v11126_v23  ;;  %v14798_v47 = vpop.f32.mrb[36].mxu1  ;;  %v20243_v24 = vadd.f32 %v15919_v21, %v11173_v41 }
 0x868   : > { %v20240_v32 = vadd.f32 %v15918_v0, %v11176_v35  ;;  %v11083_v16 = vadd.f32 %v14798_v47, %v20054_v57  ;;  %v10943_v22 = vpop.f32.mrb[37].mxu1  ;;  %22437 = vst [vmem:[#allocation100_spill] sm:$0xff] %v20248_v60 }
 0x869   : > { %22435 = vst [vmem:[#allocation82_spill] sm:$0xff] %v20243_v24  ;;  %v20245_v4 = vadd.f32 %v15920_v52, %v11174_v36  ;;  %v11081_v14 = vadd.f32 %v20054_v57, %v10943_v22  ;;  %v14799_v3 = vpop.f32.mrb[38].mxu1  ;;  %v22440_v22 = vld [vmem:[#allocation51_spill] sm:$0xff] }
 0x86a   : > { %22434 = vst [vmem:[#allocation99_spill] sm:$0xff] %v20240_v32  ;;  %v11131_v23 = vmul.f32 %v22438_v51, %v11083_v16  ;;  %v11084_v0 = vadd.f32 %v14799_v3, %v20054_v57  ;;  %v10946_v35 = vpop.f32.mrb[39].mxu1  ;;  %v11254_v36 = vpack.c.bf16 %v20240_v32, %v20248_v60  ;;  %v15923_v32 = vld [vmem:[#allocation2 + $0x120] sm:$0xff] }
 0x86b   : > { %22436 = vst [vmem:[#allocation69_spill] sm:$0xff] %v20245_v4  ;;  %v11253_v47 = vpack.c.bf16 %v20245_v4, %v20243_v24  ;;  %v11129_v41 = vmul.f32 %v22439_v56, %v11081_v14  ;;  %v11082_v21 = vadd.f32 %v20054_v57, %v10946_v35  ;;  %v15922_v24 = vld [vmem:[#allocation2 + $0x138] sm:$0xff] }
 0x86c   : > { %v11132_v52 = vmul.f32 %v22440_v22, %v11084_v0  ;;  %v11179_v16 = vmul.f32 0.1, %v11131_v23  ;;  %v15924_v0 = vld [vmem:[#allocation2 + $0x128] sm:$0xff] }
 0x86d   : > { %v11177_v17 = vmul.f32 0.1, %v11129_v41  ;;  %v11130_v46 = vmul.f32 %v22441_v31, %v11082_v21  ;;  %14844 = vmatprep.mubr.msk.bf16.mxu0 %vm22442_vm5, %v11253_v47  ;;  %v15925_v21 = vld [vmem:[#allocation2 + $0x130] sm:$0xff]  ;;  %vm22478_vm5 = vmmov %vm22347_vm0 }
 0x86e   : > { %v11180_v3 = vmul.f32 0.1, %v11132_v52  ;;  %14845 = vmatmul.mubr.msk.bf16.gmra.mrb[80].mxu0 %vm22443_vm14, %v11254_v36  ;;  %v20270_v52 = vadd.f32 %v15925_v21, %v11179_v16  ;;  %v22448_v36 = vld [vmem:[#allocation53_spill] sm:$0xff]  ;;  %v22451_v16 = vld [vmem:[#allocation56_spill] sm:$0xff]  ;;  %vm22479_vm14 = vmmov %vm22347_vm0 }
 0x86f   : > { %v11178_v37 = vmul.f32 0.1, %v11130_v46  ;;  %v14802_v4 = vpop.f32.mrb[40].mxu1  ;;  %v20265_v60 = vadd.f32 %v15923_v32, %v11177_v17 }
 0x870   : > { %v20262_v14 = vadd.f32 %v15922_v24, %v11180_v3  ;;  %v11087_v35 = vadd.f32 %v14802_v4, %v20054_v57  ;;  %v10959_v38 = vpop.f32.mrb[41].mxu1  ;;  %22447 = vst [vmem:[#allocation88_spill] sm:$0xff] %v20270_v52 }
 0x871   : > { %22445 = vst [vmem:[#allocation85_spill] sm:$0xff] %v20265_v60  ;;  %v20267_v41 = vadd.f32 %v15924_v0, %v11178_v37  ;;  %v11085_v47 = vadd.f32 %v20054_v57, %v10959_v38  ;;  %v14803_v23 = vpop.f32.mrb[42].mxu1  ;;  %v22450_v38 = vld [vmem:[#allocation55_spill] sm:$0xff] }
 0x872   : > { %22444 = vst [vmem:[#allocation84_spill] sm:$0xff] %v20262_v14  ;;  %v11135_v46 = vmul.f32 %v22448_v36, %v11087_v35  ;;  %v11088_v24 = vadd.f32 %v14803_v23, %v20054_v57  ;;  %v10962_v3 = vpop.f32.mrb[43].mxu1  ;;  %v11256_v37 = vpack.c.bf16 %v20262_v14, %v20270_v52  ;;  %v15927_v14 = vld [vmem:[#allocation2 + $0x140] sm:$0xff] }
 0x873   : > { %22446 = vst [vmem:[#allocation87_spill] sm:$0xff] %v20267_v41  ;;  %v11255_v4 = vpack.c.bf16 %v20267_v41, %v20265_v60  ;;  %v11133_v17 = vmul.f32 %v22449_v7, %v11085_v47  ;;  %v11086_v32 = vadd.f32 %v20054_v57, %v10962_v3  ;;  %v15926_v60 = vld [vmem:[#allocation2 + $0x158] sm:$0xff] }
 0x874   : > { %v11136_v0 = vmul.f32 %v22450_v38, %v11088_v24  ;;  %v11183_v35 = vmul.f32 0.1, %v11135_v46  ;;  %v15928_v24 = vld [vmem:[#allocation2 + $0x148] sm:$0xff] }
 0x875   : > { %v11181_v39 = vmul.f32 0.1, %v11133_v17  ;;  %v11134_v21 = vmul.f32 %v22451_v16, %v11086_v32  ;;  %14848 = vmatprep.mubr.msk.bf16.mxu0 %vm22452_vm8, %v11255_v4  ;;  %v15929_v32 = vld [vmem:[#allocation2 + $0x150] sm:$0xff]  ;;  %v22459_v38 = vld [vmem:[#allocation58_spill] sm:$0xff]  ;;  %vm22480_vm8 = vmmov %vm22347_vm0 }
 0x876   : > { %v11184_v23 = vmul.f32 0.1, %v11136_v0  ;;  %14849 = vmatmul.mubr.msk.bf16.gmra.mrb[84].mxu0 %vm22453_vm11, %v11256_v37  ;;  %v20292_v0 = vadd.f32 %v15929_v32, %v11183_v35  ;;  %v22458_v37 = vld [vmem:[#allocation57_spill] sm:$0xff]  ;;  %v22461_v35 = vld [vmem:[#allocation60_spill] sm:$0xff]  ;;  %vm22481_vm11 = vmmov %vm22347_vm0 }
 0x877   : > { %v11182_v27 = vmul.f32 0.1, %v11134_v21  ;;  %v14806_v41 = vpop.f32.mrb[44].mxu1  ;;  %v20287_v52 = vadd.f32 %v15927_v14, %v11181_v39 }
 0x878   : > { %v20284_v47 = vadd.f32 %v15926_v60, %v11184_v23  ;;  %v11091_v3 = vadd.f32 %v14806_v41, %v20054_v57  ;;  %v10975_v6 = vpop.f32.mrb[45].mxu1  ;;  %22457 = vst [vmem:[#allocation14_spill] sm:$0xff] %v20292_v0 }
 0x879   : > { %22455 = vst [vmem:[#allocation89_spill] sm:$0xff] %v20287_v52  ;;  %v20289_v17 = vadd.f32 %v15928_v24, %v11182_v27  ;;  %v11089_v4 = vadd.f32 %v20054_v57, %v10975_v6  ;;  %v14807_v46 = vpop.f32.mrb[46].mxu1  ;;  %v22460_v6 = vld [vmem:[#allocation59_spill] sm:$0xff] }
 0x87a   : > { %22454 = vst [vmem:[#allocation86_spill] sm:$0xff] %v20284_v47  ;;  %v11139_v21 = vmul.f32 %v22458_v37, %v11091_v3  ;;  %v11092_v60 = vadd.f32 %v14807_v46, %v20054_v57  ;;  %v10978_v23 = vpop.f32.mrb[47].mxu1  ;;  %v11258_v27 = vpack.c.bf16 %v20284_v47, %v20292_v0  ;;  %v15932_v47 = vld [vmem:[#allocation2 + $0x168] sm:$0xff] }
 0x87b   : > { %22456 = vst [vmem:[#allocation13_spill] sm:$0xff] %v20289_v17  ;;  %v11257_v41 = vpack.c.bf16 %v20289_v17, %v20287_v52  ;;  %v11137_v39 = vmul.f32 %v22459_v38, %v11089_v4  ;;  %v11090_v14 = vadd.f32 %v20054_v57, %v10978_v23  ;;  %v15930_v52 = vld [vmem:[#allocation2 + $0x178] sm:$0xff]  ;;  %v15931_v57 = vld [vmem:[#allocation2 + $0x160] sm:$0xff] }
 0x87c   : > { %v11140_v24 = vmul.f32 %v22460_v6, %v11092_v60  ;;  %v11187_v3 = vmul.f32 0.1, %v11139_v21  ;;  %v15933_v60 = vld [vmem:[#allocation2 + $0x170] sm:$0xff] }
 0x87d   : > { %v11185_v16 = vmul.f32 0.1, %v11137_v39  ;;  %v11138_v32 = vmul.f32 %v22461_v35, %v11090_v14  ;;  %14852 = vmatprep.mubr.msk.bf16.mxu0 %vm22462_vm9, %v11257_v41  ;;  %vm22482_vm9 = vmmov %vm22347_vm0 }
 0x87e   : > { %v11188_v46 = vmul.f32 0.1, %v11140_v24  ;;  %14853 = vmatmul.mubr.msk.bf16.gmra.mrb[88].mxu0 %vm22463_vm6, %v11258_v27  ;;  %v20312_v39 = vadd.f32 %v15933_v60, %v11187_v3  ;;  %vm22483_vm6 = vmmov %vm22347_vm0 }
 0x87f   : > { %v11186_v17 = vmul.f32 0.1, %v11138_v32  ;;  %v20308_v23 = vadd.f32 %v15931_v57, %v11185_v16 }
 0x880   : > { %v20306_v4 = vadd.f32 %v15930_v52, %v11188_v46  ;;  %22467 = vst [vmem:[#allocation20_spill] sm:$0xff] %v20312_v39  ;;  %v20325_v52 = vld [vmem:[%s22470_s27] ss:$0 sm:$0xff] }
 0x881   : > { %22465 = vst [vmem:[#allocation16_spill] sm:$0xff] %v20308_v23  ;;  %v20310_v0 = vadd.f32 %v15932_v47, %v11186_v17 }
 0x882   : > { %22464 = vst [vmem:[#allocation15_spill] sm:$0xff] %v20306_v4  ;;  %v11260_v41 = vpack.c.bf16 %v20306_v4, %v20312_v39 }
 0x883   : > { %22466 = vst [vmem:[#allocation17_spill] sm:$0xff] %v20310_v0  ;;  %v11259_v21 = vpack.c.bf16 %v20310_v0, %v20308_v23 }
 0x885   : > { %14856 = vmatprep.mubr.msk.bf16.mxu0 %vm22468_vm10, %v11259_v21  ;;  %vm22484_vm10 = vmmov %vm22347_vm0 }
 0x886   : > { %14857 = vmatmul.mubr.msk.bf16.gmra.mrb[92].mxu0 %vm22469_vm13, %v11260_v41  ;;  %vm22485_vm13 = vmmov %vm22347_vm0 }
 0x901   : > { %v14814_v16 = vpop.f32.mrb[48].mxu0 }
 0x902   : > { %v11399_v47 = vadd.f32 %v14814_v16, %v20325_v52  ;;  %v11390_v17 = vpop.f32.mrb[49].mxu0 }
 0x903   : > { %v11391_v14 = vadd.f32 %v20325_v52, %v11390_v17  ;;  %v14815_v27 = vpop.f32.mrb[50].mxu0 }
 0x904   : > { %v11402_v24 = vadd.f32 %v14815_v27, %v20325_v52  ;;  %v11393_v32 = vpop.f32.mrb[51].mxu0  ;;  %v11583_v46 = vmax.f32 %v11399_v47, 0.0 }
 0x905   : > { %v11394_v3 = vadd.f32 %v20325_v52, %v11393_v32  ;;  %v11581_v60 = vmax.f32 %v11391_v14, 0.0 }
 0x906   : > { %v11584_v57 = vmax.f32 %v11402_v24, 0.0 }
 0x907   : > { %v11582_v21 = vmax.f32 %v11394_v3, 0.0 }
 0x908   : > { %v11630_v41 = vpack.c.bf16 %v11584_v57, %v11583_v46 }
 0x909   : > { %v11629_v4 = vpack.c.bf16 %v11582_v21, %v11581_v60  ;;  %v14818_v39 = vpop.f32.mrb[52].mxu0 }
 0x90a   : > { %v11415_v0 = vadd.f32 %v14818_v39, %v20325_v52  ;;  %v11406_v23 = vpop.f32.mrb[53].mxu0 }
 0x90b   : > { %v11407_v16 = vadd.f32 %v20325_v52, %v11406_v23  ;;  %v14819_v6 = vpop.f32.mrb[54].mxu0  ;;  %14864 = vmatprep.mubr.msk.bf16.mxu1 %vm22471_vm3, %v11629_v4  ;;  %vm22486_vm3 = vmmov %vm22347_vm0 }
 0x90c   : > { %v11418_v17 = vadd.f32 %v14819_v6, %v20325_v52  ;;  %v11409_v27 = vpop.f32.mrb[55].mxu0  ;;  %14865 = vmatmul.mubr.msk.bf16.vlgmr.msra.gmra.mrb[48].mxu1 %vm22472_vm15, %v11630_v41  ;;  %v11587_v14 = vmax.f32 %v11415_v0, 0.0  ;;  %vm22487_vm15 = vmmov %vm22347_vm0 }
 0x90d   : > { %v11410_v47 = vadd.f32 %v20325_v52, %v11409_v27  ;;  %v11585_v32 = vmax.f32 %v11407_v16, 0.0 }
 0x90e   : > { %v11588_v24 = vmax.f32 %v11418_v17, 0.0 }
 0x90f   : > { %v11586_v3 = vmax.f32 %v11410_v47, 0.0 }
 0x910   : > { %v11632_v46 = vpack.c.bf16 %v11588_v24, %v11587_v14 }
 0x911   : > { %v11631_v57 = vpack.c.bf16 %v11586_v3, %v11585_v32  ;;  %v14822_v39 = vpop.f32.mrb[56].mxu0 }
 0x912   : > { %v11431_v60 = vadd.f32 %v14822_v39, %v20325_v52  ;;  %v11422_v23 = vpop.f32.mrb[57].mxu0 }
 0x913   : > { %v11423_v21 = vadd.f32 %v20325_v52, %v11422_v23  ;;  %v14823_v4 = vpop.f32.mrb[58].mxu0  ;;  %14868 = vmatprep.mubr.msk.bf16.mxu1 %vm22473_vm12, %v11631_v57  ;;  %vm22488_vm12 = vmmov %vm22347_vm0 }
 0x914   : > { %v11434_v6 = vadd.f32 %v14823_v4, %v20325_v52  ;;  %v11425_v41 = vpop.f32.mrb[59].mxu0  ;;  %14869 = vmatmul.mubr.msk.bf16.gmra.mrb[52].mxu1 %vm22474_vm1, %v11632_v46  ;;  %v11591_v16 = vmax.f32 %v11431_v60, 0.0  ;;  %vm22489_vm1 = vmmov %vm22347_vm0 }
 0x915   : > { %v11426_v0 = vadd.f32 %v20325_v52, %v11425_v41  ;;  %v11589_v27 = vmax.f32 %v11423_v21, 0.0 }
 0x916   : > { %v11592_v17 = vmax.f32 %v11434_v6, 0.0 }
 0x917   : > { %v11590_v47 = vmax.f32 %v11426_v0, 0.0 }
 0x918   : > { %v11634_v14 = vpack.c.bf16 %v11592_v17, %v11591_v16 }
 0x919   : > { %v11633_v24 = vpack.c.bf16 %v11590_v47, %v11589_v27  ;;  %v14826_v32 = vpop.f32.mrb[60].mxu0 }
 0x91a   : > { %v11447_v3 = vadd.f32 %v14826_v32, %v20325_v52  ;;  %v11438_v39 = vpop.f32.mrb[61].mxu0 }
 0x91b   : > { %v11439_v23 = vadd.f32 %v20325_v52, %v11438_v39  ;;  %v14827_v57 = vpop.f32.mrb[62].mxu0  ;;  %14872 = vmatprep.mubr.msk.bf16.mxu1 %vm22475_vm7, %v11633_v24  ;;  %vm22490_vm7 = vmmov %vm22347_vm0 }
 0x91c   : > { %v11450_v4 = vadd.f32 %v14827_v57, %v20325_v52  ;;  %v11441_v46 = vpop.f32.mrb[63].mxu0  ;;  %14873 = vmatmul.mubr.msk.bf16.gmra.mrb[56].mxu1 %vm22347_vm0, %v11634_v14  ;;  %v11595_v21 = vmax.f32 %v11447_v3, 0.0 }
 0x91d   : > { %v11442_v60 = vadd.f32 %v20325_v52, %v11441_v46  ;;  %v11593_v41 = vmax.f32 %v11439_v23, 0.0 }
 0x91e   : > { %v11596_v6 = vmax.f32 %v11450_v4, 0.0 }
 0x91f   : > { %v11594_v0 = vmax.f32 %v11442_v60, 0.0 }
 0x920   : > { %v11636_v16 = vpack.c.bf16 %v11596_v6, %v11595_v21 }
 0x921   : > { %v11635_v17 = vpack.c.bf16 %v11594_v0, %v11593_v41  ;;  %v14830_v27 = vpop.f32.mrb[64].mxu0 }
 0x922   : > { %v11463_v47 = vadd.f32 %v14830_v27, %v20325_v52  ;;  %v11454_v32 = vpop.f32.mrb[65].mxu0 }
 0x923   : > { %v11455_v39 = vadd.f32 %v20325_v52, %v11454_v32  ;;  %v14831_v24 = vpop.f32.mrb[66].mxu0  ;;  %14876 = vmatprep.mubr.msk.bf16.mxu1 %vm22476_vm2, %v11635_v17  ;;  %vm22491_vm2 = vmmov %vm22347_vm0 }
 0x924   : > { %v11466_v57 = vadd.f32 %v14831_v24, %v20325_v52  ;;  %v11457_v14 = vpop.f32.mrb[67].mxu0  ;;  %14877 = vmatmul.mubr.msk.bf16.gmra.mrb[60].mxu1 %vm22477_vm4, %v11636_v16  ;;  %v11599_v23 = vmax.f32 %v11463_v47, 0.0  ;;  %vm22492_vm4 = vmmov %vm22347_vm0 }
 0x925   : > { %v11458_v3 = vadd.f32 %v20325_v52, %v11457_v14  ;;  %v11597_v46 = vmax.f32 %v11455_v39, 0.0 }
 0x926   : > { %v11600_v4 = vmax.f32 %v11466_v57, 0.0 }
 0x927   : > { %v11598_v60 = vmax.f32 %v11458_v3, 0.0 }
 0x928   : > { %v11638_v21 = vpack.c.bf16 %v11600_v4, %v11599_v23 }
 0x929   : > { %v11637_v6 = vpack.c.bf16 %v11598_v60, %v11597_v46  ;;  %v14834_v41 = vpop.f32.mrb[68].mxu0 }
 0x92a   : > { %v11479_v0 = vadd.f32 %v14834_v41, %v20325_v52  ;;  %v11470_v27 = vpop.f32.mrb[69].mxu0 }
 0x92b   : > { %v11471_v32 = vadd.f32 %v20325_v52, %v11470_v27  ;;  %v14835_v17 = vpop.f32.mrb[70].mxu0  ;;  %14880 = vmatprep.mubr.msk.bf16.mxu1 %vm22478_vm5, %v11637_v6  ;;  %vm22494_vm5 = vmmov %vm22347_vm0 }
 0x92c   : > { %v11482_v24 = vadd.f32 %v14835_v17, %v20325_v52  ;;  %v11473_v16 = vpop.f32.mrb[71].mxu0  ;;  %14881 = vmatmul.mubr.msk.bf16.gmra.mrb[64].mxu1 %vm22479_vm14, %v11638_v21  ;;  %v11603_v39 = vmax.f32 %v11479_v0, 0.0  ;;  %vm22495_vm14 = vmmov %vm22347_vm0 }
 0x92d   : > { %v11474_v47 = vadd.f32 %v20325_v52, %v11473_v16  ;;  %v11601_v14 = vmax.f32 %v11471_v32, 0.0 }
 0x92e   : > { %v11604_v57 = vmax.f32 %v11482_v24, 0.0 }
 0x92f   : > { %v11602_v3 = vmax.f32 %v11474_v47, 0.0 }
 0x930   : > { %v11640_v23 = vpack.c.bf16 %v11604_v57, %v11603_v39 }
 0x931   : > { %v11639_v4 = vpack.c.bf16 %v11602_v3, %v11601_v14  ;;  %v14838_v46 = vpop.f32.mrb[72].mxu0 }
 0x932   : > { %v11495_v60 = vadd.f32 %v14838_v46, %v20325_v52  ;;  %v11486_v41 = vpop.f32.mrb[73].mxu0 }
 0x933   : > { %v11487_v27 = vadd.f32 %v20325_v52, %v11486_v41  ;;  %v14839_v6 = vpop.f32.mrb[74].mxu0  ;;  %14884 = vmatprep.mubr.msk.bf16.mxu1 %vm22480_vm8, %v11639_v4  ;;  %vm22496_vm8 = vmmov %vm22347_vm0 }
 0x934   : > { %v11498_v17 = vadd.f32 %v14839_v6, %v20325_v52  ;;  %v11489_v21 = vpop.f32.mrb[75].mxu0  ;;  %14885 = vmatmul.mubr.msk.bf16.gmra.mrb[68].mxu1 %vm22481_vm11, %v11640_v23  ;;  %v11607_v32 = vmax.f32 %v11495_v60, 0.0  ;;  %vm22497_vm11 = vmmov %vm22347_vm0 }
 0x935   : > { %v11490_v0 = vadd.f32 %v20325_v52, %v11489_v21  ;;  %v11605_v16 = vmax.f32 %v11487_v27, 0.0 }
 0x936   : > { %v11608_v24 = vmax.f32 %v11498_v17, 0.0 }
 0x937   : > { %v11606_v47 = vmax.f32 %v11490_v0, 0.0 }
 0x938   : > { %v11642_v39 = vpack.c.bf16 %v11608_v24, %v11607_v32 }
 0x939   : > { %v11641_v57 = vpack.c.bf16 %v11606_v47, %v11605_v16  ;;  %v14842_v14 = vpop.f32.mrb[76].mxu0 }
 0x93a   : > { %v11511_v3 = vadd.f32 %v14842_v14, %v20325_v52  ;;  %v11502_v46 = vpop.f32.mrb[77].mxu0 }
 0x93b   : > { %v11503_v41 = vadd.f32 %v20325_v52, %v11502_v46  ;;  %v14843_v4 = vpop.f32.mrb[78].mxu0  ;;  %14888 = vmatprep.mubr.msk.bf16.mxu1 %vm22482_vm9, %v11641_v57  ;;  %vm22498_vm9 = vmmov %vm22347_vm0 }
 0x93c   : > { %v11514_v6 = vadd.f32 %v14843_v4, %v20325_v52  ;;  %v11505_v23 = vpop.f32.mrb[79].mxu0  ;;  %14889 = vmatmul.mubr.msk.bf16.gmra.mrb[72].mxu1 %vm22483_vm6, %v11642_v39  ;;  %v11611_v27 = vmax.f32 %v11511_v3, 0.0  ;;  %vm22499_vm6 = vmmov %vm22347_vm0 }
 0x93d   : > { %v11506_v60 = vadd.f32 %v20325_v52, %v11505_v23  ;;  %v11609_v21 = vmax.f32 %v11503_v41, 0.0 }
 0x93e   : > { %v11612_v17 = vmax.f32 %v11514_v6, 0.0 }
 0x93f   : > { %v11610_v0 = vmax.f32 %v11506_v60, 0.0 }
 0x940   : > { %v11644_v32 = vpack.c.bf16 %v11612_v17, %v11611_v27 }
 0x941   : > { %v11643_v24 = vpack.c.bf16 %v11610_v0, %v11609_v21  ;;  %v14846_v16 = vpop.f32.mrb[80].mxu0 }
 0x942   : > { %v11527_v47 = vadd.f32 %v14846_v16, %v20325_v52  ;;  %v11518_v14 = vpop.f32.mrb[81].mxu0 }
 0x943   : > { %v11519_v46 = vadd.f32 %v20325_v52, %v11518_v14  ;;  %v14847_v57 = vpop.f32.mrb[82].mxu0  ;;  %14892 = vmatprep.mubr.msk.bf16.mxu1 %vm22484_vm10, %v11643_v24  ;;  %vm22500_vm10 = vmmov %vm22347_vm0 }
 0x944   : > { %v11530_v4 = vadd.f32 %v14847_v57, %v20325_v52  ;;  %v11521_v39 = vpop.f32.mrb[83].mxu0  ;;  %14893 = vmatmul.mubr.msk.bf16.gmra.mrb[76].mxu1 %vm22485_vm13, %v11644_v32  ;;  %v11615_v41 = vmax.f32 %v11527_v47, 0.0  ;;  %vm22501_vm13 = vmmov %vm22347_vm0 }
 0x945   : > { %v11522_v3 = vadd.f32 %v20325_v52, %v11521_v39  ;;  %v11613_v23 = vmax.f32 %v11519_v46, 0.0 }
 0x946   : > { %v11616_v6 = vmax.f32 %v11530_v4, 0.0 }
 0x947   : > { %v11614_v60 = vmax.f32 %v11522_v3, 0.0 }
 0x948   : > { %v11646_v27 = vpack.c.bf16 %v11616_v6, %v11615_v41 }
 0x949   : > { %v11645_v17 = vpack.c.bf16 %v11614_v60, %v11613_v23  ;;  %v14850_v21 = vpop.f32.mrb[84].mxu0 }
 0x94a   : > { %v11543_v0 = vadd.f32 %v14850_v21, %v20325_v52  ;;  %v11534_v16 = vpop.f32.mrb[85].mxu0 }
 0x94b   : > { %v11535_v14 = vadd.f32 %v20325_v52, %v11534_v16  ;;  %v14851_v24 = vpop.f32.mrb[86].mxu0  ;;  %14896 = vmatprep.mubr.msk.bf16.mxu1 %vm22486_vm3, %v11645_v17  ;;  %vm22502_vm3 = vmmov %vm22347_vm0 }
 0x94c   : > { %v11546_v57 = vadd.f32 %v14851_v24, %v20325_v52  ;;  %v11537_v32 = vpop.f32.mrb[87].mxu0  ;;  %14897 = vmatmul.mubr.msk.bf16.gmra.mrb[80].mxu1 %vm22487_vm15, %v11646_v27  ;;  %v11619_v46 = vmax.f32 %v11543_v0, 0.0  ;;  %vm22503_vm15 = vmmov %vm22347_vm0 }
 0x94d   : > { %v11538_v47 = vadd.f32 %v20325_v52, %v11537_v32  ;;  %v11617_v39 = vmax.f32 %v11535_v14, 0.0 }
 0x94e   : > { %v11620_v4 = vmax.f32 %v11546_v57, 0.0 }
 0x94f   : > { %v11618_v3 = vmax.f32 %v11538_v47, 0.0 }
 0x950   : > { %v11648_v41 = vpack.c.bf16 %v11620_v4, %v11619_v46 }
 0x951   : > { %v11647_v6 = vpack.c.bf16 %v11618_v3, %v11617_v39  ;;  %v14854_v23 = vpop.f32.mrb[88].mxu0 }
 0x952   : > { %v11559_v60 = vadd.f32 %v14854_v23, %v20325_v52  ;;  %v11550_v21 = vpop.f32.mrb[89].mxu0 }
 0x953   : > { %v11551_v16 = vadd.f32 %v20325_v52, %v11550_v21  ;;  %v14855_v17 = vpop.f32.mrb[90].mxu0  ;;  %14900 = vmatprep.mubr.msk.bf16.mxu1 %vm22488_vm12, %v11647_v6  ;;  %vm22504_vm12 = vmmov %vm22347_vm0 }
 0x954   : > { %v11562_v24 = vadd.f32 %v14855_v17, %v20325_v52  ;;  %v11553_v27 = vpop.f32.mrb[91].mxu0  ;;  %14901 = vmatmul.mubr.msk.bf16.gmra.mrb[84].mxu1 %vm22489_vm1, %v11648_v41  ;;  %v11623_v14 = vmax.f32 %v11559_v60, 0.0  ;;  %vm22505_vm1 = vmmov %vm22347_vm0 }
 0x955   : > { %v11554_v0 = vadd.f32 %v20325_v52, %v11553_v27  ;;  %v11621_v32 = vmax.f32 %v11551_v16, 0.0 }
 0x956   : > { %v11624_v57 = vmax.f32 %v11562_v24, 0.0 }
 0x957   : > { %v11622_v47 = vmax.f32 %v11554_v0, 0.0 }
 0x958   : > { %v11650_v46 = vpack.c.bf16 %v11624_v57, %v11623_v14 }
 0x959   : > { %v11649_v4 = vpack.c.bf16 %v11622_v47, %v11621_v32  ;;  %v14858_v39 = vpop.f32.mrb[92].mxu0  ;;  %v20404_v32 = vld [vmem:[%s22493_s20] ss:$0 sm:$0xff] }
 0x95a   : > { %v11575_v3 = vadd.f32 %v14858_v39, %v20325_v52  ;;  %v11566_v23 = vpop.f32.mrb[93].mxu0 }
 0x95b   : > { %v11567_v6 = vadd.f32 %v20325_v52, %v11566_v23  ;;  %v14859_v21 = vpop.f32.mrb[94].mxu0  ;;  %14904 = vmatprep.mubr.msk.bf16.mxu1 %vm22490_vm7, %v11649_v4  ;;  %vm22506_vm7 = vmmov %vm22347_vm0 }
 0x95c   : > { %v11578_v41 = vadd.f32 %v14859_v21, %v20325_v52  ;;  %v11569_v17 = vpop.f32.mrb[95].mxu0  ;;  %14905 = vmatmul.mubr.msk.bf16.gmra.mrb[88].mxu1 %vm22347_vm0, %v11650_v46  ;;  %v11627_v16 = vmax.f32 %v11575_v3, 0.0 }
 0x95d   : > { %v11570_v60 = vadd.f32 %v20325_v52, %v11569_v17  ;;  %v11625_v27 = vmax.f32 %v11567_v6, 0.0 }
 0x95e   : > { %v11628_v24 = vmax.f32 %v11578_v41, 0.0 }
 0x95f   : > { %v11626_v0 = vmax.f32 %v11570_v60, 0.0 }
 0x960   : > { %v11652_v14 = vpack.c.bf16 %v11628_v24, %v11627_v16 }
 0x961   : > { %v11651_v57 = vpack.c.bf16 %v11626_v0, %v11625_v27 }
 0x963   : > { %14908 = vmatprep.mubr.msk.bf16.mxu1 %vm22491_vm2, %v11651_v57  ;;  %vm22507_vm2 = vmmov %vm22347_vm0 }
 0x964   : > { %14909 = vmatmul.mubr.msk.bf16.gmra.mrb[92].mxu1 %vm22492_vm4, %v11652_v14  ;;  %vm22508_vm4 = vmmov %vm22347_vm0 }
 0x9df   : > { %v14866_v47 = vpop.f32.mrb[48].mxu1 }
 0x9e0   : > { %v11782_v46 = vpop.f32.mrb[49].mxu1  ;;  %v11791_v52 = vadd.f32 %v14866_v47, %v20404_v32 }
 0x9e1   : > { %v11783_v4 = vadd.f32 %v20404_v32, %v11782_v46  ;;  %v14867_v39 = vpop.f32.mrb[50].mxu1 }
 0x9e2   : > { %v11785_v3 = vpop.f32.mrb[51].mxu1  ;;  %v11794_v6 = vadd.f32 %v14867_v39, %v20404_v32  ;;  %v20414_v41 = vmul.f32 %v22351_v58, %v11791_v52 }
 0x9e3   : > { %v20409_v23 = vmul.f32 %v22352_v8, %v11783_v4  ;;  %v11786_v21 = vadd.f32 %v20404_v32, %v11785_v3 }
 0x9e4   : > { %v20422_v16 = vmul.f32 %v22353_v45, %v11794_v6  ;;  %v12024_v14 = vsel %vm22496_vm8, %v20414_v41, 0.0  ;;  %vm22511_vm8 = vmmov %vm22347_vm0 }
 0x9e5   : > { %v20417_v17 = vmul.f32 %v22354_v49, %v11786_v21  ;;  %v12021_v60 = vsel %vm22494_vm5, %v20409_v23, 0.0  ;;  %vm22509_vm5 = vmmov %vm22347_vm0 }
 0x9e6   : > { %v12026_v45 = vsel %vm22497_vm11, %v20422_v16, 0.0  ;;  %vm22512_vm11 = vmmov %vm22347_vm0 }
 0x9e7   : > { %v12022_v8 = vsel %vm22495_vm14, %v20417_v17, 0.0  ;;  %v14870_v24 = vpop.f32.mrb[52].mxu1  ;;  %vm22510_vm14 = vmmov %vm22347_vm0 }
 0x9e8   : > { %v12023_v27 = vadd.f32 %v12022_v8, %v12021_v60  ;;  %v11798_v0 = vpop.f32.mrb[53].mxu1  ;;  %v11807_v58 = vadd.f32 %v14870_v24, %v20404_v32 }
 0x9e9   : > { %v11799_v49 = vadd.f32 %v20404_v32, %v11798_v0  ;;  %v14871_v57 = vpop.f32.mrb[54].mxu1 }
 0x9ea   : > { %v12025_v47 = vadd.f32 %v12024_v14, %v12023_v27  ;;  %v11801_v46 = vpop.f32.mrb[55].mxu1  ;;  %v11810_v4 = vadd.f32 %v14871_v57, %v20404_v32  ;;  %v20438_v6 = vmul.f32 %v22359_v19, %v11807_v58 }
 0x9eb   : > { %v20433_v52 = vmul.f32 %v22360_v42, %v11799_v49  ;;  %v11802_v39 = vadd.f32 %v20404_v32, %v11801_v46 }
 0x9ec   : > { %v12027_v3 = vadd.f32 %v12026_v45, %v12025_v47  ;;  %v20446_v24 = vmul.f32 %v22361_v43, %v11810_v4  ;;  %v12032_v19 = vsel %vm22500_vm10, %v20438_v6, 0.0  ;;  %vm22515_vm10 = vmmov %vm22347_vm0 }
 0x9ed   : > { %v12028_v21 = vsel %vm22498_vm9, %v20433_v52, 0.0  ;;  %v20443_v60 = vmul.f32 %v22362_v62, %v11802_v39  ;;  %vm22513_vm9 = vmmov %vm22347_vm0 }
 0x9ee   : > { %v12029_v8 = vadd.f32 %v12028_v21, %v12027_v3  ;;  %v12034_v43 = vsel %vm22501_vm13, %v20446_v24, 0.0  ;;  %vm22516_vm13 = vmmov %vm22347_vm0 }
 0x9ef   : > { %v12030_v42 = vsel %vm22499_vm6, %v20443_v60, 0.0  ;;  %v14874_v27 = vpop.f32.mrb[56].mxu1  ;;  %vm22514_vm6 = vmmov %vm22347_vm0 }
 0x9f0   : > { %v12031_v0 = vadd.f32 %v12030_v42, %v12029_v8  ;;  %v11814_v14 = vpop.f32.mrb[57].mxu1  ;;  %v11823_v58 = vadd.f32 %v14874_v27, %v20404_v32 }
 0x9f1   : > { %v11815_v49 = vadd.f32 %v20404_v32, %v11814_v14  ;;  %v14875_v57 = vpop.f32.mrb[58].mxu1 }
 0x9f2   : > { %v12033_v62 = vadd.f32 %v12032_v19, %v12031_v0  ;;  %v11817_v47 = vpop.f32.mrb[59].mxu1  ;;  %v11826_v45 = vadd.f32 %v14875_v57, %v20404_v32  ;;  %v20462_v3 = vmul.f32 %v22369_v50, %v11823_v58 }
 0x9f3   : > { %v20457_v46 = vmul.f32 %v22370_v11, %v11815_v49  ;;  %v11818_v4 = vadd.f32 %v20404_v32, %v11817_v47 }
 0x9f4   : > { %v12035_v39 = vadd.f32 %v12034_v43, %v12033_v62  ;;  %v20470_v27 = vmul.f32 %v22371_v2, %v11826_v45  ;;  %v12040_v50 = vsel %vm22504_vm12, %v20462_v3, 0.0  ;;  %vm22519_vm12 = vmmov %vm22347_vm0 }
 0x9f5   : > { %v12036_v21 = vsel %vm22502_vm3, %v20457_v46, 0.0  ;;  %v20467_v8 = vmul.f32 %v22372_v33, %v11818_v4  ;;  %vm22517_vm3 = vmmov %vm22347_vm0 }
 0x9f6   : > { %v12037_v42 = vadd.f32 %v12036_v21, %v12035_v39  ;;  %v12042_v2 = vsel %vm22505_vm1, %v20470_v27, 0.0  ;;  %vm22520_vm1 = vmmov %vm22347_vm0 }
 0x9f7   : > { %v12038_v11 = vsel %vm22503_vm15, %v20467_v8, 0.0  ;;  %v14878_v0 = vpop.f32.mrb[60].mxu1  ;;  %vm22518_vm15 = vmmov %vm22347_vm0 }
 0x9f8   : > { %v12039_v14 = vadd.f32 %v12038_v11, %v12037_v42  ;;  %v11830_v19 = vpop.f32.mrb[61].mxu1  ;;  %v11839_v58 = vadd.f32 %v14878_v0, %v20404_v32 }
 0x9f9   : > { %v11831_v49 = vadd.f32 %v20404_v32, %v11830_v19  ;;  %v14879_v57 = vpop.f32.mrb[62].mxu1 }
 0x9fa   : > { %v12041_v33 = vadd.f32 %v12040_v50, %v12039_v14  ;;  %v11833_v62 = vpop.f32.mrb[63].mxu1  ;;  %v11842_v43 = vadd.f32 %v14879_v57, %v20404_v32  ;;  %v20486_v39 = vmul.f32 %v22379_v5, %v11839_v58 }
 0x9fb   : > { %v20481_v47 = vmul.f32 %v22380_v53, %v11831_v49  ;;  %v11834_v45 = vadd.f32 %v20404_v32, %v11833_v62 }
 0x9fc   : > { %v12043_v4 = vadd.f32 %v12042_v2, %v12041_v33  ;;  %v20494_v0 = vmul.f32 %v22381_v61, %v11842_v43  ;;  %v12048_v5 = vsel %vm22507_vm2, %v20486_v39, 0.0  ;;  %vm22522_vm2 = vmmov %vm22347_vm0 }
 0x9fd   : > { %v12044_v21 = vsel %vm22506_vm7, %v20481_v47, 0.0  ;;  %v20491_v42 = vmul.f32 %v22382_v55, %v11834_v45  ;;  %vm22521_vm7 = vmmov %vm22347_vm0 }
 0x9fe   : > { %v12045_v11 = vadd.f32 %v12044_v21, %v12043_v4  ;;  %v12050_v61 = vsel %vm22508_vm4, %v20494_v0, 0.0  ;;  %vm22523_vm4 = vmmov %vm22347_vm0 }
 0x9ff   : > { %v12046_v53 = vsel %vm22347_vm0, %v20491_v42, 0.0  ;;  %v14882_v14 = vpop.f32.mrb[64].mxu1 }
 0xa00   : > { %v12047_v19 = vadd.f32 %v12046_v53, %v12045_v11  ;;  %v11846_v50 = vpop.f32.mrb[65].mxu1  ;;  %v11855_v58 = vadd.f32 %v14882_v14, %v20404_v32 }
 0xa01   : > { %v11847_v49 = vadd.f32 %v20404_v32, %v11846_v50  ;;  %v14883_v57 = vpop.f32.mrb[66].mxu1 }
 0xa02   : > { %v12049_v55 = vadd.f32 %v12048_v5, %v12047_v19  ;;  %v11849_v33 = vpop.f32.mrb[67].mxu1  ;;  %v11858_v2 = vadd.f32 %v14883_v57, %v20404_v32  ;;  %v20510_v4 = vmul.f32 %v22389_v9, %v11855_v58 }
 0xa03   : > { %v20505_v62 = vmul.f32 %v22390_v59, %v11847_v49  ;;  %v11850_v43 = vadd.f32 %v20404_v32, %v11849_v33 }
 0xa04   : > { %v12051_v45 = vadd.f32 %v12050_v61, %v12049_v55  ;;  %v20518_v14 = vmul.f32 %v22391_v18, %v11858_v2  ;;  %v12056_v9 = vsel %vm22511_vm8, %v20510_v4, 0.0  ;;  %vm22526_vm8 = vmmov %vm22347_vm0 }
 0xa05   : > { %v12052_v21 = vsel %vm22509_vm5, %v20505_v62, 0.0  ;;  %v20515_v11 = vmul.f32 %v22392_v20, %v11850_v43  ;;  %vm22524_vm5 = vmmov %vm22347_vm0 }
 0xa06   : > { %v12053_v53 = vadd.f32 %v12052_v21, %v12051_v45  ;;  %v12058_v18 = vsel %vm22512_vm11, %v20518_v14, 0.0  ;;  %vm22527_vm11 = vmmov %vm22347_vm0 }
 0xa07   : > { %v12054_v59 = vsel %vm22510_vm14, %v20515_v11, 0.0  ;;  %v14886_v19 = vpop.f32.mrb[68].mxu1  ;;  %vm22525_vm14 = vmmov %vm22347_vm0 }
 0xa08   : > { %v12055_v50 = vadd.f32 %v12054_v59, %v12053_v53  ;;  %v11862_v5 = vpop.f32.mrb[69].mxu1  ;;  %v11871_v58 = vadd.f32 %v14886_v19, %v20404_v32 }
 0xa09   : > { %v11863_v49 = vadd.f32 %v20404_v32, %v11862_v5  ;;  %v14887_v57 = vpop.f32.mrb[70].mxu1 }
 0xa0a   : > { %v12057_v20 = vadd.f32 %v12056_v9, %v12055_v50  ;;  %v11865_v55 = vpop.f32.mrb[71].mxu1  ;;  %v11874_v61 = vadd.f32 %v14887_v57, %v20404_v32  ;;  %v20534_v45 = vmul.f32 %v22399_v10, %v11871_v58 }
 0xa0b   : > { %v20529_v33 = vmul.f32 %v22400_v44, %v11863_v49  ;;  %v11866_v2 = vadd.f32 %v20404_v32, %v11865_v55 }
 0xa0c   : > { %v12059_v43 = vadd.f32 %v12058_v18, %v12057_v20  ;;  %v20542_v19 = vmul.f32 %v22401_v25, %v11874_v61  ;;  %v12064_v10 = vsel %vm22515_vm10, %v20534_v45, 0.0  ;;  %vm22530_vm10 = vmmov %vm22347_vm0 }
 0xa0d   : > { %v12060_v21 = vsel %vm22513_vm9, %v20529_v33, 0.0  ;;  %v20539_v53 = vmul.f32 %v22402_v48, %v11866_v2  ;;  %vm22528_vm9 = vmmov %vm22347_vm0 }
 0xa0e   : > { %v12061_v59 = vadd.f32 %v12060_v21, %v12059_v43  ;;  %v12066_v25 = vsel %vm22516_vm13, %v20542_v19, 0.0  ;;  %vm22531_vm13 = vmmov %vm22347_vm0 }
 0xa0f   : > { %v12062_v44 = vsel %vm22514_vm6, %v20539_v53, 0.0  ;;  %v14890_v50 = vpop.f32.mrb[72].mxu1  ;;  %vm22529_vm6 = vmmov %vm22347_vm0 }
 0xa10   : > { %v12063_v5 = vadd.f32 %v12062_v44, %v12061_v59  ;;  %v11878_v9 = vpop.f32.mrb[73].mxu1  ;;  %v11887_v58 = vadd.f32 %v14890_v50, %v20404_v32 }
 0xa11   : > { %v11879_v49 = vadd.f32 %v20404_v32, %v11878_v9  ;;  %v14891_v57 = vpop.f32.mrb[74].mxu1 }
 0xa12   : > { %v12065_v48 = vadd.f32 %v12064_v10, %v12063_v5  ;;  %v11881_v20 = vpop.f32.mrb[75].mxu1  ;;  %v11890_v18 = vadd.f32 %v14891_v57, %v20404_v32  ;;  %v20558_v43 = vmul.f32 %v22409_v1, %v11887_v58 }
 0xa13   : > { %v20553_v55 = vmul.f32 %v22410_v40, %v11879_v49  ;;  %v11882_v61 = vadd.f32 %v20404_v32, %v11881_v20 }
 0xa14   : > { %v12067_v2 = vadd.f32 %v12066_v25, %v12065_v48  ;;  %v20566_v50 = vmul.f32 %v22411_v13, %v11890_v18  ;;  %v12072_v1 = vsel %vm22519_vm12, %v20558_v43, 0.0  ;;  %vm22536_vm12 = vmmov %vm22347_vm0 }
 0xa15   : > { %v12068_v21 = vsel %vm22517_vm3, %v20553_v55, 0.0  ;;  %v20563_v59 = vmul.f32 %v22412_v34, %v11882_v61  ;;  %vm22532_vm3 = vmmov %vm22347_vm0 }
 0xa16   : > { %v12069_v44 = vadd.f32 %v12068_v21, %v12067_v2  ;;  %v12074_v13 = vsel %vm22520_vm1, %v20566_v50, 0.0  ;;  %vm22537_vm1 = vmmov %vm22347_vm0 }
 0xa17   : > { %v12070_v40 = vsel %vm22518_vm15, %v20563_v59, 0.0  ;;  %v14894_v5 = vpop.f32.mrb[76].mxu1  ;;  %vm22535_vm15 = vmmov %vm22347_vm0 }
 0xa18   : > { %v12071_v9 = vadd.f32 %v12070_v40, %v12069_v44  ;;  %v11894_v10 = vpop.f32.mrb[77].mxu1  ;;  %v11903_v58 = vadd.f32 %v14894_v5, %v20404_v32 }
 0xa19   : > { %v11895_v49 = vadd.f32 %v20404_v32, %v11894_v10  ;;  %v14895_v57 = vpop.f32.mrb[78].mxu1 }
 0xa1a   : > { %v12073_v34 = vadd.f32 %v12072_v1, %v12071_v9  ;;  %v11897_v48 = vpop.f32.mrb[79].mxu1  ;;  %v11906_v25 = vadd.f32 %v14895_v57, %v20404_v32  ;;  %v20582_v2 = vmul.f32 %v22419_v54, %v11903_v58 }
 0xa1b   : > { %v20577_v20 = vmul.f32 %v22420_v12, %v11895_v49  ;;  %v11898_v18 = vadd.f32 %v20404_v32, %v11897_v48 }
 0xa1c   : > { %v12075_v61 = vadd.f32 %v12074_v13, %v12073_v34  ;;  %v20590_v5 = vmul.f32 %v22421_v30, %v11906_v25  ;;  %v12080_v54 = vsel %vm22522_vm2, %v20582_v2, 0.0  ;;  %vm22540_vm2 = vmmov %vm22347_vm0 }
 0xa1d   : > { %v12076_v21 = vsel %vm22521_vm7, %v20577_v20, 0.0  ;;  %v20587_v44 = vmul.f32 %v22422_v28, %v11898_v18  ;;  %vm22538_vm7 = vmmov %vm22347_vm0 }
 0xa1e   : > { %v12077_v40 = vadd.f32 %v12076_v21, %v12075_v61  ;;  %v12082_v30 = vsel %vm22523_vm4, %v20590_v5, 0.0  ;;  %vm22541_vm4 = vmmov %vm22347_vm0 }
 0xa1f   : > { %v12078_v12 = vsel %vm22347_vm0, %v20587_v44, 0.0  ;;  %v14898_v9 = vpop.f32.mrb[80].mxu1 }
 0xa20   : > { %v12079_v10 = vadd.f32 %v12078_v12, %v12077_v40  ;;  %v11910_v1 = vpop.f32.mrb[81].mxu1  ;;  %v11919_v58 = vadd.f32 %v14898_v9, %v20404_v32 }
 0xa21   : > { %v11911_v49 = vadd.f32 %v20404_v32, %v11910_v1  ;;  %v14899_v57 = vpop.f32.mrb[82].mxu1 }
 0xa22   : > { %v12081_v28 = vadd.f32 %v12080_v54, %v12079_v10  ;;  %v11913_v34 = vpop.f32.mrb[83].mxu1  ;;  %v11922_v13 = vadd.f32 %v14899_v57, %v20404_v32  ;;  %v20606_v61 = vmul.f32 %v22428_v26, %v11919_v58 }
 0xa23   : > { %v20601_v48 = vmul.f32 %v22429_v29, %v11911_v49  ;;  %v11914_v25 = vadd.f32 %v20404_v32, %v11913_v34 }
 0xa24   : > { %v12083_v18 = vadd.f32 %v12082_v30, %v12081_v28  ;;  %v20614_v9 = vmul.f32 %v22430_v15, %v11922_v13  ;;  %v12088_v26 = vsel %vm22526_vm8, %v20606_v61, 0.0  ;;  %vm22550_vm8 = vmmov %vm22347_vm0 }
 0xa25   : > { %v12084_v21 = vsel %vm22524_vm5, %v20601_v48, 0.0  ;;  %v20611_v40 = vmul.f32 %v22431_v63, %v11914_v25  ;;  %vm12125_vm5 = vcmask 254976  }
 0xa26   : > { %v12085_v12 = vadd.f32 %v12084_v21, %v12083_v18  ;;  %v12090_v15 = vsel %vm22527_vm11, %v20614_v9, 0.0  ;;  %vm22552_vm11 = vmmov %vm22347_vm0 }
 0xa27   : > { %v12086_v29 = vsel %vm22525_vm14, %v20611_v40, 0.0  ;;  %v14902_v10 = vpop.f32.mrb[84].mxu1  ;;  %vm22548_vm14 = vmmov %vm22347_vm0 }
 0xa28   : > { %v12087_v1 = vadd.f32 %v12086_v29, %v12085_v12  ;;  %v11926_v54 = vpop.f32.mrb[85].mxu1  ;;  %v11935_v58 = vadd.f32 %v14902_v10, %v20404_v32 }
 0xa29   : > { %v11927_v49 = vadd.f32 %v20404_v32, %v11926_v54  ;;  %v14903_v57 = vpop.f32.mrb[86].mxu1 }
 0xa2a   : > { %v12089_v63 = vadd.f32 %v12088_v26, %v12087_v1  ;;  %v11929_v28 = vpop.f32.mrb[87].mxu1  ;;  %v11938_v30 = vadd.f32 %v14903_v57, %v20404_v32  ;;  %v20630_v18 = vmul.f32 %v22438_v51, %v11935_v58 }
 0xa2b   : > { %v20625_v34 = vmul.f32 %v22439_v56, %v11927_v49  ;;  %v11930_v13 = vadd.f32 %v20404_v32, %v11929_v28 }
 0xa2c   : > { %v12091_v25 = vadd.f32 %v12090_v15, %v12089_v63  ;;  %v20638_v10 = vmul.f32 %v22440_v22, %v11938_v30  ;;  %v12096_v51 = vsel %vm22530_vm10, %v20630_v18, 0.0  ;;  %vm22558_vm10 = vmmov %vm22347_vm0 }
 0xa2d   : > { %v12092_v21 = vsel %vm22528_vm9, %v20625_v34, 0.0  ;;  %v20635_v12 = vmul.f32 %v22441_v31, %v11930_v13  ;;  %vm22554_vm9 = vmmov %vm22347_vm0 }
 0xa2e   : > { %v12093_v29 = vadd.f32 %v12092_v21, %v12091_v25  ;;  %v12098_v22 = vsel %vm22531_vm13, %v20638_v10, 0.0  ;;  %vm22560_vm13 = vmmov %vm22347_vm0 }
 0xa2f   : > { %v12094_v56 = vsel %vm22529_vm6, %v20635_v12, 0.0  ;;  %v14906_v1 = vpop.f32.mrb[88].mxu1  ;;  %vm22556_vm6 = vmmov %vm22347_vm0 }
 0xa30   : > { %v12095_v54 = vadd.f32 %v12094_v56, %v12093_v29  ;;  %v11942_v26 = vpop.f32.mrb[89].mxu1  ;;  %v11951_v58 = vadd.f32 %v14906_v1, %v20404_v32  ;;  %v22533_v29 = vld [vmem:[#allocation56_spill] sm:$0xff] }
 0xa31   : > { %v11943_v49 = vadd.f32 %v20404_v32, %v11942_v26  ;;  %v14907_v57 = vpop.f32.mrb[90].mxu1 }
 0xa32   : > { %v12097_v31 = vadd.f32 %v12096_v51, %v12095_v54  ;;  %v11945_v63 = vpop.f32.mrb[91].mxu1  ;;  %v11954_v15 = vadd.f32 %v14907_v57, %v20404_v32  ;;  %v20654_v25 = vmul.f32 %v22448_v36, %v11951_v58  ;;  %v22534_v54 = vld [vmem:[#allocation55_spill] sm:$0xff] }
 0xa33   : > { %v20649_v28 = vmul.f32 %v22449_v7, %v11943_v49  ;;  %v11946_v30 = vadd.f32 %v20404_v32, %v11945_v63 }
 0xa34   : > { %v12099_v13 = vadd.f32 %v12098_v22, %v12097_v31  ;;  %v20662_v26 = vmul.f32 %v22534_v54, %v11954_v15  ;;  %v12104_v36 = vsel %vm22536_vm12, %v20654_v25, 0.0  ;;  %vm22566_vm12 = vmmov %vm22347_vm0 }
 0xa35   : > { %v12100_v21 = vsel %vm22532_vm3, %v20649_v28, 0.0  ;;  %v20659_v56 = vmul.f32 %v22533_v29, %v11946_v30  ;;  %vm22562_vm3 = vmmov %vm22347_vm0 }
 0xa36   : > { %v12101_v1 = vadd.f32 %v12100_v21, %v12099_v13  ;;  %v12106_v15 = vsel %vm22537_vm1, %v20662_v26, 0.0  ;;  %vm22568_vm1 = vmmov %vm22347_vm0 }
 0xa37   : > { %v12102_v7 = vsel %vm22535_vm15, %v20659_v56, 0.0  ;;  %v14910_v51 = vpop.f32.mrb[92].mxu1  ;;  %vm22564_vm15 = vmmov %vm22347_vm0 }
 0xa38   : > { %v12103_v49 = vadd.f32 %v12102_v7, %v12101_v1  ;;  %v11958_v57 = vpop.f32.mrb[93].mxu1  ;;  %v11967_v58 = vadd.f32 %v14910_v51, %v20404_v32 }
 0xa39   : > { %v11959_v31 = vadd.f32 %v20404_v32, %v11958_v57  ;;  %v14911_v63 = vpop.f32.mrb[94].mxu1  ;;  %v22539_v57 = vld [vmem:[#allocation59_spill] sm:$0xff] }
 0xa3a   : > { %v12105_v22 = vadd.f32 %v12104_v36, %v12103_v49  ;;  %v11961_v30 = vpop.f32.mrb[95].mxu1  ;;  %v11970_v21 = vadd.f32 %v14911_v63, %v20404_v32  ;;  %v20678_v54 = vmul.f32 %v22458_v37, %v11967_v58 }
 0xa3b   : > { %v20673_v13 = vmul.f32 %v22459_v38, %v11959_v31  ;;  %v11962_v29 = vadd.f32 %v20404_v32, %v11961_v30 }
 0xa3c   : > { %v12107_v1 = vadd.f32 %v12106_v15, %v12105_v22  ;;  %v20686_v36 = vmul.f32 %v22539_v57, %v11970_v21  ;;  %v12112_v32 = vsel %vm22540_vm2, %v20678_v54, 0.0  ;;  %vm22581_vm2 = vmmov %vm22347_vm0 }
 0xa3d   : > { %v12108_v7 = vsel %vm22538_vm7, %v20673_v13, 0.0  ;;  %v20683_v51 = vmul.f32 %v22461_v35, %v11962_v29  ;;  %vm22572_vm7 = vmmov %vm22347_vm0 }
 0xa3e   : > { %v12109_v49 = vadd.f32 %v12108_v7, %v12107_v1  ;;  %v12114_v58 = vsel %vm22541_vm4, %v20686_v36, 0.0  ;;  %v12123_v1 = vld [vmem:[%s637_s0] sm:$0x3]  ;;  %vm22586_vm4 = vmmov %vm22347_vm0 }
 0xa3f   : > { %v12110_v38 = vsel %vm22347_vm0, %v20683_v51, 0.0 }
 0xa40   : > { %v12111_v31 = vadd.f32 %v12110_v38, %v12109_v49  ;;  %v15976_v38 = vmov 0  }
 0xa41   : > { %15821 = vset.pattern.permute.xlu0 %v15976_v38 }
 0xa42   : > { %v12113_v37 = vadd.f32 %v12112_v32, %v12111_v31  ;;  %v12129_v31 = vld [vmem:[%s641_s21] sm:$0x3] }
 0xa44   : > { %v12115_v63 = vadd.f32 %v12114_v58, %v12113_v37 }
 0xa46   : > { %v12116_v22 = vrot.slane %v12115_v63, 4 }
 0xa48   : > { %v12117_v35 = vadd.f32 %v12116_v22, %v12115_v63  ;;  %v12132_v63 = vld [vmem:[%s645_s24] sm:$0x3] }
 0xa4a   : > { %v12118_v30 = vrot.slane %v12117_v35, 2 }
 0xa4c   : > { %v12119_v15 = vadd.f32 %v12118_v30, %v12117_v35 }
 0xa4e   : > { %v12120_v21 = vrot.slane %v12119_v15, 1 }
 0xa50   : > { %v12121_v29 = vadd.f32 %v12120_v21, %v12119_v15 }
 0xa52   : > { %v12122_v7 = vmul.f32 0.00390625, %v12121_v29 }
 0xa54   : > { %v12124_v49 = vmul.f32 %v12123_v1, %v12122_v7 }
 0xa56   : > { %v12126_v57 = vsel %vm12125_vm5, %v12124_v49, 0.0  ;;  %v12146_v49 = vld [vmem:[%s648_s28] sm:$0x1] }
 0xa57   : > { %12127 = vadd.xlane.f32.xlu0 %v12126_v57 }
 0xae4   : > { %v12128_v32 = vpop.xlane.xlu0 %12127 }
 0xae5   : > { %v12130_v37 = vadd.f32 %v12129_v31, %v12128_v32 }
 0xae7   : > { %v12131_v58 = vmax.f32 %v12130_v37, 0.0 }
 0xae9   : > { %12135 = vperm.xlu0 %15821, %v12131_v58   ;;  %v22542_v58 = vld [vmem:[#allocation11_spill] sm:$0xff] }
 0xb68   : > { %v12136_v22 = vpop.permute.xlu0 %12135 }
 0xb69   : > { %v12138_v35 = vmul.f32 %v12136_v22, %v12132_v63  ;;  %v12156_v63 = vsub.s32 0, %v22542_v58 }
 0xb6b   : > { %v12139_v30 = vsel %vm12125_vm5, %v12138_v35, 0.0  ;;  %vm22587_vm5 = vmmov %vm22347_vm0 }
 0xb6c   : > { %v12140_v15 = vrot.slane %v12139_v30, 4 }
 0xb6e   : > { %v12141_v21 = vadd.f32 %v12140_v15, %v12139_v30 }
 0xb70   : > { %v12142_v29 = vrot.slane %v12141_v21, 2 }
 0xb72   : > { %v12143_v1 = vadd.f32 %v12142_v29, %v12141_v21 }
 0xb74   : > { %v12144_v7 = vrot.slane %v12143_v1, 1 }
 0xb76   : > { %v12145_v57 = vadd.f32 %v12144_v7, %v12143_v1 }
 0xb78   : > { %v12147_v38 = vadd.f32 %v12146_v49, %v12145_v57 }
 0xb7a   : > { %v13346_v31 = vmul.f32 -1.442695, %v12147_v38 }
 0xb7c   : > { %15862 = vpow2.f32 %v13346_v31 }
 0xb86   : > { %v15863_v32 = vpop.eup %15862 }
 0xb87   : > { %v12151_v37 = vadd.f32 1.0, %v15863_v32 }
 0xb89   : > { %15864 = vrcp.f32 %v12151_v37 }
 0xb93   : > { %v15865_v22 = vpop.eup %15864 }
 0xb94   : > { %v12157_v35 = vrot.slane %v15865_v22, %v12156_v63 }
 0xb96   : > { %v12158_v30 = vmul.f32 %v12157_v35, %v20409_v23  ;;  %v12159_v15 = vmul.f32 %v12157_v35, %v20417_v17  ;;  %v12160_v21 = vmul.f32 %v12157_v35, %v20414_v41  ;;  %v12161_v29 = vmul.f32 %v12157_v35, %v20422_v16 }
 0xb97   : > { %v12162_v1 = vmul.f32 %v12157_v35, %v20433_v52  ;;  %v12163_v7 = vmul.f32 %v12157_v35, %v20443_v60  ;;  %v12164_v49 = vmul.f32 %v12157_v35, %v20438_v6  ;;  %v12165_v57 = vmul.f32 %v12157_v35, %v20446_v24 }
 0xb98   : > { %v12166_v38 = vmul.f32 %v12157_v35, %v20457_v46  ;;  %v12167_v31 = vmul.f32 %v12157_v35, %v20467_v8  ;;  %v12168_v23 = vmul.f32 %v12157_v35, %v20462_v3  ;;  %v12169_v17 = vmul.f32 %v12157_v35, %v20470_v27 }
 0xb99   : > { %v12170_v41 = vmul.f32 %v12157_v35, %v20481_v47  ;;  %v12171_v16 = vmul.f32 %v12157_v35, %v20491_v42  ;;  %v12172_v52 = vmul.f32 %v12157_v35, %v20486_v39  ;;  %v12173_v60 = vmul.f32 %v12157_v35, %v20494_v0 }
 0xb9a   : > { %v12174_v6 = vmul.f32 %v12157_v35, %v20505_v62  ;;  %v12175_v24 = vmul.f32 %v12157_v35, %v20515_v11  ;;  %v12176_v46 = vmul.f32 %v12157_v35, %v20510_v4  ;;  %v12177_v8 = vmul.f32 %v12157_v35, %v20518_v14 }
 0xb9b   : > { %v12178_v3 = vmul.f32 %v12157_v35, %v20529_v33  ;;  %v12179_v27 = vmul.f32 %v12157_v35, %v20539_v53  ;;  %v12180_v47 = vmul.f32 %v12157_v35, %v20534_v45  ;;  %v12181_v42 = vmul.f32 %v12157_v35, %v20542_v19 }
 0xb9c   : > { %v12182_v39 = vmul.f32 %v12157_v35, %v20553_v55  ;;  %v12183_v0 = vmul.f32 %v12157_v35, %v20563_v59  ;;  %v12184_v62 = vmul.f32 %v12157_v35, %v20558_v43  ;;  %v12185_v11 = vmul.f32 %v12157_v35, %v20566_v50 }
 0xb9d   : > { %v12186_v4 = vmul.f32 %v12157_v35, %v20577_v20  ;;  %v12187_v14 = vmul.f32 %v12157_v35, %v20587_v44  ;;  %v12188_v33 = vmul.f32 %v12157_v35, %v20582_v2  ;;  %v12189_v53 = vmul.f32 %v12157_v35, %v20590_v5 }
 0xb9e   : > { %v12190_v45 = vmul.f32 %v12157_v35, %v20601_v48  ;;  %v20749_v19 = vmul.f32 %v12157_v35, %v20611_v40  ;;  %v20752_v55 = vmul.f32 %v12157_v35, %v20606_v61  ;;  %v20755_v43 = vmul.f32 %v12157_v35, %v20614_v9 }
 0xb9f   : > { %v20758_v59 = vmul.f32 %v12157_v35, %v20625_v34  ;;  %v20761_v50 = vmul.f32 %v12157_v35, %v20635_v12  ;;  %v20764_v20 = vmul.f32 %v12157_v35, %v20630_v18  ;;  %v20767_v2 = vmul.f32 %v12157_v35, %v20638_v10 }
 0xba0   : > { %v20770_v44 = vmul.f32 %v12157_v35, %v20649_v28  ;;  %v20773_v5 = vmul.f32 %v12157_v35, %v20659_v56  ;;  %v20776_v48 = vmul.f32 %v12157_v35, %v20654_v25  ;;  %v20779_v61 = vmul.f32 %v12157_v35, %v20662_v26 }
 0xba1   : > { %v20782_v40 = vmul.f32 %v12157_v35, %v20673_v13  ;;  %v20785_v9 = vmul.f32 %v12157_v35, %v20683_v51  ;;  %v20788_v34 = vmul.f32 %v12157_v35, %v20678_v54  ;;  %v12206_v18 = vmul.f32 0.1, %v12158_v30  ;;  %v22545_v13 = vld [vmem:[#allocation63_spill] sm:$0xff]  ;;  %v22546_v54 = vld [vmem:[#allocation62_spill] sm:$0xff] }
 0xba2   : > { %v12207_v12 = vmul.f32 0.1, %v12159_v15  ;;  %v12208_v10 = vmul.f32 0.1, %v12160_v21  ;;  %v20791_v28 = vmul.f32 %v12157_v35, %v20686_v36  ;;  %v12209_v25 = vmul.f32 0.1, %v12161_v29 }
 0xba3   : > { %22543 = vst [vmem:[#allocation21_spill] sm:$0xff] %v20785_v9  ;;  %22544 = vst [vmem:[#allocation22_spill] sm:$0xff] %v20788_v34  ;;  %v12210_v56 = vmul.f32 0.1, %v12162_v1  ;;  %v12211_v32 = vmul.f32 0.1, %v12163_v7  ;;  %v20794_v63 = vadd.f32 %v12206_v18, %v22545_v13 }
 0xba4   : > { %v12212_v26 = vmul.f32 0.1, %v12164_v49  ;;  %v12213_v37 = vmul.f32 0.1, %v12165_v57  ;;  %v12214_v58 = vmul.f32 0.1, %v12166_v38  ;;  %v20797_v34 = vadd.f32 %v12207_v12, %v22546_v54 }
 0xba5   : > { %v12215_v51 = vmul.f32 0.1, %v12167_v31  ;;  %v12216_v22 = vmul.f32 0.1, %v12168_v23  ;;  %v12217_v9 = vmul.f32 0.1, %v12169_v17 }
 0xba6   : > { %v12218_v30 = vmul.f32 0.1, %v12170_v41  ;;  %v12219_v15 = vmul.f32 0.1, %v12171_v16  ;;  %v12220_v21 = vmul.f32 0.1, %v12172_v52 }
 0xba7   : > { %v22547_v36 = vld [vmem:[#allocation65_spill] sm:$0xff]  ;;  %12302 = vst.msk [vmem:[#allocation2] sm:$0xff] %vm22548_vm14, %v20794_v63  ;;  %v12221_v29 = vmul.f32 0.1, %v12173_v60  ;;  %v12222_v1 = vmul.f32 0.1, %v12174_v6  ;;  %vm22588_vm14 = vmmov %vm22347_vm0 }
 0xba8   : > { %v20800_v35 = vadd.f32 %v12208_v10, %v22547_v36  ;;  %v12223_v7 = vmul.f32 0.1, %v12175_v24  ;;  %v22549_v49 = vld [vmem:[#allocation61_spill] sm:$0xff]  ;;  %12303 = vst.msk [vmem:[#allocation2 + $0x8] sm:$0xff] %vm22550_vm8, %v20797_v34  ;;  %v12224_v38 = vmul.f32 0.1, %v12176_v46  ;;  %vm22589_vm8 = vmmov %vm22347_vm0 }
 0xba9   : > { %v20805_v57 = vadd.f32 %v12209_v25, %v22549_v49  ;;  %v12225_v31 = vmul.f32 0.1, %v12177_v8  ;;  %v12226_v23 = vmul.f32 0.1, %v12178_v3  ;;  %v22551_v17 = vld [vmem:[#allocation97_spill] sm:$0xff]  ;;  %v22553_v6 = vld [vmem:[#allocation96_spill] sm:$0xff] }
 0xbaa   : > { %v20810_v41 = vadd.f32 %v12210_v56, %v22551_v17  ;;  %12304 = vst.msk [vmem:[#allocation2 + $0x10] sm:$0xff] %vm22552_vm11, %v20800_v35  ;;  %v12227_v16 = vmul.f32 0.1, %v12179_v27  ;;  %v12228_v52 = vmul.f32 0.1, %v12180_v47  ;;  %v20815_v24 = vadd.f32 %v12211_v32, %v22553_v6  ;;  %v22555_v8 = vld [vmem:[#allocation67_spill] sm:$0xff]  ;;  %vm22594_vm11 = vmmov %vm22347_vm0 }
 0xbab   : > { %v12229_v60 = vmul.f32 0.1, %v12181_v42  ;;  %12305 = vst.msk [vmem:[#allocation2 + $0x18] sm:$0xff] %vm22554_vm9, %v20805_v57  ;;  %v12230_v18 = vmul.f32 0.1, %v12182_v39  ;;  %v20820_v3 = vadd.f32 %v12212_v26, %v22555_v8  ;;  %v22557_v47 = vld [vmem:[#allocation64_spill] sm:$0xff]  ;;  %vm22595_vm9 = vmmov %vm22347_vm0 }
 0xbac   : > { %v12231_v12 = vmul.f32 0.1, %v12183_v0  ;;  %v12232_v46 = vmul.f32 0.1, %v12184_v62  ;;  %12306 = vst.msk [vmem:[#allocation2 + $0x20] sm:$0xff] %vm22556_vm6, %v20810_v41  ;;  %v20825_v42 = vadd.f32 %v12213_v37, %v22557_v47  ;;  %v22559_v0 = vld [vmem:[#allocation12_spill] sm:$0xff]  ;;  %vm22596_vm6 = vmmov %vm22347_vm0 }
 0xbad   : > { %v12233_v10 = vmul.f32 0.1, %v12185_v11  ;;  %v12234_v25 = vmul.f32 0.1, %v12186_v4  ;;  %v12235_v27 = vmul.f32 0.1, %v12187_v14  ;;  %v20830_v62 = vadd.f32 %v12214_v58, %v22559_v0 }
 0xbae   : > { %12307 = vst.msk [vmem:[#allocation2 + $0x28] sm:$0xff] %vm22558_vm10, %v20815_v24  ;;  %v12236_v56 = vmul.f32 0.1, %v12188_v33  ;;  %v12237_v32 = vmul.f32 0.1, %v12189_v53  ;;  %v22561_v14 = vld [vmem:[#allocation71_spill] sm:$0xff]  ;;  %vm22597_vm10 = vmmov %vm22347_vm0 }
 0xbaf   : > { %v12238_v39 = vmul.f32 0.1, %v12190_v45  ;;  %12308 = vst.msk [vmem:[#allocation2 + $0x30] sm:$0xff] %vm22560_vm13, %v20820_v3  ;;  %v12239_v26 = vmul.f32 0.1, %v20749_v19  ;;  %v20838_v37 = vadd.f32 %v12215_v51, %v22561_v14  ;;  %v22563_v58 = vld [vmem:[#allocation72_spill] sm:$0xff]  ;;  %vm22602_vm13 = vmmov %vm22347_vm0 }
 0xbb0   : > { %v12240_v11 = vmul.f32 0.1, %v20752_v55  ;;  %v12241_v4 = vmul.f32 0.1, %v20755_v43  ;;  %12309 = vst.msk [vmem:[#allocation2 + $0x38] sm:$0xff] %vm22562_vm3, %v20825_v42  ;;  %v20846_v13 = vadd.f32 %v12216_v22, %v22563_v58  ;;  %v22565_v51 = vld [vmem:[#allocation68_spill] sm:$0xff]  ;;  %vm22603_vm3 = vmmov %vm22347_vm0 }
 0xbb1   : > { %v12242_v33 = vmul.f32 0.1, %v20758_v59  ;;  %v12243_v53 = vmul.f32 0.1, %v20761_v50  ;;  %v12244_v45 = vmul.f32 0.1, %v20764_v20  ;;  %v20854_v54 = vadd.f32 %v12217_v9, %v22565_v51 }
 0xbb2   : > { %12310 = vst.msk [vmem:[#allocation2 + $0x40] sm:$0xff] %vm22564_vm15, %v20830_v62  ;;  %v12245_v19 = vmul.f32 0.1, %v20767_v2  ;;  %v12246_v55 = vmul.f32 0.1, %v20770_v44  ;;  %v22567_v22 = vld [vmem:[#allocation73_spill] sm:$0xff]  ;;  %vm22604_vm15 = vmmov %vm22347_vm0 }
 0xbb3   : > { %v12247_v43 = vmul.f32 0.1, %v20773_v5  ;;  %12311 = vst.msk [vmem:[#allocation2 + $0x48] sm:$0xff] %vm22566_vm12, %v20838_v37  ;;  %v12248_v59 = vmul.f32 0.1, %v20776_v48  ;;  %v20862_v36 = vadd.f32 %v12218_v30, %v22567_v22  ;;  %v22569_v2 = vld [vmem:[#allocation21_spill] sm:$0xff]  ;;  %vm22605_vm12 = vmmov %vm22347_vm0 }
 0xbb4   : > { %v12249_v50 = vmul.f32 0.1, %v20779_v61  ;;  %v12250_v20 = vmul.f32 0.1, %v20782_v40  ;;  %12312 = vst.msk [vmem:[#allocation2 + $0x50] sm:$0xff] %vm22568_vm1, %v20846_v13  ;;  %v22570_v5 = vld [vmem:[#allocation22_spill] sm:$0xff]  ;;  %vm22610_vm1 = vmmov %vm22347_vm0 }
 0xbb5   : > { %v12251_v44 = vmul.f32 0.1, %v22569_v2  ;;  %v12252_v9 = vmul.f32 0.1, %v22570_v5  ;;  %v12253_v49 = vmul.f32 0.1, %v20791_v28 }
 0xbb6   : > { %v22571_v17 = vld [vmem:[#allocation74_spill] sm:$0xff]  ;;  %12313 = vst.msk [vmem:[#allocation2 + $0x58] sm:$0xff] %vm22572_vm7, %v20854_v54  ;;  %v22573_v48 = vld [vmem:[#allocation101_spill] sm:$0xff]  ;;  %v22575_v8 = vld [vmem:[#allocation76_spill] sm:$0xff] }
 0xbb7   : > { %v20870_v6 = vadd.f32 %v12219_v15, %v22571_v17  ;;  %v20875_v61 = vadd.f32 %v12220_v21, %v22573_v48  ;;  %v22574_v40 = vld [vmem:[#allocation70_spill] sm:$0xff]  ;;  %v20881_v47 = vadd.f32 %v12222_v1, %v22575_v8  ;;  %12314 = vst.msk [vmem:[#allocation2 + $0x60] sm:$0xff] %vm22347_vm0, %v20862_v36  ;;  %v22577_v28 = vld [vmem:[#allocation79_spill] sm:$0xff]  ;;  %v22583_v5 = vld [vmem:[#allocation77_spill] sm:$0xff] }
 0xbb8   : > { %v20878_v30 = vadd.f32 %v12221_v29, %v22574_v40  ;;  %v22576_v0 = vld [vmem:[#allocation78_spill] sm:$0xff]  ;;  %v20889_v15 = vadd.f32 %v12224_v38, %v22577_v28  ;;  %v22578_v58 = vld [vmem:[#allocation75_spill] sm:$0xff]  ;;  %v20906_v17 = vadd.f32 %v12229_v60, %v22583_v5  ;;  %v22584_v38 = vld [vmem:[#allocation93_spill] sm:$0xff] }
 0xbb9   : > { %v20884_v14 = vadd.f32 %v12223_v7, %v22576_v0  ;;  %v20892_v51 = vadd.f32 %v12225_v31, %v22578_v58  ;;  %v22579_v21 = vld [vmem:[#allocation83_spill] sm:$0xff]  ;;  %v22580_v29 = vld [vmem:[#allocation90_spill] sm:$0xff]  ;;  %12315 = vst.msk [vmem:[#allocation2 + $0x68] sm:$0xff] %vm22581_vm2, %v20870_v6  ;;  %v20909_v48 = vadd.f32 %v12230_v18, %v22584_v38  ;;  %v22593_v8 = vld [vmem:[#allocation80_spill] sm:$0xff] }
 0xbba   : > { %v20895_v22 = vadd.f32 %v12226_v23, %v22579_v21  ;;  %v20898_v2 = vadd.f32 %v12227_v16, %v22580_v29  ;;  %v22582_v1 = vld [vmem:[#allocation91_spill] sm:$0xff]  ;;  %v22585_v31 = vld [vmem:[#allocation94_spill] sm:$0xff]  ;;  %12316 = vst.msk [vmem:[#allocation2 + $0x70] sm:$0xff] %vm22586_vm4, %v20875_v61  ;;  %v20932_v0 = vadd.f32 %v12235_v27, %v22593_v8  ;;  %v22601_v21 = vld [vmem:[#allocation69_spill] sm:$0xff] }
 0xbbb   : > { %v20903_v7 = vadd.f32 %v12228_v52, %v22582_v1  ;;  %v20912_v40 = vadd.f32 %v12231_v12, %v22585_v31  ;;  %12317 = vst.msk [vmem:[#allocation2 + $0x78] sm:$0xff] %vm22587_vm5, %v20878_v30  ;;  %v22590_v23 = vld [vmem:[#allocation95_spill] sm:$0xff]  ;;  %v22591_v52 = vld [vmem:[#allocation92_spill] sm:$0xff]  ;;  %v22592_v18 = vld [vmem:[#allocation66_spill] sm:$0xff]  ;;  %v20952_v29 = vadd.f32 %v12239_v26, %v22601_v21 }
 0xbbc   : > { %12318 = vst.msk [vmem:[#allocation2 + $0x80] sm:$0xff] %vm22588_vm14, %v20881_v47  ;;  %v20923_v16 = vadd.f32 %v12232_v46, %v22590_v23  ;;  %v20926_v60 = vadd.f32 %v12233_v10, %v22591_v52  ;;  %v20929_v12 = vadd.f32 %v12234_v25, %v22592_v18  ;;  %v22598_v46 = vld [vmem:[#allocation81_spill] sm:$0xff]  ;;  %v22599_v25 = vld [vmem:[#allocation98_spill] sm:$0xff]  ;;  %v22609_v38 = vld [vmem:[#allocation87_spill] sm:$0xff] }
 0xbbd   : > { %12319 = vst.msk [vmem:[#allocation2 + $0x88] sm:$0xff] %vm22589_vm8, %v20884_v14  ;;  %v20943_v10 = vadd.f32 %v12236_v56, %v22598_v46  ;;  %v20946_v28 = vadd.f32 %v12237_v32, %v22599_v25  ;;  %v22600_v27 = vld [vmem:[#allocation82_spill] sm:$0xff]  ;;  %v22606_v56 = vld [vmem:[#allocation100_spill] sm:$0xff]  ;;  %v22608_v26 = vld [vmem:[#allocation85_spill] sm:$0xff]  ;;  %v20972_v31 = vadd.f32 %v12243_v53, %v22609_v38 }
 0xbbe   : > { %12320 = vst.msk [vmem:[#allocation2 + $0x90] sm:$0xff] %vm22594_vm11, %v20889_v15  ;;  %v20949_v58 = vadd.f32 %v12238_v39, %v22600_v27  ;;  %v20963_v32 = vadd.f32 %v12240_v11, %v22606_v56  ;;  %v22607_v39 = vld [vmem:[#allocation99_spill] sm:$0xff]  ;;  %v20969_v5 = vadd.f32 %v12242_v33, %v22608_v26  ;;  %vm22611_vm7 = vmmov %vm22347_vm0  ;;  %v22613_v11 = vld [vmem:[#allocation88_spill] sm:$0xff] }
 0xbbf   : > { %12321 = vst.msk [vmem:[#allocation2 + $0x98] sm:$0xff] %vm22595_vm9, %v20892_v51  ;;  %v20966_v1 = vadd.f32 %v12241_v4, %v22607_v39  ;;  %vm22612_vm2 = vmmov %vm22347_vm0  ;;  %v20983_v4 = vadd.f32 %v12244_v45, %v22613_v11  ;;  %v22614_v33 = vld [vmem:[#allocation84_spill] sm:$0xff]  ;;  %v22615_v53 = vld [vmem:[#allocation89_spill] sm:$0xff] }
 0xbc0   : > { %12322 = vst.msk [vmem:[#allocation2 + $0xa0] sm:$0xff] %vm22596_vm6, %v20895_v22  ;;  %v20986_v23 = vadd.f32 %v12245_v19, %v22614_v33  ;;  %v20989_v52 = vadd.f32 %v12246_v55, %v22615_v53  ;;  %v22616_v18 = vld [vmem:[#allocation13_spill] sm:$0xff]  ;;  %vm22617_vm4 = vmmov %vm22347_vm0  ;;  %v22621_v45 = vld [vmem:[#allocation14_spill] sm:$0xff] }
 0xbc1   : > { %12323 = vst.msk [vmem:[#allocation2 + $0xa8] sm:$0xff] %vm22597_vm10, %v20898_v2  ;;  %v20992_v8 = vadd.f32 %v12247_v43, %v22616_v18  ;;  %vm22618_vm5 = vmmov %vm22347_vm0  ;;  %v21003_v19 = vadd.f32 %v12248_v59, %v22621_v45  ;;  %v22622_v55 = vld [vmem:[#allocation86_spill] sm:$0xff]  ;;  %v22623_v43 = vld [vmem:[#allocation16_spill] sm:$0xff] }
 0xbc2   : > { %12324 = vst.msk [vmem:[#allocation2 + $0xb0] sm:$0xff] %vm22602_vm13, %v20903_v7  ;;  %vm22619_vm14 = vmmov %vm22347_vm0  ;;  %v21006_v46 = vadd.f32 %v12249_v50, %v22622_v55  ;;  %v21009_v25 = vadd.f32 %v12250_v20, %v22623_v43  ;;  %v22624_v27 = vld [vmem:[#allocation17_spill] sm:$0xff]  ;;  %v22629_v59 = vld [vmem:[#allocation20_spill] sm:$0xff] }
 0xbc3   : > { %12325 = vst.msk [vmem:[#allocation2 + $0xb8] sm:$0xff] %vm22603_vm3, %v20906_v17  ;;  %vm22620_vm8 = vmmov %vm22347_vm0  ;;  %v21012_v21 = vadd.f32 %v12251_v44, %v22624_v27  ;;  %v21023_v50 = vadd.f32 %v12252_v9, %v22629_v59  ;;  %v22630_v20 = vld [vmem:[#allocation15_spill] sm:$0xff]  ;;  %v12354_v44 = vld [vmem:[%s16093_s23] sm:$0xff] (!%p13347_p8) }
 0xbc4   : > { %12326 = vst.msk [vmem:[#allocation2 + $0xc0] sm:$0xff] %vm22604_vm15, %v20909_v48  ;;  %vm22625_vm11 = vmmov %vm22347_vm0  ;;  %v21026_v56 = vadd.f32 %v12253_v49, %v22630_v20  ;;  %v12355_v9 = vld [vmem:[%s16093_s23 + $0x8] sm:$0xff] (!%p13347_p8)  ;;  %v12356_v49 = vld [vmem:[%s16093_s23 + $0x10] sm:$0xff] (!%p13347_p8)  ;;  %v12402_v39 = vadd.f32 (!%p13347_p8), %v12354_v44, %v20794_v63 }
 0xbc5   : > { %12327 = vst.msk [vmem:[#allocation2 + $0xc8] sm:$0xff] %vm22605_vm12, %v20912_v40  ;;  %vm22626_vm9 = vmmov %vm22347_vm0  ;;  %v12403_v26 = vadd.f32 (!%p13347_p8), %v12355_v9, %v20797_v34  ;;  %v12404_v38 = vadd.f32 (!%p13347_p8), %v12356_v49, %v20800_v35  ;;  %v12357_v11 = vld [vmem:[%s16093_s23 + $0x18] sm:$0xff] (!%p13347_p8)  ;;  %v12358_v33 = vld [vmem:[%s16093_s23 + $0x20] sm:$0xff] (!%p13347_p8) }
 0xbc6   : > { %12328 = vst.msk [vmem:[#allocation2 + $0xd0] sm:$0xff] %vm22610_vm1, %v20923_v16  ;;  %vm22627_vm6 = vmmov %vm22347_vm0  ;;  %v12359_v53 = vld [vmem:[%s16093_s23 + $0x28] sm:$0xff] (!%p13347_p8)  ;;  %v12405_v18 = vadd.f32 (!%p13347_p8), %v12357_v11, %v20805_v57  ;;  %v12406_v45 = vadd.f32 (!%p13347_p8), %v12358_v33, %v20810_v41  ;;  %v12360_v63 = vld [vmem:[%s16093_s23 + $0x30] sm:$0xff] (!%p13347_p8) }
 0xbc7   : > { %12329 = vst.msk [vmem:[#allocation2 + $0xd8] sm:$0xff] %vm22611_vm7, %v20926_v60  ;;  %vm22628_vm10 = vmmov %vm22347_vm0  ;;  %v12407_v55 = vadd.f32 (!%p13347_p8), %v12359_v53, %v20815_v24  ;;  %v12361_v43 = vld [vmem:[%s16093_s23 + $0x38] sm:$0xff] (!%p13347_p8)  ;;  %v12362_v34 = vld [vmem:[%s16093_s23 + $0x40] sm:$0xff] (!%p13347_p8)  ;;  %v12408_v35 = vadd.f32 (!%p13347_p8), %v12360_v63, %v20820_v3 }
 0xbc8   : > { %12330 = vst.msk [vmem:[#allocation2 + $0xe0] sm:$0xff] %vm22347_vm0, %v20929_v12  ;;  %vm22631_vm13 = vmmov %vm22347_vm0  ;;  %v12409_v57 = vadd.f32 (!%p13347_p8), %v12361_v43, %v20825_v42  ;;  %v12410_v41 = vadd.f32 (!%p13347_p8), %v12362_v34, %v20830_v62  ;;  %v12363_v24 = vld [vmem:[%s16093_s23 + $0x48] sm:$0xff] (!%p13347_p8)  ;;  %v12364_v27 = vld [vmem:[%s16093_s23 + $0x50] sm:$0xff] (!%p13347_p8) }
 0xbc9   : > { %12331 = vst.msk [vmem:[#allocation2 + $0xe8] sm:$0xff] %vm22612_vm2, %v20932_v0  ;;  %vm22632_vm3 = vmmov %vm22347_vm0  ;;  %v12365_v59 = vld [vmem:[%s16093_s23 + $0x58] sm:$0xff] (!%p13347_p8)  ;;  %v12411_v3 = vadd.f32 (!%p13347_p8), %v12363_v24, %v20838_v37  ;;  %v12412_v42 = vadd.f32 (!%p13347_p8), %v12364_v27, %v20846_v13  ;;  %v12366_v20 = vld [vmem:[%s16093_s23 + $0x60] sm:$0xff] (!%p13347_p8) }
 0xbca   : > { %12332 = vst.msk [vmem:[#allocation2 + $0xf0] sm:$0xff] %vm22617_vm4, %v20943_v10  ;;  %vm22633_vm15 = vmmov %vm22347_vm0  ;;  %v12413_v62 = vadd.f32 (!%p13347_p8), %v12365_v59, %v20854_v54  ;;  %v12367_v44 = vld [vmem:[%s16093_s23 + $0x68] sm:$0xff] (!%p13347_p8)  ;;  %v12368_v9 = vld [vmem:[%s16093_s23 + $0x70] sm:$0xff] (!%p13347_p8)  ;;  %v12414_v37 = vadd.f32 (!%p13347_p8), %v12366_v20, %v20862_v36 }
 0xbcb   : > { %12333 = vst.msk [vmem:[#allocation2 + $0xf8] sm:$0xff] %vm22618_vm5, %v20946_v28  ;;  %vm22634_vm12 = vmmov %vm22347_vm0  ;;  %v12415_v13 = vadd.f32 (!%p13347_p8), %v12367_v44, %v20870_v6  ;;  %v12416_v54 = vadd.f32 (!%p13347_p8), %v12368_v9, %v20875_v61  ;;  %v12369_v49 = vld [vmem:[%s16093_s23 + $0x78] sm:$0xff] (!%p13347_p8)  ;;  %v12374_v33 = vld [vmem:[%s16093_s23 + $0xa0] sm:$0xff] (!%p13347_p8) }
 0xbcc   : > { %12334 = vst.msk [vmem:[#allocation2 + $0x100] sm:$0xff] %vm22619_vm14, %v20949_v58  ;;  %vm22635_vm1 = vmmov %vm22347_vm0  ;;  %vm22641_vm14 = vcmask (!%p13347_p8), 261120   ;;  %v12417_v36 = vadd.f32 (!%p13347_p8), %v12369_v49, %v20878_v30  ;;  %v12373_v11 = vld [vmem:[%s16093_s23 + $0x98] sm:$0xff] (!%p13347_p8)  ;;  %v12375_v53 = vld [vmem:[%s16093_s23 + $0xa8] sm:$0xff] (!%p13347_p8) }
 0xbcd   : > { %12335 = vst.msk [vmem:[#allocation2 + $0x108] sm:$0xff] %vm22620_vm8, %v20952_v29  ;;  %vm22636_vm7 = vmmov %vm22347_vm0  ;;  %v12379_v63 = vld [vmem:[%s16093_s23 + $0xc8] sm:$0xff] (!%p13347_p8)  ;;  %v12380_v43 = vld [vmem:[%s16093_s23 + $0xd0] sm:$0xff] (!%p13347_p8) }
 0xbce   : > { %12336 = vst.msk [vmem:[#allocation2 + $0x110] sm:$0xff] %vm22625_vm11, %v20963_v32  ;;  %vm22637_vm2 = vmmov %vm22347_vm0  ;;  %v12381_v34 = vld [vmem:[%s16093_s23 + $0xd8] sm:$0xff] (!%p13347_p8)  ;;  %v12386_v27 = vld [vmem:[%s16093_s23 + $0x100] sm:$0xff] (!%p13347_p8) }
 0xbcf   : > { %12337 = vst.msk [vmem:[#allocation2 + $0x118] sm:$0xff] %vm22626_vm9, %v20966_v1  ;;  %vm22638_vm4 = vmmov %vm22347_vm0  ;;  %v12385_v24 = vld [vmem:[%s16093_s23 + $0xf8] sm:$0xff] (!%p13347_p8)  ;;  %v12387_v59 = vld [vmem:[%s16093_s23 + $0x108] sm:$0xff] (!%p13347_p8) }
 0xbd0   : > { %12338 = vst.msk [vmem:[#allocation2 + $0x120] sm:$0xff] %vm22627_vm6, %v20969_v5  ;;  %vm22639_vm5 = vmmov %vm22347_vm0  ;;  %v12391_v20 = vld [vmem:[%s16093_s23 + $0x128] sm:$0xff] (!%p13347_p8)  ;;  %v12392_v44 = vld [vmem:[%s16093_s23 + $0x130] sm:$0xff] (!%p13347_p8) }
 0xbd1   : > { %12339 = vst.msk [vmem:[#allocation2 + $0x128] sm:$0xff] %vm22628_vm10, %v20972_v31  ;;  %vm22642_vm8 = vmmov (!%p13347_p8), %vm22641_vm14  ;;  %v12393_v9 = vld [vmem:[%s16093_s23 + $0x138] sm:$0xff] (!%p13347_p8) }
 0xbd2   : > { %12340 = vst.msk [vmem:[#allocation2 + $0x130] sm:$0xff] %vm22631_vm13, %v20983_v4  ;;  %vm22643_vm11 = vmmov (!%p13347_p8), %vm22642_vm8  ;;  %v12397_v49 = vld [vmem:[%s16093_s23 + $0x158] sm:$0xff] (!%p13347_p8) }
 0xbd3   : > { %12341 = vst.msk [vmem:[#allocation2 + $0x138] sm:$0xff] %vm22632_vm3, %v20986_v23  ;;  %vm22644_vm9 = vmmov (!%p13347_p8), %vm22642_vm8 }
 0xbd4   : > { %12342 = vst.msk [vmem:[#allocation2 + $0x140] sm:$0xff] %vm22633_vm15, %v20989_v52  ;;  %vm22645_vm6 = vmmov (!%p13347_p8), %vm22642_vm8 }
 0xbd5   : > { %12343 = vst.msk [vmem:[#allocation2 + $0x148] sm:$0xff] %vm22634_vm12, %v20992_v8  ;;  %12353 = sbr.rel (%p13347_p8) target bundleno = 3084 (0xc0c), region = 80  ;;  %vm22646_vm10 = vmmov (!%p13347_p8), %vm22645_vm6 }
 0xbd6   : > { %12344 = vst.msk [vmem:[#allocation2 + $0x150] sm:$0xff] %vm22635_vm1, %v21003_v19  ;;  %vm22647_vm13 = vmmov (!%p13347_p8), %vm22645_vm6 }
 0xbd7   : > { %12345 = vst.msk [vmem:[#allocation2 + $0x158] sm:$0xff] %vm22636_vm7, %v21006_v46  ;;  %vm22648_vm3 = vmmov (!%p13347_p8), %vm22645_vm6 }
 0xbd8   : > { %12346 = vst.msk [vmem:[#allocation2 + $0x160] sm:$0xff] %vm22347_vm0, %v21009_v25  ;;  %vm22649_vm15 = vmmov (!%p13347_p8), %vm22648_vm3 }
 0xbd9   : > { %12347 = vst.msk [vmem:[#allocation2 + $0x168] sm:$0xff] %vm22637_vm2, %v21012_v21  ;;  %vm22650_vm12 = vmmov (!%p13347_p8), %vm22648_vm3 }
 0xbda   : > { %12348 = vst.msk [vmem:[#allocation2 + $0x170] sm:$0xff] %vm22638_vm4, %v21023_v50  ;;  %vm22651_vm1 = vmmov (!%p13347_p8), %vm22648_vm3 }
 0xbdb   : > { %12349 = vst.msk [vmem:[#allocation2 + $0x178] sm:$0xff] %vm22639_vm5, %v21026_v56  ;;  %vm22652_vm7 = vmmov (!%p13347_p8), %vm22651_vm1 }
 0xbdc   : > { %12450 = vst.msk [vmem:[%s16150_s7] sm:$0xff] %vm22641_vm14, %v12402_v39  ;;  %v12370_v39 = vld [vmem:[%s16093_s23 + $0x80] sm:$0xff]  ;;  %vm22653_vm0 = vmmov %vm22651_vm1 }
 0xbdd   : > { %12451 = vst.msk [vmem:[%s16150_s7 + $0x8] sm:$0xff] %vm22642_vm8, %v12403_v26  ;;  %v12371_v26 = vld [vmem:[%s16093_s23 + $0x88] sm:$0xff]  ;;  %v12418_v6 = vadd.f32 %v12370_v39, %v20881_v47  ;;  %vm22654_vm2 = vmmov %vm22653_vm0  ;;  %v12421_v47 = vadd.f32 %v12373_v11, %v20892_v51  ;;  %v12398_v39 = vld [vmem:[%s16093_s23 + $0x160] sm:$0xff] }
 0xbde   : > { %12452 = vst.msk [vmem:[%s16150_s7 + $0x10] sm:$0xff] %vm22643_vm11, %v12404_v38  ;;  %v12419_v61 = vadd.f32 %v12371_v26, %v20884_v14  ;;  %v12372_v38 = vld [vmem:[%s16093_s23 + $0x90] sm:$0xff]  ;;  %vm22655_vm4 = vmmov %vm22653_vm0  ;;  %v12422_v14 = vadd.f32 %v12374_v33, %v20895_v22  ;;  %v12399_v26 = vld [vmem:[%s16093_s23 + $0x168] sm:$0xff] }
 0xbdf   : > { %12453 = vst.msk [vmem:[%s16150_s7 + $0x18] sm:$0xff] %vm22644_vm9, %v12405_v18  ;;  %v12420_v30 = vadd.f32 %v12372_v38, %v20889_v15  ;;  %v12376_v18 = vld [vmem:[%s16093_s23 + $0xb0] sm:$0xff]  ;;  %vm22656_vm5 = vmmov %vm22653_vm0  ;;  %v12423_v15 = vadd.f32 %v12375_v53, %v20898_v2 }
 0xbe0   : > { %12454 = vst.msk [vmem:[%s16150_s7 + $0x20] sm:$0xff] %vm22645_vm6, %v12406_v45  ;;  %v12377_v45 = vld [vmem:[%s16093_s23 + $0xb8] sm:$0xff]  ;;  %vm22657_vm14 = vmmov %vm22653_vm0  ;;  %v12424_v51 = vadd.f32 %v12376_v18, %v20903_v7  ;;  %v12427_v7 = vadd.f32 %v12379_v63, %v20912_v40 }
 0xbe1   : > { %12455 = vst.msk [vmem:[%s16150_s7 + $0x28] sm:$0xff] %vm22646_vm10, %v12407_v55  ;;  %vm22658_vm8 = vmmov %vm22653_vm0  ;;  %v12425_v22 = vadd.f32 %v12377_v45, %v20906_v17  ;;  %v12378_v55 = vld [vmem:[%s16093_s23 + $0xc0] sm:$0xff]  ;;  %v12428_v17 = vadd.f32 %v12380_v43, %v20923_v16 }
 0xbe2   : > { %12456 = vst.msk [vmem:[%s16150_s7 + $0x30] sm:$0xff] %vm22647_vm13, %v12408_v35  ;;  %vm22659_vm11 = vmmov %vm22653_vm0  ;;  %v12426_v2 = vadd.f32 %v12378_v55, %v20909_v48  ;;  %v12382_v35 = vld [vmem:[%s16093_s23 + $0xe0] sm:$0xff]  ;;  %v12429_v48 = vadd.f32 %v12381_v34, %v20926_v60 }
 0xbe3   : > { %12457 = vst.msk [vmem:[%s16150_s7 + $0x38] sm:$0xff] %vm22648_vm3, %v12409_v57  ;;  %vm22660_vm9 = vmmov %vm22653_vm0  ;;  %v12383_v57 = vld [vmem:[%s16093_s23 + $0xe8] sm:$0xff]  ;;  %v12430_v40 = vadd.f32 %v12382_v35, %v20929_v12  ;;  %v12433_v12 = vadd.f32 %v12385_v24, %v20946_v28 }
 0xbe4   : > { %12458 = vst.msk [vmem:[%s16150_s7 + $0x40] sm:$0xff] %vm22649_vm15, %v12410_v41  ;;  %vm22661_vm6 = vmmov %vm22653_vm0  ;;  %v12431_v16 = vadd.f32 %v12383_v57, %v20932_v0  ;;  %v12384_v41 = vld [vmem:[%s16093_s23 + $0xf0] sm:$0xff]  ;;  %v12434_v0 = vadd.f32 %v12386_v27, %v20949_v58 }
 0xbe5   : > { %12459 = vst.msk [vmem:[%s16150_s7 + $0x48] sm:$0xff] %vm22650_vm12, %v12411_v3  ;;  %vm22662_vm10 = vmmov %vm22653_vm0  ;;  %v12432_v60 = vadd.f32 %v12384_v41, %v20943_v10  ;;  %v12388_v3 = vld [vmem:[%s16093_s23 + $0x110] sm:$0xff]  ;;  %v12435_v10 = vadd.f32 %v12387_v59, %v20952_v29 }
 0xbe6   : > { %12460 = vst.msk [vmem:[%s16150_s7 + $0x50] sm:$0xff] %vm22651_vm1, %v12412_v42  ;;  %vm22663_vm13 = vmmov %vm22653_vm0  ;;  %v12389_v42 = vld [vmem:[%s16093_s23 + $0x118] sm:$0xff]  ;;  %v12436_v28 = vadd.f32 %v12388_v3, %v20963_v32  ;;  %v12439_v32 = vadd.f32 %v12391_v20, %v20972_v31 }
 0xbe7   : > { %12461 = vst.msk [vmem:[%s16150_s7 + $0x58] sm:$0xff] %vm22652_vm7, %v12413_v62  ;;  %vm22664_vm3 = vmmov %vm22653_vm0  ;;  %v12437_v58 = vadd.f32 %v12389_v42, %v20966_v1  ;;  %v12390_v62 = vld [vmem:[%s16093_s23 + $0x120] sm:$0xff]  ;;  %v12440_v1 = vadd.f32 %v12392_v44, %v20983_v4 }
 0xbe8   : > { %12462 = vst.msk [vmem:[%s16150_s7 + $0x60] sm:$0xff] %vm22653_vm0, %v12414_v37  ;;  %vm22665_vm15 = vmmov %vm22653_vm0  ;;  %v12438_v29 = vadd.f32 %v12390_v62, %v20969_v5  ;;  %v12394_v37 = vld [vmem:[%s16093_s23 + $0x140] sm:$0xff]  ;;  %v12441_v5 = vadd.f32 %v12393_v9, %v20986_v23 }
 0xbe9   : > { %12463 = vst.msk [vmem:[%s16150_s7 + $0x68] sm:$0xff] %vm22654_vm2, %v12415_v13  ;;  %vm22666_vm12 = vmmov %vm22653_vm0  ;;  %v12395_v13 = vld [vmem:[%s16093_s23 + $0x148] sm:$0xff]  ;;  %v12442_v31 = vadd.f32 %v12394_v37, %v20989_v52  ;;  %v12445_v52 = vadd.f32 %v12397_v49, %v21006_v46 }
 0xbea   : > { %12464 = vst.msk [vmem:[%s16150_s7 + $0x70] sm:$0xff] %vm22655_vm4, %v12416_v54  ;;  %vm22667_vm1 = vmmov %vm22653_vm0  ;;  %v12443_v4 = vadd.f32 %v12395_v13, %v20992_v8  ;;  %v12396_v54 = vld [vmem:[%s16093_s23 + $0x150] sm:$0xff]  ;;  %v12446_v8 = vadd.f32 %v12398_v39, %v21009_v25 }
 0xbeb   : > { %12465 = vst.msk [vmem:[%s16150_s7 + $0x78] sm:$0xff] %vm22656_vm5, %v12417_v36  ;;  %vm22668_vm7 = vmmov %vm22653_vm0  ;;  %v12444_v23 = vadd.f32 %v12396_v54, %v21003_v19  ;;  %v12400_v36 = vld [vmem:[%s16093_s23 + $0x170] sm:$0xff] }
 0xbec   : > { %12466 = vst.msk [vmem:[%s16150_s7 + $0x80] sm:$0xff] %vm22657_vm14, %v12418_v6  ;;  %vm22669_vm2 = vmmov %vm22653_vm0  ;;  %v12401_v6 = vld [vmem:[%s16093_s23 + $0x178] sm:$0xff]  ;;  %v12448_v38 = vadd.f32 %v12400_v36, %v21023_v50 }
 0xbed   : > { %12467 = vst.msk [vmem:[%s16150_s7 + $0x88] sm:$0xff] %vm22658_vm8, %v12419_v61  ;;  %vm22670_vm4 = vmmov %vm22653_vm0  ;;  %v12447_v61 = vadd.f32 %v12399_v26, %v21012_v21  ;;  %v12449_v19 = vadd.f32 %v12401_v6, %v21026_v56 }
 0xbee   : > { %12468 = vst.msk [vmem:[%s16150_s7 + $0x90] sm:$0xff] %vm22659_vm11, %v12420_v30  ;;  %vm22671_vm5 = vmmov %vm22653_vm0 }
 0xbef   : > { %12469 = vst.msk [vmem:[%s16150_s7 + $0x98] sm:$0xff] %vm22660_vm9, %v12421_v47  ;;  %vm22672_vm14 = vmmov %vm22653_vm0 }
 0xbf0   : > { %12470 = vst.msk [vmem:[%s16150_s7 + $0xa0] sm:$0xff] %vm22661_vm6, %v12422_v14  ;;  %vm22673_vm8 = vmmov %vm22653_vm0 }
 0xbf1   : > { %12471 = vst.msk [vmem:[%s16150_s7 + $0xa8] sm:$0xff] %vm22662_vm10, %v12423_v15  ;;  %vm22674_vm11 = vmmov %vm22653_vm0 }
 0xbf2   : > { %12472 = vst.msk [vmem:[%s16150_s7 + $0xb0] sm:$0xff] %vm22663_vm13, %v12424_v51  ;;  %vm22675_vm9 = vmmov %vm22653_vm0 }
 0xbf3   : > { %12473 = vst.msk [vmem:[%s16150_s7 + $0xb8] sm:$0xff] %vm22664_vm3, %v12425_v22  ;;  %vm22676_vm6 = vmmov %vm22653_vm0 }
 0xbf4   : > { %12474 = vst.msk [vmem:[%s16150_s7 + $0xc0] sm:$0xff] %vm22665_vm15, %v12426_v2  ;;  %vm22677_vm10 = vmmov %vm22653_vm0 }
 0xbf5   : > { %12475 = vst.msk [vmem:[%s16150_s7 + $0xc8] sm:$0xff] %vm22666_vm12, %v12427_v7  ;;  %vm22678_vm13 = vmmov %vm22653_vm0 }
 0xbf6   : > { %12476 = vst.msk [vmem:[%s16150_s7 + $0xd0] sm:$0xff] %vm22667_vm1, %v12428_v17  ;;  %vm22679_vm3 = vmmov %vm22653_vm0 }
 0xbf7   : > { %12477 = vst.msk [vmem:[%s16150_s7 + $0xd8] sm:$0xff] %vm22668_vm7, %v12429_v48  ;;  %vm22680_vm15 = vmmov %vm22653_vm0 }
 0xbf8   : > { %12478 = vst.msk [vmem:[%s16150_s7 + $0xe0] sm:$0xff] %vm22653_vm0, %v12430_v40  ;;  %vm22681_vm12 = vmmov %vm22653_vm0 }
 0xbf9   : > { %12479 = vst.msk [vmem:[%s16150_s7 + $0xe8] sm:$0xff] %vm22669_vm2, %v12431_v16  ;;  %vm22682_vm1 = vmmov %vm22653_vm0 }
 0xbfa   : > { %12480 = vst.msk [vmem:[%s16150_s7 + $0xf0] sm:$0xff] %vm22670_vm4, %v12432_v60  ;;  %vm22683_vm7 = vmmov %vm22653_vm0 }
 0xbfb   : > { %12481 = vst.msk [vmem:[%s16150_s7 + $0xf8] sm:$0xff] %vm22671_vm5, %v12433_v12  ;;  %vm22684_vm2 = vmmov %vm22653_vm0 }
 0xbfc   : > { %12482 = vst.msk [vmem:[%s16150_s7 + $0x100] sm:$0xff] %vm22672_vm14, %v12434_v0  ;;  %vm22685_vm4 = vmmov %vm22653_vm0 }
 0xbfd   : > { %12483 = vst.msk [vmem:[%s16150_s7 + $0x108] sm:$0xff] %vm22673_vm8, %v12435_v10  ;;  %vm22686_vm5 = vmmov %vm22653_vm0 }
 0xbfe   : > { %12484 = vst.msk [vmem:[%s16150_s7 + $0x110] sm:$0xff] %vm22674_vm11, %v12436_v28 }
 0xbff   : > { %12485 = vst.msk [vmem:[%s16150_s7 + $0x118] sm:$0xff] %vm22675_vm9, %v12437_v58 }
 0xc00   : > { %12486 = vst.msk [vmem:[%s16150_s7 + $0x120] sm:$0xff] %vm22676_vm6, %v12438_v29 }
 0xc01   : > { %12487 = vst.msk [vmem:[%s16150_s7 + $0x128] sm:$0xff] %vm22677_vm10, %v12439_v32 }
 0xc02   : > { %12488 = vst.msk [vmem:[%s16150_s7 + $0x130] sm:$0xff] %vm22678_vm13, %v12440_v1 }
 0xc03   : > { %12489 = vst.msk [vmem:[%s16150_s7 + $0x138] sm:$0xff] %vm22679_vm3, %v12441_v5 }
 0xc04   : > { %12490 = vst.msk [vmem:[%s16150_s7 + $0x140] sm:$0xff] %vm22680_vm15, %v12442_v31 }
 0xc05   : > { %12491 = vst.msk [vmem:[%s16150_s7 + $0x148] sm:$0xff] %vm22681_vm12, %v12443_v4 }
 0xc06   : > { %12492 = vst.msk [vmem:[%s16150_s7 + $0x150] sm:$0xff] %vm22682_vm1, %v12444_v23 }
 0xc07   : > { %12493 = vst.msk [vmem:[%s16150_s7 + $0x158] sm:$0xff] %vm22683_vm7, %v12445_v52 }
 0xc08   : > { %12494 = vst.msk [vmem:[%s16150_s7 + $0x160] sm:$0xff] %vm22653_vm0, %v12446_v8 }
 0xc09   : > { %12495 = vst.msk [vmem:[%s16150_s7 + $0x168] sm:$0xff] %vm22684_vm2, %v12447_v61 }
 0xc0a   : > { %12496 = vst.msk [vmem:[%s16150_s7 + $0x170] sm:$0xff] %vm22685_vm4, %v12448_v38 }
 0xc0b   : > { %12497 = vst.msk [vmem:[%s16150_s7 + $0x178] sm:$0xff] %vm22686_vm5, %v12449_v19 }
 0xc0c PF: > { %s22687_s23 = sld [smem:[#allocation7_spill]]  ;;  %s22688_s25 = sld [smem:[#allocation5_spill]] }
 0xc0d   : > { %s22689_s26 = sld [smem:[#allocation6_spill]]  ;;  %s22690_s27 = sld [smem:[#allocation8_spill]] }
 0xc0e   : > { %s22691_s28 = sld [smem:[#allocation9_spill]] }
 0xc12   : > { %s23_s29 = sadd.s32 1, %s22687_s23  }
 0xc13   : > { %p20_p9 = scmp.ge.s32.totalorder %s23_s29, 6  }
 0xc15   :  { %22 = sbr.rel (!%p20_p9) target bundleno = 7 (0x7), region = 162 }

</bundles_post_ra>
